<compile_context>
chip_gen: v5e
topology: v5e:2x2
jax: 0.10.0
libtpu: 0.0.40
codegen_flags: <defaults>
</compile_context>

<pallas_src>
import functools

import jax
import jax.numpy as jnp
from jax.experimental import pallas as pl
from jax.experimental.pallas import tpu as pltpu

# --------------------------------------------------------------------------
# Config (synthetic, scaled-down EfficientNet)
# --------------------------------------------------------------------------
STEM_C, B1_C, B2_EXP, B2_C, HEAD_C, NUM_CLASSES = 16, 16, 64, 24, 64, 2
SE_RED = 4
BN_EPS = 1e-3
LANE = 128                     # lane-dense width for the classifier store
IMG = 16                       # input spatial size
K_STEM, STRIDE_STEM = 3, 2


def _swish(x):
    return x * jax.nn.sigmoid(x)


def _full_spec(shape):
    nd = len(shape)
    return pl.BlockSpec(shape, lambda i, _nd=nd: (0,) * _nd)


# --------------------------------------------------------------------------
# In-kernel building blocks (operate on VMEM-resident values / scratch refs)
# --------------------------------------------------------------------------
def _dwconv3x3(pad_ref, h, w_ref, b_ref):
    """Depthwise 3x3, stride 1, pad 1 + folded BN + swish, VMEM-resident.

    The padded activation lives in a VMEM scratch ref; the 9 shifted taps are
    static Ref slices (plain offset loads, no value-slice copies).
    """
    B, H, W, C = h.shape
    pad_ref[...] = jnp.zeros(pad_ref.shape, pad_ref.dtype)
    pad_ref[:, 1:1 + H, 1:1 + W, :] = h
    w = w_ref[...]                                   # (3, 3, C)
    acc = jnp.zeros((B, H, W, C), jnp.float32)
    for kh in range(3):                              # static unroll: 9 VPU MACs
        for kw in range(3):
            acc = acc + pad_ref[:, kh:kh + H, kw:kw + W, :] * w[kh, kw]
    return _swish(acc + b_ref[...])


def _squeeze_excite(h, w1_ref, b1_ref, w2_ref, b2_ref):
    """GAP -> fc(swish) -> fc(sigmoid) -> channel scale (tiny; filler work)."""
    s = jnp.mean(h, axis=(1, 2))                     # (B, C)
    z = _swish(jnp.dot(s, w1_ref[...], preferred_element_type=jnp.float32)
               + b1_ref[...])
    g = jax.nn.sigmoid(jnp.dot(z, w2_ref[...], preferred_element_type=jnp.float32)
                       + b2_ref[...])                # (B, C)
    return h * g[:, None, None, :]


# --------------------------------------------------------------------------
# The fused forward kernel
# --------------------------------------------------------------------------
def _fused_efficientnet_kernel(
        # stride-2 phase planes of the spatially padded NHWC input
        x00_ref, x01_ref, x10_ref, x11_ref,
        # stem conv3x3/s2 (+BN folded)
        stem_w_ref, stem_b_ref,
        # MBConv block 1 (expand ratio 1)
        dw1_w_ref, dw1_b_ref,
        se1_w1_ref, se1_b1_ref, se1_w2_ref, se1_b2_ref,
        pw1_w_ref, pw1_b_ref,
        # MBConv block 2 (expand ratio 4)
        ex2_w_ref, ex2_b_ref,
        dw2_w_ref, dw2_b_ref,
        se2_w1_ref, se2_b1_ref, se2_w2_ref, se2_b2_ref,
        pw2_w_ref, pw2_b_ref,
        # head conv1x1 + classifier (lane-padded to 128)
        head_w_ref, head_b_ref, fc_w_ref, fc_b_ref,
        # output + scratch
        out_ref, pad1_ref, pad2_ref):
    B = out_ref.shape[0]
    H = pad1_ref.shape[1] - 2
    W = pad1_ref.shape[2] - 2
    R = B * H * W                                    # flattened output rows

    # ---- stem: conv3x3 stride 2 + BN + swish (im2col done in-kernel) -------
    # tap (kh, kw) = HxW window of phase (kh % 2, kw % 2) at offset
    # (kh // 2, kw // 2); the input is read exactly once, no 9x patch matrix.
    phase_refs = (x00_ref, x01_ref, x10_ref, x11_ref)
    acc = jnp.zeros((R, STEM_C), jnp.float32)
    for kh in range(3):
        for kw in range(3):
            p_ref = phase_refs[2 * (kh % 2) + (kw % 2)]
            oh, ow = kh // 2, kw // 2
            tap = p_ref[:, oh:oh + H, ow:ow + W, :]          # (B, H, W, 3)
            tap = tap.reshape(R, 3).astype(jnp.bfloat16)
            r0 = (kh * 3 + kw) * 3
            w_tap = stem_w_ref[r0:r0 + 3, :]                 # (3, STEM_C) bf16
            acc = acc + jnp.dot(tap, w_tap, preferred_element_type=jnp.float32)
    h = _swish(acc + stem_b_ref[...]).reshape(B, H, W, STEM_C)

    # ---- MBConv block 1: dw3x3 + SE + project 1x1 + identity skip ----------
    res = h
    h = _dwconv3x3(pad1_ref, h, dw1_w_ref, dw1_b_ref)
    h = _squeeze_excite(h, se1_w1_ref, se1_b1_ref, se1_w2_ref, se1_b2_ref)
    proj = jnp.dot(h.reshape(R, B1_C).astype(jnp.bfloat16), pw1_w_ref[...],
                   preferred_element_type=jnp.float32) + pw1_b_ref[...]
    h = proj.reshape(B, H, W, B1_C) + res            # skip (no activation)

    # ---- MBConv block 2: expand 1x1 + dw3x3 + SE + project 1x1 (no skip) ---
    h = _swish(jnp.dot(h.reshape(R, B1_C).astype(jnp.bfloat16), ex2_w_ref[...],
                       preferred_element_type=jnp.float32) + ex2_b_ref[...])
    h = h.reshape(B, H, W, B2_EXP)
    h = _dwconv3x3(pad2_ref, h, dw2_w_ref, dw2_b_ref)
    h = _squeeze_excite(h, se2_w1_ref, se2_b1_ref, se2_w2_ref, se2_b2_ref)
    h = jnp.dot(h.reshape(R, B2_EXP).astype(jnp.bfloat16), pw2_w_ref[...],
                preferred_element_type=jnp.float32) + pw2_b_ref[...]   # (R, B2_C)

    # ---- head conv1x1 + BN + swish ------------------------------------------
    h = _swish(jnp.dot(h.astype(jnp.bfloat16), head_w_ref[...],
                       preferred_element_type=jnp.float32) + head_b_ref[...])

    # ---- gap = avg_pool(features); dropout (identity in eval); fc ----------
    # TODO(synk): dropout is identity in inference; training-mode dropout and
    # the hem-emb (gap, output) training branch are not modeled.
    gap = jnp.mean(h.reshape(B, H, W, HEAD_C), axis=(1, 2))           # (B, HEAD_C)
    logits = jnp.dot(gap.astype(jnp.bfloat16), fc_w_ref[...],
                     preferred_element_type=jnp.float32) + fc_b_ref[...]
    out_ref[...] = logits.astype(out_ref.dtype)       # lane-dense (B, 128) store


# --------------------------------------------------------------------------
# Deterministic parameter init (BN folded; matmul weights stored as bf16)
# --------------------------------------------------------------------------
def _bn_fold(keys, c):
    gamma = 1.0 + 0.1 * jax.random.normal(next(keys), (c,), jnp.float32)
    beta = 0.1 * jax.random.normal(next(keys), (c,), jnp.float32)
    mean = 0.1 * jax.random.normal(next(keys), (c,), jnp.float32)
    var = 1.0 + jnp.abs(jax.random.normal(next(keys), (c,), jnp.float32))
    scale = gamma / jnp.sqrt(var + BN_EPS)
    return scale, beta - mean * scale


def _conv_bn(keys, k, cin, cout):
    w = 0.1 * jax.random.normal(next(keys), (k, k, cin, cout), jnp.float32)
    scale, bias = _bn_fold(keys, cout)
    w_mat = (w * scale).reshape(k * k * cin, cout).astype(jnp.bfloat16)
    return w_mat, bias.reshape(1, cout)


def _dwconv_bn(keys, c):
    w = 0.1 * jax.random.normal(next(keys), (3, 3, c), jnp.float32)
    scale, bias = _bn_fold(keys, c)
    return w * scale, bias.reshape(1, c)


def _se_params(keys, c_exp, c_red):
    w1 = 0.1 * jax.random.normal(next(keys), (c_exp, c_red), jnp.float32)
    b1 = 0.1 * jax.random.normal(next(keys), (1, c_red), jnp.float32)
    w2 = 0.1 * jax.random.normal(next(keys), (c_red, c_exp), jnp.float32)
    b2 = 0.1 * jax.random.normal(next(keys), (1, c_exp), jnp.float32)
    return w1, b1, w2, b2


def init_params(key):
    keys = iter(jax.random.split(key, 64))
    p = {}
    p["stem_w"], p["stem_b"] = _conv_bn(keys, 3, 3, STEM_C)
    # block 1 (expand ratio 1)
    p["b1_dw_w"], p["b1_dw_b"] = _dwconv_bn(keys, B1_C)
    p["b1_se"] = _se_params(keys, B1_C, SE_RED)
    p["b1_pw_w"], p["b1_pw_b"] = _conv_bn(keys, 1, B1_C, B1_C)
    # block 2 (expand ratio 4)
    p["b2_ex_w"], p["b2_ex_b"] = _conv_bn(keys, 1, B1_C, B2_EXP)
    p["b2_dw_w"], p["b2_dw_b"] = _dwconv_bn(keys, B2_EXP)
    p["b2_se"] = _se_params(keys, B2_EXP, SE_RED)
    p["b2_pw_w"], p["b2_pw_b"] = _conv_bn(keys, 1, B2_EXP, B2_C)
    # head conv + fc (fc lane-padded to 128 for an unmasked store)
    p["head_w"], p["head_b"] = _conv_bn(keys, 1, B2_C, HEAD_C)
    fc_w = 0.1 * jax.random.normal(next(keys), (HEAD_C, NUM_CLASSES), jnp.float32)
    fc_b = 0.1 * jax.random.normal(next(keys), (1, NUM_CLASSES), jnp.float32)
    p["fc_w"] = (jnp.zeros((HEAD_C, LANE), jnp.float32)
                 .at[:, :NUM_CLASSES].set(fc_w).astype(jnp.bfloat16))
    p["fc_b"] = jnp.zeros((1, LANE), jnp.float32).at[:, :NUM_CLASSES].set(fc_b)
    return p


# --------------------------------------------------------------------------
# Forward pass (== CustomEfficientNet.forward, eval mode, use_emb=False)
# --------------------------------------------------------------------------
def efficientnet_forward(params, x_nchw):
    # layout: NCHW (PyTorch) -> NHWC (channels on the 128-lane axis)
    x = jnp.transpose(x_nchw, (0, 2, 3, 1)).astype(jnp.float32)
    B, Hin, Win, _ = x.shape
    Ho = (Hin + 2 - K_STEM) // STRIDE_STEM + 1
    Wo = (Win + 2 - K_STEM) // STRIDE_STEM + 1

    # glue: spatial pad + stride-2 phase split (no data duplication).
    xp = jnp.pad(x, ((0, 0), (1, 1), (1, 1), (0, 0)))
    phases = [xp[:, ph::2, pw::2, :] for ph in range(2) for pw in range(2)]

    inputs = phases + [
        params["stem_w"], params["stem_b"],
        params["b1_dw_w"], params["b1_dw_b"], *params["b1_se"],
        params["b1_pw_w"], params["b1_pw_b"],
        params["b2_ex_w"], params["b2_ex_b"],
        params["b2_dw_w"], params["b2_dw_b"], *params["b2_se"],
        params["b2_pw_w"], params["b2_pw_b"],
        params["head_w"], params["head_b"],
        params["fc_w"], params["fc_b"],
    ]

    # Everything (inputs + intermediates + scratch) is well under 1 MiB, so the
    # full network runs as one grid step with all data VMEM-resident.
    # Note: at real EfficientNet resolutions this would need a tiled grid with a
    # "parallel" row axis (v7x megacore) and VMEM-sized blocks; not needed here.
    out = pl.pallas_call(
        _fused_efficientnet_kernel,
        out_shape=jax.ShapeDtypeStruct((B, LANE), jnp.float32),
        grid=(1,),
        in_specs=[_full_spec(a.shape) for a in inputs],
        out_specs=_full_spec((B, LANE)),
        scratch_shapes=[pltpu.VMEM((B, Ho + 2, Wo + 2, B1_C), jnp.float32),
                        pltpu.VMEM((B, Ho + 2, Wo + 2, B2_EXP), jnp.float32)],
        compiler_params=pltpu.CompilerParams(
            dimension_semantics=("arbitrary",)),
    )(*inputs)

    return out[:, :NUM_CLASSES]


if __name__ == "__main__":
    key = jax.random.PRNGKey(0)
    pkey, xkey = jax.random.split(key)
    params = init_params(pkey)
    x = jax.random.normal(xkey, (2, 3, IMG, IMG), jnp.float32)   # NCHW like PyTorch
    fwd = jax.jit(functools.partial(efficientnet_forward, params))
    out = fwd(x)
    jax.block_until_ready(out)
    assert out.shape == (2, NUM_CLASSES) and out.dtype == jnp.float32
    print("KERNEL_OK")
</pallas_src>

<mosaic_0001>
module attributes {stable_mosaic.version = 11 : i64} {
  func.func @_fused_efficientnet_kernel(%arg0: i32, %arg1: memref<2x9x9x3xf32, #tpu.memory_space<vmem>>, %arg2: memref<2x9x9x3xf32, #tpu.memory_space<vmem>>, %arg3: memref<2x9x9x3xf32, #tpu.memory_space<vmem>>, %arg4: memref<2x9x9x3xf32, #tpu.memory_space<vmem>>, %arg5: memref<27x16xbf16, #tpu.memory_space<vmem>>, %arg6: memref<1x16xf32, #tpu.memory_space<vmem>>, %arg7: memref<3x3x16xf32, #tpu.memory_space<vmem>>, %arg8: memref<1x16xf32, #tpu.memory_space<vmem>>, %arg9: memref<16x4xf32, #tpu.memory_space<vmem>>, %arg10: memref<1x4xf32, #tpu.memory_space<vmem>>, %arg11: memref<4x16xf32, #tpu.memory_space<vmem>>, %arg12: memref<1x16xf32, #tpu.memory_space<vmem>>, %arg13: memref<16x16xbf16, #tpu.memory_space<vmem>>, %arg14: memref<1x16xf32, #tpu.memory_space<vmem>>, %arg15: memref<16x64xbf16, #tpu.memory_space<vmem>>, %arg16: memref<1x64xf32, #tpu.memory_space<vmem>>, %arg17: memref<3x3x64xf32, #tpu.memory_space<vmem>>, %arg18: memref<1x64xf32, #tpu.memory_space<vmem>>, %arg19: memref<64x4xf32, #tpu.memory_space<vmem>>, %arg20: memref<1x4xf32, #tpu.memory_space<vmem>>, %arg21: memref<4x64xf32, #tpu.memory_space<vmem>>, %arg22: memref<1x64xf32, #tpu.memory_space<vmem>>, %arg23: memref<64x24xbf16, #tpu.memory_space<vmem>>, %arg24: memref<1x24xf32, #tpu.memory_space<vmem>>, %arg25: memref<24x64xbf16, #tpu.memory_space<vmem>>, %arg26: memref<1x64xf32, #tpu.memory_space<vmem>>, %arg27: memref<64x128xbf16, #tpu.memory_space<vmem>>, %arg28: memref<1x128xf32, #tpu.memory_space<vmem>>, %arg29: memref<2x128xf32, #tpu.memory_space<vmem>>, %arg30: memref<2x10x10x16xf32, #tpu.memory_space<vmem>>, %arg31: memref<2x10x10x64xf32, #tpu.memory_space<vmem>>) attributes {dimension_semantics = [#tpu.dimension_semantics<arbitrary>], iteration_bounds = array<i64: 1>, scalar_prefetch = 0 : i64, scratch_operands = 2 : i64, tpu.core_type = #tpu.core_type<tc>, window_params = [{pipeline_mode = #tpu.pipeline_mode<synchronous>, transform_indices = @transform_0, window_bounds = array<i64: 2, 9, 9, 3>}, {pipeline_mode = #tpu.pipeline_mode<synchronous>, transform_indices = @transform_1, window_bounds = array<i64: 2, 9, 9, 3>}, {pipeline_mode = #tpu.pipeline_mode<synchronous>, transform_indices = @transform_2, window_bounds = array<i64: 2, 9, 9, 3>}, {pipeline_mode = #tpu.pipeline_mode<synchronous>, transform_indices = @transform_3, window_bounds = array<i64: 2, 9, 9, 3>}, {pipeline_mode = #tpu.pipeline_mode<synchronous>, transform_indices = @transform_4, window_bounds = array<i64: 27, 16>}, {pipeline_mode = #tpu.pipeline_mode<synchronous>, transform_indices = @transform_5, window_bounds = array<i64: 1, 16>}, {pipeline_mode = #tpu.pipeline_mode<synchronous>, transform_indices = @transform_6, window_bounds = array<i64: 3, 3, 16>}, {pipeline_mode = #tpu.pipeline_mode<synchronous>, transform_indices = @transform_7, window_bounds = array<i64: 1, 16>}, {pipeline_mode = #tpu.pipeline_mode<synchronous>, transform_indices = @transform_8, window_bounds = array<i64: 16, 4>}, {pipeline_mode = #tpu.pipeline_mode<synchronous>, transform_indices = @transform_9, window_bounds = array<i64: 1, 4>}, {pipeline_mode = #tpu.pipeline_mode<synchronous>, transform_indices = @transform_10, window_bounds = array<i64: 4, 16>}, {pipeline_mode = #tpu.pipeline_mode<synchronous>, transform_indices = @transform_11, window_bounds = array<i64: 1, 16>}, {pipeline_mode = #tpu.pipeline_mode<synchronous>, transform_indices = @transform_12, window_bounds = array<i64: 16, 16>}, {pipeline_mode = #tpu.pipeline_mode<synchronous>, transform_indices = @transform_13, window_bounds = array<i64: 1, 16>}, {pipeline_mode = #tpu.pipeline_mode<synchronous>, transform_indices = @transform_14, window_bounds = array<i64: 16, 64>}, {pipeline_mode = #tpu.pipeline_mode<synchronous>, transform_indices = @transform_15, window_bounds = array<i64: 1, 64>}, {pipeline_mode = #tpu.pipeline_mode<synchronous>, transform_indices = @transform_16, window_bounds = array<i64: 3, 3, 64>}, {pipeline_mode = #tpu.pipeline_mode<synchronous>, transform_indices = @transform_17, window_bounds = array<i64: 1, 64>}, {pipeline_mode = #tpu.pipeline_mode<synchronous>, transform_indices = @transform_18, window_bounds = array<i64: 64, 4>}, {pipeline_mode = #tpu.pipeline_mode<synchronous>, transform_indices = @transform_19, window_bounds = array<i64: 1, 4>}, {pipeline_mode = #tpu.pipeline_mode<synchronous>, transform_indices = @transform_20, window_bounds = array<i64: 4, 64>}, {pipeline_mode = #tpu.pipeline_mode<synchronous>, transform_indices = @transform_21, window_bounds = array<i64: 1, 64>}, {pipeline_mode = #tpu.pipeline_mode<synchronous>, transform_indices = @transform_22, window_bounds = array<i64: 64, 24>}, {pipeline_mode = #tpu.pipeline_mode<synchronous>, transform_indices = @transform_23, window_bounds = array<i64: 1, 24>}, {pipeline_mode = #tpu.pipeline_mode<synchronous>, transform_indices = @transform_24, window_bounds = array<i64: 24, 64>}, {pipeline_mode = #tpu.pipeline_mode<synchronous>, transform_indices = @transform_25, window_bounds = array<i64: 1, 64>}, {pipeline_mode = #tpu.pipeline_mode<synchronous>, transform_indices = @transform_26, window_bounds = array<i64: 64, 128>}, {pipeline_mode = #tpu.pipeline_mode<synchronous>, transform_indices = @transform_27, window_bounds = array<i64: 1, 128>}, {pipeline_mode = #tpu.pipeline_mode<synchronous>, transform_indices = @transform_28, window_bounds = array<i64: 2, 128>}]} {
    %cst = arith.constant 0.000000e+00 : f32
    %0 = vector.broadcast %cst : f32 to vector<128x16xf32>
    %c0 = arith.constant 0 : index
    %c0_0 = arith.constant 0 : index
    %c0_1 = arith.constant 0 : index
    %c0_2 = arith.constant 0 : index
    %1 = vector.load %arg1[%c0, %c0_0, %c0_1, %c0_2] : memref<2x9x9x3xf32, #tpu.memory_space<vmem>>, vector<2x8x8x3xf32>
    %2 = vector.shape_cast %1 : vector<2x8x8x3xf32> to vector<128x3xf32>
    %3 = arith.truncf %2 : vector<128x3xf32> to vector<128x3xbf16>
    %c0_3 = arith.constant 0 : index
    %c0_4 = arith.constant 0 : index
    %4 = vector.load %arg5[%c0_3, %c0_4] : memref<27x16xbf16, #tpu.memory_space<vmem>>, vector<3x16xbf16>
    %cst_5 = arith.constant dense<0.000000e+00> : vector<128x16xf32>
    %5 = tpu.matmul %3, %4, %cst_5 {dimension_numbers = #tpu.dot_dimension_numbers<[1], [0], [0], [1], [0, 0, 1, 1], [], []>} : vector<128x3xbf16>, vector<3x16xbf16>, vector<128x16xf32> -> vector<128x16xf32>
    %6 = arith.addf %0, %5 : vector<128x16xf32>
    %c0_6 = arith.constant 0 : index
    %c0_7 = arith.constant 0 : index
    %c0_8 = arith.constant 0 : index
    %c0_9 = arith.constant 0 : index
    %7 = vector.load %arg2[%c0_6, %c0_7, %c0_8, %c0_9] : memref<2x9x9x3xf32, #tpu.memory_space<vmem>>, vector<2x8x8x3xf32>
    %8 = vector.shape_cast %7 : vector<2x8x8x3xf32> to vector<128x3xf32>
    %9 = arith.truncf %8 : vector<128x3xf32> to vector<128x3xbf16>
    %c3 = arith.constant 3 : index
    %c0_10 = arith.constant 0 : index
    %10 = vector.load %arg5[%c3, %c0_10] : memref<27x16xbf16, #tpu.memory_space<vmem>>, vector<3x16xbf16>
    %cst_11 = arith.constant dense<0.000000e+00> : vector<128x16xf32>
    %11 = tpu.matmul %9, %10, %cst_11 {dimension_numbers = #tpu.dot_dimension_numbers<[1], [0], [0], [1], [0, 0, 1, 1], [], []>} : vector<128x3xbf16>, vector<3x16xbf16>, vector<128x16xf32> -> vector<128x16xf32>
    %12 = arith.addf %6, %11 : vector<128x16xf32>
    %c0_12 = arith.constant 0 : index
    %c0_13 = arith.constant 0 : index
    %c1 = arith.constant 1 : index
    %c0_14 = arith.constant 0 : index
    %13 = vector.load %arg1[%c0_12, %c0_13, %c1, %c0_14] : memref<2x9x9x3xf32, #tpu.memory_space<vmem>>, vector<2x8x8x3xf32>
    %14 = vector.shape_cast %13 : vector<2x8x8x3xf32> to vector<128x3xf32>
    %15 = arith.truncf %14 : vector<128x3xf32> to vector<128x3xbf16>
    %c6 = arith.constant 6 : index
    %c0_15 = arith.constant 0 : index
    %16 = vector.load %arg5[%c6, %c0_15] : memref<27x16xbf16, #tpu.memory_space<vmem>>, vector<3x16xbf16>
    %cst_16 = arith.constant dense<0.000000e+00> : vector<128x16xf32>
    %17 = tpu.matmul %15, %16, %cst_16 {dimension_numbers = #tpu.dot_dimension_numbers<[1], [0], [0], [1], [0, 0, 1, 1], [], []>} : vector<128x3xbf16>, vector<3x16xbf16>, vector<128x16xf32> -> vector<128x16xf32>
    %18 = arith.addf %12, %17 : vector<128x16xf32>
    %c0_17 = arith.constant 0 : index
    %c0_18 = arith.constant 0 : index
    %c0_19 = arith.constant 0 : index
    %c0_20 = arith.constant 0 : index
    %19 = vector.load %arg3[%c0_17, %c0_18, %c0_19, %c0_20] : memref<2x9x9x3xf32, #tpu.memory_space<vmem>>, vector<2x8x8x3xf32>
    %20 = vector.shape_cast %19 : vector<2x8x8x3xf32> to vector<128x3xf32>
    %21 = arith.truncf %20 : vector<128x3xf32> to vector<128x3xbf16>
    %c9 = arith.constant 9 : index
    %c0_21 = arith.constant 0 : index
    %22 = vector.load %arg5[%c9, %c0_21] : memref<27x16xbf16, #tpu.memory_space<vmem>>, vector<3x16xbf16>
    %cst_22 = arith.constant dense<0.000000e+00> : vector<128x16xf32>
    %23 = tpu.matmul %21, %22, %cst_22 {dimension_numbers = #tpu.dot_dimension_numbers<[1], [0], [0], [1], [0, 0, 1, 1], [], []>} : vector<128x3xbf16>, vector<3x16xbf16>, vector<128x16xf32> -> vector<128x16xf32>
    %24 = arith.addf %18, %23 : vector<128x16xf32>
    %c0_23 = arith.constant 0 : index
    %c0_24 = arith.constant 0 : index
    %c0_25 = arith.constant 0 : index
    %c0_26 = arith.constant 0 : index
    %25 = vector.load %arg4[%c0_23, %c0_24, %c0_25, %c0_26] : memref<2x9x9x3xf32, #tpu.memory_space<vmem>>, vector<2x8x8x3xf32>
    %26 = vector.shape_cast %25 : vector<2x8x8x3xf32> to vector<128x3xf32>
    %27 = arith.truncf %26 : vector<128x3xf32> to vector<128x3xbf16>
    %c12 = arith.constant 12 : index
    %c0_27 = arith.constant 0 : index
    %28 = vector.load %arg5[%c12, %c0_27] : memref<27x16xbf16, #tpu.memory_space<vmem>>, vector<3x16xbf16>
    %cst_28 = arith.constant dense<0.000000e+00> : vector<128x16xf32>
    %29 = tpu.matmul %27, %28, %cst_28 {dimension_numbers = #tpu.dot_dimension_numbers<[1], [0], [0], [1], [0, 0, 1, 1], [], []>} : vector<128x3xbf16>, vector<3x16xbf16>, vector<128x16xf32> -> vector<128x16xf32>
    %30 = arith.addf %24, %29 : vector<128x16xf32>
    %c0_29 = arith.constant 0 : index
    %c0_30 = arith.constant 0 : index
    %c1_31 = arith.constant 1 : index
    %c0_32 = arith.constant 0 : index
    %31 = vector.load %arg3[%c0_29, %c0_30, %c1_31, %c0_32] : memref<2x9x9x3xf32, #tpu.memory_space<vmem>>, vector<2x8x8x3xf32>
    %32 = vector.shape_cast %31 : vector<2x8x8x3xf32> to vector<128x3xf32>
    %33 = arith.truncf %32 : vector<128x3xf32> to vector<128x3xbf16>
    %c15 = arith.constant 15 : index
    %c0_33 = arith.constant 0 : index
    %34 = vector.load %arg5[%c15, %c0_33] : memref<27x16xbf16, #tpu.memory_space<vmem>>, vector<3x16xbf16>
    %cst_34 = arith.constant dense<0.000000e+00> : vector<128x16xf32>
    %35 = tpu.matmul %33, %34, %cst_34 {dimension_numbers = #tpu.dot_dimension_numbers<[1], [0], [0], [1], [0, 0, 1, 1], [], []>} : vector<128x3xbf16>, vector<3x16xbf16>, vector<128x16xf32> -> vector<128x16xf32>
    %36 = arith.addf %30, %35 : vector<128x16xf32>
    %c0_35 = arith.constant 0 : index
    %c1_36 = arith.constant 1 : index
    %c0_37 = arith.constant 0 : index
    %c0_38 = arith.constant 0 : index
    %37 = vector.load %arg1[%c0_35, %c1_36, %c0_37, %c0_38] : memref<2x9x9x3xf32, #tpu.memory_space<vmem>>, vector<2x8x8x3xf32>
    %38 = vector.shape_cast %37 : vector<2x8x8x3xf32> to vector<128x3xf32>
    %39 = arith.truncf %38 : vector<128x3xf32> to vector<128x3xbf16>
    %c18 = arith.constant 18 : index
    %c0_39 = arith.constant 0 : index
    %40 = vector.load %arg5[%c18, %c0_39] : memref<27x16xbf16, #tpu.memory_space<vmem>>, vector<3x16xbf16>
    %cst_40 = arith.constant dense<0.000000e+00> : vector<128x16xf32>
    %41 = tpu.matmul %39, %40, %cst_40 {dimension_numbers = #tpu.dot_dimension_numbers<[1], [0], [0], [1], [0, 0, 1, 1], [], []>} : vector<128x3xbf16>, vector<3x16xbf16>, vector<128x16xf32> -> vector<128x16xf32>
    %42 = arith.addf %36, %41 : vector<128x16xf32>
    %c0_41 = arith.constant 0 : index
    %c1_42 = arith.constant 1 : index
    %c0_43 = arith.constant 0 : index
    %c0_44 = arith.constant 0 : index
    %43 = vector.load %arg2[%c0_41, %c1_42, %c0_43, %c0_44] : memref<2x9x9x3xf32, #tpu.memory_space<vmem>>, vector<2x8x8x3xf32>
    %44 = vector.shape_cast %43 : vector<2x8x8x3xf32> to vector<128x3xf32>
    %45 = arith.truncf %44 : vector<128x3xf32> to vector<128x3xbf16>
    %c21 = arith.constant 21 : index
    %c0_45 = arith.constant 0 : index
    %46 = vector.load %arg5[%c21, %c0_45] : memref<27x16xbf16, #tpu.memory_space<vmem>>, vector<3x16xbf16>
    %cst_46 = arith.constant dense<0.000000e+00> : vector<128x16xf32>
    %47 = tpu.matmul %45, %46, %cst_46 {dimension_numbers = #tpu.dot_dimension_numbers<[1], [0], [0], [1], [0, 0, 1, 1], [], []>} : vector<128x3xbf16>, vector<3x16xbf16>, vector<128x16xf32> -> vector<128x16xf32>
    %48 = arith.addf %42, %47 : vector<128x16xf32>
    %c0_47 = arith.constant 0 : index
    %c1_48 = arith.constant 1 : index
    %c1_49 = arith.constant 1 : index
    %c0_50 = arith.constant 0 : index
    %49 = vector.load %arg1[%c0_47, %c1_48, %c1_49, %c0_50] : memref<2x9x9x3xf32, #tpu.memory_space<vmem>>, vector<2x8x8x3xf32>
    %50 = vector.shape_cast %49 : vector<2x8x8x3xf32> to vector<128x3xf32>
    %51 = arith.truncf %50 : vector<128x3xf32> to vector<128x3xbf16>
    %c24 = arith.constant 24 : index
    %c0_51 = arith.constant 0 : index
    %52 = vector.load %arg5[%c24, %c0_51] : memref<27x16xbf16, #tpu.memory_space<vmem>>, vector<3x16xbf16>
    %cst_52 = arith.constant dense<0.000000e+00> : vector<128x16xf32>
    %53 = tpu.matmul %51, %52, %cst_52 {dimension_numbers = #tpu.dot_dimension_numbers<[1], [0], [0], [1], [0, 0, 1, 1], [], []>} : vector<128x3xbf16>, vector<3x16xbf16>, vector<128x16xf32> -> vector<128x16xf32>
    %54 = arith.addf %48, %53 : vector<128x16xf32>
    %c0_53 = arith.constant 0 : index
    %c0_54 = arith.constant 0 : index
    %55 = vector.load %arg6[%c0_53, %c0_54] : memref<1x16xf32, #tpu.memory_space<vmem>>, vector<1x16xf32>
    %56 = vector.broadcast %55 : vector<1x16xf32> to vector<128x16xf32>
    %57 = arith.addf %54, %56 : vector<128x16xf32>
    %58 = arith.negf %57 : vector<128x16xf32>
    %59 = math.exp %58 : vector<128x16xf32>
    %cst_55 = arith.constant 1.000000e+00 : f32
    %60 = vector.broadcast %cst_55 : f32 to vector<128x16xf32>
    %61 = arith.addf %60, %59 : vector<128x16xf32>
    %62 = arith.divf %60, %61 : vector<128x16xf32>
    %63 = arith.mulf %57, %62 : vector<128x16xf32>
    %64 = vector.shape_cast %63 : vector<128x16xf32> to vector<2x8x8x16xf32>
    %cst_56 = arith.constant 0.000000e+00 : f32
    %65 = vector.broadcast %cst_56 : f32 to vector<2x10x10x16xf32>
    %c0_57 = arith.constant 0 : index
    %c0_58 = arith.constant 0 : index
    %c0_59 = arith.constant 0 : index
    %c0_60 = arith.constant 0 : index
    %66 = vector.load %arg30[%c0_57, %c0_58, %c0_59, %c0_60] : memref<2x10x10x16xf32, #tpu.memory_space<vmem>>, vector<2x10x10x16xf32>
    tpu.vector_store %arg30[%c0_57, %c0_58, %c0_59, %c0_60], %65 {strides = array<i32>} : memref<2x10x10x16xf32, #tpu.memory_space<vmem>>, vector<2x10x10x16xf32>,
    %c0_61 = arith.constant 0 : index
    %c1_62 = arith.constant 1 : index
    %c1_63 = arith.constant 1 : index
    %c0_64 = arith.constant 0 : index
    %67 = vector.load %arg30[%c0_61, %c1_62, %c1_63, %c0_64] : memref<2x10x10x16xf32, #tpu.memory_space<vmem>>, vector<2x8x8x16xf32>
    tpu.vector_store %arg30[%c0_61, %c1_62, %c1_63, %c0_64], %64 {strides = array<i32>} : memref<2x10x10x16xf32, #tpu.memory_space<vmem>>, vector<2x8x8x16xf32>,
    %c0_65 = arith.constant 0 : index
    %c0_66 = arith.constant 0 : index
    %c0_67 = arith.constant 0 : index
    %68 = vector.load %arg7[%c0_65, %c0_66, %c0_67] : memref<3x3x16xf32, #tpu.memory_space<vmem>>, vector<3x3x16xf32>
    %cst_68 = arith.constant 0.000000e+00 : f32
    %69 = vector.broadcast %cst_68 : f32 to vector<2x8x8x16xf32>
    %c0_69 = arith.constant 0 : index
    %c0_70 = arith.constant 0 : index
    %c0_71 = arith.constant 0 : index
    %c0_72 = arith.constant 0 : index
    %70 = vector.load %arg30[%c0_69, %c0_70, %c0_71, %c0_72] : memref<2x10x10x16xf32, #tpu.memory_space<vmem>>, vector<2x8x8x16xf32>
    %71 = vector.extract_strided_slice %68 {offsets = [0, 0, 0], sizes = [1, 1, 16], strides = [1, 1, 1]} : vector<3x3x16xf32> to vector<1x1x16xf32>
    %72 = vector.shape_cast %71 : vector<1x1x16xf32> to vector<16xf32>
    %73 = vector.shape_cast %72 : vector<16xf32> to vector<1x1x1x16xf32>
    %74 = vector.broadcast %73 : vector<1x1x1x16xf32> to vector<2x8x8x16xf32>
    %75 = arith.mulf %70, %74 : vector<2x8x8x16xf32>
    %76 = arith.addf %69, %75 : vector<2x8x8x16xf32>
    %c0_73 = arith.constant 0 : index
    %c0_74 = arith.constant 0 : index
    %c1_75 = arith.constant 1 : index
    %c0_76 = arith.constant 0 : index
    %77 = vector.load %arg30[%c0_73, %c0_74, %c1_75, %c0_76] : memref<2x10x10x16xf32, #tpu.memory_space<vmem>>, vector<2x8x8x16xf32>
    %78 = vector.extract_strided_slice %68 {offsets = [0, 1, 0], sizes = [1, 1, 16], strides = [1, 1, 1]} : vector<3x3x16xf32> to vector<1x1x16xf32>
    %79 = vector.shape_cast %78 : vector<1x1x16xf32> to vector<16xf32>
    %80 = vector.shape_cast %79 : vector<16xf32> to vector<1x1x1x16xf32>
    %81 = vector.broadcast %80 : vector<1x1x1x16xf32> to vector<2x8x8x16xf32>
    %82 = arith.mulf %77, %81 : vector<2x8x8x16xf32>
    %83 = arith.addf %76, %82 : vector<2x8x8x16xf32>
    %c0_77 = arith.constant 0 : index
    %c0_78 = arith.constant 0 : index
    %c2 = arith.constant 2 : index
    %c0_79 = arith.constant 0 : index
    %84 = vector.load %arg30[%c0_77, %c0_78, %c2, %c0_79] : memref<2x10x10x16xf32, #tpu.memory_space<vmem>>, vector<2x8x8x16xf32>
    %85 = vector.extract_strided_slice %68 {offsets = [0, 2, 0], sizes = [1, 1, 16], strides = [1, 1, 1]} : vector<3x3x16xf32> to vector<1x1x16xf32>
    %86 = vector.shape_cast %85 : vector<1x1x16xf32> to vector<16xf32>
    %87 = vector.shape_cast %86 : vector<16xf32> to vector<1x1x1x16xf32>
    %88 = vector.broadcast %87 : vector<1x1x1x16xf32> to vector<2x8x8x16xf32>
    %89 = arith.mulf %84, %88 : vector<2x8x8x16xf32>
    %90 = arith.addf %83, %89 : vector<2x8x8x16xf32>
    %c0_80 = arith.constant 0 : index
    %c1_81 = arith.constant 1 : index
    %c0_82 = arith.constant 0 : index
    %c0_83 = arith.constant 0 : index
    %91 = vector.load %arg30[%c0_80, %c1_81, %c0_82, %c0_83] : memref<2x10x10x16xf32, #tpu.memory_space<vmem>>, vector<2x8x8x16xf32>
    %92 = vector.extract_strided_slice %68 {offsets = [1, 0, 0], sizes = [1, 1, 16], strides = [1, 1, 1]} : vector<3x3x16xf32> to vector<1x1x16xf32>
    %93 = vector.shape_cast %92 : vector<1x1x16xf32> to vector<16xf32>
    %94 = vector.shape_cast %93 : vector<16xf32> to vector<1x1x1x16xf32>
    %95 = vector.broadcast %94 : vector<1x1x1x16xf32> to vector<2x8x8x16xf32>
    %96 = arith.mulf %91, %95 : vector<2x8x8x16xf32>
    %97 = arith.addf %90, %96 : vector<2x8x8x16xf32>
    %c0_84 = arith.constant 0 : index
    %c1_85 = arith.constant 1 : index
    %c1_86 = arith.constant 1 : index
    %c0_87 = arith.constant 0 : index
    %98 = vector.load %arg30[%c0_84, %c1_85, %c1_86, %c0_87] : memref<2x10x10x16xf32, #tpu.memory_space<vmem>>, vector<2x8x8x16xf32>
    %99 = vector.extract_strided_slice %68 {offsets = [1, 1, 0], sizes = [1, 1, 16], strides = [1, 1, 1]} : vector<3x3x16xf32> to vector<1x1x16xf32>
    %100 = vector.shape_cast %99 : vector<1x1x16xf32> to vector<16xf32>
    %101 = vector.shape_cast %100 : vector<16xf32> to vector<1x1x1x16xf32>
    %102 = vector.broadcast %101 : vector<1x1x1x16xf32> to vector<2x8x8x16xf32>
    %103 = arith.mulf %98, %102 : vector<2x8x8x16xf32>
    %104 = arith.addf %97, %103 : vector<2x8x8x16xf32>
    %c0_88 = arith.constant 0 : index
    %c1_89 = arith.constant 1 : index
    %c2_90 = arith.constant 2 : index
    %c0_91 = arith.constant 0 : index
    %105 = vector.load %arg30[%c0_88, %c1_89, %c2_90, %c0_91] : memref<2x10x10x16xf32, #tpu.memory_space<vmem>>, vector<2x8x8x16xf32>
    %106 = vector.extract_strided_slice %68 {offsets = [1, 2, 0], sizes = [1, 1, 16], strides = [1, 1, 1]} : vector<3x3x16xf32> to vector<1x1x16xf32>
    %107 = vector.shape_cast %106 : vector<1x1x16xf32> to vector<16xf32>
    %108 = vector.shape_cast %107 : vector<16xf32> to vector<1x1x1x16xf32>
    %109 = vector.broadcast %108 : vector<1x1x1x16xf32> to vector<2x8x8x16xf32>
    %110 = arith.mulf %105, %109 : vector<2x8x8x16xf32>
    %111 = arith.addf %104, %110 : vector<2x8x8x16xf32>
    %c0_92 = arith.constant 0 : index
    %c2_93 = arith.constant 2 : index
    %c0_94 = arith.constant 0 : index
    %c0_95 = arith.constant 0 : index
    %112 = vector.load %arg30[%c0_92, %c2_93, %c0_94, %c0_95] : memref<2x10x10x16xf32, #tpu.memory_space<vmem>>, vector<2x8x8x16xf32>
    %113 = vector.extract_strided_slice %68 {offsets = [2, 0, 0], sizes = [1, 1, 16], strides = [1, 1, 1]} : vector<3x3x16xf32> to vector<1x1x16xf32>
    %114 = vector.shape_cast %113 : vector<1x1x16xf32> to vector<16xf32>
    %115 = vector.shape_cast %114 : vector<16xf32> to vector<1x1x1x16xf32>
    %116 = vector.broadcast %115 : vector<1x1x1x16xf32> to vector<2x8x8x16xf32>
    %117 = arith.mulf %112, %116 : vector<2x8x8x16xf32>
    %118 = arith.addf %111, %117 : vector<2x8x8x16xf32>
    %c0_96 = arith.constant 0 : index
    %c2_97 = arith.constant 2 : index
    %c1_98 = arith.constant 1 : index
    %c0_99 = arith.constant 0 : index
    %119 = vector.load %arg30[%c0_96, %c2_97, %c1_98, %c0_99] : memref<2x10x10x16xf32, #tpu.memory_space<vmem>>, vector<2x8x8x16xf32>
    %120 = vector.extract_strided_slice %68 {offsets = [2, 1, 0], sizes = [1, 1, 16], strides = [1, 1, 1]} : vector<3x3x16xf32> to vector<1x1x16xf32>
    %121 = vector.shape_cast %120 : vector<1x1x16xf32> to vector<16xf32>
    %122 = vector.shape_cast %121 : vector<16xf32> to vector<1x1x1x16xf32>
    %123 = vector.broadcast %122 : vector<1x1x1x16xf32> to vector<2x8x8x16xf32>
    %124 = arith.mulf %119, %123 : vector<2x8x8x16xf32>
    %125 = arith.addf %118, %124 : vector<2x8x8x16xf32>
    %c0_100 = arith.constant 0 : index
    %c2_101 = arith.constant 2 : index
    %c2_102 = arith.constant 2 : index
    %c0_103 = arith.constant 0 : index
    %126 = vector.load %arg30[%c0_100, %c2_101, %c2_102, %c0_103] : memref<2x10x10x16xf32, #tpu.memory_space<vmem>>, vector<2x8x8x16xf32>
    %127 = vector.extract_strided_slice %68 {offsets = [2, 2, 0], sizes = [1, 1, 16], strides = [1, 1, 1]} : vector<3x3x16xf32> to vector<1x1x16xf32>
    %128 = vector.shape_cast %127 : vector<1x1x16xf32> to vector<16xf32>
    %129 = vector.shape_cast %128 : vector<16xf32> to vector<1x1x1x16xf32>
    %130 = vector.broadcast %129 : vector<1x1x1x16xf32> to vector<2x8x8x16xf32>
    %131 = arith.mulf %126, %130 : vector<2x8x8x16xf32>
    %132 = arith.addf %125, %131 : vector<2x8x8x16xf32>
    %c0_104 = arith.constant 0 : index
    %c0_105 = arith.constant 0 : index
    %133 = vector.load %arg8[%c0_104, %c0_105] : memref<1x16xf32, #tpu.memory_space<vmem>>, vector<1x16xf32>
    %134 = vector.shape_cast %133 : vector<1x16xf32> to vector<1x1x1x16xf32>
    %135 = vector.broadcast %134 : vector<1x1x1x16xf32> to vector<2x8x8x16xf32>
    %136 = arith.addf %132, %135 : vector<2x8x8x16xf32>
    %137 = arith.negf %136 : vector<2x8x8x16xf32>
    %138 = math.exp %137 : vector<2x8x8x16xf32>
    %cst_106 = arith.constant 1.000000e+00 : f32
    %139 = vector.broadcast %cst_106 : f32 to vector<2x8x8x16xf32>
    %140 = arith.addf %139, %138 : vector<2x8x8x16xf32>
    %141 = arith.divf %139, %140 : vector<2x8x8x16xf32>
    %142 = arith.mulf %136, %141 : vector<2x8x8x16xf32>
    %cst_107 = arith.constant dense<0.000000e+00> : vector<2x16xf32>
    %143 = vector.multi_reduction <add>, %142, %cst_107 [1, 2] : vector<2x8x8x16xf32> to vector<2x16xf32>
    %cst_108 = arith.constant 6.400000e+01 : f32
    %144 = vector.broadcast %cst_108 : f32 to vector<2x16xf32>
    %145 = arith.divf %143, %144 : vector<2x16xf32>
    %c0_109 = arith.constant 0 : index
    %c0_110 = arith.constant 0 : index
    %146 = vector.load %arg9[%c0_109, %c0_110] : memref<16x4xf32, #tpu.memory_space<vmem>>, vector<16x4xf32>
    %cst_111 = arith.constant dense<0.000000e+00> : vector<2x4xf32>
    %147 = tpu.matmul %145, %146, %cst_111 {dimension_numbers = #tpu.dot_dimension_numbers<[1], [0], [0], [1], [0, 0, 1, 1], [], []>} : vector<2x16xf32>, vector<16x4xf32>, vector<2x4xf32> -> vector<2x4xf32>
    %c0_112 = arith.constant 0 : index
    %c0_113 = arith.constant 0 : index
    %148 = vector.load %arg10[%c0_112, %c0_113] : memref<1x4xf32, #tpu.memory_space<vmem>>, vector<1x4xf32>
    %149 = vector.broadcast %148 : vector<1x4xf32> to vector<2x4xf32>
    %150 = arith.addf %147, %149 : vector<2x4xf32>
    %151 = arith.negf %150 : vector<2x4xf32>
    %152 = math.exp %151 : vector<2x4xf32>
    %cst_114 = arith.constant 1.000000e+00 : f32
    %153 = vector.broadcast %cst_114 : f32 to vector<2x4xf32>
    %154 = arith.addf %153, %152 : vector<2x4xf32>
    %155 = arith.divf %153, %154 : vector<2x4xf32>
    %156 = arith.mulf %150, %155 : vector<2x4xf32>
    %c0_115 = arith.constant 0 : index
    %c0_116 = arith.constant 0 : index
    %157 = vector.load %arg11[%c0_115, %c0_116] : memref<4x16xf32, #tpu.memory_space<vmem>>, vector<4x16xf32>
    %cst_117 = arith.constant dense<0.000000e+00> : vector<2x16xf32>
    %158 = tpu.matmul %156, %157, %cst_117 {dimension_numbers = #tpu.dot_dimension_numbers<[1], [0], [0], [1], [0, 0, 1, 1], [], []>} : vector<2x4xf32>, vector<4x16xf32>, vector<2x16xf32> -> vector<2x16xf32>
    %c0_118 = arith.constant 0 : index
    %c0_119 = arith.constant 0 : index
    %159 = vector.load %arg12[%c0_118, %c0_119] : memref<1x16xf32, #tpu.memory_space<vmem>>, vector<1x16xf32>
    %160 = vector.broadcast %159 : vector<1x16xf32> to vector<2x16xf32>
    %161 = arith.addf %158, %160 : vector<2x16xf32>
    %162 = arith.negf %161 : vector<2x16xf32>
    %163 = math.exp %162 : vector<2x16xf32>
    %cst_120 = arith.constant 1.000000e+00 : f32
    %164 = vector.broadcast %cst_120 : f32 to vector<2x16xf32>
    %165 = arith.addf %164, %163 : vector<2x16xf32>
    %166 = arith.divf %164, %165 : vector<2x16xf32>
    %167 = vector.shape_cast %166 : vector<2x16xf32> to vector<2x1x1x16xf32>
    %168 = vector.broadcast %167 : vector<2x1x1x16xf32> to vector<2x8x8x16xf32>
    %169 = arith.mulf %142, %168 : vector<2x8x8x16xf32>
    %170 = vector.shape_cast %169 : vector<2x8x8x16xf32> to vector<128x16xf32>
    %171 = arith.truncf %170 : vector<128x16xf32> to vector<128x16xbf16>
    %c0_121 = arith.constant 0 : index
    %c0_122 = arith.constant 0 : index
    %172 = vector.load %arg13[%c0_121, %c0_122] : memref<16x16xbf16, #tpu.memory_space<vmem>>, vector<16x16xbf16>
    %cst_123 = arith.constant dense<0.000000e+00> : vector<128x16xf32>
    %173 = tpu.matmul %171, %172, %cst_123 {dimension_numbers = #tpu.dot_dimension_numbers<[1], [0], [0], [1], [0, 0, 1, 1], [], []>} : vector<128x16xbf16>, vector<16x16xbf16>, vector<128x16xf32> -> vector<128x16xf32>
    %c0_124 = arith.constant 0 : index
    %c0_125 = arith.constant 0 : index
    %174 = vector.load %arg14[%c0_124, %c0_125] : memref<1x16xf32, #tpu.memory_space<vmem>>, vector<1x16xf32>
    %175 = vector.broadcast %174 : vector<1x16xf32> to vector<128x16xf32>
    %176 = arith.addf %173, %175 : vector<128x16xf32>
    %177 = vector.shape_cast %176 : vector<128x16xf32> to vector<2x8x8x16xf32>
    %178 = arith.addf %177, %64 : vector<2x8x8x16xf32>
    %179 = vector.shape_cast %178 : vector<2x8x8x16xf32> to vector<128x16xf32>
    %180 = arith.truncf %179 : vector<128x16xf32> to vector<128x16xbf16>
    %c0_126 = arith.constant 0 : index
    %c0_127 = arith.constant 0 : index
    %181 = vector.load %arg15[%c0_126, %c0_127] : memref<16x64xbf16, #tpu.memory_space<vmem>>, vector<16x64xbf16>
    %cst_128 = arith.constant dense<0.000000e+00> : vector<128x64xf32>
    %182 = tpu.matmul %180, %181, %cst_128 {dimension_numbers = #tpu.dot_dimension_numbers<[1], [0], [0], [1], [0, 0, 1, 1], [], []>} : vector<128x16xbf16>, vector<16x64xbf16>, vector<128x64xf32> -> vector<128x64xf32>
    %c0_129 = arith.constant 0 : index
    %c0_130 = arith.constant 0 : index
    %183 = vector.load %arg16[%c0_129, %c0_130] : memref<1x64xf32, #tpu.memory_space<vmem>>, vector<1x64xf32>
    %184 = vector.broadcast %183 : vector<1x64xf32> to vector<128x64xf32>
    %185 = arith.addf %182, %184 : vector<128x64xf32>
    %186 = arith.negf %185 : vector<128x64xf32>
    %187 = math.exp %186 : vector<128x64xf32>
    %cst_131 = arith.constant 1.000000e+00 : f32
    %188 = vector.broadcast %cst_131 : f32 to vector<128x64xf32>
    %189 = arith.addf %188, %187 : vector<128x64xf32>
    %190 = arith.divf %188, %189 : vector<128x64xf32>
    %191 = arith.mulf %185, %190 : vector<128x64xf32>
    %192 = vector.shape_cast %191 : vector<128x64xf32> to vector<2x8x8x64xf32>
    %cst_132 = arith.constant 0.000000e+00 : f32
    %193 = vector.broadcast %cst_132 : f32 to vector<2x10x10x64xf32>
    %c0_133 = arith.constant 0 : index
    %c0_134 = arith.constant 0 : index
    %c0_135 = arith.constant 0 : index
    %c0_136 = arith.constant 0 : index
    %194 = vector.load %arg31[%c0_133, %c0_134, %c0_135, %c0_136] : memref<2x10x10x64xf32, #tpu.memory_space<vmem>>, vector<2x10x10x64xf32>
    tpu.vector_store %arg31[%c0_133, %c0_134, %c0_135, %c0_136], %193 {strides = array<i32>} : memref<2x10x10x64xf32, #tpu.memory_space<vmem>>, vector<2x10x10x64xf32>,
    %c0_137 = arith.constant 0 : index
    %c1_138 = arith.constant 1 : index
    %c1_139 = arith.constant 1 : index
    %c0_140 = arith.constant 0 : index
    %195 = vector.load %arg31[%c0_137, %c1_138, %c1_139, %c0_140] : memref<2x10x10x64xf32, #tpu.memory_space<vmem>>, vector<2x8x8x64xf32>
    tpu.vector_store %arg31[%c0_137, %c1_138, %c1_139, %c0_140], %192 {strides = array<i32>} : memref<2x10x10x64xf32, #tpu.memory_space<vmem>>, vector<2x8x8x64xf32>,
    %c0_141 = arith.constant 0 : index
    %c0_142 = arith.constant 0 : index
    %c0_143 = arith.constant 0 : index
    %196 = vector.load %arg17[%c0_141, %c0_142, %c0_143] : memref<3x3x64xf32, #tpu.memory_space<vmem>>, vector<3x3x64xf32>
    %cst_144 = arith.constant 0.000000e+00 : f32
    %197 = vector.broadcast %cst_144 : f32 to vector<2x8x8x64xf32>
    %c0_145 = arith.constant 0 : index
    %c0_146 = arith.constant 0 : index
    %c0_147 = arith.constant 0 : index
    %c0_148 = arith.constant 0 : index
    %198 = vector.load %arg31[%c0_145, %c0_146, %c0_147, %c0_148] : memref<2x10x10x64xf32, #tpu.memory_space<vmem>>, vector<2x8x8x64xf32>
    %199 = vector.extract_strided_slice %196 {offsets = [0, 0, 0], sizes = [1, 1, 64], strides = [1, 1, 1]} : vector<3x3x64xf32> to vector<1x1x64xf32>
    %200 = vector.shape_cast %199 : vector<1x1x64xf32> to vector<64xf32>
    %201 = vector.shape_cast %200 : vector<64xf32> to vector<1x1x1x64xf32>
    %202 = vector.broadcast %201 : vector<1x1x1x64xf32> to vector<2x8x8x64xf32>
    %203 = arith.mulf %198, %202 : vector<2x8x8x64xf32>
    %204 = arith.addf %197, %203 : vector<2x8x8x64xf32>
    %c0_149 = arith.constant 0 : index
    %c0_150 = arith.constant 0 : index
    %c1_151 = arith.constant 1 : index
    %c0_152 = arith.constant 0 : index
    %205 = vector.load %arg31[%c0_149, %c0_150, %c1_151, %c0_152] : memref<2x10x10x64xf32, #tpu.memory_space<vmem>>, vector<2x8x8x64xf32>
    %206 = vector.extract_strided_slice %196 {offsets = [0, 1, 0], sizes = [1, 1, 64], strides = [1, 1, 1]} : vector<3x3x64xf32> to vector<1x1x64xf32>
    %207 = vector.shape_cast %206 : vector<1x1x64xf32> to vector<64xf32>
    %208 = vector.shape_cast %207 : vector<64xf32> to vector<1x1x1x64xf32>
    %209 = vector.broadcast %208 : vector<1x1x1x64xf32> to vector<2x8x8x64xf32>
    %210 = arith.mulf %205, %209 : vector<2x8x8x64xf32>
    %211 = arith.addf %204, %210 : vector<2x8x8x64xf32>
    %c0_153 = arith.constant 0 : index
    %c0_154 = arith.constant 0 : index
    %c2_155 = arith.constant 2 : index
    %c0_156 = arith.constant 0 : index
    %212 = vector.load %arg31[%c0_153, %c0_154, %c2_155, %c0_156] : memref<2x10x10x64xf32, #tpu.memory_space<vmem>>, vector<2x8x8x64xf32>
    %213 = vector.extract_strided_slice %196 {offsets = [0, 2, 0], sizes = [1, 1, 64], strides = [1, 1, 1]} : vector<3x3x64xf32> to vector<1x1x64xf32>
    %214 = vector.shape_cast %213 : vector<1x1x64xf32> to vector<64xf32>
    %215 = vector.shape_cast %214 : vector<64xf32> to vector<1x1x1x64xf32>
    %216 = vector.broadcast %215 : vector<1x1x1x64xf32> to vector<2x8x8x64xf32>
    %217 = arith.mulf %212, %216 : vector<2x8x8x64xf32>
    %218 = arith.addf %211, %217 : vector<2x8x8x64xf32>
    %c0_157 = arith.constant 0 : index
    %c1_158 = arith.constant 1 : index
    %c0_159 = arith.constant 0 : index
    %c0_160 = arith.constant 0 : index
    %219 = vector.load %arg31[%c0_157, %c1_158, %c0_159, %c0_160] : memref<2x10x10x64xf32, #tpu.memory_space<vmem>>, vector<2x8x8x64xf32>
    %220 = vector.extract_strided_slice %196 {offsets = [1, 0, 0], sizes = [1, 1, 64], strides = [1, 1, 1]} : vector<3x3x64xf32> to vector<1x1x64xf32>
    %221 = vector.shape_cast %220 : vector<1x1x64xf32> to vector<64xf32>
    %222 = vector.shape_cast %221 : vector<64xf32> to vector<1x1x1x64xf32>
    %223 = vector.broadcast %222 : vector<1x1x1x64xf32> to vector<2x8x8x64xf32>
    %224 = arith.mulf %219, %223 : vector<2x8x8x64xf32>
    %225 = arith.addf %218, %224 : vector<2x8x8x64xf32>
    %c0_161 = arith.constant 0 : index
    %c1_162 = arith.constant 1 : index
    %c1_163 = arith.constant 1 : index
    %c0_164 = arith.constant 0 : index
    %226 = vector.load %arg31[%c0_161, %c1_162, %c1_163, %c0_164] : memref<2x10x10x64xf32, #tpu.memory_space<vmem>>, vector<2x8x8x64xf32>
    %227 = vector.extract_strided_slice %196 {offsets = [1, 1, 0], sizes = [1, 1, 64], strides = [1, 1, 1]} : vector<3x3x64xf32> to vector<1x1x64xf32>
    %228 = vector.shape_cast %227 : vector<1x1x64xf32> to vector<64xf32>
    %229 = vector.shape_cast %228 : vector<64xf32> to vector<1x1x1x64xf32>
    %230 = vector.broadcast %229 : vector<1x1x1x64xf32> to vector<2x8x8x64xf32>
    %231 = arith.mulf %226, %230 : vector<2x8x8x64xf32>
    %232 = arith.addf %225, %231 : vector<2x8x8x64xf32>
    %c0_165 = arith.constant 0 : index
    %c1_166 = arith.constant 1 : index
    %c2_167 = arith.constant 2 : index
    %c0_168 = arith.constant 0 : index
    %233 = vector.load %arg31[%c0_165, %c1_166, %c2_167, %c0_168] : memref<2x10x10x64xf32, #tpu.memory_space<vmem>>, vector<2x8x8x64xf32>
    %234 = vector.extract_strided_slice %196 {offsets = [1, 2, 0], sizes = [1, 1, 64], strides = [1, 1, 1]} : vector<3x3x64xf32> to vector<1x1x64xf32>
    %235 = vector.shape_cast %234 : vector<1x1x64xf32> to vector<64xf32>
    %236 = vector.shape_cast %235 : vector<64xf32> to vector<1x1x1x64xf32>
    %237 = vector.broadcast %236 : vector<1x1x1x64xf32> to vector<2x8x8x64xf32>
    %238 = arith.mulf %233, %237 : vector<2x8x8x64xf32>
    %239 = arith.addf %232, %238 : vector<2x8x8x64xf32>
    %c0_169 = arith.constant 0 : index
    %c2_170 = arith.constant 2 : index
    %c0_171 = arith.constant 0 : index
    %c0_172 = arith.constant 0 : index
    %240 = vector.load %arg31[%c0_169, %c2_170, %c0_171, %c0_172] : memref<2x10x10x64xf32, #tpu.memory_space<vmem>>, vector<2x8x8x64xf32>
    %241 = vector.extract_strided_slice %196 {offsets = [2, 0, 0], sizes = [1, 1, 64], strides = [1, 1, 1]} : vector<3x3x64xf32> to vector<1x1x64xf32>
    %242 = vector.shape_cast %241 : vector<1x1x64xf32> to vector<64xf32>
    %243 = vector.shape_cast %242 : vector<64xf32> to vector<1x1x1x64xf32>
    %244 = vector.broadcast %243 : vector<1x1x1x64xf32> to vector<2x8x8x64xf32>
    %245 = arith.mulf %240, %244 : vector<2x8x8x64xf32>
    %246 = arith.addf %239, %245 : vector<2x8x8x64xf32>
    %c0_173 = arith.constant 0 : index
    %c2_174 = arith.constant 2 : index
    %c1_175 = arith.constant 1 : index
    %c0_176 = arith.constant 0 : index
    %247 = vector.load %arg31[%c0_173, %c2_174, %c1_175, %c0_176] : memref<2x10x10x64xf32, #tpu.memory_space<vmem>>, vector<2x8x8x64xf32>
    %248 = vector.extract_strided_slice %196 {offsets = [2, 1, 0], sizes = [1, 1, 64], strides = [1, 1, 1]} : vector<3x3x64xf32> to vector<1x1x64xf32>
    %249 = vector.shape_cast %248 : vector<1x1x64xf32> to vector<64xf32>
    %250 = vector.shape_cast %249 : vector<64xf32> to vector<1x1x1x64xf32>
    %251 = vector.broadcast %250 : vector<1x1x1x64xf32> to vector<2x8x8x64xf32>
    %252 = arith.mulf %247, %251 : vector<2x8x8x64xf32>
    %253 = arith.addf %246, %252 : vector<2x8x8x64xf32>
    %c0_177 = arith.constant 0 : index
    %c2_178 = arith.constant 2 : index
    %c2_179 = arith.constant 2 : index
    %c0_180 = arith.constant 0 : index
    %254 = vector.load %arg31[%c0_177, %c2_178, %c2_179, %c0_180] : memref<2x10x10x64xf32, #tpu.memory_space<vmem>>, vector<2x8x8x64xf32>
    %255 = vector.extract_strided_slice %196 {offsets = [2, 2, 0], sizes = [1, 1, 64], strides = [1, 1, 1]} : vector<3x3x64xf32> to vector<1x1x64xf32>
    %256 = vector.shape_cast %255 : vector<1x1x64xf32> to vector<64xf32>
    %257 = vector.shape_cast %256 : vector<64xf32> to vector<1x1x1x64xf32>
    %258 = vector.broadcast %257 : vector<1x1x1x64xf32> to vector<2x8x8x64xf32>
    %259 = arith.mulf %254, %258 : vector<2x8x8x64xf32>
    %260 = arith.addf %253, %259 : vector<2x8x8x64xf32>
    %c0_181 = arith.constant 0 : index
    %c0_182 = arith.constant 0 : index
    %261 = vector.load %arg18[%c0_181, %c0_182] : memref<1x64xf32, #tpu.memory_space<vmem>>, vector<1x64xf32>
    %262 = vector.shape_cast %261 : vector<1x64xf32> to vector<1x1x1x64xf32>
    %263 = vector.broadcast %262 : vector<1x1x1x64xf32> to vector<2x8x8x64xf32>
    %264 = arith.addf %260, %263 : vector<2x8x8x64xf32>
    %265 = arith.negf %264 : vector<2x8x8x64xf32>
    %266 = math.exp %265 : vector<2x8x8x64xf32>
    %cst_183 = arith.constant 1.000000e+00 : f32
    %267 = vector.broadcast %cst_183 : f32 to vector<2x8x8x64xf32>
    %268 = arith.addf %267, %266 : vector<2x8x8x64xf32>
    %269 = arith.divf %267, %268 : vector<2x8x8x64xf32>
    %270 = arith.mulf %264, %269 : vector<2x8x8x64xf32>
    %cst_184 = arith.constant dense<0.000000e+00> : vector<2x64xf32>
    %271 = vector.multi_reduction <add>, %270, %cst_184 [1, 2] : vector<2x8x8x64xf32> to vector<2x64xf32>
    %cst_185 = arith.constant 6.400000e+01 : f32
    %272 = vector.broadcast %cst_185 : f32 to vector<2x64xf32>
    %273 = arith.divf %271, %272 : vector<2x64xf32>
    %c0_186 = arith.constant 0 : index
    %c0_187 = arith.constant 0 : index
    %274 = vector.load %arg19[%c0_186, %c0_187] : memref<64x4xf32, #tpu.memory_space<vmem>>, vector<64x4xf32>
    %cst_188 = arith.constant dense<0.000000e+00> : vector<2x4xf32>
    %275 = tpu.matmul %273, %274, %cst_188 {dimension_numbers = #tpu.dot_dimension_numbers<[1], [0], [0], [1], [0, 0, 1, 1], [], []>} : vector<2x64xf32>, vector<64x4xf32>, vector<2x4xf32> -> vector<2x4xf32>
    %c0_189 = arith.constant 0 : index
    %c0_190 = arith.constant 0 : index
    %276 = vector.load %arg20[%c0_189, %c0_190] : memref<1x4xf32, #tpu.memory_space<vmem>>, vector<1x4xf32>
    %277 = vector.broadcast %276 : vector<1x4xf32> to vector<2x4xf32>
    %278 = arith.addf %275, %277 : vector<2x4xf32>
    %279 = arith.negf %278 : vector<2x4xf32>
    %280 = math.exp %279 : vector<2x4xf32>
    %cst_191 = arith.constant 1.000000e+00 : f32
    %281 = vector.broadcast %cst_191 : f32 to vector<2x4xf32>
    %282 = arith.addf %281, %280 : vector<2x4xf32>
    %283 = arith.divf %281, %282 : vector<2x4xf32>
    %284 = arith.mulf %278, %283 : vector<2x4xf32>
    %c0_192 = arith.constant 0 : index
    %c0_193 = arith.constant 0 : index
    %285 = vector.load %arg21[%c0_192, %c0_193] : memref<4x64xf32, #tpu.memory_space<vmem>>, vector<4x64xf32>
    %cst_194 = arith.constant dense<0.000000e+00> : vector<2x64xf32>
    %286 = tpu.matmul %284, %285, %cst_194 {dimension_numbers = #tpu.dot_dimension_numbers<[1], [0], [0], [1], [0, 0, 1, 1], [], []>} : vector<2x4xf32>, vector<4x64xf32>, vector<2x64xf32> -> vector<2x64xf32>
    %c0_195 = arith.constant 0 : index
    %c0_196 = arith.constant 0 : index
    %287 = vector.load %arg22[%c0_195, %c0_196] : memref<1x64xf32, #tpu.memory_space<vmem>>, vector<1x64xf32>
    %288 = vector.broadcast %287 : vector<1x64xf32> to vector<2x64xf32>
    %289 = arith.addf %286, %288 : vector<2x64xf32>
    %290 = arith.negf %289 : vector<2x64xf32>
    %291 = math.exp %290 : vector<2x64xf32>
    %cst_197 = arith.constant 1.000000e+00 : f32
    %292 = vector.broadcast %cst_197 : f32 to vector<2x64xf32>
    %293 = arith.addf %292, %291 : vector<2x64xf32>
    %294 = arith.divf %292, %293 : vector<2x64xf32>
    %295 = vector.shape_cast %294 : vector<2x64xf32> to vector<2x1x1x64xf32>
    %296 = vector.broadcast %295 : vector<2x1x1x64xf32> to vector<2x8x8x64xf32>
    %297 = arith.mulf %270, %296 : vector<2x8x8x64xf32>
    %298 = vector.shape_cast %297 : vector<2x8x8x64xf32> to vector<128x64xf32>
    %299 = arith.truncf %298 : vector<128x64xf32> to vector<128x64xbf16>
    %c0_198 = arith.constant 0 : index
    %c0_199 = arith.constant 0 : index
    %300 = vector.load %arg23[%c0_198, %c0_199] : memref<64x24xbf16, #tpu.memory_space<vmem>>, vector<64x24xbf16>
    %cst_200 = arith.constant dense<0.000000e+00> : vector<128x24xf32>
    %301 = tpu.matmul %299, %300, %cst_200 {dimension_numbers = #tpu.dot_dimension_numbers<[1], [0], [0], [1], [0, 0, 1, 1], [], []>} : vector<128x64xbf16>, vector<64x24xbf16>, vector<128x24xf32> -> vector<128x24xf32>
    %c0_201 = arith.constant 0 : index
    %c0_202 = arith.constant 0 : index
    %302 = vector.load %arg24[%c0_201, %c0_202] : memref<1x24xf32, #tpu.memory_space<vmem>>, vector<1x24xf32>
    %303 = vector.broadcast %302 : vector<1x24xf32> to vector<128x24xf32>
    %304 = arith.addf %301, %303 : vector<128x24xf32>
    %305 = arith.truncf %304 : vector<128x24xf32> to vector<128x24xbf16>
    %c0_203 = arith.constant 0 : index
    %c0_204 = arith.constant 0 : index
    %306 = vector.load %arg25[%c0_203, %c0_204] : memref<24x64xbf16, #tpu.memory_space<vmem>>, vector<24x64xbf16>
    %cst_205 = arith.constant dense<0.000000e+00> : vector<128x64xf32>
    %307 = tpu.matmul %305, %306, %cst_205 {dimension_numbers = #tpu.dot_dimension_numbers<[1], [0], [0], [1], [0, 0, 1, 1], [], []>} : vector<128x24xbf16>, vector<24x64xbf16>, vector<128x64xf32> -> vector<128x64xf32>
    %c0_206 = arith.constant 0 : index
    %c0_207 = arith.constant 0 : index
    %308 = vector.load %arg26[%c0_206, %c0_207] : memref<1x64xf32, #tpu.memory_space<vmem>>, vector<1x64xf32>
    %309 = vector.broadcast %308 : vector<1x64xf32> to vector<128x64xf32>
    %310 = arith.addf %307, %309 : vector<128x64xf32>
    %311 = arith.negf %310 : vector<128x64xf32>
    %312 = math.exp %311 : vector<128x64xf32>
    %cst_208 = arith.constant 1.000000e+00 : f32
    %313 = vector.broadcast %cst_208 : f32 to vector<128x64xf32>
    %314 = arith.addf %313, %312 : vector<128x64xf32>
    %315 = arith.divf %313, %314 : vector<128x64xf32>
    %316 = arith.mulf %310, %315 : vector<128x64xf32>
    %317 = vector.shape_cast %316 : vector<128x64xf32> to vector<2x8x8x64xf32>
    %cst_209 = arith.constant dense<0.000000e+00> : vector<2x64xf32>
    %318 = vector.multi_reduction <add>, %317, %cst_209 [1, 2] : vector<2x8x8x64xf32> to vector<2x64xf32>
    %cst_210 = arith.constant 6.400000e+01 : f32
    %319 = vector.broadcast %cst_210 : f32 to vector<2x64xf32>
    %320 = arith.divf %318, %319 : vector<2x64xf32>
    %321 = arith.truncf %320 : vector<2x64xf32> to vector<2x64xbf16>
    %c0_211 = arith.constant 0 : index
    %c0_212 = arith.constant 0 : index
    %322 = vector.load %arg27[%c0_211, %c0_212] : memref<64x128xbf16, #tpu.memory_space<vmem>>, vector<64x128xbf16>
    %cst_213 = arith.constant dense<0.000000e+00> : vector<2x128xf32>
    %323 = tpu.matmul %321, %322, %cst_213 {dimension_numbers = #tpu.dot_dimension_numbers<[1], [0], [0], [1], [0, 0, 1, 1], [], []>} : vector<2x64xbf16>, vector<64x128xbf16>, vector<2x128xf32> -> vector<2x128xf32>
    %c0_214 = arith.constant 0 : index
    %c0_215 = arith.constant 0 : index
    %324 = vector.load %arg28[%c0_214, %c0_215] : memref<1x128xf32, #tpu.memory_space<vmem>>, vector<1x128xf32>
    %325 = vector.broadcast %324 : vector<1x128xf32> to vector<2x128xf32>
    %326 = arith.addf %323, %325 : vector<2x128xf32>
    %c0_216 = arith.constant 0 : index
    %c0_217 = arith.constant 0 : index
    %327 = vector.load %arg29[%c0_216, %c0_217] : memref<2x128xf32, #tpu.memory_space<vmem>>, vector<2x128xf32>
    tpu.vector_store %arg29[%c0_216, %c0_217], %326 {strides = array<i32>} : memref<2x128xf32, #tpu.memory_space<vmem>>, vector<2x128xf32>,
    return
  }
  func.func @transform_0(%arg0: i32) -> (i32, i32, i32, i32) {
    %c0_i32 = arith.constant 0 : i32
    %c0_i32_0 = arith.constant 0 : i32
    %c0_i32_1 = arith.constant 0 : i32
    %c0_i32_2 = arith.constant 0 : i32
    %c0_i32_3 = arith.constant 0 : i32
    return %c0_i32, %c0_i32_0, %c0_i32_1, %c0_i32_2 : i32, i32, i32, i32
  }
  func.func @transform_1(%arg0: i32) -> (i32, i32, i32, i32) {
    %c0_i32 = arith.constant 0 : i32
    %c0_i32_0 = arith.constant 0 : i32
    %c0_i32_1 = arith.constant 0 : i32
    %c0_i32_2 = arith.constant 0 : i32
    %c0_i32_3 = arith.constant 0 : i32
    return %c0_i32, %c0_i32_0, %c0_i32_1, %c0_i32_2 : i32, i32, i32, i32
  }
  func.func @transform_2(%arg0: i32) -> (i32, i32, i32, i32) {
    %c0_i32 = arith.constant 0 : i32
    %c0_i32_0 = arith.constant 0 : i32
    %c0_i32_1 = arith.constant 0 : i32
    %c0_i32_2 = arith.constant 0 : i32
    %c0_i32_3 = arith.constant 0 : i32
    return %c0_i32, %c0_i32_0, %c0_i32_1, %c0_i32_2 : i32, i32, i32, i32
  }
  func.func @transform_3(%arg0: i32) -> (i32, i32, i32, i32) {
    %c0_i32 = arith.constant 0 : i32
    %c0_i32_0 = arith.constant 0 : i32
    %c0_i32_1 = arith.constant 0 : i32
    %c0_i32_2 = arith.constant 0 : i32
    %c0_i32_3 = arith.constant 0 : i32
    return %c0_i32, %c0_i32_0, %c0_i32_1, %c0_i32_2 : i32, i32, i32, i32
  }
  func.func @transform_4(%arg0: i32) -> (i32, i32) {
    %c0_i32 = arith.constant 0 : i32
    %c0_i32_0 = arith.constant 0 : i32
    %c0_i32_1 = arith.constant 0 : i32
    return %c0_i32, %c0_i32_0 : i32, i32
  }
  func.func @transform_5(%arg0: i32) -> (i32, i32) {
    %c0_i32 = arith.constant 0 : i32
    %c0_i32_0 = arith.constant 0 : i32
    %c0_i32_1 = arith.constant 0 : i32
    return %c0_i32, %c0_i32_0 : i32, i32
  }
  func.func @transform_6(%arg0: i32) -> (i32, i32, i32) {
    %c0_i32 = arith.constant 0 : i32
    %c0_i32_0 = arith.constant 0 : i32
    %c0_i32_1 = arith.constant 0 : i32
    %c0_i32_2 = arith.constant 0 : i32
    return %c0_i32, %c0_i32_0, %c0_i32_1 : i32, i32, i32
  }
  func.func @transform_7(%arg0: i32) -> (i32, i32) {
    %c0_i32 = arith.constant 0 : i32
    %c0_i32_0 = arith.constant 0 : i32
    %c0_i32_1 = arith.constant 0 : i32
    return %c0_i32, %c0_i32_0 : i32, i32
  }
  func.func @transform_8(%arg0: i32) -> (i32, i32) {
    %c0_i32 = arith.constant 0 : i32
    %c0_i32_0 = arith.constant 0 : i32
    %c0_i32_1 = arith.constant 0 : i32
    return %c0_i32, %c0_i32_0 : i32, i32
  }
  func.func @transform_9(%arg0: i32) -> (i32, i32) {
    %c0_i32 = arith.constant 0 : i32
    %c0_i32_0 = arith.constant 0 : i32
    %c0_i32_1 = arith.constant 0 : i32
    return %c0_i32, %c0_i32_0 : i32, i32
  }
  func.func @transform_10(%arg0: i32) -> (i32, i32) {
    %c0_i32 = arith.constant 0 : i32
    %c0_i32_0 = arith.constant 0 : i32
    %c0_i32_1 = arith.constant 0 : i32
    return %c0_i32, %c0_i32_0 : i32, i32
  }
  func.func @transform_11(%arg0: i32) -> (i32, i32) {
    %c0_i32 = arith.constant 0 : i32
    %c0_i32_0 = arith.constant 0 : i32
    %c0_i32_1 = arith.constant 0 : i32
    return %c0_i32, %c0_i32_0 : i32, i32
  }
  func.func @transform_12(%arg0: i32) -> (i32, i32) {
    %c0_i32 = arith.constant 0 : i32
    %c0_i32_0 = arith.constant 0 : i32
    %c0_i32_1 = arith.constant 0 : i32
    return %c0_i32, %c0_i32_0 : i32, i32
  }
  func.func @transform_13(%arg0: i32) -> (i32, i32) {
    %c0_i32 = arith.constant 0 : i32
    %c0_i32_0 = arith.constant 0 : i32
    %c0_i32_1 = arith.constant 0 : i32
    return %c0_i32, %c0_i32_0 : i32, i32
  }
  func.func @transform_14(%arg0: i32) -> (i32, i32) {
    %c0_i32 = arith.constant 0 : i32
    %c0_i32_0 = arith.constant 0 : i32
    %c0_i32_1 = arith.constant 0 : i32
    return %c0_i32, %c0_i32_0 : i32, i32
  }
  func.func @transform_15(%arg0: i32) -> (i32, i32) {
    %c0_i32 = arith.constant 0 : i32
    %c0_i32_0 = arith.constant 0 : i32
    %c0_i32_1 = arith.constant 0 : i32
    return %c0_i32, %c0_i32_0 : i32, i32
  }
  func.func @transform_16(%arg0: i32) -> (i32, i32, i32) {
    %c0_i32 = arith.constant 0 : i32
    %c0_i32_0 = arith.constant 0 : i32
    %c0_i32_1 = arith.constant 0 : i32
    %c0_i32_2 = arith.constant 0 : i32
    return %c0_i32, %c0_i32_0, %c0_i32_1 : i32, i32, i32
  }
  func.func @transform_17(%arg0: i32) -> (i32, i32) {
    %c0_i32 = arith.constant 0 : i32
    %c0_i32_0 = arith.constant 0 : i32
    %c0_i32_1 = arith.constant 0 : i32
    return %c0_i32, %c0_i32_0 : i32, i32
  }
  func.func @transform_18(%arg0: i32) -> (i32, i32) {
    %c0_i32 = arith.constant 0 : i32
    %c0_i32_0 = arith.constant 0 : i32
    %c0_i32_1 = arith.constant 0 : i32
    return %c0_i32, %c0_i32_0 : i32, i32
  }
  func.func @transform_19(%arg0: i32) -> (i32, i32) {
    %c0_i32 = arith.constant 0 : i32
    %c0_i32_0 = arith.constant 0 : i32
    %c0_i32_1 = arith.constant 0 : i32
    return %c0_i32, %c0_i32_0 : i32, i32
  }
  func.func @transform_20(%arg0: i32) -> (i32, i32) {
    %c0_i32 = arith.constant 0 : i32
    %c0_i32_0 = arith.constant 0 : i32
    %c0_i32_1 = arith.constant 0 : i32
    return %c0_i32, %c0_i32_0 : i32, i32
  }
  func.func @transform_21(%arg0: i32) -> (i32, i32) {
    %c0_i32 = arith.constant 0 : i32
    %c0_i32_0 = arith.constant 0 : i32
    %c0_i32_1 = arith.constant 0 : i32
    return %c0_i32, %c0_i32_0 : i32, i32
  }
  func.func @transform_22(%arg0: i32) -> (i32, i32) {
    %c0_i32 = arith.constant 0 : i32
    %c0_i32_0 = arith.constant 0 : i32
    %c0_i32_1 = arith.constant 0 : i32
    return %c0_i32, %c0_i32_0 : i32, i32
  }
  func.func @transform_23(%arg0: i32) -> (i32, i32) {
    %c0_i32 = arith.constant 0 : i32
    %c0_i32_0 = arith.constant 0 : i32
    %c0_i32_1 = arith.constant 0 : i32
    return %c0_i32, %c0_i32_0 : i32, i32
  }
  func.func @transform_24(%arg0: i32) -> (i32, i32) {
    %c0_i32 = arith.constant 0 : i32
    %c0_i32_0 = arith.constant 0 : i32
    %c0_i32_1 = arith.constant 0 : i32
    return %c0_i32, %c0_i32_0 : i32, i32
  }
  func.func @transform_25(%arg0: i32) -> (i32, i32) {
    %c0_i32 = arith.constant 0 : i32
    %c0_i32_0 = arith.constant 0 : i32
    %c0_i32_1 = arith.constant 0 : i32
    return %c0_i32, %c0_i32_0 : i32, i32
  }
  func.func @transform_26(%arg0: i32) -> (i32, i32) {
    %c0_i32 = arith.constant 0 : i32
    %c0_i32_0 = arith.constant 0 : i32
    %c0_i32_1 = arith.constant 0 : i32
    return %c0_i32, %c0_i32_0 : i32, i32
  }
  func.func @transform_27(%arg0: i32) -> (i32, i32) {
    %c0_i32 = arith.constant 0 : i32
    %c0_i32_0 = arith.constant 0 : i32
    %c0_i32_1 = arith.constant 0 : i32
    return %c0_i32, %c0_i32_0 : i32, i32
  }
  func.func @transform_28(%arg0: i32) -> (i32, i32) {
    %c0_i32 = arith.constant 0 : i32
    %c0_i32_0 = arith.constant 0 : i32
    %c0_i32_1 = arith.constant 0 : i32
    return %c0_i32, %c0_i32_0 : i32, i32
  }
}

</mosaic_0001>

<bundles_post_ra>
// kernel: efficientnet_forward.1
= control target key start
LH: loop header
LB: loop body
LE: loop exit
PB: predicated region body
PF: predicated region fallthrough
CT: control target
= control target key end

     0   :  { %s9504_s0 = inlined_call_operand.vmem [shape: f32[2,9,9,3], index: 0, kind: input, shape index: {}]   ;;  %s9505_s1 = inlined_call_operand.vmem [shape: f32[2,9,9,3], index: 1, kind: input, shape index: {}]   ;;  %s9506_s2 = inlined_call_operand.vmem [shape: f32[2,9,9,3], index: 2, kind: input, shape index: {}]   ;;  %s9507_s3 = inlined_call_operand.vmem [shape: f32[2,9,9,3], index: 3, kind: input, shape index: {}]   ;;  %s9508_s4 = inlined_call_operand.vmem [shape: bf16[27,16], index: 4, kind: input, shape index: {}]   ;;  %s9509_s5 = inlined_call_operand.vmem [shape: f32[1,16], index: 5, kind: input, shape index: {}]   ;;  %s9510_s6 = inlined_call_operand.vmem [shape: f32[3,3,16], index: 6, kind: input, shape index: {}]   ;;  %s9511_s7 = inlined_call_operand.vmem [shape: f32[1,16], index: 7, kind: input, shape index: {}]   ;;  %s9512_s8 = inlined_call_operand.vmem [shape: f32[16,4], index: 8, kind: input, shape index: {}]   ;;  %s9513_s9 = inlined_call_operand.vmem [shape: f32[1,4], index: 9, kind: input, shape index: {}]   ;;  %s9514_s10 = inlined_call_operand.vmem [shape: f32[4,16], index: 10, kind: input, shape index: {}]   ;;  %s9515_s11 = inlined_call_operand.vmem [shape: f32[1,16], index: 11, kind: input, shape index: {}]   ;;  %s9516_s12 = inlined_call_operand.vmem [shape: bf16[16,16], index: 12, kind: input, shape index: {}]   ;;  %s9517_s13 = inlined_call_operand.vmem [shape: f32[1,16], index: 13, kind: input, shape index: {}]   ;;  %s9518_s14 = inlined_call_operand.vmem [shape: bf16[16,64], index: 14, kind: input, shape index: {}]   ;;  %s9519_s15 = inlined_call_operand.vmem [shape: f32[1,64], index: 15, kind: input, shape index: {}]   ;;  %s9520_s16 = inlined_call_operand.vmem [shape: f32[3,3,64], index: 16, kind: input, shape index: {}]   ;;  %s9521_s17 = inlined_call_operand.vmem [shape: f32[1,64], index: 17, kind: input, shape index: {}]   ;;  %s9522_s18 = inlined_call_operand.vmem [shape: f32[64,4], index: 18, kind: input, shape index: {}]   ;;  %s9523_s19 = inlined_call_operand.vmem [shape: f32[1,4], index: 19, kind: input, shape index: {}]   ;;  %s9524_s20 = inlined_call_operand.vmem [shape: f32[4,64], index: 20, kind: input, shape index: {}]   ;;  %s9525_s21 = inlined_call_operand.vmem [shape: f32[1,64], index: 21, kind: input, shape index: {}]   ;;  %s9526_s22 = inlined_call_operand.vmem [shape: bf16[64,24], index: 22, kind: input, shape index: {}]   ;;  %s9527_s23 = inlined_call_operand.vmem [shape: f32[1,24], index: 23, kind: input, shape index: {}]   ;;  %s9528_s24 = inlined_call_operand.vmem [shape: bf16[24,64], index: 24, kind: input, shape index: {}]   ;;  %s9529_s25 = inlined_call_operand.vmem [shape: f32[1,64], index: 25, kind: input, shape index: {}]   ;;  %s9530_s26 = inlined_call_operand.vmem [shape: bf16[64,128], index: 26, kind: input, shape index: {}]   ;;  %s9531_s27 = inlined_call_operand.vmem [shape: f32[1,128], index: 27, kind: input, shape index: {}]   ;;  %s9532_s28 = inlined_call_operand.hbm [shape: f32[2,128], index: 28, kind: output, shape index: {}]  }
   0x1   :  { %9568 = sst [smem:[#allocation29_spill]] %s9504_s0 }
   0x2   :  { %9569 = sst [smem:[#allocation30_spill]] %s9505_s1 }
   0x3   :  { %9570 = sst [smem:[#allocation31_spill]] %s9506_s2 }
   0x4   :  { %9571 = sst [smem:[#allocation32_spill]] %s9507_s3 }
   0x5   :  { %9572 = sst [smem:[#allocation33_spill]] %s9508_s4 }
   0x6   :  { %9573 = sst [smem:[#allocation34_spill]] %s9509_s5 }
   0x7   :  { %9574 = sst [smem:[#allocation35_spill]] %s9510_s6 }
   0x8   :  { %9575 = sst [smem:[#allocation36_spill]] %s9511_s7 }
   0x9   :  { %9576 = sst [smem:[#allocation37_spill]] %s9512_s8 }
   0xa   :  { %9577 = sst [smem:[#allocation38_spill]] %s9513_s9 }
   0xb   :  { %9578 = sst [smem:[#allocation39_spill]] %s9514_s10 }
   0xc   :  { %9579 = sst [smem:[#allocation40_spill]] %s9515_s11 }
   0xd   :  { %9580 = sst [smem:[#allocation41_spill]] %s9516_s12 }
   0xe   :  { %s9581_s9 = sld [smem:[#allocation33_spill]]  ;;  %vm177_vm0 = vcmask 1040384   ;;  %vm178_vm1 = vcmask 1041408   ;;  %v5434_v2 = vmov 65535  }
   0xf   :  { %v179_v3 = vsel %vm177_vm0, 4294967295, %v5434_v2  ;;  %s9582_s7 = sld [smem:[#allocation30_spill]] }
  0x10   :  { %v5592_v11 = vsel %vm178_vm1, %v179_v3, 0 }
  0x14   :  { %v140_v0 = vld [vmem:[%s9581_s9] sm:$0x6]  ;;  %v584_v5 = vld [vmem:[%s9581_s9 + $0x4] sm:$0xc]  ;;  %v457_v6 = vld [vmem:[%s9581_s9 + $0x4] sm:$0x3] }
  0x15   :  { %v142_v1 = vunpack.c.l.b16 %v140_v0  ;;  %v586_v7 = vunpack.c.l.b16 %v584_v5  ;;  %v459_v8 = vunpack.c.l.b16 %v457_v6  ;;  %v115_v12 = vld [vmem:[%s9581_s9] sm:$0x3]  ;;  %v5603_v18 = vld [vmem:[%s9582_s7 + $0x10] sm:$0xff]  ;;  %v4757_v29 = vld [vmem:[%s9581_s9] sm:$0x8] }
  0x16   :  { %v116_v17 = vld [vmem:[%s9582_s7] sm:$0xff]  ;;  %v5613_v20 = vld [vmem:[%s9582_s7 + $0x70] sm:$0xff]  ;;  %v258_v26 = vand.u32 %v5592_v11, %v115_v12 }
  0x17   :  { %v143_v4 = vpack.c.b16 %v142_v1, %v142_v1  ;;  %v587_v13 = vpack.c.b16 %v586_v7, %v586_v7  ;;  %v460_v14 = vpack.c.b16 %v459_v8, %v459_v8  ;;  %v5608_v19 = vld [vmem:[%s9582_s7 + $0x60] sm:$0xff]  ;;  %v5618_v21 = vld [vmem:[%s9582_s7 + $0xd0] sm:$0xff]  ;;  %v132_v34 = vpack.c.bf16 %v5603_v18, %v116_v17 }
  0x18   :  { %v5624_v27 = vld [vmem:[%s9582_s7 + $0xe0] sm:$0xff]  ;;  %v135_v35 = vpack.c.bf16 %v5613_v20, %v5608_v19 }
  0x19   :  { %v145_v9 = vshrl.u32 %v143_v4, 16  ;;  %v148_v10 = vshll.u32 %v143_v4, 16  ;;  %v588_v22 = vrot.slane %v587_v13, 2  ;;  %v462_v23 = vshrl.u32 %v460_v14, 16  ;;  %v5034_v30 = vld [vmem:[%s9581_s9] sm:$0x10] }
  0x1a   :  { %v464_v24 = vshll.u32 %v460_v14, 16  ;;  %v4758_v33 = vor.u32 %v5034_v30, %v4757_v29 }
  0x1b   :  { %v147_v15 = vrot.slane %v145_v9, 1  ;;  %v150_v16 = vrot.slane %v148_v10, 2  ;;  %v614_v32 = vand.u32 %v588_v22, %v5592_v11 }
  0x1c   :  { %v466_v28 = vrot.slane %v464_v24, 1 }
  0x1d   :  { %v151_v25 = vor.u32 %v150_v16, %v147_v15 }
  0x1e   :  { %v467_v36 = vor.u32 %v466_v28, %v462_v23 }
  0x1f   :  { %v182_v31 = vand.u32 %v5592_v11, %v151_v25 }
  0x20   :  { %33 = vsyncpa [#allocation5], 0  ;;  %vm152_vm2 = vcmask 23552   ;;  %v138_v37 = vpack.c.bf16 %v5624_v27, %v5618_v21  ;;  %v340_v38 = vrot.slane %v4758_v33, 3  ;;  %v493_v39 = vand.u32 %v467_v36, %v5592_v11  ;;  %s9583_s8 = sld [smem:[#allocation29_spill]]  ;;  %v5663_v53 = vld [vmem:[%s9582_s7 + $0x20] sm:$0xff] }
  0x21   :  { %191 = vmatpush.bf16.msra.mxu0 %v182_v31  ;;  %5047 = vmatpush.bf16.msra.mxu1 %v182_v31  ;;  %v837_v44 = vld [vmem:[%s9581_s9 + $0x8] sm:$0x6]  ;;  %v5669_v57 = vld [vmem:[%s9582_s7 + $0x30] sm:$0xff]  ;;  %v5677_v59 = vld [vmem:[%s9582_s7 + $0xa0] sm:$0xff]  ;;  %s9584_s30 = sld [smem:[#allocation31_spill]]  ;;  %vm9567_vm3 = vcmask 130048  }
  0x22   :  { %5048 = vmatpush.bf16.msra.mxu3 %v182_v31  ;;  %v366_v40 = vand.u32 %v340_v38, %v5592_v11  ;;  %v959_v45 = vld [vmem:[%s9581_s9 + $0x8] sm:$0xc]  ;;  %v839_v46 = vunpack.c.l.b16 %v837_v44  ;;  %v124_v58 = vld [vmem:[%s9582_s7 + $0x90] sm:$0xff]  ;;  %v5687_v61 = vld [vmem:[%s9582_s7 + $0x100] sm:$0xff]  ;;  %v133_v63 = vpack.c.bf16 %v5669_v57, %v5663_v53  ;;  %s9585_s3 = sld [smem:[#allocation32_spill]]  ;;  %vm1522_vm4 = vcmask 123904  }
  0x23   :  { %v961_v47 = vunpack.c.l.b16 %v959_v45  ;;  %v5682_v60 = vld [vmem:[%s9582_s7 + $0xf0] sm:$0xff]  ;;  %v136_v0 = vpack.c.bf16 %v5677_v59, %v124_v58  ;;  %v4785_v3 = vld [vmem:[%s9581_s9 + $0x4] sm:$0x8]  ;;  %v5035_v4 = vld [vmem:[%s9581_s9 + $0x4] sm:$0x10]  ;;  %s9589_s0 = sld [smem:[#allocation34_spill]] }
  0x24   :  { %4739 = vmatmul.msk.bf16.vlgmr.msra.gmra.mxu0 %vm152_vm2, %v132_v34  ;;  %4742 = vmatmul.msk.bf16.vlgmr.msra.gmra.mxu1 %vm152_vm2, %v135_v35  ;;  %v840_v48 = vpack.c.b16 %v839_v46, %v839_v46  ;;  %v139_v2 = vpack.c.bf16 %v5687_v61, %v5682_v60  ;;  %v4786_v6 = vor.u32 %v5035_v4, %v4785_v3  ;;  %v1087_v9 = vld [vmem:[%s9581_s9 + $0xc] sm:$0x3]  ;;  %v5724_v17 = vld [vmem:[%s9582_s7 + $0x40] sm:$0xff]  ;;  %v5729_v22 = vld [vmem:[%s9582_s7 + $0x50] sm:$0xff]  ;;  %s9592_s9 = sld [smem:[#allocation35_spill]] }
  0x25   :  { %267 = vmatpush.bf16.msrb.mxu1 %v258_v26  ;;  %623 = vmatpush.bf16.msrb.mxu0 %v614_v32  ;;  %v962_v49 = vpack.c.b16 %v961_v47, %v961_v47  ;;  %v1113_v13 = vand.u32 %v1087_v9, %v5592_v11  ;;  %v5734_v23 = vld [vmem:[%s9582_s7 + $0xb0] sm:$0xff]  ;;  %v5739_v24 = vld [vmem:[%s9582_s7 + $0xc0] sm:$0xff]  ;;  %v134_v29 = vpack.c.bf16 %v5729_v22, %v5724_v17  ;;  %s9621_s10 = sld [smem:[#allocation37_spill]] }
  0x26   :  { %v309_v41 = vld [vmem:[%s9583_s8 + $0x1] sm:$0xff]  ;;  %v5649_v42 = vld [vmem:[%s9583_s8 + $0x11] sm:$0xff]  ;;  %4745 = vmatmul.msk.bf16.vlgmr.msra.gmra.mxu3 %vm152_vm2, %v138_v37  ;;  %375 = vmatpush.bf16.msra.mxu2 %v366_v40  ;;  %v841_v50 = vrot.slane %v840_v48, 1  ;;  %v713_v10 = vshrl.u32 %v4786_v6, 16  ;;  %v716_v12 = vshll.u32 %v4786_v6, 16  ;;  %v137_v30 = vpack.c.bf16 %v5739_v24, %v5734_v23  ;;  %s9640_s2 = sld [smem:[#allocation36_spill]] }
  0x27   :  { %v325_v43 = vpack.c.bf16 %v5649_v42, %v309_v41  ;;  %502 = vmatpush.bf16.msrb.mxu3 %v493_v39  ;;  %v964_v51 = vshrl.u32 %v962_v49, 16  ;;  %v967_v52 = vshll.u32 %v962_v49, 16  ;;  %v5706_v5 = vld [vmem:[%s9583_s8 + $0x21] sm:$0xff]  ;;  %v5712_v7 = vld [vmem:[%s9583_s8 + $0x31] sm:$0xff]  ;;  %s9726_s5 = sld [smem:[#allocation39_spill]] }
  0x28   :  { %v867_v54 = vand.u32 %v841_v50, %v5592_v11  ;;  %v326_v8 = vpack.c.bf16 %v5712_v7, %v5706_v5  ;;  %v715_v14 = vrot.slane %v713_v10, 3  ;;  %v718_v15 = vrot.slane %v716_v12, 4  ;;  %v433_v26 = vld [vmem:[%s9584_s30] sm:$0xff]  ;;  %v434_v28 = vld [vmem:[%s9584_s30 + $0x10] sm:$0xff]  ;;  %s9728_s11 = sld [smem:[#allocation40_spill]] }
  0x29   :  { %4759 = vmatmul.msk.bf16.vlgmr.msra.gmra.mxu2 %vm152_vm2, %v325_v43  ;;  %v966_v55 = vrot.slane %v964_v51, 2  ;;  %v969_v56 = vrot.slane %v967_v52, 3  ;;  %1122 = vmatpush.bf16.msra.mxu0 %v1113_v13  ;;  %v449_v31 = vpack.c.bf16 %v434_v28, %v433_v26  ;;  %v5762_v32 = vld [vmem:[%s9583_s8 + $0x51] sm:$0xff]  ;;  %v91_v34 = vld [vmem:[%s9583_s8] sm:$0xff] }
  0x2a   :  { %876 = vmatpush.bf16.msrb.mxu2 %v867_v54  ;;  %v719_v16 = vor.u32 %v718_v15, %v715_v14  ;;  %v5774_v35 = vld [vmem:[%s9583_s8 + $0x10] sm:$0xff]  ;;  %v560_v36 = vld [vmem:[%s9585_s3] sm:$0xff] }
  0x2b   :  { %v970_v62 = vor.u32 %v969_v56, %v966_v55  ;;  %v561_v37 = vld [vmem:[%s9585_s3 + $0x10] sm:$0xff]  ;;  %v435_v38 = vld [vmem:[%s9584_s30 + $0x20] sm:$0xff]  ;;  %v107_v40 = vpack.c.bf16 %v5774_v35, %v91_v34 }
  0x2c   :  { %v745_v25 = vand.u32 %v719_v16, %v5592_v11  ;;  %v436_v39 = vld [vmem:[%s9584_s30 + $0x30] sm:$0xff]  ;;  %v576_v41 = vpack.c.bf16 %v561_v37, %v560_v36  ;;  %v5794_v44 = vld [vmem:[%s9583_s8 + $0x61] sm:$0xff] }
  0x2d   :  { %v996_v1 = vand.u32 %v970_v62, %v5592_v11  ;;  %v5757_v11 = vld [vmem:[%s9583_s8 + $0x41] sm:$0xff]  ;;  %v450_v43 = vpack.c.bf16 %v436_v39, %v435_v38  ;;  %v5799_v45 = vld [vmem:[%s9583_s8 + $0x71] sm:$0xff] }
  0x2e   :  { %754 = vmatpush.bf16.msra.mxu1 %v745_v25  ;;  %v327_v33 = vpack.c.bf16 %v5762_v32, %v5757_v11  ;;  %v328_v46 = vpack.c.bf16 %v5799_v45, %v5794_v44  ;;  %v5808_v47 = vld [vmem:[%s9583_s8 + $0x20] sm:$0xff]  ;;  %v5813_v48 = vld [vmem:[%s9583_s8 + $0x30] sm:$0xff] }
  0x2f   :  { %1005 = vmatpush.bf16.msra.mxu3 %v996_v1  ;;  %v562_v49 = vld [vmem:[%s9585_s3 + $0x20] sm:$0xff]  ;;  %v563_v50 = vld [vmem:[%s9585_s3 + $0x30] sm:$0xff]  ;;  %v108_v54 = vpack.c.bf16 %v5813_v48, %v5808_v47 }
  0x30   :  { %v437_v51 = vld [vmem:[%s9584_s30 + $0x40] sm:$0xff]  ;;  %v438_v52 = vld [vmem:[%s9584_s30 + $0x50] sm:$0xff]  ;;  %v577_v55 = vpack.c.bf16 %v563_v50, %v562_v49 }
  0x31   :  { %v451_v56 = vpack.c.bf16 %v438_v52, %v437_v51  ;;  %v317_v58 = vld [vmem:[%s9583_s8 + $0x91] sm:$0xff]  ;;  %v5837_v62 = vld [vmem:[%s9583_s8 + $0xa1] sm:$0xff] }
  0x32   :  { %v5850_v1 = vld [vmem:[%s9583_s8 + $0x50] sm:$0xff]  ;;  %v439_v4 = vld [vmem:[%s9584_s30 + $0x60] sm:$0xff] }
  0x33   :  { %v565_v3 = vld [vmem:[%s9585_s3 + $0x50] sm:$0xff]  ;;  %v5876_v13 = vld [vmem:[%s9583_s8 + $0xc1] sm:$0xff] }
  0x34   :  { %4740 = vmatmul.msk.bf16.gmra.mxu0 %vm152_vm2, %v133_v63  ;;  %4743 = vmatmul.msk.bf16.gmra.mxu1 %vm152_vm2, %v136_v0  ;;  %v329_v63 = vpack.c.bf16 %v5837_v62, %v317_v58  ;;  %v5845_v0 = vld [vmem:[%s9583_s8 + $0x40] sm:$0xff]  ;;  %v440_v6 = vld [vmem:[%s9584_s30 + $0x70] sm:$0xff] }
  0x35   :  { %v452_v10 = vpack.c.bf16 %v440_v6, %v439_v4  ;;  %v5871_v12 = vld [vmem:[%s9583_s8 + $0xb1] sm:$0xff]  ;;  %v5885_v15 = vld [vmem:[%s9583_s8 + $0x60] sm:$0xff] }
  0x36   :  { %4746 = vmatmul.msk.bf16.gmra.mxu3 %vm152_vm2, %v139_v2  ;;  %v564_v2 = vld [vmem:[%s9585_s3 + $0x40] sm:$0xff]  ;;  %v330_v14 = vpack.c.bf16 %v5876_v13, %v5871_v12  ;;  %v5890_v16 = vld [vmem:[%s9583_s8 + $0x70] sm:$0xff] }
  0x37   :  { %v578_v9 = vpack.c.bf16 %v565_v3, %v564_v2  ;;  %v566_v25 = vld [vmem:[%s9585_s3 + $0x60] sm:$0xff]  ;;  %v567_v26 = vld [vmem:[%s9585_s3 + $0x70] sm:$0xff] }
  0x38   :  { %v441_v28 = vld [vmem:[%s9584_s30 + $0x90] sm:$0xff]  ;;  %v5916_v36 = vld [vmem:[%s9583_s8 + $0xe1] sm:$0xff] }
  0x39   :  { %4760 = vmatmul.msk.bf16.gmra.mxu2 %vm152_vm2, %v326_v8  ;;  %v109_v8 = vpack.c.bf16 %v5850_v1, %v5845_v0  ;;  %v5911_v34 = vld [vmem:[%s9583_s8 + $0xd1] sm:$0xff]  ;;  %v5928_v39 = vld [vmem:[%s9583_s8 + $0xa0] sm:$0xff] }
  0x3a   :  { %v331_v37 = vpack.c.bf16 %v5916_v36, %v5911_v34  ;;  %v99_v38 = vld [vmem:[%s9583_s8 + $0x90] sm:$0xff]  ;;  %v5967_v58 = vld [vmem:[%s9583_s8 + $0xc0] sm:$0xff] }
  0x3b   :  { %v111_v49 = vpack.c.bf16 %v5928_v39, %v99_v38  ;;  %v5948_v52 = vld [vmem:[%s9583_s8 + $0xf1] sm:$0xff]  ;;  %v571_v2 = vld [vmem:[%s9585_s3 + $0xc0] sm:$0xff] }
  0x3c   :  { %v445_v3 = vld [vmem:[%s9584_s30 + $0xd0] sm:$0xff]  ;;  %v446_v4 = vld [vmem:[%s9584_s30 + $0xe0] sm:$0xff] }
  0x3d   :  { %v448_v38 = vld [vmem:[%s9584_s30 + $0x100] sm:$0xff] }
  0x44   :  { %4741 = vmatmul.msk.bf16.gmra.mxu0 %vm152_vm2, %v134_v29  ;;  %4744 = vmatmul.msk.bf16.gmra.mxu1 %vm152_vm2, %v137_v30  ;;  %v442_v29 = vld [vmem:[%s9584_s30 + $0xa0] sm:$0xff]  ;;  %v110_v30 = vpack.c.bf16 %v5890_v16, %v5885_v15 }
  0x46   :  { %4767 = vmatmul.msk.bf16.vlgmr.msrb.gmra.mxu3 %vm152_vm2, %v449_v31  ;;  %v579_v31 = vpack.c.bf16 %v567_v26, %v566_v25  ;;  %v829_v25 = vpack.c.bf16 %v5808_v47, %v5774_v35  ;;  %v6005_v35 = vld [vmem:[%s9583_s8 + $0xe0] sm:$0xff]  ;;  %v572_v47 = vld [vmem:[%s9585_s3 + $0xd0] sm:$0xff] }
  0x49   :  { %4761 = vmatmul.msk.bf16.gmra.mxu2 %vm152_vm2, %v327_v33  ;;  %v453_v33 = vpack.c.bf16 %v442_v29, %v441_v28 }
  0x54   :  { %4747 = vmatmul.msk.bf16.vlgmr.msrb.gmra.mxu1 %vm152_vm2, %v107_v40  ;;  %4775 = vmatmul.msk.bf16.vlgmr.msrb.gmra.mxu0 %vm152_vm2, %v576_v41  ;;  %v568_v40 = vld [vmem:[%s9585_s3 + $0x90] sm:$0xff]  ;;  %v569_v41 = vld [vmem:[%s9585_s3 + $0xa0] sm:$0xff] }
  0x55   :  { %v580_v50 = vpack.c.bf16 %v569_v41, %v568_v40 }
  0x56   :  { %4768 = vmatmul.msk.bf16.gmra.mxu3 %vm152_vm2, %v450_v43  ;;  %v443_v43 = vld [vmem:[%s9584_s30 + $0xb0] sm:$0xff] }
  0x59   :  { %4762 = vmatmul.msk.bf16.gmra.mxu2 %vm152_vm2, %v328_v46  ;;  %v444_v46 = vld [vmem:[%s9584_s30 + $0xc0] sm:$0xff] }
  0x5a   :  { %v454_v51 = vpack.c.bf16 %v444_v46, %v443_v43 }
  0x64   :  { %4748 = vmatmul.msk.bf16.gmra.mxu1 %vm152_vm2, %v108_v54  ;;  %4776 = vmatmul.msk.bf16.gmra.mxu0 %vm152_vm2, %v577_v55  ;;  %v5953_v54 = vld [vmem:[%s9583_s8 + $0x101] sm:$0xff] }
  0x65   :  { %v332_v55 = vpack.c.bf16 %v5953_v54, %v5948_v52 }
  0x66   :  { %4769 = vmatmul.msk.bf16.gmra.mxu3 %vm152_vm2, %v451_v56  ;;  %v5962_v56 = vld [vmem:[%s9583_s8 + $0xb0] sm:$0xff] }
  0x67   :  { %v112_v6 = vpack.c.bf16 %v5967_v58, %v5962_v56 }
  0x69   :  { %4763 = vmatmul.msk.bf16.gmra.mxu2 %vm152_vm2, %v329_v63  ;;  %v570_v63 = vld [vmem:[%s9585_s3 + $0xb0] sm:$0xff] }
  0x74   :  { %4749 = vmatmul.msk.bf16.gmra.mxu1 %vm152_vm2, %v109_v8  ;;  %4777 = vmatmul.msk.bf16.gmra.mxu0 %vm152_vm2, %v578_v9  ;;  %v581_v8 = vpack.c.bf16 %v571_v2, %v570_v63 }
  0x76   :  { %4770 = vmatmul.msk.bf16.gmra.mxu3 %vm152_vm2, %v452_v10 }
  0x79   :  { %4764 = vmatmul.msk.bf16.gmra.mxu2 %vm152_vm2, %v330_v14  ;;  %v455_v14 = vpack.c.bf16 %v446_v4, %v445_v3 }
  0x84   :  { %4750 = vmatmul.msk.bf16.gmra.mxu1 %vm152_vm2, %v110_v30  ;;  %4778 = vmatmul.msk.bf16.gmra.mxu0 %vm152_vm2, %v579_v31  ;;  %v6000_v31 = vld [vmem:[%s9583_s8 + $0xd0] sm:$0xff] }
  0x85   :  { %v113_v40 = vpack.c.bf16 %v6005_v35, %v6000_v31 }
  0x86   :  { %4771 = vmatmul.msk.bf16.gmra.mxu3 %vm152_vm2, %v453_v33  ;;  %v573_v33 = vld [vmem:[%s9585_s3 + $0xe0] sm:$0xff] }
  0x87   :  { %v582_v41 = vpack.c.bf16 %v573_v33, %v572_v47 }
  0x89   :  { %4765 = vmatmul.msk.bf16.gmra.mxu2 %vm152_vm2, %v331_v37  ;;  %v447_v37 = vld [vmem:[%s9584_s30 + $0xf0] sm:$0xff] }
  0x94   :  { %4751 = vmatmul.msk.bf16.gmra.mxu1 %vm152_vm2, %v111_v49  ;;  %4779 = vmatmul.msk.bf16.gmra.mxu0 %vm152_vm2, %v580_v50  ;;  %v456_v50 = vpack.c.bf16 %v448_v38, %v447_v37  ;;  %v951_v38 = vpack.c.bf16 %v5663_v53, %v5603_v18  ;;  %v681_v18 = vld [vmem:[%s9584_s30 + $0x1] sm:$0xff]  ;;  %v682_v53 = vld [vmem:[%s9584_s30 + $0x11] sm:$0xff] }
  0x96   :  { %4772 = vmatmul.msk.bf16.gmra.mxu3 %vm152_vm2, %v454_v51 }
  0x99   :  { %4766 = vmatmul.msk.bf16.gmra.mxu2 %vm152_vm2, %v332_v55  ;;  %v830_v55 = vpack.c.bf16 %v5845_v0, %v5813_v48  ;;  %v574_v48 = vld [vmem:[%s9585_s3 + $0xf0] sm:$0xff]  ;;  %v575_v0 = vld [vmem:[%s9585_s3 + $0x100] sm:$0xff] }
  0xa1   :  { %v193_v9 = vpop.f32.mrf.mxu0  ;;  %v5983_v10 = vpop.f32.mrf.mxu1 }
  0xa4   :  { %4752 = vmatmul.msk.bf16.gmra.mxu1 %vm152_vm2, %v112_v6  ;;  %4780 = vmatmul.msk.bf16.gmra.mxu0 %vm152_vm2, %v581_v8  ;;  %v6042_v6 = vld [vmem:[%s9583_s8 + $0xf0] sm:$0xff]  ;;  %v6047_v8 = vld [vmem:[%s9583_s8 + $0x100] sm:$0xff] }
  0xa6   :  { %4773 = vmatmul.msk.bf16.gmra.mxu3 %vm152_vm2, %v455_v14  ;;  %v114_v14 = vpack.c.bf16 %v6047_v8, %v6042_v6 }
  0xa9   :  { %v5990_v26 = vpop.f32.mrf.mxu3  ;;  %4811 = vmatmul.msk.bf16.vlgmr.msrb.gmra.mxu2 %vm152_vm2, %v829_v25  ;;  %v5993_v28 = vpop.f32.mrf.mxu0  ;;  %v583_v25 = vpack.c.bf16 %v575_v0, %v574_v48 }
  0xaa   :  { %v5995_v29 = vpop.f32.mrf.mxu1 }
  0xac   :  { %v377_v30 = vpop.f32.mrf.mxu2 }
  0xb1   :  { %v6021_v43 = vpop.f32.mrf.mxu3  ;;  %v6023_v46 = vpop.f32.mrf.mxu0 }
  0xb2   :  { %9586 = vst [vmem:[#allocation7_spill] sm:$0xff] %v6021_v43  ;;  %v6025_v49 = vpop.f32.mrf.mxu1 }
  0xb4   :  { %v379_v51 = vpop.f32.mrf.mxu2  ;;  %4753 = vmatmul.msk.bf16.gmra.mxu1 %vm152_vm2, %v113_v40  ;;  %4781 = vmatmul.msk.bf16.gmra.mxu0 %vm152_vm2, %v582_v41  ;;  %v831_v41 = vpack.c.bf16 %v5885_v15, %v5850_v1  ;;  %v1079_v1 = vpack.c.bf16 %v5706_v5, %v5649_v42  ;;  %v4802_v42 = vld [vmem:[%s9583_s8 + $0x80] sm:$0xff] }
  0xb6   :  { %4774 = vmatmul.msk.bf16.gmra.mxu3 %vm152_vm2, %v456_v50 }
  0xb9   :  { %v6032_v63 = vpop.f32.mrf.mxu3  ;;  %4812 = vmatmul.msk.bf16.gmra.mxu2 %vm152_vm2, %v830_v55  ;;  %v6035_v2 = vpop.f32.mrf.mxu0 }
  0xba   :  { %v6037_v3 = vpop.f32.mrf.mxu1 }
  0xbc   :  { %v382_v4 = vpop.f32.mrf.mxu2 }
  0xc1   :  { %v6057_v47 = vpop.f32.mrf.mxu3  ;;  %v6059_v33 = vpop.f32.mrf.mxu0 }
  0xc2   :  { %9587 = vst [vmem:[#allocation8_spill] sm:$0xff] %v6057_v47  ;;  %v6061_v37 = vpop.f32.mrf.mxu1 }
  0xc4   :  { %v384_v40 = vpop.f32.mrf.mxu2  ;;  %4754 = vmatmul.msk.bf16.gmra.mxu1 %vm152_vm2, %v114_v14  ;;  %4782 = vmatmul.msk.bf16.gmra.mxu0 %vm152_vm2, %v583_v25  ;;  %v697_v14 = vpack.c.bf16 %v682_v53, %v681_v18  ;;  %v832_v18 = vpack.c.bf16 %v4802_v42, %v5890_v16  ;;  %v684_v16 = vld [vmem:[%s9584_s30 + $0x31] sm:$0xff] }
  0xc6   :  { %4835 = vmatmul.msk.bf16.vlgmr.msra.gmra.mxu3 %vm152_vm2, %v951_v38 }
  0xc9   :  { %v504_v50 = vpop.f32.mrf.mxu3  ;;  %4813 = vmatmul.msk.bf16.gmra.mxu2 %vm152_vm2, %v831_v41  ;;  %v6071_v55 = vpop.f32.mrf.mxu0  ;;  %v952_v41 = vpack.c.bf16 %v5724_v17, %v5669_v57 }
  0xca   :  { %v6073_v48 = vpop.f32.mrf.mxu1 }
  0xcb   :  { %9588 = vst [vmem:[#allocation9_spill] sm:$0xff] %v6073_v48 }
  0xcc   :  { %v6075_v0 = vpop.f32.mrf.mxu2 }
  0xd1   :  { %v506_v15 = vpop.f32.mrf.mxu3  ;;  %v625_v38 = vpop.f32.mrf.mxu0 }
  0xd2   :  { %v269_v25 = vpop.f32.mrf.mxu1 }
  0xd3   :  { %v270_v47 = vadd.f32 %v269_v25, %v193_v9 }
  0xd4   :  { %v6087_v43 = vpop.f32.mrf.mxu2  ;;  %4787 = vmatmul.msk.bf16.vlgmr.msra.gmra.mxu1 %vm152_vm2, %v697_v14  ;;  %4859 = vmatmul.msk.bf16.vlgmr.msra.gmra.mxu0 %vm152_vm2, %v1079_v1  ;;  %v683_v1 = vld [vmem:[%s9584_s30 + $0x21] sm:$0xff] }
  0xd5   :  { %v417_v48 = vadd.f32 %v377_v30, %v270_v47  ;;  %v698_v25 = vpack.c.bf16 %v684_v16, %v683_v1 }
  0xd6   :  { %4836 = vmatmul.msk.bf16.gmra.mxu3 %vm152_vm2, %v952_v41 }
  0xd7   :  { %v544_v5 = vadd.f32 %v504_v50, %v417_v48 }
  0xd9   :  { %v6096_v53 = vadd.f32 %v625_v38, %v544_v5  ;;  %v509_v57 = vpop.f32.mrf.mxu3  ;;  %4814 = vmatmul.msk.bf16.gmra.mxu2 %vm152_vm2, %v832_v18  ;;  %v627_v9 = vpop.f32.mrf.mxu0  ;;  %v1080_v38 = vpack.c.bf16 %v5757_v11, %v5712_v7  ;;  %v833_v7 = vpack.c.bf16 %v5962_v56, %v5928_v39  ;;  %v686_v39 = vld [vmem:[%s9584_s30 + $0x51] sm:$0xff] }
  0xda   :  { %v271_v17 = vpop.f32.mrf.mxu1 }
  0xdb   :  { %v272_v30 = vadd.f32 %v271_v17, %v5993_v28 }
  0xdc   :  { %v6100_v47 = vpop.f32.mrf.mxu2 }
  0xdd   :  { %v418_v14 = vadd.f32 %v379_v51, %v272_v30  ;;  %v953_v51 = vpack.c.bf16 %v5608_v19, %v5729_v22 }
  0xdf   :  { %v545_v50 = vadd.f32 %v506_v15, %v418_v14  ;;  %v685_v14 = vld [vmem:[%s9584_s30 + $0x41] sm:$0xff] }
  0xe0   :  { %v699_v16 = vpack.c.bf16 %v686_v39, %v685_v14  ;;  %v955_v14 = vpack.c.bf16 %v5734_v23, %v5677_v59 }
  0xe1   :  { %v6108_v48 = vadd.f32 %v627_v9, %v545_v50  ;;  %v511_v41 = vpop.f32.mrf.mxu3  ;;  %v630_v42 = vpop.f32.mrf.mxu0 }
  0xe2   :  { %v274_v28 = vpop.f32.mrf.mxu1 }
  0xe3   :  { %v275_v5 = vadd.f32 %v274_v28, %v6023_v46 }
  0xe4   :  { %v6115_v18 = vpop.f32.mrf.mxu2  ;;  %4788 = vmatmul.msk.bf16.gmra.mxu1 %vm152_vm2, %v698_v25  ;;  %4860 = vmatmul.msk.bf16.gmra.mxu0 %vm152_vm2, %v1080_v38 }
  0xe5   :  { %v419_v17 = vadd.f32 %v382_v4, %v275_v5 }
  0xe6   :  { %4837 = vmatmul.msk.bf16.gmra.mxu3 %vm152_vm2, %v953_v51 }
  0xe7   :  { %v546_v15 = vadd.f32 %v509_v57, %v419_v17  ;;  %v4826_v57 = vld [vmem:[%s9582_s7 + $0x80] sm:$0xff] }
  0xe8   :  { %v954_v38 = vpack.c.bf16 %v4826_v57, %v5613_v20 }
  0xe9   :  { %v6122_v11 = vadd.f32 %v630_v42, %v546_v15  ;;  %v514_v9 = vpop.f32.mrf.mxu3  ;;  %4815 = vmatmul.msk.bf16.gmra.mxu2 %vm152_vm2, %v833_v7  ;;  %v632_v22 = vpop.f32.mrf.mxu0  ;;  %v687_v7 = vld [vmem:[%s9584_s30 + $0x61] sm:$0xff] }
  0xea   :  { %v276_v19 = vpop.f32.mrf.mxu1 }
  0xeb   :  { %v277_v46 = vadd.f32 %v276_v19, %v6035_v2  ;;  %v1081_v2 = vpack.c.bf16 %v5794_v44, %v5762_v32  ;;  %v834_v32 = vpack.c.bf16 %v6000_v31, %v5967_v58  ;;  %v688_v58 = vld [vmem:[%s9584_s30 + $0x71] sm:$0xff]  ;;  %v4850_v31 = vld [vmem:[%s9583_s8 + $0x81] sm:$0xff] }
  0xec   :  { %v6126_v4 = vpop.f32.mrf.mxu2 }
  0xed   :  { %v420_v30 = vadd.f32 %v384_v40, %v277_v46 }
  0xef   :  { %v547_v56 = vadd.f32 %v511_v41, %v420_v30 }
  0xf1   :  { %v6137_v1 = vadd.f32 %v632_v22, %v547_v56  ;;  %v516_v40 = vpop.f32.mrf.mxu3  ;;  %v635_v25 = vpop.f32.mrf.mxu0  ;;  %v1082_v22 = vpack.c.bf16 %v4850_v31, %v5799_v45  ;;  %v835_v45 = vpack.c.bf16 %v6042_v6, %v6005_v35 }
  0xf2   :  { %v279_v50 = vpop.f32.mrf.mxu1 }
  0xf3   :  { %v280_v28 = vadd.f32 %v279_v50, %v6059_v33  ;;  %v689_v50 = vld [vmem:[%s9584_s30 + $0x91] sm:$0xff] }
  0xf4   :  { %v6143_v42 = vpop.f32.mrf.mxu2  ;;  %4789 = vmatmul.msk.bf16.gmra.mxu1 %vm152_vm2, %v699_v16  ;;  %4861 = vmatmul.msk.bf16.gmra.mxu0 %vm152_vm2, %v1081_v2 }
  0xf5   :  { %v421_v41 = vadd.f32 %v6075_v0, %v280_v28 }
  0xf6   :  { %4838 = vmatmul.msk.bf16.gmra.mxu3 %vm152_vm2, %v954_v38 }
  0xf7   :  { %v548_v51 = vadd.f32 %v514_v9, %v421_v41  ;;  %v1083_v41 = vpack.c.bf16 %v5871_v12, %v5837_v62  ;;  %v4810_v62 = vld [vmem:[%s9583_s8 + $0x110] sm:$0xff] }
  0xf9   :  { %v6151_v44 = vadd.f32 %v635_v25, %v548_v51  ;;  %v519_v5 = vpop.f32.mrf.mxu3  ;;  %4816 = vmatmul.msk.bf16.gmra.mxu2 %vm152_vm2, %v834_v32  ;;  %v637_v33 = vpop.f32.mrf.mxu0  ;;  %v690_v25 = vld [vmem:[%s9584_s30 + $0xa1] sm:$0xff]  ;;  %v956_v32 = vpack.c.bf16 %v5618_v21, %v5739_v24 }
  0xfa   :  { %v281_v20 = vpop.f32.mrf.mxu1  ;;  %v701_v28 = vpack.c.bf16 %v690_v25, %v689_v50 }
  0xfb   :  { %v282_v17 = vadd.f32 %v281_v20, %v6071_v55  ;;  %v700_v55 = vpack.c.bf16 %v688_v58, %v687_v7  ;;  %v692_v7 = vld [vmem:[%s9584_s30 + $0xc1] sm:$0xff]  ;;  %v1084_v58 = vpack.c.bf16 %v5911_v34, %v5876_v13 }
  0xfc   :  { %v6155_v0 = vpop.f32.mrf.mxu2 }
  0xfd   :  { %v422_v15 = vadd.f32 %v6087_v43, %v282_v17 }
  0xff   :  { %v549_v9 = vadd.f32 %v516_v40, %v422_v15  ;;  %v691_v15 = vld [vmem:[%s9584_s30 + $0xb1] sm:$0xff] }
 0x101   :  { %v6167_v19 = vadd.f32 %v637_v33, %v549_v9  ;;  %v521_v46 = vpop.f32.mrf.mxu3  ;;  %v640_v30 = vpop.f32.mrf.mxu0  ;;  %v836_v33 = vpack.c.bf16 %v4810_v62, %v6047_v8  ;;  %v702_v8 = vpack.c.bf16 %v692_v7, %v691_v15 }
 0x102   :  { %v284_v43 = vpop.f32.mrf.mxu1 }
 0x103   :  { %v285_v39 = vadd.f32 %v284_v43, %v5983_v10 }
 0x104   :  { %4790 = vmatmul.msk.bf16.gmra.mxu1 %vm152_vm2, %v700_v55  ;;  %4862 = vmatmul.msk.bf16.gmra.mxu0 %vm152_vm2, %v1082_v22  ;;  %v6176_v57 = vpop.f32.mrf.mxu2  ;;  %v957_v22 = vpack.c.bf16 %v5682_v60, %v5624_v27  ;;  %v693_v60 = vld [vmem:[%s9584_s30 + $0xd1] sm:$0xff] }
 0x105   :  { %v423_v56 = vadd.f32 %v6100_v47, %v285_v39 }
 0x106   :  { %4839 = vmatmul.msk.bf16.gmra.mxu3 %vm152_vm2, %v955_v14 }
 0x107   :  { %v550_v16 = vadd.f32 %v519_v5, %v423_v56 }
 0x109   :  { %v6181_v2 = vadd.f32 %v640_v30, %v550_v16  ;;  %v524_v40 = vpop.f32.mrf.mxu3  ;;  %4817 = vmatmul.msk.bf16.gmra.mxu2 %vm152_vm2, %v835_v45  ;;  %v642_v23 = vpop.f32.mrf.mxu0  ;;  %v1085_v45 = vpack.c.bf16 %v5948_v52, %v5916_v36 }
 0x10a   :  { %v286_v59 = vpop.f32.mrf.mxu1 }
 0x10b   :  { %v287_v10 = vadd.f32 %v286_v59, %v5995_v29 }
 0x10c   :  { %v407_v6 = vpop.f32.mrf.mxu2 }
 0x10d   :  { %v424_v47 = vadd.f32 %v6115_v18, %v287_v10 }
 0x10f   :  { %v551_v35 = vadd.f32 %v521_v46, %v424_v47 }
 0x111   :  { %v6192_v38 = vadd.f32 %v642_v23, %v551_v35  ;;  %v6196_v51 = vpop.f32.mrf.mxu3  ;;  %v645_v18 = vpop.f32.mrf.mxu0 }
 0x112   :  { %v289_v29 = vpop.f32.mrf.mxu1 }
 0x113   :  { %v290_v5 = vadd.f32 %v289_v29, %v6025_v49 }
 0x114   :  { %4791 = vmatmul.msk.bf16.gmra.mxu1 %vm152_vm2, %v701_v28  ;;  %4863 = vmatmul.msk.bf16.gmra.mxu0 %vm152_vm2, %v1083_v41  ;;  %v6211_v24 = vpop.f32.mrf.mxu2 }
 0x115   :  { %v425_v20 = vadd.f32 %v6126_v4, %v290_v5 }
 0x116   :  { %4840 = vmatmul.msk.bf16.gmra.mxu3 %vm152_vm2, %v956_v32 }
 0x117   :  { %v552_v12 = vadd.f32 %v524_v40, %v425_v20 }
 0x119   :  { %v6209_v17 = vadd.f32 %v645_v18, %v552_v12  ;;  %v529_v21 = vpop.f32.mrf.mxu3  ;;  %4818 = vmatmul.msk.bf16.gmra.mxu2 %vm152_vm2, %v836_v33  ;;  %v6216_v4 = vpop.f32.mrf.mxu0 }
 0x11a   :  { %v6214_v49 = vpop.f32.mrf.mxu1 }
 0x11c   :  { %v412_v43 = vpop.f32.mrf.mxu2 }
 0x121   :  { %v6226_v31 = vpop.f32.mrf.mxu3  ;;  %v650_v55 = vpop.f32.mrf.mxu0 }
 0x122   :  { %v294_v9 = vpop.f32.mrf.mxu1 }
 0x123   :  { %v295_v46 = vadd.f32 %v294_v9, %v6061_v37  ;;  %v694_v37 = vld [vmem:[%s9584_s30 + $0xe1] sm:$0xff] }
 0x124   :  { %4792 = vmatmul.msk.bf16.gmra.mxu1 %vm152_vm2, %v702_v8  ;;  %4864 = vmatmul.msk.bf16.gmra.mxu0 %vm152_vm2, %v1084_v58  ;;  %v6241_v27 = vpop.f32.mrf.mxu2  ;;  %v703_v16 = vpack.c.bf16 %v694_v37, %v693_v60 }
 0x125   :  { %v427_v30 = vadd.f32 %v6155_v0, %v295_v46  ;;  %v4834_v0 = vld [vmem:[%s9582_s7 + $0x110] sm:$0xff]  ;;  %s9725_s7 = sld [smem:[#allocation38_spill]] }
 0x126   :  { %4841 = vmatmul.msk.bf16.gmra.mxu3 %vm152_vm2, %v957_v22  ;;  %v958_v10 = vpack.c.bf16 %v4834_v0, %v5687_v61  ;;  %v695_v61 = vld [vmem:[%s9584_s30 + $0xf1] sm:$0xff] }
 0x127   :  { %v554_v14 = vadd.f32 %v529_v21, %v427_v30 }
 0x129   :  { %v6235_v13 = vadd.f32 %v650_v55, %v554_v14  ;;  %v534_v34 = vpop.f32.mrf.mxu3  ;;  %v6239_v56 = vpop.f32.mrf.mxu0  ;;  %v6292_v14 = vld [vmem:[%s9589_s0] ss:$0 sm:$0xff] }
 0x12a   :  { %v6237_v39 = vpop.f32.mrf.mxu1 }
 0x12c   :  { %v878_v35 = vpop.f32.mrf.mxu2 }
 0x131   :  { %v6254_v40 = vpop.f32.mrf.mxu3  ;;  %v655_v23 = vpop.f32.mrf.mxu0 }
 0x132   :  { %v299_v59 = vpop.f32.mrf.mxu1 }
 0x133   :  { %v300_v47 = vadd.f32 %v299_v59, %v5990_v26  ;;  %v696_v26 = vld [vmem:[%s9584_s30 + $0x101] sm:$0xff] }
 0x134   :  { %4793 = vmatmul.msk.bf16.gmra.mxu1 %vm152_vm2, %v703_v16  ;;  %4865 = vmatmul.msk.bf16.gmra.mxu0 %vm152_vm2, %v1085_v45  ;;  %v704_v29 = vpack.c.bf16 %v696_v26, %v695_v61  ;;  %v880_v5 = vpop.f32.mrf.mxu2 }
 0x135   :  { %v429_v50 = vadd.f32 %v407_v6, %v300_v47  ;;  %v4858_v6 = vld [vmem:[%s9583_s8 + $0x111] sm:$0xff]  ;;  %s9727_s8 = sld [smem:[#allocation41_spill]] }
 0x136   :  { %4842 = vmatmul.msk.bf16.gmra.mxu3 %vm152_vm2, %v958_v10  ;;  %v1086_v18 = vpack.c.bf16 %v4858_v6, %v5953_v54 }
 0x137   :  { %v556_v25 = vadd.f32 %v534_v34, %v429_v50  ;;  %v9541_v34 = vmov 0.0  }
 0x138   :  { %1521 = vst.msk [vmem:[#allocation2] sm:$0xff] %vm9567_vm3, %v9541_v34 }
 0x139   :  { %v6261_v28 = vadd.f32 %v655_v23, %v556_v25  ;;  %v539_v36 = vpop.f32.mrf.mxu3  ;;  %v6265_v41 = vpop.f32.mrf.mxu0  ;;  %1523 = vst.msk [vmem:[#allocation2 + $0x8] sm:$0x3] %vm1522_vm4, %v9541_v34 }
 0x13a   :  { %v6263_v52 = vpop.f32.mrf.mxu1  ;;  %1524 = vst.msk [vmem:[#allocation2 + $0x10] sm:$0xff] %vm9567_vm3, %v9541_v34 }
 0x13b   :  { %1525 = vst.msk [vmem:[#allocation2 + $0x18] sm:$0x3] %vm1522_vm4, %v9541_v34 }
 0x13c   :  { %v883_v54 = vpop.f32.mrf.mxu2  ;;  %1526 = vst.msk [vmem:[#allocation2 + $0x20] sm:$0xff] %vm9567_vm3, %v9541_v34 }
 0x13d   :  { %1527 = vst.msk [vmem:[#allocation2 + $0x28] sm:$0x3] %vm1522_vm4, %v9541_v34 }
 0x13e   :  { %1528 = vst.msk [vmem:[#allocation2 + $0x30] sm:$0xff] %vm9567_vm3, %v9541_v34 }
 0x13f   :  { %1529 = vst.msk [vmem:[#allocation2 + $0x38] sm:$0x3] %vm1522_vm4, %v9541_v34 }
 0x140   :  { %1530 = vst.msk [vmem:[#allocation2 + $0x40] sm:$0xff] %vm9567_vm3, %v9541_v34 }
 0x141   :  { %v6277_v32 = vpop.f32.mrf.mxu3  ;;  %v660_v62 = vpop.f32.mrf.mxu0  ;;  %1531 = vst.msk [vmem:[#allocation2 + $0x48] sm:$0x3] %vm1522_vm4, %v9541_v34 }
 0x142   :  { %v304_v20 = vpop.f32.mrf.mxu1  ;;  %1532 = vst.msk [vmem:[#allocation2 + $0x50] sm:$0xff] %vm9567_vm3, %v9541_v34 }
 0x143   :  { %v305_v12 = vadd.f32 %v304_v20, %v6032_v63  ;;  %1533 = vst.msk [vmem:[#allocation2 + $0x58] sm:$0x3] %vm1522_vm4, %v9541_v34 }
 0x144   :  { %4794 = vmatmul.msk.bf16.gmra.mxu1 %vm152_vm2, %v704_v29  ;;  %4866 = vmatmul.msk.bf16.gmra.mxu0 %vm152_vm2, %v1086_v18  ;;  %1534 = vst.msk [vmem:[#allocation2 + $0x60] sm:$0xff] %vm9567_vm3, %v9541_v34 }
 0x145   :  { %v431_v33 = vadd.f32 %v412_v43, %v305_v12  ;;  %v885_v43 = vpop.f32.mrf.mxu2  ;;  %1535 = vst.msk [vmem:[#allocation2 + $0x68] sm:$0x3] %vm1522_vm4, %v9541_v34 }
 0x146   :  { %1536 = vst.msk [vmem:[#allocation2 + $0x70] sm:$0xff] %vm9567_vm3, %v9541_v34 }
 0x147   :  { %v558_v21 = vadd.f32 %v539_v36, %v431_v33  ;;  %1537 = vst.msk [vmem:[#allocation2 + $0x78] sm:$0x3] %vm1522_vm4, %v9541_v34 }
 0x148   :  { %1538 = vst.msk [vmem:[#allocation2 + $0x80] sm:$0xff] %vm9567_vm3, %v9541_v34 }
 0x149   :  { %v6282_v15 = vadd.f32 %v660_v62, %v558_v21  ;;  %v1007_v7 = vpop.f32.mrf.mxu3  ;;  %v6286_v58 = vpop.f32.mrf.mxu0  ;;  %1539 = vst.msk [vmem:[#allocation2 + $0x88] sm:$0x3] %vm1522_vm4, %v9541_v34 }
 0x14a   :  { %v6284_v8 = vpop.f32.mrf.mxu1  ;;  %1540 = vst.msk [vmem:[#allocation2 + $0x90] sm:$0xff] %vm9567_vm3, %v9541_v34 }
 0x14b   :  { %1541 = vst.msk [vmem:[#allocation2 + $0x98] sm:$0x3] %vm1522_vm4, %v9541_v34 }
 0x14c   :  { %1542 = vst.msk [vmem:[#allocation2 + $0xa0] sm:$0xff] %vm9567_vm3, %v9541_v34 }
 0x14d   :  { %v6317_v47 = vpop.f32.mrf.mxu2  ;;  %1543 = vst.msk [vmem:[#allocation2 + $0xa8] sm:$0x3] %vm1522_vm4, %v9541_v34 }
 0x14e   :  { %1544 = vst.msk [vmem:[#allocation2 + $0xb0] sm:$0xff] %vm9567_vm3, %v9541_v34 }
 0x14f   :  { %1545 = vst.msk [vmem:[#allocation2 + $0xb8] sm:$0x3] %vm1522_vm4, %v9541_v34 }
 0x150   :  { %1546 = vst.msk [vmem:[#allocation2 + $0xc0] sm:$0xff] %vm9567_vm3, %v9541_v34 }
 0x151   :  { %v1009_v9 = vpop.f32.mrf.mxu3  ;;  %v1124_v22 = vpop.f32.mrf.mxu0  ;;  %1547 = vst.msk [vmem:[#allocation2 + $0xc8] sm:$0x3] %vm1522_vm4, %v9541_v34 }
 0x152   :  { %v756_v55 = vpop.f32.mrf.mxu1  ;;  %1548 = vst.msk [vmem:[#allocation2 + $0xd0] sm:$0xff] %vm9567_vm3, %v9541_v34 }
 0x153   :  { %v796_v46 = vadd.f32 %v756_v55, %v6096_v53  ;;  %1549 = vst.msk [vmem:[#allocation2 + $0xd8] sm:$0x3] %vm1522_vm4, %v9541_v34 }
 0x154   :  { %1550 = vst.msk [vmem:[#allocation2 + $0xe0] sm:$0xff] %vm9567_vm3, %v9541_v34 }
 0x155   :  { %v918_v63 = vadd.f32 %v878_v35, %v796_v46  ;;  %v6344_v62 = vpop.f32.mrf.mxu2  ;;  %1551 = vst.msk [vmem:[#allocation2 + $0xe8] sm:$0x3] %vm1522_vm4, %v9541_v34 }
 0x156   :  { %1552 = vst.msk [vmem:[#allocation2 + $0xf0] sm:$0xff] %vm9567_vm3, %v9541_v34 }
 0x157   :  { %v1047_v30 = vadd.f32 %v1007_v7, %v918_v63  ;;  %1553 = vst.msk [vmem:[#allocation2 + $0xf8] sm:$0x3] %vm1522_vm4, %v9541_v34 }
 0x158   :  { %1554 = vst.msk [vmem:[#allocation2 + $0x100] sm:$0xff] %vm9567_vm3, %v9541_v34 }
 0x159   :  { %v1164_v60 = vadd.f32 %v1124_v22, %v1047_v30  ;;  %v1012_v53 = vpop.f32.mrf.mxu3  ;;  %v1126_v0 = vpop.f32.mrf.mxu0  ;;  %1555 = vst.msk [vmem:[#allocation2 + $0x108] sm:$0x3] %vm1522_vm4, %v9541_v34 }
 0x15a   :  { %v758_v37 = vpop.f32.mrf.mxu1  ;;  %1556 = vst.msk [vmem:[#allocation2 + $0x110] sm:$0xff] %vm9567_vm3, %v9541_v34 }
 0x15b   :  { %v6303_v16 = vadd.f32 %v6292_v14, %v1164_v60  ;;  %v797_v45 = vadd.f32 %v758_v37, %v6108_v48  ;;  %1557 = vst.msk [vmem:[#allocation2 + $0x118] sm:$0x3] %vm1522_vm4, %v9541_v34 }
 0x15c   :  { %1558 = vst.msk [vmem:[#allocation2 + $0x120] sm:$0xff] %vm9567_vm3, %v9541_v34 }
 0x15d   :  { %v4867_v59 = vmul.f32 -1.442695, %v6303_v16  ;;  %v919_v23 = vadd.f32 %v880_v5, %v797_v45  ;;  %1559 = vst.msk [vmem:[#allocation2 + $0x128] sm:$0x3] %vm1522_vm4, %v9541_v34 }
 0x15e   :  { %1560 = vst.msk [vmem:[#allocation2 + $0x130] sm:$0xff] %vm9567_vm3, %v9541_v34 }
 0x15f   :  { %5065 = vpow2.f32 %v4867_v59  ;;  %v1048_v10 = vadd.f32 %v1009_v9, %v919_v23  ;;  %1561 = vst.msk [vmem:[#allocation2 + $0x138] sm:$0x3] %vm1522_vm4, %v9541_v34 }
 0x161   :  { %v1165_v48 = vadd.f32 %v1126_v0, %v1048_v10  ;;  %v1014_v50 = vpop.f32.mrf.mxu3  ;;  %v1129_v35 = vpop.f32.mrf.mxu0 }
 0x162   :  { %v761_v25 = vpop.f32.mrf.mxu1 }
 0x163   :  { %v6328_v36 = vadd.f32 %v6292_v14, %v1165_v48  ;;  %v798_v61 = vadd.f32 %v761_v25, %v6122_v11  ;;  %v6380_v48 = vpop.f32.mrf.mxu2 }
 0x165   :  { %v5066_v26 = vpop.eup %5065  ;;  %v4868_v6 = vmul.f32 -1.442695, %v6328_v36  ;;  %v920_v29 = vadd.f32 %v883_v54, %v798_v61 }
 0x166   :  { %v1248_v18 = vadd.f32 1.0, %v5066_v26 }
 0x167   :  { %5067 = vpow2.f32 %v4868_v6  ;;  %v1049_v5 = vadd.f32 %v1012_v53, %v920_v29 }
 0x168   :  { %5069 = vrcp.f32 %v1248_v18  ;;  %v1273_v53 = vand.u32 2147483647, %v1248_v18  ;;  %v1275_v37 = vand.u32 2147483648, %v1248_v18  ;;  %vm1269_vm6 = vweird.f32 %v1248_v18 }
 0x169   :  { %v1166_v11 = vadd.f32 %v1129_v35, %v1049_v5  ;;  %v1017_v20 = vpop.f32.mrf.mxu3  ;;  %v1131_v33 = vpop.f32.mrf.mxu0  ;;  %v292_v5 = vadd.f32 %v6214_v49, %v6037_v3 }
 0x16a   :  { %v763_v12 = vpop.f32.mrf.mxu1  ;;  %v1276_v6 = vor.u32 1.1754944e-38, %v1275_v37  ;;  %vm1274_vm8 = vcmp.eq.f32.partialorder %v1273_v53, 8.507059e+37 }
 0x16b   :  { %v6351_v21 = vadd.f32 %v6292_v14, %v1166_v11  ;;  %v799_v7 = vadd.f32 %v763_v12, %v6137_v1 }
 0x16d   :  { %v5068_v54 = vpop.eup %5067  ;;  %v4869_v9 = vmul.f32 -1.442695, %v6351_v21  ;;  %v921_v55 = vadd.f32 %v885_v43, %v799_v7 }
 0x16e   :  { %v5070_v22 = vpop.eup %5069  ;;  %v6361_v46 = vadd.f32 1.0, %v5068_v54 }
 0x16f   :  { %v1265_v63 = vmul.f32 %v5070_v22, %v1248_v18  ;;  %5071 = vpow2.f32 %v4869_v9  ;;  %v1050_v1 = vadd.f32 %v1014_v50, %v921_v55  ;;  %vm1270_vm5 = vweird.f32 %v5070_v22 }
 0x170   :  { %5073 = vrcp.f32 %v6361_v46  ;;  %vm1271_vm7 = vmor %vm1269_vm6, %vm1270_vm5  ;;  %v1288_v3 = vand.u32 2147483647, %v6361_v46  ;;  %v1290_v49 = vand.u32 2147483648, %v6361_v46  ;;  %vm1284_vm10 = vweird.f32 %v6361_v46 }
 0x171   :  { %v1266_v30 = vsub.f32 1.0, %v1265_v63  ;;  %v1167_v43 = vadd.f32 %v1131_v33, %v1050_v1  ;;  %v6370_v60 = vpop.f32.mrf.mxu3  ;;  %v1134_v45 = vpop.f32.mrf.mxu0  ;;  %v9591_v1 = vld [vmem:[#allocation9_spill] sm:$0xff] }
 0x172   :  { %v766_v0 = vpop.f32.mrf.mxu1  ;;  %vm1289_vm12 = vcmp.eq.f32.partialorder %v1288_v3, 8.507059e+37 }
 0x173   :  { %v1267_v59 = vmul.f32 %v5070_v22, %v1266_v30  ;;  %v6377_v23 = vadd.f32 %v6292_v14, %v1167_v43  ;;  %v800_v10 = vadd.f32 %v766_v0, %v6151_v44  ;;  %v297_v30 = vadd.f32 %v6237_v39, %v9591_v1  ;;  %v1579_v43 = vld [vmem:[%s9592_s9] sm:$0x7] }
 0x174   :  { %v9593_v0 = vld [vmem:[#allocation7_spill] sm:$0xff]  ;;  %v1291_v39 = vor.u32 1.1754944e-38, %v1290_v49  ;;  %v9595_v49 = vld [vmem:[#allocation8_spill] sm:$0xff] }
 0x175   :  { %v5072_v50 = vpop.eup %5071  ;;  %v1268_v25 = vadd.f32 %v5070_v22, %v1267_v59  ;;  %v4870_v35 = vmul.f32 -1.442695, %v6377_v23  ;;  %v922_v61 = vadd.f32 %v6317_v47, %v800_v10 }
 0x176   :  { %v5074_v26 = vpop.eup %5073  ;;  %v6390_v44 = vadd.f32 1.0, %v5072_v50 }
 0x177   :  { %v1272_v29 = vsel %vm1271_vm7, %v5070_v22, %v1268_v25  ;;  %v1280_v18 = vmul.f32 %v5074_v26, %v6361_v46  ;;  %5075 = vpow2.f32 %v4870_v35  ;;  %v1051_v33 = vadd.f32 %v1017_v20, %v922_v61 }
 0x178   :  { %v1277_v47 = vsel %vm1274_vm8, %v1276_v6, %v1272_v29  ;;  %5077 = vrcp.f32 %v6390_v44  ;;  %vm1285_vm9 = vweird.f32 %v5074_v26  ;;  %v426_v20 = vadd.f32 %v6143_v42, %v292_v5  ;;  %v6428_v42 = vpop.f32.mrf.mxu2  ;;  %v1582_v5 = vld [vmem:[#allocation2] sm:$0xff] }
 0x179   :  { %v6401_v11 = vmul.f32 %v1277_v47, %v6303_v16  ;;  %v1281_v12 = vsub.f32 1.0, %v1280_v18  ;;  %v6405_v7 = vpop.f32.mrf.mxu3  ;;  %v1136_v9 = vpop.f32.mrf.mxu0  ;;  %v1168_v55 = vadd.f32 %v1134_v45, %v1051_v33  ;;  %v302_v45 = vadd.f32 %v6263_v52, %v9593_v0  ;;  %vm1286_vm11 = vmor %vm1284_vm10, %vm1285_vm9  ;;  %v1631_v47 = vld [vmem:[#allocation2 + $0x1] sm:$0xff] }
 0x17a   :  { %v768_v54 = vpop.f32.mrf.mxu1  ;;  %v553_v52 = vadd.f32 %v6196_v51, %v426_v20  ;;  %v6443_v35 = vperm.slane %v1579_v43, 0  ;;  %v6446_v6 = vperm.slane %v1579_v43, 1  ;;  %v428_v18 = vadd.f32 %v6176_v57, %v297_v30  ;;  %v1680_v20 = vld [vmem:[#allocation2 + $0x2] sm:$0xff] }
 0x17b   :  { %9590 = vst [vmem:[#allocation10_spill] sm:$0xff] %v6401_v11  ;;  %v1282_v16 = vmul.f32 %v5074_v26, %v1281_v12  ;;  %v801_v22 = vadd.f32 %v768_v54, %v6167_v19  ;;  %v6426_v19 = vadd.f32 %v6292_v14, %v1168_v55  ;;  %v430_v3 = vadd.f32 %v6211_v24, %v302_v45  ;;  %v1580_v45 = vld [vmem:[%s9592_s9 + $0x4] sm:$0x7] }
 0x17c   :  { %1563 = vst.msk [vmem:[#allocation2 + $0x11] sm:$0xff] %vm9567_vm3, %v6401_v11  ;;  %v307_v54 = vadd.f32 %v6284_v8, %v9595_v49  ;;  %v1303_v55 = vand.u32 2147483647, %v6390_v44  ;;  %v1648_v24 = vmul.f32 %v6446_v6, %v1631_v47  ;;  %v555_v1 = vadd.f32 %v6226_v31, %v428_v18 }
 0x17d   :  { %v5076_v63 = vpop.eup %5075  ;;  %v1283_v53 = vadd.f32 %v5074_v26, %v1282_v16  ;;  %v923_v10 = vadd.f32 %v6344_v62, %v801_v22  ;;  %v4871_v25 = vmul.f32 -1.442695, %v6426_v19  ;;  %v6463_v16 = vperm.slane %v1579_v43, 2 }
 0x17e   :  { %v5078_v37 = vpop.eup %5077  ;;  %v6435_v59 = vadd.f32 1.0, %v5076_v63  ;;  %v1599_v22 = vmul.f32 %v6443_v35, %v1582_v5  ;;  %vm1299_vm14 = vweird.f32 %v6390_v44  ;;  %v557_v0 = vadd.f32 %v6254_v40, %v430_v3 }
 0x17f   :  { %v1287_v46 = vsel %vm1286_vm11, %v5074_v26, %v1283_v53  ;;  %v1295_v50 = vmul.f32 %v5078_v37, %v6390_v44  ;;  %v1052_v51 = vadd.f32 %v6370_v60, %v923_v10  ;;  %vm1300_vm13 = vweird.f32 %v5078_v37 }
 0x180   :  { %v1292_v61 = vsel %vm1289_vm12, %v1291_v39, %v1287_v46  ;;  %5079 = vrcp.f32 %v6435_v59  ;;  %v6467_v60 = vadd.f32 %v6216_v4, %v553_v52  ;;  %v432_v4 = vadd.f32 %v6241_v27, %v307_v54  ;;  %vm1301_vm15 = vmor %vm1299_vm14, %vm1300_vm13  ;;  %v6484_v39 = vpop.f32.mrf.mxu2 }
 0x181   :  { %v6449_v62 = vmul.f32 %v1292_v61, %v6328_v36  ;;  %v1296_v29 = vsub.f32 1.0, %v1295_v50  ;;  %5081 = vpow2.f32 %v4871_v25  ;;  %v6451_v26 = vpop.f32.mrf.mxu3  ;;  %v6455_v33 = vpop.f32.mrf.mxu0  ;;  %v1305_v36 = vand.u32 2147483648, %v6390_v44 }
 0x182   :  { %v771_v12 = vpop.f32.mrf.mxu1  ;;  %v1169_v8 = vadd.f32 %v1136_v9, %v1052_v51  ;;  %v1697_v44 = vmul.f32 %v6463_v16, %v1680_v20  ;;  %vm1304_vm0 = vcmp.eq.f32.partialorder %v1303_v55, 8.507059e+37  ;;  %v1664_v46 = vadd.f32 %v1648_v24, %v1599_v22 }
 0x183   :  { %9594 = vst [vmem:[#allocation9_spill] sm:$0xff] %v6449_v62  ;;  %v1297_v57 = vmul.f32 %v5078_v37, %v1296_v29  ;;  %v802_v43 = vadd.f32 %v771_v12, %v6181_v2  ;;  %v1306_v9 = vor.u32 1.1754944e-38, %v1305_v36  ;;  %v1583_v40 = vld [vmem:[#allocation2 + $0x10] sm:$0xff]  ;;  %v6492_v61 = vperm.slane %v1580_v45, 0 }
 0x184   :  { %1564 = vst.msk [vmem:[#allocation2 + $0x21] sm:$0xff] %vm9567_vm3, %v6449_v62  ;;  %v1632_v27 = vld [vmem:[#allocation2 + $0x11] sm:$0xff]  ;;  %v6490_v52 = vadd.f32 %v6292_v14, %v1169_v8  ;;  %v6502_v47 = vadd.f32 %v6239_v56, %v555_v1  ;;  %v6505_v51 = vadd.f32 %v6265_v41, %v557_v0  ;;  %v1318_v12 = vand.u32 2147483647, %v6435_v59 }
 0x185   :  { %v1298_v30 = vadd.f32 %v5078_v37, %v1297_v57  ;;  %v1320_v3 = vand.u32 2147483648, %v6435_v59  ;;  %v1649_v54 = vmul.f32 %v6446_v6, %v1632_v27  ;;  %v559_v56 = vadd.f32 %v6277_v32, %v432_v4  ;;  %v6524_v20 = vld [vmem:[#allocation2 + $0x12] sm:$0xff] }
 0x186   :  { %v6471_v63 = vpop.eup %5079  ;;  %v1713_v41 = vadd.f32 %v1697_v44, %v1664_v46  ;;  %vm1314_vm2 = vweird.f32 %v6435_v59  ;;  %v4872_v36 = vmul.f32 -1.442695, %v6490_v52  ;;  %v1746_v57 = vmul.f32 %v6492_v61, %v1583_v40 }
 0x187   :  { %v5082_v53 = vpop.eup %5081  ;;  %v1310_v31 = vmul.f32 %v6471_v63, %v6435_v59  ;;  %v1302_v2 = vsel %vm1301_vm15, %v5078_v37, %v1298_v30  ;;  %v924_v37 = vadd.f32 %v6380_v48, %v802_v43  ;;  %vm1315_vm1 = vweird.f32 %v6471_v63  ;;  %v1581_v30 = vld [vmem:[%s9592_s9 + $0x8] sm:$0x7] }
 0x188   :  { %v6487_v10 = vadd.f32 1.0, %v5082_v53  ;;  %v1307_v50 = vsel %vm1304_vm0, %v1306_v9, %v1302_v2  ;;  %v6526_v8 = vperm.slane %v1580_v45, 1  ;;  %vm1316_vm4 = vmor %vm1314_vm2, %vm1315_vm1  ;;  %vm1319_vm5 = vcmp.eq.f32.partialorder %v1318_v12, 8.507059e+37 }
 0x189   :  { %v1311_v25 = vsub.f32 1.0, %v1310_v31  ;;  %v6495_v29 = vmul.f32 %v1307_v50, %v6351_v21  ;;  %v6499_v5 = vpop.f32.mrf.mxu0  ;;  %v6509_v49 = vpop.f32.mrf.mxu3  ;;  %v1600_v21 = vmul.f32 %v6443_v35, %v1583_v40  ;;  %v1053_v22 = vadd.f32 %v6405_v7, %v924_v37 }
 0x18a   :  { %5083 = vrcp.f32 %v6487_v10  ;;  %v773_v18 = vpop.f32.mrf.mxu1  ;;  %v1321_v32 = vor.u32 1.1754944e-38, %v1320_v3  ;;  %v6535_v53 = vadd.f32 %v6286_v58, %v559_v56  ;;  %v6537_v0 = vperm.slane %v1580_v45, 2  ;;  %v6540_v31 = vpop.f32.mrf.mxu2 }
 0x18b   :  { %9596 = vst [vmem:[#allocation7_spill] sm:$0xff] %v6495_v29  ;;  %v1312_v48 = vmul.f32 %v6471_v63, %v1311_v25  ;;  %v803_v24 = vadd.f32 %v773_v18, %v6192_v38  ;;  %5085 = vpow2.f32 %v4872_v36  ;;  %v1665_v59 = vadd.f32 %v1649_v54, %v1600_v21  ;;  %v6544_v40 = vld [vmem:[#allocation2 + $0x20] sm:$0xff] }
 0x18c   :  { %1565 = vst.msk [vmem:[#allocation2 + $0x31] sm:$0xff] %vm9567_vm3, %v6495_v29  ;;  %v1170_v7 = vadd.f32 %v6455_v33, %v1053_v22  ;;  %v1698_v44 = vmul.f32 %v6463_v16, %v6524_v20  ;;  %v1762_v2 = vadd.f32 %v1746_v57, %v1713_v41  ;;  %v6552_v46 = vperm.slane %v1581_v30, 0  ;;  %v1682_v56 = vld [vmem:[#allocation2 + $0x22] sm:$0xff] }
 0x18d   :  { %v1313_v55 = vadd.f32 %v6471_v63, %v1312_v48  ;;  %v925_v38 = vadd.f32 %v6428_v42, %v803_v24  ;;  %v1795_v12 = vmul.f32 %v6526_v8, %v1632_v27  ;;  %v1335_v3 = vand.u32 2147483648, %v6487_v10 }
 0x18e   :  { %v6550_v58 = vadd.f32 %v6292_v14, %v1170_v7  ;;  %v1714_v18 = vadd.f32 %v1698_v44, %v1665_v59  ;;  %v1601_v54 = vmul.f32 %v6443_v35, %v6544_v40  ;;  %v1747_v27 = vmul.f32 %v6492_v61, %v6544_v40 }
 0x18f   :  { %v1317_v43 = vsel %vm1316_vm4, %v6471_v63, %v1313_v55  ;;  %v1633_v63 = vld [vmem:[#allocation2 + $0x21] sm:$0xff]  ;;  %v1054_v25 = vadd.f32 %v6451_v26, %v925_v38  ;;  %v1811_v41 = vadd.f32 %v1795_v12, %v1762_v2  ;;  %vm1329_vm7 = vweird.f32 %v6487_v10 }
 0x190   :  { %v5084_v1 = vpop.eup %5083  ;;  %v1322_v4 = vsel %vm1319_vm5, %v1321_v32, %v1317_v43  ;;  %v1650_v48 = vmul.f32 %v6446_v6, %v1633_v63  ;;  %v4873_v57 = vmul.f32 -1.442695, %v6550_v58  ;;  %v1699_v59 = vmul.f32 %v6463_v16, %v1682_v56 }
 0x191   :  { %v1325_v9 = vmul.f32 %v5084_v1, %v6487_v10  ;;  %v6547_v33 = vmul.f32 %v1322_v4, %v6377_v23  ;;  %v1144_v45 = vpop.f32.mrf.mxu0  ;;  %v1333_v23 = vand.u32 2147483647, %v6487_v10  ;;  %v5086_v21 = vpop.eup %5085  ;;  %vm1330_vm6 = vweird.f32 %v5084_v1 }
 0x192   :  { %v776_v42 = vpop.f32.mrf.mxu1  ;;  %v6566_v36 = vadd.f32 1.0, %v5086_v21  ;;  %v1171_v24 = vadd.f32 %v6499_v5, %v1054_v25  ;;  %vm1331_vm8 = vmor %vm1329_vm7, %vm1330_vm6  ;;  %v1336_v43 = vor.u32 1.1754944e-38, %v1335_v3  ;;  %v1666_v7 = vadd.f32 %v1650_v48, %v1601_v54  ;;  %v903_v12 = vpop.f32.mrf.mxu2 }
 0x193   :  { %9597 = vst [vmem:[#allocation8_spill] sm:$0xff] %v6547_v33  ;;  %v1326_v50 = vsub.f32 1.0, %v1325_v9  ;;  %v804_v37 = vadd.f32 %v776_v42, %v6209_v17  ;;  %v1029_v17 = vpop.f32.mrf.mxu3  ;;  %v6569_v55 = vld [vmem:[#allocation2 + $0x30] sm:$0xff]  ;;  %vm1334_vm9 = vcmp.eq.f32.partialorder %v1333_v23, 8.507059e+37  ;;  %v1763_v9 = vadd.f32 %v1747_v27, %v1714_v18 }
 0x194   :  { %1566 = vst.msk [vmem:[#allocation2 + $0x41] sm:$0xff] %vm9567_vm3, %v6547_v33  ;;  %v1634_v30 = vld [vmem:[#allocation2 + $0x31] sm:$0xff]  ;;  %5087 = vrcp.f32 %v6566_v36  ;;  %v6577_v4 = vadd.f32 %v6292_v14, %v1171_v24  ;;  %v1602_v10 = vmul.f32 %v6443_v35, %v6569_v55  ;;  %v1844_v18 = vmul.f32 %v6537_v0, %v6524_v20 }
 0x195   :  { %v1327_v26 = vmul.f32 %v5084_v1, %v1326_v50  ;;  %v926_v32 = vadd.f32 %v6484_v39, %v804_v37  ;;  %5089 = vpow2.f32 %v4873_v57  ;;  %v1651_v42 = vmul.f32 %v6446_v6, %v1634_v30  ;;  %v1683_v50 = vld [vmem:[#allocation2 + $0x32] sm:$0xff] }
 0x196   :  { %v1796_v23 = vmul.f32 %v6526_v8, %v1633_v63  ;;  %v1748_v3 = vmul.f32 %v6492_v61, %v6569_v55  ;;  %v1715_v21 = vadd.f32 %v1699_v59, %v1666_v7  ;;  %v1797_v20 = vmul.f32 %v6526_v8, %v1634_v30 }
 0x197   :  { %v1328_v22 = vadd.f32 %v5084_v1, %v1327_v26  ;;  %v1055_v39 = vadd.f32 %v6509_v49, %v926_v32  ;;  %v1845_v49 = vmul.f32 %v6537_v0, %v1682_v56  ;;  %v1700_v26 = vmul.f32 %v6463_v16, %v1683_v50 }
 0x198   :  { %v1812_v27 = vadd.f32 %v1796_v23, %v1763_v9  ;;  %v6599_v56 = vadd.f32 %v1844_v18, %v1811_v41  ;;  %v1348_v7 = vand.u32 2147483647, %v6566_v36  ;;  %vm1344_vm11 = vweird.f32 %v6566_v36 }
 0x199   :  { %v1332_v38 = vsel %vm1331_vm8, %v5084_v1, %v1328_v22  ;;  %v1146_v2 = vpop.f32.mrf.mxu0  ;;  %v4874_v1 = vmul.f32 -1.442695, %v6577_v4  ;;  %v1667_v22 = vadd.f32 %v1651_v42, %v1602_v10 }
 0x19a   :  { %v1337_v5 = vsel %vm1334_vm9, %v1336_v43, %v1332_v38  ;;  %v778_v44 = vpop.f32.mrf.mxu1  ;;  %v5088_v48 = vpop.eup %5087  ;;  %v1764_v43 = vadd.f32 %v1748_v3, %v1715_v21  ;;  %vm6628_vm12 = vcmp.eq.f32.partialorder %v1348_v7, 8.507059e+37 }
 0x19b   :  { %v6584_v25 = vmul.f32 %v1337_v5, %v6426_v19  ;;  %v805_v37 = vadd.f32 %v778_v44, %v6467_v60  ;;  %v1586_v54 = vld [vmem:[#allocation2 + $0x40] sm:$0xff]  ;;  %5091 = vpow2.f32 %v4874_v1  ;;  %v1172_v19 = vadd.f32 %v1144_v45, %v1055_v39  ;;  %v5090_v57 = vpop.eup %5089  ;;  %v1032_v45 = vpop.f32.mrf.mxu3 }
 0x19c   :  { %v1635_v63 = vld [vmem:[#allocation2 + $0x41] sm:$0xff]  ;;  %v1340_v24 = vmul.f32 %v5088_v48, %v6566_v36  ;;  %v6607_v38 = vadd.f32 1.0, %v5090_v57  ;;  %v6612_v5 = vmul.f32 %v6537_v0, %v1683_v50  ;;  %v1749_v39 = vmul.f32 %v6492_v61, %v1586_v54 }
 0x19d   :  { %9598 = vst [vmem:[#allocation11_spill] sm:$0xff] %v6584_v25  ;;  %v927_v60 = vadd.f32 %v6540_v31, %v805_v37  ;;  %v6603_v32 = vadd.f32 %v6292_v14, %v1172_v19  ;;  %v1603_v31 = vmul.f32 %v6443_v35, %v1586_v54  ;;  %v1652_v30 = vmul.f32 %v6446_v6, %v1635_v63  ;;  %v1684_v3 = vld [vmem:[#allocation2 + $0x42] sm:$0xff]  ;;  %v905_v19 = vpop.f32.mrf.mxu2 }
 0x19e   :  { %1567 = vst.msk [vmem:[#allocation2 + $0x51] sm:$0xff] %vm9567_vm3, %v6584_v25  ;;  %v1341_v41 = vsub.f32 1.0, %v1340_v24  ;;  %5093 = vrcp.f32 %v6607_v38  ;;  %v6623_v50 = vmul.f32 %v6552_v46, %v6569_v55  ;;  %vm1345_vm10 = vweird.f32 %v5088_v48 }
 0x19f   :  { %v1056_v59 = vadd.f32 %v1029_v17, %v927_v60  ;;  %v4875_v9 = vmul.f32 -1.442695, %v6603_v32  ;;  %v1350_v17 = vand.u32 2147483648, %v6566_v36  ;;  %v1668_v60 = vadd.f32 %v1652_v30, %v1603_v31  ;;  %vm1346_vm13 = vmor %vm1344_vm11, %vm1345_vm10 }
 0x1a0   :  { %v1342_v37 = vmul.f32 %v5088_v48, %v1341_v41  ;;  %v6632_v57 = vadd.f32 %v1797_v20, %v1764_v43  ;;  %v1798_v36 = vmul.f32 %v6526_v8, %v1635_v63  ;;  %v1365_v20 = vand.u32 2147483648, %v6607_v38 }
 0x1a1   :  { %v1173_v10 = vadd.f32 %v1146_v2, %v1056_v59  ;;  %v1149_v42 = vpop.f32.mrf.mxu0  ;;  %v5092_v1 = vpop.eup %5091  ;;  %5095 = vpow2.f32 %v4875_v9  ;;  %v1716_v2 = vadd.f32 %v1700_v26, %v1667_v22  ;;  %v1351_v26 = vor.u32 1.1754944e-38, %v1350_v17 }
 0x1a2   :  { %v781_v44 = vpop.f32.mrf.mxu1  ;;  %v6625_v21 = vadd.f32 1.0, %v5092_v1  ;;  %v1701_v22 = vmul.f32 %v6463_v16, %v1684_v3  ;;  %v1363_v9 = vand.u32 2147483647, %v6607_v38  ;;  %v6640_v43 = vadd.f32 %v1845_v49, %v1812_v27 }
 0x1a3   :  { %v6618_v18 = vadd.f32 %v6292_v14, %v1173_v10  ;;  %v806_v23 = vadd.f32 %v781_v44, %v6235_v13  ;;  %v1343_v13 = vadd.f32 %v5088_v48, %v1342_v37  ;;  %v1765_v55 = vadd.f32 %v1749_v39, %v1716_v2  ;;  %v1034_v17 = vpop.f32.mrf.mxu3 }
 0x1a4   :  { %5097 = vrcp.f32 %v6625_v21  ;;  %v5094_v7 = vpop.eup %5093  ;;  %v6645_v44 = vadd.f32 %v1701_v22, %v1668_v60  ;;  %vm1359_vm14 = vweird.f32 %v6607_v38  ;;  %vm6665_vm15 = vcmp.eq.f32.partialorder %v1363_v9, 8.507059e+37 }
 0x1a5   :  { %v4876_v24 = vmul.f32 -1.442695, %v6618_v18  ;;  %v928_v59 = vadd.f32 %v903_v12, %v806_v23  ;;  %v1347_v41 = vsel %vm1346_vm13, %v5088_v48, %v1343_v13  ;;  %v1587_v30 = vld [vmem:[#allocation2 + $0x50] sm:$0xff]  ;;  %v1355_v39 = vmul.f32 %v5094_v7, %v6607_v38 }
 0x1a6   :  { %v1352_v10 = vsel %vm6628_vm12, %v1351_v26, %v1347_v41  ;;  %v6649_v12 = vmul.f32 %v6552_v46, %v6544_v40  ;;  %v6657_v27 = vadd.f32 %v1798_v36, %v1765_v55  ;;  %v6659_v1 = vld [vmem:[#allocation2 + $0x51] sm:$0xff]  ;;  %v1604_v40 = vmul.f32 %v6443_v35, %v1587_v30  ;;  %v1590_v26 = vld [vmem:[#allocation2 + $0xa0] sm:$0xff] }
 0x1a7   :  { %v5096_v31 = vpop.eup %5095  ;;  %v6652_v48 = vmul.f32 %v1352_v10, %v6490_v52  ;;  %v1356_v37 = vsub.f32 1.0, %v1355_v39  ;;  %5099 = vpow2.f32 %v4876_v24  ;;  %v1057_v23 = vadd.f32 %v1032_v45, %v928_v59  ;;  %v1639_v55 = vld [vmem:[#allocation2 + $0xa1] sm:$0xff] }
 0x1a8   :  { %v6655_v49 = vadd.f32 1.0, %v5096_v31  ;;  %v1366_v54 = vor.u32 1.1754944e-38, %v1365_v20  ;;  %vm1360_vm0 = vweird.f32 %v5094_v7  ;;  %v1653_v22 = vmul.f32 %v6446_v6, %v6659_v1  ;;  %v908_v31 = vpop.f32.mrf.mxu2 }
 0x1a9   :  { %9601 = vst [vmem:[#allocation12_spill] sm:$0xff] %v6652_v48  ;;  %v1151_v60 = vpop.f32.mrf.mxu0  ;;  %v1357_v13 = vmul.f32 %v5094_v7, %v1356_v37  ;;  %v6675_v24 = vmul.f32 %v6492_v61, %v1587_v30  ;;  %v1174_v59 = vadd.f32 %v1149_v42, %v1057_v23  ;;  %vm1374_vm1 = vweird.f32 %v6625_v21  ;;  %vm1361_vm2 = vmor %vm1359_vm14, %vm1360_vm0 }
 0x1aa   :  { %v783_v63 = vpop.f32.mrf.mxu1  ;;  %v5098_v3 = vpop.eup %5097  ;;  %1568 = vst.msk [vmem:[#allocation2 + $0x61] sm:$0xff] %vm9567_vm3, %v6652_v48  ;;  %5101 = vrcp.f32 %v6655_v49  ;;  %v1380_v20 = vand.u32 2147483648, %v6625_v21  ;;  %v1607_v10 = vmul.f32 %v6443_v35, %v1590_v26  ;;  %v1656_v39 = vmul.f32 %v6446_v6, %v1639_v55 }
 0x1ab   :  { %v807_v2 = vadd.f32 %v783_v63, %v6502_v47  ;;  %v1370_v45 = vmul.f32 %v5098_v3, %v6625_v21  ;;  %v1378_v47 = vand.u32 2147483647, %v6625_v21  ;;  %v1358_v41 = vadd.f32 %v5094_v7, %v1357_v13 }
 0x1ac   :  { %v6684_v63 = vadd.f32 %v6292_v14, %v1174_v59  ;;  %vm1375_vm4 = vweird.f32 %v5098_v3  ;;  %v1672_v52 = vadd.f32 %v1656_v39, %v1607_v10  ;;  %vm1389_vm8 = vweird.f32 %v6655_v49 }
 0x1ad   :  { %v929_v36 = vadd.f32 %v905_v19, %v807_v2  ;;  %v1371_v9 = vsub.f32 1.0, %v1370_v45  ;;  %v5100_v42 = vpop.eup %5099  ;;  %v1362_v19 = vsel %vm1361_vm2, %v5094_v7, %v1358_v41  ;;  %vm6686_vm5 = vcmp.eq.f32.partialorder %v1378_v47, 8.507059e+37  ;;  %v1688_v2 = vld [vmem:[#allocation2 + $0xa2] sm:$0xff]  ;;  %vm1376_vm6 = vmor %vm1374_vm1, %vm1375_vm4 }
 0x1ae   :  { %v1367_v38 = vsel %vm6665_vm15, %v1366_v54, %v1362_v19  ;;  %v6692_v45 = vadd.f32 1.0, %v5100_v42  ;;  %v4877_v26 = vmul.f32 -1.442695, %v6684_v63  ;;  %v1669_v41 = vadd.f32 %v1653_v22, %v1604_v40  ;;  %v1685_v42 = vld [vmem:[#allocation2 + $0x52] sm:$0xff]  ;;  %v6708_v40 = vld [vmem:[#allocation2 + $0x42] sm:$0xff] }
 0x1af   :  { %v1058_v30 = vadd.f32 %v1034_v17, %v929_v36  ;;  %v1372_v37 = vmul.f32 %v5098_v3, %v1371_v9  ;;  %v6696_v17 = vmul.f32 %v1367_v38, %v6550_v58  ;;  %v1037_v36 = vpop.f32.mrf.mxu3  ;;  %v1381_v9 = vor.u32 1.1754944e-38, %v1380_v20 }
 0x1b0   :  { %v5102_v13 = vpop.eup %5101  ;;  %v1705_v54 = vmul.f32 %v6463_v16, %v1688_v2  ;;  %5103 = vrcp.f32 %v6692_v45  ;;  %v1393_v22 = vand.u32 2147483647, %v6655_v49  ;;  %v1395_v20 = vand.u32 2147483648, %v6655_v49 }
 0x1b1   :  { %v1175_v55 = vadd.f32 %v1151_v60, %v1058_v30  ;;  %9606 = vst [vmem:[#allocation13_spill] sm:$0xff] %v6696_v17  ;;  %v1373_v7 = vadd.f32 %v5098_v3, %v1372_v37  ;;  %v1385_v47 = vmul.f32 %v5102_v13, %v6655_v49  ;;  %5105 = vpow2.f32 %v4877_v26  ;;  %v1154_v39 = vpop.f32.mrf.mxu0 }
 0x1b2   :  { %v786_v59 = vpop.f32.mrf.mxu1  ;;  %1569 = vst.msk [vmem:[#allocation2 + $0x71] sm:$0xff] %vm9567_vm3, %v6696_v17  ;;  %vm1390_vm7 = vweird.f32 %v5102_v13  ;;  %v1702_v2 = vmul.f32 %v6463_v16, %v1685_v42  ;;  %v1847_v23 = vmul.f32 %v6537_v0, %v6708_v40  ;;  %v6724_v26 = vadd.f32 %v6612_v5, %v6632_v57  ;;  %v6731_v5 = vld [vmem:[#allocation2 + $0x60] sm:$0xff] }
 0x1b3   :  { %v1377_v58 = vsel %vm1376_vm6, %v5098_v3, %v1373_v7  ;;  %v1386_v60 = vsub.f32 1.0, %v1385_v47  ;;  %v6706_v30 = vadd.f32 %v6292_v14, %v1175_v55  ;;  %v808_v10 = vadd.f32 %v786_v59, %v6261_v28  ;;  %v910_v55 = vpop.f32.mrf.mxu2  ;;  %vm1391_vm9 = vmor %vm1389_vm8, %vm1390_vm7  ;;  %v1637_v57 = vld [vmem:[#allocation2 + $0x61] sm:$0xff] }
 0x1b4   :  { %v1382_v21 = vsel %vm6686_vm5, %v1381_v9, %v1377_v58  ;;  %vm1394_vm10 = vcmp.eq.f32.partialorder %v1393_v22, 8.507059e+37  ;;  %v1718_v9 = vadd.f32 %v1702_v2, %v1669_v41  ;;  %vm1404_vm12 = vweird.f32 %v6692_v45 }
 0x1b5   :  { %v6716_v19 = vmul.f32 %v1382_v21, %v6577_v4  ;;  %v1387_v3 = vmul.f32 %v5102_v13, %v1386_v60  ;;  %v4878_v37 = vmul.f32 -1.442695, %v6706_v30  ;;  %v930_v38 = vadd.f32 %v908_v31, %v808_v10 }
 0x1b6   :  { %v6729_v4 = vadd.f32 %v1705_v54, %v1672_v52  ;;  %v5104_v59 = vpop.eup %5103  ;;  %v1396_v31 = vor.u32 1.1754944e-38, %v1395_v20  ;;  %v1766_v52 = vadd.f32 %v6675_v24, %v6645_v44  ;;  %v1605_v44 = vmul.f32 %v6443_v35, %v6731_v5 }
 0x1b7   :  { %9607 = vst [vmem:[#allocation14_spill] sm:$0xff] %v6716_v19  ;;  %v1388_v28 = vadd.f32 %v5102_v13, %v1387_v3  ;;  %5107 = vpow2.f32 %v4878_v37  ;;  %v1059_v7 = vadd.f32 %v1037_v36, %v930_v38  ;;  %v5106_v58 = vpop.eup %5105  ;;  %v1400_v21 = vmul.f32 %v5104_v59, %v6692_v45  ;;  %v1039_v3 = vpop.f32.mrf.mxu3 }
 0x1b8   :  { %1570 = vst.msk [vmem:[#allocation2 + $0x81] sm:$0xff] %vm9567_vm3, %v6716_v19  ;;  %v6737_v10 = vadd.f32 1.0, %v5106_v58  ;;  %v1799_v36 = vmul.f32 %v6526_v8, %v6659_v1  ;;  %v1654_v24 = vmul.f32 %v6446_v6, %v1637_v57  ;;  %vm1405_vm11 = vweird.f32 %v5104_v59 }
 0x1b9   :  { %v1392_v60 = vsel %vm1391_vm9, %v5102_v13, %v1388_v28  ;;  %v1176_v22 = vadd.f32 %v1154_v39, %v1059_v7  ;;  %v1401_v20 = vsub.f32 1.0, %v1400_v21  ;;  %v1408_v13 = vand.u32 2147483647, %v6692_v45  ;;  %v1156_v28 = vpop.f32.mrf.mxu0  ;;  %v6769_v21 = vld [vmem:[#allocation2 + $0x62] sm:$0xff]  ;;  %vm1406_vm14 = vmor %vm1404_vm12, %vm1405_vm11 }
 0x1ba   :  { %v788_v47 = vpop.f32.mrf.mxu1  ;;  %v1397_v54 = vsel %vm1394_vm10, %v1396_v31, %v1392_v60  ;;  %5109 = vrcp.f32 %v6737_v10  ;;  %v6762_v31 = vadd.f32 %v1847_v23, %v6657_v27  ;;  %9611 = vst [vmem:[#allocation16_spill] sm:$0xff] %v6769_v21  ;;  %v1751_v27 = vmul.f32 %v6492_v61, %v6731_v5 }
 0x1bb   :  { %v809_v49 = vadd.f32 %v788_v47, %v6505_v51  ;;  %v6742_v41 = vmul.f32 %v1397_v54, %v6603_v32  ;;  %v1410_v51 = vand.u32 2147483648, %v6692_v45  ;;  %v1402_v32 = vmul.f32 %v5104_v59, %v1401_v20  ;;  %v1879_v45 = vld [vmem:[#allocation2 + $0x40] sm:$0xff]  ;;  %v913_v20 = vpop.f32.mrf.mxu2 }
 0x1bc   :  { %v6753_v1 = vadd.f32 %v6292_v14, %v1176_v22  ;;  %vm6764_vm13 = vcmp.eq.f32.partialorder %v1408_v13, 8.507059e+37  ;;  %v1670_v54 = vadd.f32 %v1654_v24, %v1605_v44  ;;  %v1423_v24 = vand.u32 2147483647, %v6737_v10 }
 0x1bd   :  { %9608 = vst [vmem:[#allocation15_spill] sm:$0xff] %v6742_v41  ;;  %v931_v37 = vadd.f32 %v910_v55, %v809_v49  ;;  %v5108_v39 = vpop.eup %5107  ;;  %v6759_v55 = vmul.f32 %v6537_v0, %v1685_v42  ;;  %v1403_v7 = vadd.f32 %v5104_v59, %v1402_v32  ;;  %v1411_v49 = vor.u32 1.1754944e-38, %v1410_v51  ;;  %v6782_v51 = vld [vmem:[#allocation2 + $0x71] sm:$0xff] }
 0x1be   :  { %1571 = vst.msk [vmem:[#allocation2 + $0xb1] sm:$0xff] %vm9567_vm3, %v6742_v41  ;;  %v6756_v38 = vadd.f32 1.0, %v5108_v39  ;;  %v4879_v58 = vmul.f32 -1.442695, %v6753_v1  ;;  %v1425_v32 = vand.u32 2147483648, %v6737_v10  ;;  %v6802_v47 = vmul.f32 %v6526_v8, %v1637_v57 }
 0x1bf   :  { %v1060_v2 = vadd.f32 %v1039_v3, %v931_v37  ;;  %v1407_v23 = vsel %vm1406_vm14, %v5104_v59, %v1403_v7  ;;  %v6780_v37 = vld [vmem:[#allocation2 + $0x70] sm:$0xff]  ;;  %v1703_v59 = vmul.f32 %v6463_v16, %v6769_v21  ;;  %v6799_v7 = vadd.f32 %v1751_v27, %v1718_v9 }
 0x1c0   :  { %5111 = vrcp.f32 %v6756_v38  ;;  %v6778_v3 = vpop.eup %5109  ;;  %v1412_v44 = vsel %vm6764_vm13, %v1411_v49, %v1407_v23  ;;  %v6816_v9 = vmul.f32 %v6537_v0, %v6769_v21  ;;  %vm1419_vm15 = vweird.f32 %v6737_v10  ;;  %v6826_v27 = vld [vmem:[#allocation2 + $0x72] sm:$0xff] }
 0x1c1   :  { %v1177_v60 = vadd.f32 %v1156_v28, %v1060_v2  ;;  %5113 = vpow2.f32 %v4879_v58  ;;  %v6793_v39 = vmul.f32 %v1412_v44, %v6618_v18  ;;  %v6804_v58 = vadd.f32 %v1799_v36, %v1766_v52  ;;  %v1042_v18 = vpop.f32.mrf.mxu3  ;;  %9615 = vst [vmem:[#allocation18_spill] sm:$0xff] %v6826_v27  ;;  %v1159_v19 = vpop.f32.mrf.mxu0 }
 0x1c2   :  { %v791_v42 = vpop.f32.mrf.mxu1  ;;  %v6812_v49 = vadd.f32 %v1703_v59, %v1670_v54  ;;  %vm6821_vm0 = vcmp.eq.f32.partialorder %v1423_v24, 8.507059e+37  ;;  %v1426_v54 = vor.u32 1.1754944e-38, %v1425_v32  ;;  %vm1420_vm1 = vweird.f32 %v6778_v3 }
 0x1c3   :  { %v6775_v22 = vadd.f32 %v6292_v14, %v1177_v60  ;;  %v810_v13 = vadd.f32 %v791_v42, %v6282_v15  ;;  %v6790_v14 = vmul.f32 %v6552_v46, %v1879_v45  ;;  %9612 = vst [vmem:[#allocation17_spill] sm:$0xff] %v6793_v39  ;;  %v1415_v15 = vmul.f32 %v6778_v3, %v6737_v10  ;;  %vm6854_vm5 = vmor %vm1419_vm15, %vm1420_vm1 }
 0x1c4   :  { %1572 = vst.msk [vmem:[#allocation2 + $0xc1] sm:$0xff] %vm9567_vm3, %v6793_v39  ;;  %v1606_v60 = vmul.f32 %v6443_v35, %v6780_v37  ;;  %v1655_v45 = vmul.f32 %v6446_v6, %v6782_v51  ;;  %v1438_v42 = vand.u32 2147483647, %v6756_v38  ;;  %v1704_v48 = vmul.f32 %v6463_v16, %v6826_v27 }
 0x1c5   :  { %v4880_v2 = vmul.f32 -1.442695, %v6775_v22  ;;  %v932_v28 = vadd.f32 %v913_v20, %v810_v13  ;;  %v1416_v52 = vsub.f32 1.0, %v1415_v15  ;;  %v1440_v13 = vand.u32 2147483648, %v6756_v38  ;;  %v1591_v44 = vld [vmem:[#allocation2 + $0xb0] sm:$0xff] }
 0x1c6   :  { %v6818_v57 = vpop.eup %5111  ;;  %v1640_v59 = vld [vmem:[#allocation2 + $0xb1] sm:$0xff]  ;;  %v1671_v17 = vadd.f32 %v1655_v45, %v1606_v60  ;;  %vm1434_vm2 = vweird.f32 %v6756_v38  ;;  %vm6840_vm4 = vcmp.eq.f32.partialorder %v1438_v42, 8.507059e+37  ;;  %v1754_v60 = vmul.f32 %v6492_v61, %v1591_v44 }
 0x1c7   :  { %v5114_v23 = vpop.eup %5113  ;;  %v1430_v20 = vmul.f32 %v6818_v57, %v6756_v38  ;;  %5115 = vpow2.f32 %v4880_v2  ;;  %v1417_v15 = vmul.f32 %v6778_v3, %v1416_v52  ;;  %v1061_v34 = vadd.f32 %v1042_v18, %v932_v28  ;;  %v6845_v28 = vld [vmem:[#allocation2 + $0x80] sm:$0xff] }
 0x1c8   :  { %v6833_v24 = vadd.f32 1.0, %v5114_v23  ;;  %v1608_v18 = vmul.f32 %v6443_v35, %v1591_v44  ;;  %v915_v23 = vpop.f32.mrf.mxu2  ;;  %vm1435_vm6 = vweird.f32 %v6818_v57  ;;  %v1720_v44 = vadd.f32 %v1704_v48, %v1671_v17 }
 0x1c9   :  { %v1431_v41 = vsub.f32 1.0, %v1430_v20  ;;  %v1418_v2 = vadd.f32 %v6778_v3, %v1417_v15  ;;  %v1441_v15 = vor.u32 1.1754944e-38, %v1440_v13  ;;  %v1178_v25 = vadd.f32 %v1159_v19, %v1061_v34  ;;  %vm1436_vm7 = vmor %vm1434_vm2, %vm1435_vm6 }
 0x1ca   :  { %v793_v39 = vpop.f32.mrf.mxu1  ;;  %5117 = vrcp.f32 %v6833_v24  ;;  %v1752_v10 = vmul.f32 %v6492_v61, %v6780_v37  ;;  %v1753_v62 = vmul.f32 %v6492_v61, %v6845_v28  ;;  %v1803_v11 = vmul.f32 %v6526_v8, %v1640_v59 }
 0x1cb   :  { %v811_v32 = vadd.f32 %v793_v39, %v6535_v53  ;;  %v1657_v53 = vmul.f32 %v6446_v6, %v1640_v59  ;;  %v1689_v39 = vld [vmem:[#allocation2 + $0xb2] sm:$0xff]  ;;  %v1432_v42 = vmul.f32 %v6818_v57, %v1431_v41  ;;  %v1422_v20 = vsel %vm6854_vm5, %v6778_v3, %v1418_v2  ;;  %v1592_v21 = vld [vmem:[#allocation2 + $0xc0] sm:$0xff] }
 0x1cc   :  { %v1706_v41 = vmul.f32 %v6463_v16, %v1689_v39  ;;  %v6869_v45 = vld [vmem:[#allocation2 + $0xc1] sm:$0xff]  ;;  %v1427_v34 = vsel %vm6821_vm0, %v1426_v54, %v1422_v20  ;;  %v6875_v19 = vmul.f32 %v6526_v8, %v6782_v51  ;;  %v1770_v17 = vadd.f32 %v1754_v60, %v6729_v4  ;;  %v5403_v4 = vld [vmem:[%s9589_s0] ss:$0 sm:$0xff] }
 0x1cd   :  { %v933_v33 = vadd.f32 %v915_v23, %v811_v32  ;;  %v5116_v29 = vpop.eup %5115  ;;  %v1673_v48 = vadd.f32 %v1657_v53, %v1608_v18  ;;  %v6879_v3 = vmul.f32 %v1427_v34, %v6684_v63  ;;  %v1433_v13 = vadd.f32 %v6818_v57, %v1432_v42  ;;  %v1044_v32 = vpop.f32.mrf.mxu3  ;;  %v2416_v60 = vld [vmem:[%s9621_s10 + $0x8] sm:$0xff] }
 0x1ce   :  { %v1453_v36 = vand.u32 2147483647, %v6833_v24  ;;  %v6889_v54 = vadd.f32 1.0, %v5116_v29  ;;  %v6894_v63 = vadd.f32 %v5403_v4, %v1178_v25  ;;  %v1609_v18 = vmul.f32 %v6443_v35, %v1592_v21  ;;  %2441 = vmatpush.msra.mxu2 %v2416_v60  ;;  %v1161_v34 = vpop.f32.mrf.mxu0 }
 0x1cf   :  { %9620 = vst [vmem:[#allocation19_spill] sm:$0xff] %v6879_v3  ;;  %v1062_v2 = vadd.f32 %v1044_v32, %v933_v33  ;;  %v1658_v53 = vmul.f32 %v6446_v6, %v6869_v45  ;;  %v1437_v38 = vsel %vm1436_vm7, %v6818_v57, %v1433_v13  ;;  %v6908_v25 = vmul.f32 %v6537_v0, %v1689_v39  ;;  %v6920_v39 = vld [vmem:[#allocation2 + $0xc2] sm:$0xff] }
 0x1d0   :  { %v6882_v59 = vpop.eup %5117  ;;  %1573 = vst.msk [vmem:[#allocation2 + $0xd1] sm:$0xff] %vm9567_vm3, %v6879_v3  ;;  %v1755_v33 = vmul.f32 %v6492_v61, %v1592_v21  ;;  %v1442_v42 = vsel %vm6840_vm4, %v1441_v15, %v1437_v38  ;;  %5119 = vrcp.f32 %v6889_v54  ;;  %v1722_v23 = vadd.f32 %v1706_v41, %v1673_v48  ;;  %v6924_v38 = vld [vmem:[#allocation2 + $0x81] sm:$0xff] }
 0x1d1   :  { %v1445_v29 = vmul.f32 %v6882_v59, %v6833_v24  ;;  %v6915_v57 = vmul.f32 %v1442_v42, %v6706_v30  ;;  %v1768_v13 = vadd.f32 %v1752_v10, %v6812_v49  ;;  %v6918_v32 = vadd.f32 %v1803_v11, %v1770_v17  ;;  %9623 = vst [vmem:[#allocation21_spill] sm:$0xff] %v6920_v39 }
 0x1d2   :  { %vm1449_vm8 = vweird.f32 %v6833_v24  ;;  %v4881_v52 = vmul.f32 -1.442695, %v6894_v63  ;;  %v1179_v15 = vadd.f32 %v1161_v34, %v1062_v2  ;;  %v1674_v60 = vadd.f32 %v1658_v53, %v1609_v18 }
 0x1d3   :  { %9622 = vst [vmem:[#allocation20_spill] sm:$0xff] %v6915_v57  ;;  %v1446_v20 = vsub.f32 1.0, %v1445_v29  ;;  %vm6929_vm9 = vcmp.eq.f32.partialorder %v1453_v36, 8.507059e+37  ;;  %v1455_v11 = vand.u32 2147483648, %v6833_v24  ;;  %v1771_v49 = vadd.f32 %v1755_v33, %v1722_v23 }
 0x1d4   :  { %1574 = vst.msk [vmem:[#allocation2 + $0xe1] sm:$0xff] %vm9567_vm3, %v6915_v57  ;;  %vm1450_vm10 = vweird.f32 %v6882_v59  ;;  %5121 = vpow2.f32 %v4881_v52  ;;  %v6935_v10 = vadd.f32 %v5403_v4, %v1179_v15  ;;  %v1707_v48 = vmul.f32 %v6463_v16, %v6920_v39 }
 0x1d5   :  { %v1447_v30 = vmul.f32 %v6882_v59, %v1446_v20  ;;  %v1769_v2 = vadd.f32 %v1753_v62, %v1720_v44  ;;  %v1802_v36 = vmul.f32 %v6526_v8, %v6924_v38  ;;  %v1804_v53 = vmul.f32 %v6526_v8, %v6869_v45  ;;  %vm1451_vm11 = vmor %vm1449_vm8, %vm1450_vm10 }
 0x1d6   :  { %v6942_v18 = vpop.eup %5119  ;;  %v6948_v29 = vmul.f32 %v6537_v0, %v6920_v39  ;;  %v1468_v42 = vand.u32 2147483647, %v6889_v54  ;;  %v4882_v23 = vmul.f32 -1.442695, %v6935_v10  ;;  %v1723_v62 = vadd.f32 %v1707_v48, %v1674_v60  ;;  %v2415_v60 = vld [vmem:[%s9621_s10] sm:$0xff] }
 0x1d7   :  { %v1448_v17 = vadd.f32 %v6882_v59, %v1447_v30  ;;  %v1593_v4 = vld [vmem:[#allocation2 + $0xd0] sm:$0xff]  ;;  %v6955_v44 = vmul.f32 %v6552_v46, %v1592_v21  ;;  %v1456_v20 = vor.u32 1.1754944e-38, %v1455_v11  ;;  %v1470_v34 = vand.u32 2147483648, %v6889_v54  ;;  %v6971_v30 = vld [vmem:[#allocation2 + $0x82] sm:$0xff]  ;;  %2442 = vmatpush.msra.mxu2 %v2415_v60 }
 0x1d8   :  { %v6950_v33 = vld [vmem:[#allocation2 + $0xd1] sm:$0xff]  ;;  %v6962_v52 = vadd.f32 %v1804_v53, %v1771_v49  ;;  %vm1464_vm12 = vweird.f32 %v6889_v54  ;;  %v1816_v21 = vadd.f32 %v6802_v47, %v6799_v7  ;;  %9626 = vst [vmem:[#allocation22_spill] sm:$0xff] %v6971_v30  ;;  %v1610_v24 = vmul.f32 %v6443_v35, %v1593_v4 }
 0x1d9   :  { %v1452_v15 = vsel %vm1451_vm11, %v6882_v59, %v1448_v17  ;;  %v1659_v11 = vmul.f32 %v6446_v6, %v6950_v33  ;;  %v1460_v59 = vmul.f32 %v6942_v18, %v6889_v54  ;;  %vm6983_vm13 = vcmp.eq.f32.partialorder %v1468_v42, 8.507059e+37  ;;  %v6996_v60 = vld [vmem:[#allocation2 + $0xd2] sm:$0xff] }
 0x1da   :  { %v1457_v49 = vsel %vm6929_vm9, %v1456_v20, %v1452_v15  ;;  %v5122_v48 = vpop.eup %5121  ;;  %5123 = vpow2.f32 %v4882_v23  ;;  %v1817_v47 = vadd.f32 %v6875_v19, %v1768_v13  ;;  %v1471_v41 = vor.u32 1.1754944e-38, %v1470_v34  ;;  %9630 = vst [vmem:[#allocation24_spill] sm:$0xff] %v6996_v60 }
 0x1db   :  { %v6981_v17 = vmul.f32 %v1457_v49, %v6753_v1  ;;  %v6988_v53 = vld [vmem:[#allocation2 + $0xe0] sm:$0xff]  ;;  %v1818_v20 = vadd.f32 %v1802_v36, %v1769_v2  ;;  %v1850_v15 = vmul.f32 %v6537_v0, %v6826_v27  ;;  %v1851_v1 = vmul.f32 %v6537_v0, %v6971_v30  ;;  %v1880_v2 = vld [vmem:[#allocation2 + $0x50] sm:$0xff] }
 0x1dc   :  { %v6990_v57 = vld [vmem:[#allocation2 + $0xe1] sm:$0xff]  ;;  %v1756_v42 = vmul.f32 %v6492_v61, %v1593_v4  ;;  %v1461_v19 = vsub.f32 1.0, %v1460_v59  ;;  %v7001_v13 = vadd.f32 1.0, %v5122_v48  ;;  %v7005_v23 = vadd.f32 %v6759_v55, %v6804_v58 }
 0x1dd   :  { %9627 = vst [vmem:[#allocation23_spill] sm:$0xff] %v6981_v17  ;;  %v1675_v36 = vadd.f32 %v1659_v11, %v1610_v24  ;;  %vm1465_vm14 = vweird.f32 %v6942_v18  ;;  %v7009_v34 = vadd.f32 %v6816_v9, %v1816_v21  ;;  %v7013_v49 = vadd.f32 %v6908_v25, %v6918_v32 }
 0x1de   :  { %1575 = vst.msk [vmem:[#allocation2 + $0xf1] sm:$0xff] %vm9567_vm3, %v6981_v17  ;;  %v1611_v59 = vmul.f32 %v6443_v35, %v6988_v53  ;;  %v1660_v48 = vmul.f32 %v6446_v6, %v6990_v57  ;;  %v1462_v55 = vmul.f32 %v6942_v18, %v1461_v19  ;;  %5125 = vrcp.f32 %v7001_v13  ;;  %v7032_v17 = vld [vmem:[#allocation2 + $0xe2] sm:$0xff]  ;;  %vm1466_vm15 = vmor %vm1464_vm12, %vm1465_vm14 }
 0x1df   :  { %v1708_v58 = vmul.f32 %v6463_v16, %v6996_v60  ;;  %v7023_v24 = vadd.f32 %v1850_v15, %v1817_v47  ;;  %v7025_v9 = vadd.f32 %v1851_v1, %v1818_v20  ;;  %v7028_v25 = vmul.f32 %v6552_v46, %v1880_v2  ;;  %9631 = vst [vmem:[#allocation25_spill] sm:$0xff] %v7032_v17 }
 0x1e0   :  { %v5124_v32 = vpop.eup %5123  ;;  %v1772_v21 = vadd.f32 %v1756_v42, %v1723_v62  ;;  %v1805_v11 = vmul.f32 %v6526_v8, %v6950_v33  ;;  %v1757_v19 = vmul.f32 %v6492_v61, %v6988_v53  ;;  %v1463_v3 = vadd.f32 %v6942_v18, %v1462_v55 }
 0x1e1   :  { %v1854_v47 = vmul.f32 %v6537_v0, %v6996_v60  ;;  %v7040_v20 = vmul.f32 %v6552_v46, %v1593_v4  ;;  %v7046_v62 = vadd.f32 1.0, %v5124_v32  ;;  %v7050_v15 = vmul.f32 %v6552_v46, %v6731_v5 }
 0x1e2   :  { %v1724_v1 = vadd.f32 %v1708_v58, %v1675_v36  ;;  %v1676_v42 = vadd.f32 %v1660_v48, %v1611_v59  ;;  %v1467_v2 = vsel %vm1466_vm15, %v6942_v18, %v1463_v3  ;;  %v1483_v55 = vand.u32 2147483647, %v7001_v13  ;;  %v1884_v48 = vld [vmem:[#allocation2 + $0x90] sm:$0xff] }
 0x1e3   :  { %v1709_v4 = vmul.f32 %v6463_v16, %v7032_v17  ;;  %v1472_v54 = vsel %vm6983_vm13, %v1471_v41, %v1467_v2  ;;  %v1485_v32 = vand.u32 2147483648, %v7001_v13  ;;  %5127 = vrcp.f32 %v7046_v62 }
 0x1e4   :  { %v5126_v5 = vpop.eup %5125  ;;  %v1806_v36 = vmul.f32 %v6526_v8, %v6990_v57  ;;  %v1773_v59 = vadd.f32 %v1757_v19, %v1724_v1  ;;  %v1821_v3 = vadd.f32 %v1805_v11, %v1772_v21  ;;  %v7066_v18 = vadd.f32 %v6948_v29, %v6962_v52 }
 0x1e5   :  { %v7056_v60 = vld [vmem:[#allocation2 + $0xf0] sm:$0xff]  ;;  %v7073_v41 = vmul.f32 %v1472_v54, %v6775_v22  ;;  %v1475_v2 = vmul.f32 %v5126_v5, %v7001_v13  ;;  %v1899_v39 = vmul.f32 %v6552_v46, %v6780_v37  ;;  %vm1479_vm0 = vweird.f32 %v7001_v13 }
 0x1e6   :  { %v7068_v58 = vld [vmem:[#allocation2 + $0xf1] sm:$0xff]  ;;  %v1758_v7 = vmul.f32 %v6492_v61, %v7056_v60  ;;  %vm7079_vm1 = vcmp.eq.f32.partialorder %v1483_v55, 8.507059e+37  ;;  %v1725_v29 = vadd.f32 %v1709_v4, %v1676_v42  ;;  %v1855_v52 = vmul.f32 %v6537_v0, %v7032_v17 }
 0x1e7   :  { %9632 = vst [vmem:[#allocation26_spill] sm:$0xff] %v7073_v41  ;;  %v1476_v22 = vsub.f32 1.0, %v1475_v2  ;;  %v1486_v11 = vor.u32 1.1754944e-38, %v1485_v32  ;;  %v1900_v19 = vmul.f32 %v6552_v46, %v6845_v28  ;;  %v1901_v37 = vmul.f32 %v6552_v46, %v1884_v48  ;;  %v7095_v17 = vld [vmem:[#allocation2 + $0xf2] sm:$0xff] }
 0x1e8   :  { %1576 = vst.msk [vmem:[#allocation2 + $0x101] sm:$0xff] %vm9567_vm3, %v7073_v41  ;;  %v1612_v1 = vmul.f32 %v6443_v35, %v7056_v60  ;;  %v1661_v55 = vmul.f32 %v6446_v6, %v7068_v58  ;;  %v1498_v42 = vand.u32 2147483647, %v7046_v62  ;;  %v1822_v4 = vadd.f32 %v1806_v36, %v1773_v59 }
 0x1e9   :  { %v5128_v54 = vpop.eup %5127  ;;  %v1477_v41 = vmul.f32 %v5126_v5, %v1476_v22  ;;  %vm1480_vm2 = vweird.f32 %v5126_v5  ;;  %v1774_v32 = vadd.f32 %v1758_v7, %v1725_v29  ;;  %v7099_v28 = vadd.f32 %v6649_v12, %v6599_v56 }
 0x1ea   :  { %v1490_v48 = vmul.f32 %v5128_v54, %v7046_v62  ;;  %v1870_v2 = vadd.f32 %v1854_v47, %v1821_v3  ;;  %v7104_v30 = vadd.f32 %v6623_v50, %v6640_v43  ;;  %v7108_v36 = vadd.f32 %v6790_v14, %v6724_v26  ;;  %vm1481_vm5 = vmor %vm1479_vm0, %vm1480_vm2  ;;  %v1928_v43 = vld [vmem:[#allocation2 + $0x41] sm:$0xff] }
 0x1eb   :  { %v1478_v59 = vadd.f32 %v5126_v5, %v1477_v41  ;;  %vm1494_vm4 = vweird.f32 %v7046_v62  ;;  %v1500_v7 = vand.u32 2147483648, %v7046_v62  ;;  %v1807_v56 = vmul.f32 %v6526_v8, %v7068_v58  ;;  %v5404_v62 = vld [vmem:[%s9592_s9 + $0x8] sm:$0x7] }
 0x1ec   :  { %v1710_v12 = vmul.f32 %v6463_v16, %v7095_v17  ;;  %v1491_v50 = vsub.f32 1.0, %v1490_v48  ;;  %vm7118_vm6 = vcmp.eq.f32.partialorder %v1498_v42, 8.507059e+37  ;;  %v1677_v26 = vadd.f32 %v1661_v55, %v1612_v1  ;;  %v1892_v48 = vld [vmem:[#allocation2 + $0x130] sm:$0xff] }
 0x1ed   :  { %v1482_v14 = vsel %vm1481_vm5, %v5126_v5, %v1478_v59  ;;  %v1823_v47 = vadd.f32 %v1807_v56, %v1774_v32  ;;  %v1856_v3 = vmul.f32 %v6537_v0, %v7095_v17  ;;  %v1871_v41 = vadd.f32 %v1855_v52, %v1822_v4 }
 0x1ee   :  { %v1487_v27 = vsel %vm7079_vm1, %v1486_v11, %v1482_v14  ;;  %v1492_v13 = vmul.f32 %v5128_v54, %v1491_v50  ;;  %vm1495_vm7 = vweird.f32 %v5128_v54  ;;  %v1904_v42 = vmul.f32 %v6552_v46, %v6988_v53 }
 0x1ef   :  { %v1596_v29 = vld [vmem:[#allocation2 + $0x100] sm:$0xff]  ;;  %v7134_v55 = vmul.f32 %v1487_v27, %v6894_v63  ;;  %v1501_v52 = vor.u32 1.1754944e-38, %v1500_v7  ;;  %v1726_v32 = vadd.f32 %v1710_v12, %v1677_v26  ;;  %v1905_v11 = vmul.f32 %v6552_v46, %v7056_v60  ;;  %vm1496_vm8 = vmor %vm1494_vm4, %vm1495_vm7 }
 0x1f0   :  { %v7124_v22 = vld [vmem:[#allocation2 + $0x101] sm:$0xff]  ;;  %v1613_v1 = vmul.f32 %v6443_v35, %v1596_v29  ;;  %v1493_v4 = vadd.f32 %v5128_v54, %v1492_v13  ;;  %v1759_v21 = vmul.f32 %v6492_v61, %v1596_v29  ;;  %v1872_v53 = vadd.f32 %v1856_v3, %v1823_v47  ;;  %v1929_v47 = vld [vmem:[#allocation2 + $0x51] sm:$0xff] }
 0x1f1   :  { %v1662_v5 = vmul.f32 %v6446_v6, %v7124_v22  ;;  %9637 = vst [vmem:[#allocation27_spill] sm:$0xff] %v7134_v55  ;;  %v7144_v59 = vmul.f32 %v6552_v46, %v1892_v48  ;;  %v7148_v27 = vadd.f32 %v7028_v25, %v6762_v31  ;;  %v7152_v63 = vadd.f32 %v7050_v15, %v7005_v23  ;;  %v7154_v7 = vld [vmem:[#allocation2 + $0x102] sm:$0xff] }
 0x1f2   :  { %1577 = vst.msk [vmem:[#allocation2 + $0x111] sm:$0xff] %vm9567_vm3, %v7134_v55  ;;  %v1497_v60 = vsel %vm1496_vm8, %v5128_v54, %v1493_v4  ;;  %v1775_v56 = vadd.f32 %v1759_v21, %v1726_v32  ;;  %v7157_v12 = vadd.f32 %v1899_v39, %v7009_v34  ;;  %v7162_v50 = vperm.slane %v5404_v62, 1  ;;  %v1926_v26 = vld [vmem:[#allocation2 + $0x21] sm:$0xff] }
 0x1f3   :  { %v1502_v31 = vsel %vm7118_vm6, %v1501_v52, %v1497_v60  ;;  %v1678_v25 = vadd.f32 %v1662_v5, %v1613_v1  ;;  %v1916_v23 = vadd.f32 %v1900_v19, %v7023_v24  ;;  %v1917_v15 = vadd.f32 %v1901_v37, %v7025_v9  ;;  %v1930_v37 = vld [vmem:[#allocation2 + $0x61] sm:$0xff]  ;;  %v5405_v1 = vld [vmem:[#allocation2 + $0x31] sm:$0xff] }
 0x1f4   :  { %v7169_v54 = vmul.f32 %v1502_v31, %v6935_v10  ;;  %v1808_v39 = vmul.f32 %v6526_v8, %v7124_v22  ;;  %v1906_v34 = vmul.f32 %v6552_v46, %v1596_v29  ;;  %v7176_v14 = vadd.f32 %v6955_v44, %v7013_v49  ;;  %v1933_v49 = vld [vmem:[#allocation2 + $0x91] sm:$0xff] }
 0x1f5   :  { %v1711_v24 = vmul.f32 %v6463_v16, %v7154_v7  ;;  %v1919_v9 = vadd.f32 %v7040_v20, %v7066_v18  ;;  %v1920_v19 = vadd.f32 %v1904_v42, %v1870_v2  ;;  %v7182_v10 = vadd.f32 %v1905_v11, %v1871_v41 }
 0x1f6   :  { %9638 = vst [vmem:[#allocation28_spill] sm:$0xff] %v7169_v54  ;;  %v1824_v3 = vadd.f32 %v1808_v39, %v1775_v56  ;;  %v1857_v44 = vmul.f32 %v6537_v0, %v7154_v7  ;;  %v1943_v29 = vmul.f32 %v7162_v50, %v1926_v26  ;;  %v7189_v13 = vperm.slane %v5404_v62, 2  ;;  %v1941_v62 = vld [vmem:[#allocation2 + $0x131] sm:$0xff] }
 0x1f7   :  { %1578 = vst.msk [vmem:[#allocation2 + $0x121] sm:$0xff] %vm9567_vm3, %v7169_v54  ;;  %v1727_v48 = vadd.f32 %v1711_v24, %v1678_v25  ;;  %v1944_v20 = vmul.f32 %v5405_v1, %v7162_v50  ;;  %v1945_v18 = vmul.f32 %v7162_v50, %v1928_v43  ;;  %v1946_v2 = vmul.f32 %v7162_v50, %v1929_v47 }
 0x1f8   :  { %v1922_v5 = vadd.f32 %v1906_v34, %v1872_v53  ;;  %v1947_v52 = vmul.f32 %v7162_v50, %v1930_v37  ;;  %v1948_v4 = vmul.f32 %v7162_v50, %v6782_v51  ;;  %v1949_v32 = vmul.f32 %v7162_v50, %v6924_v38 }
 0x1f9   :  { %v1597_v41 = vld [vmem:[#allocation2 + $0x110] sm:$0xff]  ;;  %v1950_v31 = vmul.f32 %v7162_v50, %v1933_v49  ;;  %v1873_v53 = vadd.f32 %v1857_v44, %v1824_v3  ;;  %v1951_v25 = vmul.f32 %v7162_v50, %v6869_v45  ;;  %v1952_v51 = vmul.f32 %v7162_v50, %v6950_v33 }
 0x1fa   :  { %v1646_v42 = vld [vmem:[#allocation2 + $0x111] sm:$0xff]  ;;  %v1614_v21 = vmul.f32 %v6443_v35, %v1597_v41  ;;  %v1760_v56 = vmul.f32 %v6492_v61, %v1597_v41  ;;  %v1953_v38 = vmul.f32 %v7162_v50, %v6990_v57  ;;  %v1955_v39 = vmul.f32 %v7162_v50, %v7124_v22 }
 0x1fb   :  { %v1663_v11 = vmul.f32 %v6446_v6, %v1646_v42  ;;  %v7201_v60 = vld [vmem:[#allocation2 + $0x112] sm:$0xff]  ;;  %v1954_v6 = vmul.f32 %v7162_v50, %v7068_v58  ;;  %v1809_v43 = vmul.f32 %v6526_v8, %v1646_v42  ;;  %v1907_v45 = vmul.f32 %v6552_v46, %v1597_v41 }
 0x1fc   :  { %v1776_v26 = vadd.f32 %v1760_v56, %v1727_v48  ;;  %v1712_v34 = vmul.f32 %v6463_v16, %v7201_v60  ;;  %v7220_v33 = vmul.f32 %v7162_v50, %v1941_v62  ;;  %v1959_v24 = vadd.f32 %v1943_v29, %v7099_v28 }
 0x1fd   :  { %v1679_v35 = vadd.f32 %v1663_v11, %v1614_v21  ;;  %v1960_v37 = vadd.f32 %v1944_v20, %v7104_v30  ;;  %v1961_v58 = vadd.f32 %v1945_v18, %v7108_v36  ;;  %v1962_v22 = vadd.f32 %v1946_v2, %v7148_v27  ;;  %v1975_v20 = vld [vmem:[#allocation2 + $0x22] sm:$0xff]  ;;  %v1976_v18 = vld [vmem:[#allocation2 + $0x32] sm:$0xff] }
 0x1fe   :  { %v1744_v47 = vld [vmem:[#allocation2 + $0x120] sm:$0xff]  ;;  %v1825_v44 = vadd.f32 %v1809_v43, %v1776_v26  ;;  %v1963_v49 = vadd.f32 %v1947_v52, %v7152_v63  ;;  %v1858_v48 = vmul.f32 %v6537_v0, %v7201_v60  ;;  %v1964_v1 = vadd.f32 %v1948_v4, %v7157_v12  ;;  %v1978_v11 = vld [vmem:[#allocation2 + $0x52] sm:$0xff]  ;;  %v9644_v43 = vld [vmem:[#allocation24_spill] sm:$0xff] }
 0x1ff   :  { %v1793_v57 = vld [vmem:[#allocation2 + $0x121] sm:$0xff]  ;;  %v1728_v3 = vadd.f32 %v1712_v34, %v1679_v35  ;;  %v1761_v16 = vmul.f32 %v6492_v61, %v1744_v47  ;;  %v1965_v41 = vadd.f32 %v1949_v32, %v1916_v23  ;;  %v1966_v21 = vadd.f32 %v1950_v31, %v1917_v15  ;;  %v1982_v4 = vld [vmem:[#allocation2 + $0x92] sm:$0xff]  ;;  %v9639_v31 = vld [vmem:[#allocation16_spill] sm:$0xff] }
 0x200   :  { %v1810_v30 = vmul.f32 %v6526_v8, %v1793_v57  ;;  %v1842_v29 = vld [vmem:[#allocation2 + $0x122] sm:$0xff]  ;;  %v1908_v36 = vmul.f32 %v6552_v46, %v1744_v47  ;;  %v1923_v27 = vadd.f32 %v1907_v45, %v1873_v53  ;;  %v1956_v61 = vmul.f32 %v7162_v50, %v1646_v42  ;;  %v9642_v26 = vld [vmem:[#allocation22_spill] sm:$0xff] }
 0x201   :  { %v1777_v28 = vadd.f32 %v1761_v16, %v1728_v3  ;;  %v1967_v63 = vadd.f32 %v1951_v25, %v7176_v14  ;;  %v1968_v2 = vadd.f32 %v1952_v51, %v1919_v9  ;;  %v1969_v52 = vadd.f32 %v1953_v38, %v1920_v19  ;;  %v7248_v25 = vld [vmem:[%s9640_s2] ss:$0 sm:$0xff]  ;;  %v1990_v16 = vld [vmem:[#allocation2 + $0x132] sm:$0xff] }
 0x202   :  { %v1874_v12 = vadd.f32 %v1858_v48, %v1825_v44  ;;  %v1970_v23 = vadd.f32 %v1954_v6, %v7182_v10  ;;  %v1971_v15 = vadd.f32 %v1955_v39, %v1922_v5  ;;  %v1859_v8 = vmul.f32 %v6537_v0, %v1842_v29  ;;  %v9641_v38 = vld [vmem:[#allocation18_spill] sm:$0xff]  ;;  %v9643_v39 = vld [vmem:[#allocation21_spill] sm:$0xff] }
 0x203   :  { %v1826_v56 = vadd.f32 %v1810_v30, %v1777_v28  ;;  %v1992_v46 = vmul.f32 %v7189_v13, %v1975_v20  ;;  %v1993_v32 = vmul.f32 %v7189_v13, %v1976_v18  ;;  %v1994_v42 = vmul.f32 %v7189_v13, %v6708_v40 }
 0x204   :  { %v1924_v62 = vadd.f32 %v1908_v36, %v1874_v12  ;;  %v1957_v14 = vmul.f32 %v7162_v50, %v1793_v57  ;;  %v1972_v9 = vadd.f32 %v1956_v61, %v1923_v27  ;;  %v1995_v19 = vmul.f32 %v7189_v13, %v1978_v11 }
 0x205   :  { %v1996_v10 = vmul.f32 %v7189_v13, %v9639_v31  ;;  %v2008_v5 = vadd.f32 %v1992_v46, %v1959_v24  ;;  %v2009_v53 = vadd.f32 %v1993_v32, %v1960_v37  ;;  %v2010_v0 = vadd.f32 %v1994_v42, %v1961_v58  ;;  %v9645_v24 = vld [vmem:[#allocation25_spill] sm:$0xff] }
 0x206   :  { %v1875_v51 = vadd.f32 %v1859_v8, %v1826_v56  ;;  %v1997_v40 = vmul.f32 %v7189_v13, %v9641_v38  ;;  %v1999_v50 = vmul.f32 %v7189_v13, %v1982_v4  ;;  %v2011_v35 = vadd.f32 %v1995_v19, %v1962_v22 }
 0x207   :  { %v1998_v6 = vmul.f32 %v7189_v13, %v9642_v26  ;;  %v2000_v34 = vmul.f32 %v7189_v13, %v9643_v39  ;;  %v2001_v45 = vmul.f32 %v7189_v13, %v9644_v43  ;;  %v2012_v47 = vadd.f32 %v1996_v10, %v1963_v49 }
 0x208   :  { %v1973_v57 = vadd.f32 %v1957_v14, %v1924_v62  ;;  %v2002_v37 = vmul.f32 %v7189_v13, %v9645_v24  ;;  %v2003_v58 = vmul.f32 %v7189_v13, %v7095_v17  ;;  %v2013_v3 = vadd.f32 %v1997_v40, %v1964_v1 }
 0x209   :  { %v2014_v22 = vadd.f32 %v1998_v6, %v1965_v41  ;;  %v7264_v44 = vadd.f32 %v7248_v25, %v2008_v5  ;;  %v7267_v48 = vadd.f32 %v7248_v25, %v2009_v53  ;;  %v7270_v28 = vadd.f32 %v7248_v25, %v2010_v0 }
 0x20a   :  { %v1925_v49 = vadd.f32 %v7144_v59, %v1875_v51  ;;  %v2004_v30 = vmul.f32 %v7189_v13, %v7154_v7  ;;  %v2015_v36 = vadd.f32 %v1999_v50, %v1966_v21  ;;  %v7276_v17 = vadd.f32 %v7248_v25, %v2011_v35 }
 0x20b   :  { %v2005_v1 = vmul.f32 %v7189_v13, %v7201_v60  ;;  %v2006_v41 = vmul.f32 %v7189_v13, %v1842_v29  ;;  %v2016_v27 = vadd.f32 %v2000_v34, %v1967_v63  ;;  %v7282_v20 = vadd.f32 %v7248_v25, %v2012_v47 }
 0x20c   :  { %v2007_v18 = vmul.f32 %v7189_v13, %v1990_v16  ;;  %v2017_v61 = vadd.f32 %v2001_v45, %v1968_v2  ;;  %v2018_v59 = vadd.f32 %v2002_v37, %v1969_v52  ;;  %v7286_v11 = vadd.f32 %v7248_v25, %v2013_v3 }
 0x20d   :  { %v7289_v7 = vadd.f32 %v7248_v25, %v2014_v22  ;;  %v4883_v21 = vmul.f32 -1.442695, %v7264_v44  ;;  %v4884_v60 = vmul.f32 -1.442695, %v7267_v48  ;;  %v4885_v29 = vmul.f32 -1.442695, %v7270_v28 }
 0x20e   :  { %v1974_v63 = vadd.f32 %v7220_v33, %v1925_v49  ;;  %v2019_v56 = vadd.f32 %v2003_v58, %v1970_v23  ;;  %v7296_v12 = vadd.f32 %v7248_v25, %v2015_v36  ;;  %v4886_v13 = vmul.f32 -1.442695, %v7276_v17 }
 0x20f   :  { %v2020_v2 = vadd.f32 %v2004_v30, %v1971_v15  ;;  %v7300_v52 = vadd.f32 %v7248_v25, %v2016_v27  ;;  %5129 = vpow2.f32 %v4883_v21  ;;  %v4887_v8 = vmul.f32 -1.442695, %v7282_v20 }
 0x210   :  { %v2021_v4 = vadd.f32 %v2005_v1, %v1972_v9  ;;  %v7304_v46 = vadd.f32 %v7248_v25, %v2017_v61  ;;  %5131 = vpow2.f32 %v4884_v60  ;;  %v4888_v33 = vmul.f32 -1.442695, %v7286_v11 }
 0x211   :  { %v2022_v23 = vadd.f32 %v2006_v41, %v1973_v57  ;;  %v7308_v32 = vadd.f32 %v7248_v25, %v2018_v59  ;;  %5133 = vpow2.f32 %v4885_v29  ;;  %v4889_v15 = vmul.f32 -1.442695, %v7289_v7 }
 0x212   :  { %v2023_v42 = vadd.f32 %v2007_v18, %v1974_v63  ;;  %v7312_v62 = vadd.f32 %v7248_v25, %v2019_v56  ;;  %5135 = vpow2.f32 %v4886_v13  ;;  %v4890_v14 = vmul.f32 -1.442695, %v7296_v12 }
 0x213   :  { %v7316_v9 = vadd.f32 %v7248_v25, %v2020_v2  ;;  %5137 = vpow2.f32 %v4887_v8  ;;  %v4891_v19 = vmul.f32 -1.442695, %v7300_v52  ;;  %v7320_v31 = vadd.f32 %v7248_v25, %v2021_v4 }
 0x214   :  { %5139 = vpow2.f32 %v4888_v33  ;;  %v4892_v10 = vmul.f32 -1.442695, %v7304_v46  ;;  %v7324_v53 = vadd.f32 %v7248_v25, %v2022_v23  ;;  %v4893_v0 = vmul.f32 -1.442695, %v7308_v32 }
 0x215   :  { %v5130_v5 = vpop.eup %5129  ;;  %5141 = vpow2.f32 %v4889_v15  ;;  %v7328_v38 = vadd.f32 %v7248_v25, %v2023_v42  ;;  %v4894_v40 = vmul.f32 -1.442695, %v7312_v62  ;;  %v4895_v35 = vmul.f32 -1.442695, %v7316_v9 }
 0x216   :  { %9646 = vst [vmem:[#allocation16_spill] sm:$0xff] %v7324_v53  ;;  %v5132_v51 = vpop.eup %5131  ;;  %5143 = vpow2.f32 %v4890_v14  ;;  %v4896_v6 = vmul.f32 -1.442695, %v7320_v31  ;;  %v4897_v34 = vmul.f32 -1.442695, %v7324_v53  ;;  %v7335_v47 = vadd.f32 1.0, %v5130_v5 }
 0x217   :  { %9647 = vst [vmem:[#allocation18_spill] sm:$0xff] %v7328_v38  ;;  %v5134_v50 = vpop.eup %5133  ;;  %5145 = vpow2.f32 %v4891_v19  ;;  %v4898_v25 = vmul.f32 -1.442695, %v7328_v38  ;;  %v7337_v24 = vadd.f32 1.0, %v5132_v51 }
 0x218   :  { %v5136_v26 = vpop.eup %5135  ;;  %5147 = vpow2.f32 %v4892_v10  ;;  %v7339_v58 = vadd.f32 1.0, %v5134_v50  ;;  %v2119_v1 = vand.u32 2147483648, %v7335_v47  ;;  %v2117_v21 = vand.u32 2147483647, %v7335_v47 }
 0x219   :  { %v5138_v39 = vpop.eup %5137  ;;  %5149 = vpow2.f32 %v4893_v0  ;;  %v7341_v16 = vadd.f32 1.0, %v5136_v26  ;;  %v2134_v18 = vand.u32 2147483648, %v7337_v24  ;;  %v2132_v56 = vand.u32 2147483647, %v7337_v24 }
 0x21a   :  { %v5140_v43 = vpop.eup %5139  ;;  %5151 = vpow2.f32 %v4894_v40  ;;  %v7343_v49 = vadd.f32 1.0, %v5138_v39  ;;  %v2149_v60 = vand.u32 2147483648, %v7339_v58  ;;  %v7358_v63 = vor.u32 1.1754944e-38, %v2119_v1 }
 0x21b   :  { %v5142_v45 = vpop.eup %5141  ;;  %5153 = vpow2.f32 %v4895_v35  ;;  %v7346_v36 = vadd.f32 1.0, %v5140_v43  ;;  %v2164_v13 = vand.u32 2147483648, %v7341_v16  ;;  %v7367_v4 = vor.u32 1.1754944e-38, %v2134_v18 }
 0x21c   :  { %v5144_v57 = vpop.eup %5143  ;;  %5155 = vpow2.f32 %v4896_v6  ;;  %v7350_v27 = vadd.f32 1.0, %v5142_v45  ;;  %v2147_v33 = vand.u32 2147483647, %v7339_v58  ;;  %v2162_v19 = vand.u32 2147483647, %v7341_v16 }
 0x21d   :  { %v5146_v37 = vpop.eup %5145  ;;  %5157 = vpow2.f32 %v4897_v34  ;;  %v7365_v8 = vadd.f32 1.0, %v5144_v57  ;;  %vm2113_vm9 = vweird.f32 %v7335_v47  ;;  %v7389_v40 = vor.u32 1.1754944e-38, %v2149_v60 }
 0x21e   :  { %v5148_v3 = vpop.eup %5147  ;;  %5159 = vpow2.f32 %v4898_v25  ;;  %v7373_v15 = vadd.f32 1.0, %v5146_v37  ;;  %vm2128_vm10 = vweird.f32 %v7337_v24  ;;  %v7398_v39 = vor.u32 1.1754944e-38, %v2164_v13 }
 0x21f   :  { %v5150_v22 = vpop.eup %5149  ;;  %5161 = vrcp.f32 %v7335_v47  ;;  %v7375_v42 = vadd.f32 1.0, %v5148_v3  ;;  %vm2143_vm11 = vweird.f32 %v7339_v58  ;;  %v2177_v57 = vand.u32 2147483647, %v7343_v49 }
 0x220   :  { %v5152_v30 = vpop.eup %5151  ;;  %5163 = vrcp.f32 %v7337_v24  ;;  %v7382_v5 = vadd.f32 1.0, %v5150_v22  ;;  %vm2158_vm12 = vweird.f32 %v7341_v16  ;;  %v2179_v1 = vand.u32 2147483648, %v7343_v49 }
 0x221   :  { %v5154_v41 = vpop.eup %5153  ;;  %5165 = vrcp.f32 %v7339_v58  ;;  %v7384_v0 = vadd.f32 1.0, %v5152_v30  ;;  %vm2173_vm13 = vweird.f32 %v7343_v49  ;;  %vm7431_vm0 = vcmp.eq.f32.partialorder %v2117_v21, 8.507059e+37 }
 0x222   :  { %v5156_v61 = vpop.eup %5155  ;;  %5167 = vrcp.f32 %v7341_v16  ;;  %v7393_v35 = vadd.f32 1.0, %v5154_v41  ;;  %vm7435_vm1 = vcmp.eq.f32.partialorder %v2132_v56, 8.507059e+37  ;;  %vm7441_vm4 = vcmp.eq.f32.partialorder %v2147_v33, 8.507059e+37 }
 0x223   :  { %v5158_v59 = vpop.eup %5157  ;;  %5169 = vrcp.f32 %v7343_v49  ;;  %v7402_v43 = vadd.f32 1.0, %v5156_v61  ;;  %v2180_v55 = vor.u32 1.1754944e-38, %v2179_v1  ;;  %vm7449_vm6 = vcmp.eq.f32.partialorder %v2162_v19, 8.507059e+37 }
 0x224   :  { %v5160_v29 = vpop.eup %5159  ;;  %5171 = vrcp.f32 %v7346_v36  ;;  %v7410_v3 = vadd.f32 1.0, %v5158_v59  ;;  %vm7453_vm7 = vcmp.eq.f32.partialorder %v2177_v57, 8.507059e+37  ;;  %v2194_v19 = vand.u32 2147483648, %v7346_v36 }
 0x225   :  { %v7363_v2 = vpop.eup %5161  ;;  %5173 = vrcp.f32 %v7350_v27  ;;  %v7428_v54 = vadd.f32 1.0, %v5160_v29  ;;  %v2222_v53 = vand.u32 2147483647, %v7365_v8  ;;  %v2269_v1 = vand.u32 2147483648, %v7382_v5 }
 0x226   :  { %v7371_v23 = vpop.eup %5163  ;;  %v2109_v14 = vmul.f32 %v7363_v2, %v7335_v47  ;;  %vm2114_vm15 = vweird.f32 %v7363_v2  ;;  %5175 = vrcp.f32 %v7365_v8 }
 0x227   :  { %v7380_v10 = vpop.eup %5165  ;;  %v2124_v51 = vmul.f32 %v7371_v23, %v7337_v24  ;;  %vm2129_vm2 = vweird.f32 %v7371_v23  ;;  %vm7462_vm8 = vmor %vm2113_vm9, %vm2114_vm15  ;;  %5177 = vrcp.f32 %v7373_v15 }
 0x228   :  { %v7391_v50 = vpop.eup %5167  ;;  %v2110_v26 = vsub.f32 1.0, %v2109_v14  ;;  %v2139_v6 = vmul.f32 %v7380_v10, %v7339_v58  ;;  %vm2144_vm5 = vweird.f32 %v7380_v10  ;;  %vm7474_vm14 = vmor %vm2128_vm10, %vm2129_vm2  ;;  %5179 = vrcp.f32 %v7375_v42 }
 0x229   :  { %v7400_v34 = vpop.eup %5169  ;;  %v2125_v25 = vsub.f32 1.0, %v2124_v51  ;;  %v2154_v45 = vmul.f32 %v7391_v50, %v7341_v16  ;;  %v2192_v51 = vand.u32 2147483647, %v7346_v36  ;;  %vm2159_vm3 = vweird.f32 %v7391_v50  ;;  %vm7484_vm15 = vmor %vm2143_vm11, %vm2144_vm5 }
 0x22a   :  { %v7408_v37 = vpop.eup %5171  ;;  %v2140_v22 = vsub.f32 1.0, %v2139_v6  ;;  %v2169_v30 = vmul.f32 %v7400_v34, %v7343_v49  ;;  %v2111_v18 = vmul.f32 %v7363_v2, %v2110_v26  ;;  %vm2174_vm9 = vweird.f32 %v7400_v34  ;;  %vm7502_vm11 = vmor %vm2158_vm12, %vm2159_vm3 }
 0x22b   :  { %v7416_v41 = vpop.eup %5173  ;;  %v2126_v61 = vmul.f32 %v7371_v23, %v2125_v25  ;;  %v2155_v60 = vsub.f32 1.0, %v2154_v45  ;;  %v2184_v59 = vmul.f32 %v7408_v37, %v7346_v36  ;;  %vm2189_vm10 = vweird.f32 %v7408_v37  ;;  %vm7513_vm5 = vmor %vm2173_vm13, %vm2174_vm9 }
 0x22c   :  { %v2141_v13 = vmul.f32 %v7380_v10, %v2140_v22  ;;  %v2170_v14 = vsub.f32 1.0, %v2169_v30  ;;  %v2199_v6 = vmul.f32 %v7416_v41, %v7350_v27  ;;  %v2112_v38 = vadd.f32 %v7363_v2, %v2111_v18  ;;  %v7568_v25 = vpop.eup %5175 }
 0x22d   :  { %v2156_v45 = vmul.f32 %v7391_v50, %v2155_v60  ;;  %v2185_v22 = vsub.f32 1.0, %v2184_v59  ;;  %v2127_v56 = vadd.f32 %v7371_v23, %v2126_v61  ;;  %vm2204_vm2 = vweird.f32 %v7416_v41 }
 0x22e   :  { %v2171_v29 = vmul.f32 %v7400_v34, %v2170_v14  ;;  %v2200_v21 = vsub.f32 1.0, %v2199_v6  ;;  %v2142_v18 = vadd.f32 %v7380_v10, %v2141_v13  ;;  %v2207_v13 = vand.u32 2147483647, %v7350_v27 }
 0x22f   :  { %v2186_v33 = vmul.f32 %v7408_v37, %v2185_v22  ;;  %v2157_v47 = vadd.f32 %v7391_v50, %v2156_v45  ;;  %v2209_v6 = vand.u32 2147483648, %v7350_v27  ;;  %v2116_v45 = vsel %vm7462_vm8, %v7363_v2, %v2112_v38 }
 0x230   :  { %v2201_v57 = vmul.f32 %v7416_v41, %v2200_v21  ;;  %v2172_v59 = vadd.f32 %v7400_v34, %v2171_v29  ;;  %v2131_v58 = vsel %vm7474_vm14, %v7371_v23, %v2127_v56  ;;  %v2146_v38 = vsel %vm7484_vm15, %v7380_v10, %v2142_v18 }
 0x231   :  { %v2187_v24 = vadd.f32 %v7408_v37, %v2186_v33  ;;  %vm7517_vm14 = vcmp.eq.f32.partialorder %v2192_v51, 8.507059e+37  ;;  %vm2203_vm3 = vweird.f32 %v7350_v27  ;;  %v2161_v23 = vsel %vm7502_vm11, %v7391_v50, %v2157_v47 }
 0x232   :  { %v2202_v29 = vadd.f32 %v7416_v41, %v2201_v57  ;;  %v2176_v49 = vsel %vm7513_vm5, %v7400_v34, %v2172_v59  ;;  %vm9670_vm12 = vweird.f32 %v7346_v36  ;;  %v2195_v51 = vor.u32 1.1754944e-38, %v2194_v19  ;;  %vm7554_vm9 = vmor %vm2203_vm3, %vm2204_vm2 }
 0x233   :  { %vm7533_vm13 = vmor %vm9670_vm12, %vm2189_vm10  ;;  %vm7537_vm8 = vcmp.eq.f32.partialorder %v2207_v13, 8.507059e+37  ;;  %v7544_v50 = vsel %vm7431_vm0, %v7358_v63, %v2116_v45  ;;  %v7549_v34 = vsel %vm7435_vm1, %v7367_v4, %v2131_v58  ;;  %v7562_v63 = vsel %vm7441_vm4, %v7389_v40, %v2146_v38 }
 0x234   :  { %v2191_v36 = vsel %vm7533_vm13, %v7408_v37, %v2187_v24  ;;  %v2206_v4 = vsel %vm7554_vm9, %v7416_v41, %v2202_v29  ;;  %v2210_v26 = vor.u32 1.1754944e-38, %v2209_v6  ;;  %5181 = vrcp.f32 %v7382_v5 }
 0x235   :  { %v7573_v37 = vsel %vm7449_vm6, %v7398_v39, %v2161_v23  ;;  %v7577_v56 = vsel %vm7453_vm7, %v2180_v55, %v2176_v49  ;;  %v2224_v40 = vand.u32 2147483648, %v7365_v8  ;;  %v2239_v30 = vand.u32 2147483648, %v7373_v15  ;;  %v7589_v39 = vpop.eup %5177 }
 0x236   :  { %v7583_v41 = vsel %vm7517_vm14, %v2195_v51, %v2191_v36  ;;  %v2214_v33 = vmul.f32 %v7568_v25, %v7365_v8  ;;  %vm2218_vm0 = vweird.f32 %v7365_v8  ;;  %v7593_v55 = vsel %vm7537_vm8, %v2210_v26, %v2206_v4  ;;  %v7602_v61 = vpop.eup %5179 }
 0x237   :  { %v2254_v60 = vand.u32 2147483648, %v7375_v42  ;;  %5183 = vrcp.f32 %v7384_v0  ;;  %v2229_v19 = vmul.f32 %v7589_v39, %v7373_v15  ;;  %vm2233_vm1 = vweird.f32 %v7373_v15 }
 0x238   :  { %v2215_v18 = vsub.f32 1.0, %v2214_v33  ;;  %v2237_v57 = vand.u32 2147483647, %v7373_v15  ;;  %v2225_v47 = vor.u32 1.1754944e-38, %v2224_v40  ;;  %v7604_v59 = vor.u32 1.1754944e-38, %v2239_v30 }
 0x239   :  { %v2252_v13 = vand.u32 2147483647, %v7375_v42  ;;  %5185 = vrcp.f32 %v7393_v35  ;;  %vm7611_vm4 = vcmp.eq.f32.partialorder %v2222_v53, 8.507059e+37  ;;  %v2230_v45 = vsub.f32 1.0, %v2229_v19 }
 0x23a   :  { %v7608_v14 = vpop.eup %5181  ;;  %v2216_v24 = vmul.f32 %v7568_v25, %v2215_v18  ;;  %v2244_v58 = vmul.f32 %v7602_v61, %v7375_v42  ;;  %vm2248_vm6 = vweird.f32 %v7375_v42  ;;  %v2267_v22 = vand.u32 2147483647, %v7382_v5 }
 0x23b   :  { %vm2219_vm7 = vweird.f32 %v7568_v25  ;;  %v7620_v29 = vor.u32 1.1754944e-38, %v2254_v60  ;;  %v2259_v38 = vmul.f32 %v7608_v14, %v7382_v5  ;;  %vm2263_vm15 = vweird.f32 %v7382_v5 }
 0x23c   :  { %v7625_v2 = vor.u32 1.1754944e-38, %v2269_v1  ;;  %v2217_v16 = vadd.f32 %v7568_v25, %v2216_v24  ;;  %v2231_v23 = vmul.f32 %v7589_v39, %v2230_v45  ;;  %vm2234_vm10 = vweird.f32 %v7589_v39  ;;  %vm7653_vm14 = vmor %vm2218_vm0, %vm2219_vm7 }
 0x23d   :  { %vm7630_vm11 = vcmp.eq.f32.partialorder %v2237_v57, 8.507059e+37  ;;  %v2245_v10 = vsub.f32 1.0, %v2244_v58  ;;  %vm2278_vm2 = vweird.f32 %v7384_v0  ;;  %v7635_v51 = vpop.eup %5183  ;;  %v2260_v27 = vsub.f32 1.0, %v2259_v38  ;;  %vm7674_vm9 = vmor %vm2233_vm1, %vm2234_vm10 }
 0x23e   :  { %v2282_v36 = vand.u32 2147483647, %v7384_v0  ;;  %v2284_v21 = vand.u32 2147483648, %v7384_v0  ;;  %5187 = vrcp.f32 %v7402_v43  ;;  %v2232_v4 = vadd.f32 %v7589_v39, %v2231_v23 }
 0x23f   :  { %v2246_v26 = vmul.f32 %v7602_v61, %v2245_v10  ;;  %vm7642_vm5 = vcmp.eq.f32.partialorder %v2252_v13, 8.507059e+37  ;;  %v2274_v30 = vmul.f32 %v7635_v51, %v7384_v0  ;;  %v2297_v33 = vand.u32 2147483647, %v7393_v35  ;;  %v5186_v53 = vpop.eup %5185 }
 0x240   :  { %vm2249_vm3 = vweird.f32 %v7602_v61  ;;  %v2261_v1 = vmul.f32 %v7608_v14, %v2260_v27  ;;  %vm2264_vm12 = vweird.f32 %v7608_v14  ;;  %vm7660_vm13 = vcmp.eq.f32.partialorder %v2267_v22, 8.507059e+37 }
 0x241   :  { %vm2293_vm8 = vweird.f32 %v7393_v35  ;;  %v2221_v8 = vsel %vm7653_vm14, %v7568_v25, %v2217_v16  ;;  %v2247_v19 = vadd.f32 %v7602_v61, %v2246_v26  ;;  %v2275_v57 = vsub.f32 1.0, %v2274_v30  ;;  %vm7702_vm14 = vmor %vm2248_vm6, %vm2249_vm3 }
 0x242   :  { %v2289_v13 = vmul.f32 %v5186_v53, %v7393_v35  ;;  %v2262_v45 = vadd.f32 %v7608_v14, %v2261_v1  ;;  %vm7679_vm0 = vcmp.eq.f32.partialorder %v2282_v36, 8.507059e+37  ;;  %v2285_v25 = vor.u32 1.1754944e-38, %v2284_v21 }
 0x243   :  { %v2299_v22 = vand.u32 2147483648, %v7393_v35  ;;  %v2236_v38 = vsel %vm7674_vm9, %v7589_v39, %v2232_v4  ;;  %v2276_v16 = vmul.f32 %v7635_v51, %v2275_v57  ;;  %vm2279_vm1 = vweird.f32 %v7635_v51 }
 0x244   :  { %v2290_v15 = vsub.f32 1.0, %v2289_v13  ;;  %vm7689_vm7 = vcmp.eq.f32.partialorder %v2297_v33, 8.507059e+37  ;;  %vm2308_vm10 = vweird.f32 %v7402_v43  ;;  %v5188_v10 = vpop.eup %5187  ;;  %v7696_v27 = vsel %vm7611_vm4, %v2225_v47, %v2221_v8  ;;  %vm7715_vm4 = vmor %vm2263_vm15, %vm2264_vm12 }
 0x245   :  { %vm2294_vm9 = vweird.f32 %v5186_v53  ;;  %v2312_v36 = vand.u32 2147483647, %v7402_v43  ;;  %5189 = vrcp.f32 %v7410_v3  ;;  %v2251_v21 = vsel %vm7702_vm14, %v7602_v61, %v2247_v19  ;;  %vm7731_vm6 = vmor %vm2278_vm2, %vm2279_vm1 }
 0x246   :  { %v2277_v42 = vadd.f32 %v7635_v51, %v2276_v16  ;;  %v2291_v6 = vmul.f32 %v5186_v53, %v2290_v15  ;;  %v2304_v4 = vmul.f32 %v5188_v10, %v7402_v43  ;;  %v2241_v26 = vsel %vm7630_vm11, %v7604_v59, %v2236_v38  ;;  %vm7746_vm15 = vmor %vm2293_vm8, %vm2294_vm9 }
 0x247   :  { %v2266_v61 = vsel %vm7715_vm4, %v7608_v14, %v2262_v45  ;;  %v2300_v30 = vor.u32 1.1754944e-38, %v2299_v22  ;;  %v2314_v33 = vand.u32 2147483648, %v7402_v43  ;;  %v2327_v1 = vand.u32 2147483647, %v7410_v3 }
 0x248   :  { %v2281_v49 = vsel %vm7731_vm6, %v7635_v51, %v2277_v42  ;;  %v2292_v59 = vadd.f32 %v5186_v53, %v2291_v6  ;;  %v2305_v60 = vsub.f32 1.0, %v2304_v4  ;;  %v2256_v14 = vsel %vm7642_vm5, %v7620_v29, %v2251_v21 }
 0x249   :  { %vm7750_vm11 = vcmp.eq.f32.partialorder %v2312_v36, 8.507059e+37  ;;  %v2329_v51 = vand.u32 2147483648, %v7410_v3  ;;  %5191 = vrcp.f32 %v7428_v54  ;;  %v2271_v40 = vsel %vm7660_vm13, %v7625_v2, %v2266_v61 }
 0x24a   :  { %v2296_v29 = vsel %vm7746_vm15, %v5186_v53, %v2292_v59  ;;  %v2306_v35 = vmul.f32 %v5188_v10, %v2305_v60  ;;  %vm2309_vm2 = vweird.f32 %v5188_v10  ;;  %v2286_v57 = vsel %vm7679_vm0, %v2285_v25, %v2281_v49  ;;  %v9717_v60 = vld [vmem:[#allocation16_spill] sm:$0xff] }
 0x24b   :  { %v5190_v19 = vpop.eup %5189  ;;  %v2315_v13 = vor.u32 1.1754944e-38, %v2314_v33  ;;  %vm2323_vm5 = vweird.f32 %v7410_v3  ;;  %v2344_v24 = vand.u32 2147483648, %v7428_v54  ;;  %vm7766_vm3 = vcmp.eq.f32.partialorder %v2327_v1, 8.507059e+37  ;;  %vm2310_vm12 = vmor %vm2308_vm10, %vm2309_vm2 }
 0x24c   :  { %v2307_v45 = vadd.f32 %v5188_v10, %v2306_v35  ;;  %v2319_v22 = vmul.f32 %v5190_v19, %v7410_v3  ;;  %v2342_v2 = vand.u32 2147483647, %v7428_v54  ;;  %v2301_v53 = vsel %vm7689_vm7, %v2300_v30, %v2296_v29  ;;  %v9720_v29 = vld [vmem:[#allocation18_spill] sm:$0xff] }
 0x24d   :  { %v2330_v58 = vor.u32 1.1754944e-38, %v2329_v51  ;;  %v7777_v25 = vmul.f32 %v7544_v50, %v7264_v44  ;;  %v7781_v38 = vmul.f32 %v7549_v34, %v7267_v48  ;;  %vm2324_vm13 = vweird.f32 %v5190_v19 }
 0x24e   :  { %v2311_v16 = vsel %vm2310_vm12, %v5188_v10, %v2307_v45  ;;  %v2320_v15 = vsub.f32 1.0, %v2319_v22  ;;  %vm2338_vm8 = vweird.f32 %v7428_v54  ;;  %v7786_v23 = vmul.f32 %v7562_v63, %v7270_v28  ;;  %vm2325_vm14 = vmor %vm2323_vm5, %vm2324_vm13 }
 0x24f   :  { %v5192_v43 = vpop.eup %5191  ;;  %v2345_v39 = vor.u32 1.1754944e-38, %v2344_v24  ;;  %v7790_v36 = vmul.f32 %v7573_v37, %v7276_v17  ;;  %v7794_v44 = vmul.f32 %v7577_v56, %v7282_v20  ;;  %v7798_v48 = vmul.f32 %v7583_v41, %v7286_v11 }
 0x250   :  { %v2316_v50 = vsel %vm7750_vm11, %v2315_v13, %v2311_v16  ;;  %v2321_v34 = vmul.f32 %v5190_v19, %v2320_v15  ;;  %v2334_v28 = vmul.f32 %v5192_v43, %v7428_v54  ;;  %vm7803_vm0 = vcmp.eq.f32.partialorder %v2342_v2, 8.507059e+37 }
 0x251   :  { %v7809_v17 = vmul.f32 %v7593_v55, %v7289_v7  ;;  %v7812_v20 = vmul.f32 %v2241_v26, %v7300_v52  ;;  %v7815_v11 = vmul.f32 %v2256_v14, %v7304_v46  ;;  %v7818_v37 = vmul.f32 %v2271_v40, %v7308_v32 }
 0x252   :  { %vm9707_vm1 = vcmask 130048   ;;  %v2322_v41 = vadd.f32 %v5190_v19, %v2321_v34  ;;  %v2335_v10 = vsub.f32 1.0, %v2334_v28  ;;  %vm2339_vm9 = vweird.f32 %v5192_v43 }
 0x253   :  { %v2364_v56 = vsel %vm9707_vm1, %v7777_v25, 0.0  ;;  %vm9708_vm7 = vmmov %vm9707_vm1  ;;  %v7831_v52 = vmul.f32 %v7696_v27, %v7296_v12  ;;  %v7834_v46 = vmul.f32 %v2286_v57, %v7312_v62  ;;  %v7837_v42 = vmul.f32 %v2301_v53, %v7316_v9 }
 0x254   :  { %v2365_v21 = vsel %vm9708_vm7, %v7781_v38, 0.0  ;;  %vm9709_vm10 = vmmov %vm9707_vm1  ;;  %v2326_v55 = vsel %vm2325_vm14, %v5190_v19, %v2322_v41  ;;  %v2336_v47 = vmul.f32 %v5192_v43, %v2335_v10  ;;  %v7855_v5 = vmul.f32 %v2316_v50, %v7320_v31 }
 0x255   :  { %v2367_v7 = vsel %vm9709_vm10, %v7786_v23, 0.0  ;;  %v2366_v32 = vadd.f32 %v2365_v21, %v2364_v56  ;;  %vm9710_vm4 = vmmov %vm9707_vm1  ;;  %v2331_v3 = vsel %vm7766_vm3, %v2330_v58, %v2326_v55  ;;  %v5436_v8 = vmov 64.0  }
 0x256   :  { %v2369_v6 = vsel %vm9710_vm4, %v7790_v36, 0.0  ;;  %vm9711_vm6 = vmmov %vm9707_vm1  ;;  %v2337_v27 = vadd.f32 %v5192_v43, %v2336_v47  ;;  %v7862_v1 = vmul.f32 %v2331_v3, %v9717_v60  ;;  %5193 = vrcp.f32 %v5436_v8 }
 0x257   :  { %v2368_v4 = vadd.f32 %v2367_v7, %v2366_v32  ;;  %v2385_v12 = vsel %vm9711_vm6, %v7812_v20, 0.0  ;;  %vm9712_vm15 = vmmov %vm9707_vm1  ;;  %v2394_v57 = vsel %vm9707_vm1, %v7855_v5, 0.0  ;;  %vm2476_vm6 = vcmask 1043456  }
 0x258   :  { %v2386_v62 = vsel %vm9712_vm15, %v7815_v11, 0.0  ;;  %vm9713_vm11 = vmmov %vm9707_vm1 }
 0x259   :  { %v2371_v26 = vsel %vm9713_vm11, %v7794_v44, 0.0  ;;  %v2387_v61 = vadd.f32 %v2386_v62, %v2385_v12  ;;  %vm9714_vm2 = vmmov %vm9707_vm1  ;;  %v2370_v30 = vadd.f32 %v2369_v6, %v2368_v4 }
 0x25a   :  { %v2388_v9 = vsel %vm9714_vm2, %v7818_v37, 0.0  ;;  %vm2340_vm5 = vmor %vm2338_vm8, %vm2339_vm9  ;;  %vm2423_vm9 = vcmask 1041409  }
 0x25b   :  { %vm9715_vm3 = vmmov %vm9707_vm1  ;;  %v2341_v59 = vsel %vm2340_vm5, %v5192_v43, %v2337_v27  ;;  %v2389_v14 = vadd.f32 %v2388_v9, %v2387_v61  ;;  %v2372_v54 = vadd.f32 %v2371_v26, %v2370_v30  ;;  %v5055_v26 = vld [vmem:[%s9725_s7] ss:$0 sm:$0xff] }
 0x25c   :  { %v2373_v33 = vsel %vm9715_vm3, %v7798_v48, 0.0  ;;  %vm9716_vm12 = vmmov %vm9707_vm1  ;;  %v2346_v0 = vsel %vm7803_vm0, %v2345_v39, %v2341_v59  ;;  %v5194_v2 = vpop.eup %5193  ;;  %v2467_v61 = vld [vmem:[%s9726_s5] sm:$0xf]  ;;  %vm2472_vm3 = vcmask 31744  }
 0x25d   :  { %v2390_v49 = vsel %vm9716_vm12, %v7834_v46, 0.0  ;;  %vm9718_vm13 = vmmov %vm9707_vm1  ;;  %v7871_v35 = vmul.f32 %v2346_v0, %v9720_v29  ;;  %v2374_v19 = vadd.f32 %v2373_v33, %v2372_v54  ;;  %v2407_v15 = vmul.f32 64.0, %v5194_v2  ;;  %4901 = vmatpush.msk.msrb.mxu2 %vm2476_vm6, %v2467_v61  ;;  %v5036_v33 = vld [vmem:[%s9727_s8] sm:$0xff] }
 0x25e   :  { %v2392_v31 = vsel %vm9718_vm13, %v7837_v42, 0.0  ;;  %vm9719_vm8 = vmmov %vm9707_vm1  ;;  %v2391_v40 = vadd.f32 %v2390_v49, %v2389_v14  ;;  %vm2411_vm14 = vweird.f32 %v5194_v2  ;;  %2592 = vmatpush.bf16.msrb.mxu3 %v5036_v33 }
 0x25f   :  { %v2375_v51 = vsel %vm9719_vm8, %v7809_v17, 0.0  ;;  %vm9721_vm7 = vmmov %vm9707_vm1  ;;  %v2408_v50 = vsub.f32 1.0, %v2407_v15  ;;  %v5037_v15 = vld [vmem:[%s9518_s14] sm:$0xff] }
 0x260   :  { %v2377_v13 = vsel %vm9721_vm7, %v7831_v52, 0.0  ;;  %v2393_v24 = vadd.f32 %v2392_v31, %v2391_v40  ;;  %v2376_v45 = vadd.f32 %v2375_v51, %v2374_v19  ;;  %vm9722_vm0 = vmmov %vm9707_vm1  ;;  %2701 = vmatpush.bf16.msrb.mxu1 %v5037_v15 }
 0x261   :  { %v2396_v22 = vsel %vm9722_vm0, %v7862_v1, 0.0  ;;  %vm9723_vm10 = vmmov %vm9722_vm0  ;;  %v2409_v56 = vmul.f32 %v5194_v2, %v2408_v50 }
 0x262   :  { %v2395_v18 = vadd.f32 %v2394_v57, %v2393_v24  ;;  %v2378_v53 = vadd.f32 %v2377_v13, %v2376_v45  ;;  %v2398_v58 = vsel %vm9723_vm10, %v7871_v35, 0.0  ;;  %vm9724_vm4 = vmmov %vm9722_vm0  ;;  %v5056_v24 = vld [vmem:[%s9728_s11] ss:$0 sm:$0xff]  ;;  %s4730_s11 = sshll.u32 %s9532_s28, 4  ;;  %s4731_s11 = int_to_ptr.hbm [resolvable:$true] %s4730_s11 }
 0x263   :  { %v2410_v32 = vadd.f32 %v5194_v2, %v2409_v56  ;;  %vm9729_vm7 = vmmov %vm9722_vm0 }
 0x264   :  { %v2397_v16 = vadd.f32 %v2396_v22, %v2395_v18  ;;  %v2379_v43 = vrot.slane %v2378_v53, 4  ;;  %vm9730_vm10 = vmmov %vm9722_vm0 }
 0x265   :  { %v7881_v3 = vsel %vm2411_vm14, %v5194_v2, %v2410_v32  ;;  %vm9731_vm14 = vmmov %vm9722_vm0 }
 0x266   :  { %v2399_v39 = vadd.f32 %v2398_v58, %v2397_v16  ;;  %v2380_v34 = vadd.f32 %v2379_v43, %v2378_v53 }
 0x268   :  { %v2400_v28 = vrot.slane %v2399_v39, 4  ;;  %v2381_v63 = vrot.slane %v2380_v34, 2 }
 0x26a   :  { %v2401_v41 = vadd.f32 %v2400_v28, %v2399_v39  ;;  %v2382_v10 = vadd.f32 %v2381_v63, %v2380_v34 }
 0x26c   :  { %v2402_v21 = vrot.slane %v2401_v41, 2  ;;  %v2383_v7 = vrot.slane %v2382_v10, 1 }
 0x26e   :  { %v2403_v55 = vadd.f32 %v2402_v21, %v2401_v41  ;;  %v2384_v47 = vadd.f32 %v2383_v7, %v2382_v10 }
 0x270   :  { %v2404_v6 = vrot.slane %v2403_v55, 1  ;;  %v2413_v12 = vmul.f32 %v7881_v3, %v2384_v47 }
 0x272   :  { %v2405_v4 = vadd.f32 %v2404_v6, %v2403_v55 }
 0x274   :  { %v2414_v62 = vmul.f32 %v7881_v3, %v2405_v4 }
 0x276   :  { %v2424_v27 = vsel %vm2423_vm9, %v2414_v62, %v2413_v12 }
 0x277   :  { %4899 = vmatmul.msk.f32.vlgmr.msra.gmra.mxu2 %vm9724_vm4, %v2424_v27  ;;  %vm9732_vm4 = vmmov %vm9722_vm0 }
 0x2fa   :  { %v2444_v9 = vpop.f32.mrf.mxu2 }
 0x2fb   :  { %v2445_v30 = vadd.f32 %v5055_v26, %v2444_v9 }
 0x2fd   :  { %v4900_v49 = vmul.f32 -1.442695, %v2445_v30 }
 0x2ff   :  { %5195 = vpow2.f32 %v4900_v49 }
 0x305   :  { %v5196_v59 = vpop.eup %5195 }
 0x306   :  { %v2450_v60 = vadd.f32 1.0, %v5196_v59 }
 0x308   :  { %5197 = vrcp.f32 %v2450_v60  ;;  %v2462_v31 = vand.u32 2147483648, %v2450_v60  ;;  %v2460_v51 = vand.u32 2147483647, %v2450_v60  ;;  %vm2456_vm11 = vweird.f32 %v2450_v60 }
 0x30a   :  { %v2463_v29 = vor.u32 1.1754944e-38, %v2462_v31  ;;  %vm2461_vm5 = vcmp.eq.f32.partialorder %v2460_v51, 8.507059e+37 }
 0x30e   :  { %v5198_v14 = vpop.eup %5197 }
 0x30f   :  { %v2452_v0 = vmul.f32 %v5198_v14, %v2450_v60  ;;  %vm2457_vm15 = vweird.f32 %v5198_v14 }
 0x310   :  { %vm2458_vm2 = vmor %vm2456_vm11, %vm2457_vm15 }
 0x311   :  { %v2453_v54 = vsub.f32 1.0, %v2452_v0  ;;  %vm9733_vm15 = vmmov %vm9722_vm0  ;;  %v9737_v0 = vld [vmem:[#allocation9_spill] sm:$0xff] }
 0x312   :  { %vm9734_vm11 = vmmov %vm9722_vm0 }
 0x313   :  { %v2454_v8 = vmul.f32 %v5198_v14, %v2453_v54 }
 0x315   :  { %v2455_v40 = vadd.f32 %v5198_v14, %v2454_v8 }
 0x317   :  { %v2459_v19 = vsel %vm2458_vm2, %v5198_v14, %v2455_v40  ;;  %vm9735_vm2 = vmmov %vm9722_vm0  ;;  %v9736_v14 = vld [vmem:[#allocation10_spill] sm:$0xff]  ;;  %v9739_v40 = vld [vmem:[#allocation7_spill] sm:$0xff] }
 0x318   :  { %v2464_v57 = vsel %vm2461_vm5, %v2463_v29, %v2459_v19  ;;  %vm9738_vm5 = vmmov %vm9722_vm0  ;;  %v9740_v19 = vld [vmem:[#allocation8_spill] sm:$0xff] }
 0x319   :  { %v2466_v13 = vmul.f32 %v2464_v57, %v2445_v30 }
 0x31b   :  { %4902 = vmatmul.msk.f32.vlgmr.msrb.gmra.mxu2 %vm2472_vm3, %v2466_v13 }
 0x39e   :  { %v2497_v45 = vpop.f32.mrf.mxu2 }
 0x39f   :  { %v2498_v22 = vadd.f32 %v5056_v24, %v2497_v45 }
 0x3a1   :  { %v4903_v18 = vmul.f32 -1.442695, %v2498_v22 }
 0x3a3   :  { %5199 = vpow2.f32 %v4903_v18 }
 0x3a9   :  { %v5200_v2 = vpop.eup %5199 }
 0x3aa   :  { %v2503_v53 = vadd.f32 1.0, %v5200_v2  ;;  %v9742_v2 = vld [vmem:[#allocation11_spill] sm:$0xff] }
 0x3ac   :  { %5201 = vrcp.f32 %v2503_v53  ;;  %v2515_v39 = vand.u32 2147483648, %v2503_v53  ;;  %v2513_v34 = vand.u32 2147483647, %v2503_v53  ;;  %vm2509_vm13 = vweird.f32 %v2503_v53 }
 0x3ae   :  { %v2516_v63 = vor.u32 1.1754944e-38, %v2515_v39  ;;  %vm2514_vm1 = vcmp.eq.f32.partialorder %v2513_v34, 8.507059e+37 }
 0x3b2   :  { %v5202_v58 = vpop.eup %5201 }
 0x3b3   :  { %v2505_v16 = vmul.f32 %v5202_v58, %v2503_v53  ;;  %vm2510_vm12 = vweird.f32 %v5202_v58 }
 0x3b4   :  { %vm2511_vm8 = vmor %vm2509_vm13, %vm2510_vm12 }
 0x3b5   :  { %v2506_v43 = vsub.f32 1.0, %v2505_v16  ;;  %vm9741_vm12 = vmmov %vm9722_vm0 }
 0x3b6   :  { %vm9744_vm13 = vmmov %vm9722_vm0 }
 0x3b7   :  { %v2507_v50 = vmul.f32 %v5202_v58, %v2506_v43 }
 0x3b9   :  { %v2508_v28 = vadd.f32 %v5202_v58, %v2507_v50 }
 0x3bb   :  { %v2512_v56 = vsel %vm2511_vm8, %v5202_v58, %v2508_v28  ;;  %v9743_v58 = vld [vmem:[#allocation12_spill] sm:$0xff]  ;;  %v9745_v28 = vld [vmem:[#allocation13_spill] sm:$0xff]  ;;  %vm9747_vm8 = vmmov %vm9722_vm0 }
 0x3bc   :  { %v2517_v41 = vsel %vm2514_vm1, %v2516_v63, %v2512_v56  ;;  %v9746_v56 = vld [vmem:[#allocation14_spill] sm:$0xff]  ;;  %vm9750_vm1 = vmmov %vm9722_vm0 }
 0x3bd   :  { %v2521_v10 = vperm.slane %v2517_v41, 0 }
 0x3bf   :  { %v2525_v21 = vmul.f32 %v2521_v10, %v7777_v25  ;;  %v2526_v7 = vmul.f32 %v2521_v10, %v7781_v38  ;;  %v2527_v55 = vmul.f32 %v2521_v10, %v7786_v23  ;;  %v2528_v47 = vmul.f32 %v2521_v10, %v7790_v36 }
 0x3c0   :  { %v2529_v4 = vmul.f32 %v2521_v10, %v7794_v44  ;;  %v2530_v12 = vmul.f32 %v2521_v10, %v7798_v48  ;;  %v2531_v25 = vmul.f32 %v2521_v10, %v7809_v17  ;;  %v2532_v38 = vmul.f32 %v2521_v10, %v7831_v52 }
 0x3c1   :  { %v2541_v32 = vpack.c.bf16 %v2526_v7, %v2525_v21  ;;  %v2542_v6 = vpack.c.bf16 %v2528_v47, %v2527_v55  ;;  %v2520_v23 = vrot.slane %v2517_v41, 1  ;;  %v9748_v47 = vld [vmem:[#allocation15_spill] sm:$0xff] }
 0x3c2   :  { %v2543_v62 = vpack.c.bf16 %v2530_v12, %v2529_v4  ;;  %v2544_v27 = vpack.c.bf16 %v2532_v38, %v2531_v25  ;;  %v9749_v4 = vld [vmem:[#allocation17_spill] sm:$0xff] }
 0x3c3   :  { %4908 = vmatmul.msk.bf16.vlgmr.msrb.gmra.mxu3 %vm9729_vm7, %v2541_v32  ;;  %v2522_v26 = vperm.slane %v2520_v23, 0  ;;  %vm9753_vm7 = vmmov %vm9722_vm0 }
 0x3c5   :  { %v2533_v36 = vmul.f32 %v2522_v26, %v7812_v20  ;;  %v2534_v61 = vmul.f32 %v2522_v26, %v7815_v11  ;;  %v2535_v44 = vmul.f32 %v2522_v26, %v7818_v37  ;;  %v2536_v48 = vmul.f32 %v2522_v26, %v7834_v46  ;;  %v5057_v46 = vld [vmem:[%s9517_s13] ss:$0 sm:$0xff] }
 0x3c6   :  { %v2537_v17 = vmul.f32 %v2522_v26, %v7837_v42  ;;  %v2538_v52 = vmul.f32 %v2522_v26, %v7855_v5  ;;  %v2539_v20 = vmul.f32 %v2522_v26, %v7862_v1  ;;  %v2540_v11 = vmul.f32 %v2522_v26, %v7871_v35  ;;  %v9751_v26 = vld [vmem:[#allocation19_spill] sm:$0xff] }
 0x3c7   :  { %v2545_v9 = vpack.c.bf16 %v2534_v61, %v2533_v36  ;;  %v2546_v30 = vpack.c.bf16 %v2536_v48, %v2535_v44  ;;  %v9752_v61 = vld [vmem:[#allocation20_spill] sm:$0xff] }
 0x3c8   :  { %v2547_v33 = vpack.c.bf16 %v2538_v52, %v2537_v17  ;;  %v2548_v49 = vpack.c.bf16 %v2540_v11, %v2539_v20  ;;  %v9755_v11 = vld [vmem:[#allocation26_spill] sm:$0xff] }
 0x3d3   :  { %4909 = vmatmul.msk.bf16.gmra.mxu3 %vm9722_vm0, %v2542_v6 }
 0x3e3   :  { %4910 = vmatmul.msk.bf16.gmra.mxu3 %vm9730_vm10, %v2543_v62  ;;  %vm9758_vm10 = vmmov %vm9722_vm0 }
 0x3f3   :  { %4911 = vmatmul.msk.bf16.gmra.mxu3 %vm9731_vm14, %v2544_v27  ;;  %vm3063_vm14 = vcmask 523264  }
 0x403   :  { %4912 = vmatmul.msk.bf16.gmra.mxu3 %vm9732_vm4, %v2545_v9  ;;  %vm3065_vm4 = vcmask 517120  }
 0x413   :  { %4913 = vmatmul.msk.bf16.gmra.mxu3 %vm9733_vm15, %v2546_v30 }
 0x423   :  { %4914 = vmatmul.msk.bf16.gmra.mxu3 %vm9734_vm11, %v2547_v33  ;;  %v9754_v33 = vld [vmem:[#allocation23_spill] sm:$0xff] }
 0x433   :  { %4915 = vmatmul.msk.bf16.gmra.mxu3 %vm9735_vm2, %v2548_v49 }
 0x446   :  { %v2594_v37 = vpop.f32.mrf.mxu3 }
 0x447   :  { %v2595_v59 = vadd.f32 %v5057_v46, %v2594_v37 }
 0x449   :  { %v2634_v5 = vadd.f32 %v2595_v59, %v9736_v14 }
 0x44e   :  { %v2596_v60 = vpop.f32.mrf.mxu3 }
 0x44f   :  { %v2597_v42 = vadd.f32 %v5057_v46, %v2596_v60 }
 0x451   :  { %v2635_v54 = vadd.f32 %v2597_v42, %v9737_v0 }
 0x453   :  { %v2650_v31 = vpack.c.bf16 %v2635_v54, %v2634_v5  ;;  %v9756_v5 = vld [vmem:[#allocation27_spill] sm:$0xff]  ;;  %v9757_v54 = vld [vmem:[#allocation28_spill] sm:$0xff] }
 0x455   :  { %4920 = vmatmul.msk.bf16.vlgmr.msrb.gmra.mxu1 %vm9738_vm5, %v2650_v31 }
 0x456   :  { %v2599_v1 = vpop.f32.mrf.mxu3 }
 0x457   :  { %v2600_v35 = vadd.f32 %v5057_v46, %v2599_v1 }
 0x459   :  { %v2636_v29 = vadd.f32 %v2600_v35, %v9739_v40  ;;  %v7958_v35 = vld [vmem:[%s9519_s15] ss:$0 sm:$0xff] }
 0x45e   :  { %v2601_v8 = vpop.f32.mrf.mxu3 }
 0x45f   :  { %v2602_v51 = vadd.f32 %v5057_v46, %v2601_v8 }
 0x461   :  { %v2637_v57 = vadd.f32 %v2602_v51, %v9740_v19  ;;  %v9759_v51 = vmov 0.0  }
 0x462   :  { %3064 = vst.msk [vmem:[#allocation3] sm:$0xff] %vm3063_vm14, %v9759_v51 }
 0x463   :  { %v2651_v13 = vpack.c.bf16 %v2637_v57, %v2636_v29  ;;  %3066 = vst.msk [vmem:[#allocation3 + $0x8] sm:$0x3] %vm3065_vm4, %v9759_v51 }
 0x464   :  { %3067 = vst.msk [vmem:[#allocation3 + $0x10] sm:$0xff] %vm3063_vm14, %v9759_v51 }
 0x465   :  { %4921 = vmatmul.msk.bf16.gmra.mxu1 %vm9741_vm12, %v2651_v13  ;;  %3068 = vst.msk [vmem:[#allocation3 + $0x18] sm:$0x3] %vm3065_vm4, %v9759_v51 }
 0x466   :  { %v2604_v24 = vpop.f32.mrf.mxu3  ;;  %3069 = vst.msk [vmem:[#allocation3 + $0x20] sm:$0xff] %vm3063_vm14, %v9759_v51 }
 0x467   :  { %v2605_v45 = vadd.f32 %v5057_v46, %v2604_v24  ;;  %3070 = vst.msk [vmem:[#allocation3 + $0x28] sm:$0x3] %vm3065_vm4, %v9759_v51 }
 0x468   :  { %3071 = vst.msk [vmem:[#allocation3 + $0x30] sm:$0xff] %vm3063_vm14, %v9759_v51 }
 0x469   :  { %v2638_v53 = vadd.f32 %v2605_v45, %v9742_v2  ;;  %3072 = vst.msk [vmem:[#allocation3 + $0x38] sm:$0x3] %vm3065_vm4, %v9759_v51 }
 0x46a   :  { %3073 = vst.msk [vmem:[#allocation3 + $0x40] sm:$0xff] %vm3063_vm14, %v9759_v51 }
 0x46b   :  { %3074 = vst.msk [vmem:[#allocation3 + $0x48] sm:$0x3] %vm3065_vm4, %v9759_v51 }
 0x46c   :  { %3075 = vst.msk [vmem:[#allocation3 + $0x50] sm:$0xff] %vm3063_vm14, %v9759_v51 }
 0x46d   :  { %3076 = vst.msk [vmem:[#allocation3 + $0x58] sm:$0x3] %vm3065_vm4, %v9759_v51 }
 0x46e   :  { %v2606_v22 = vpop.f32.mrf.mxu3  ;;  %3077 = vst.msk [vmem:[#allocation3 + $0x60] sm:$0xff] %vm3063_vm14, %v9759_v51 }
 0x46f   :  { %v2607_v18 = vadd.f32 %v5057_v46, %v2606_v22  ;;  %3078 = vst.msk [vmem:[#allocation3 + $0x68] sm:$0x3] %vm3065_vm4, %v9759_v51 }
 0x470   :  { %3079 = vst.msk [vmem:[#allocation3 + $0x70] sm:$0xff] %vm3063_vm14, %v9759_v51 }
 0x471   :  { %v2639_v16 = vadd.f32 %v2607_v18, %v9743_v58  ;;  %3080 = vst.msk [vmem:[#allocation3 + $0x78] sm:$0x3] %vm3065_vm4, %v9759_v51 }
 0x472   :  { %3081 = vst.msk [vmem:[#allocation3 + $0x80] sm:$0xff] %vm3063_vm14, %v9759_v51 }
 0x473   :  { %v2652_v15 = vpack.c.bf16 %v2639_v16, %v2638_v53  ;;  %3082 = vst.msk [vmem:[#allocation3 + $0x88] sm:$0x3] %vm3065_vm4, %v9759_v51 }
 0x474   :  { %3083 = vst.msk [vmem:[#allocation3 + $0x90] sm:$0xff] %vm3063_vm14, %v9759_v51 }
 0x475   :  { %4922 = vmatmul.msk.bf16.gmra.mxu1 %vm9744_vm13, %v2652_v15  ;;  %3084 = vst.msk [vmem:[#allocation3 + $0x98] sm:$0x3] %vm3065_vm4, %v9759_v51 }
 0x476   :  { %v2609_v43 = vpop.f32.mrf.mxu3  ;;  %3085 = vst.msk [vmem:[#allocation3 + $0xa0] sm:$0xff] %vm3063_vm14, %v9759_v51 }
 0x477   :  { %v2610_v39 = vadd.f32 %v5057_v46, %v2609_v43  ;;  %3086 = vst.msk [vmem:[#allocation3 + $0xa8] sm:$0x3] %vm3065_vm4, %v9759_v51 }
 0x478   :  { %3087 = vst.msk [vmem:[#allocation3 + $0xb0] sm:$0xff] %vm3063_vm14, %v9759_v51 }
 0x479   :  { %v2640_v63 = vadd.f32 %v2610_v39, %v9745_v28  ;;  %3088 = vst.msk [vmem:[#allocation3 + $0xb8] sm:$0x3] %vm3065_vm4, %v9759_v51 }
 0x47a   :  { %3089 = vst.msk [vmem:[#allocation3 + $0xc0] sm:$0xff] %vm3063_vm14, %v9759_v51 }
 0x47b   :  { %3090 = vst.msk [vmem:[#allocation3 + $0xc8] sm:$0x3] %vm3065_vm4, %v9759_v51 }
 0x47c   :  { %3091 = vst.msk [vmem:[#allocation3 + $0xd0] sm:$0xff] %vm3063_vm14, %v9759_v51 }
 0x47d   :  { %3092 = vst.msk [vmem:[#allocation3 + $0xd8] sm:$0x3] %vm3065_vm4, %v9759_v51 }
 0x47e   :  { %v2611_v50 = vpop.f32.mrf.mxu3  ;;  %3093 = vst.msk [vmem:[#allocation3 + $0xe0] sm:$0xff] %vm3063_vm14, %v9759_v51 }
 0x47f   :  { %v2612_v34 = vadd.f32 %v5057_v46, %v2611_v50  ;;  %3094 = vst.msk [vmem:[#allocation3 + $0xe8] sm:$0x3] %vm3065_vm4, %v9759_v51 }
 0x480   :  { %3095 = vst.msk [vmem:[#allocation3 + $0xf0] sm:$0xff] %vm3063_vm14, %v9759_v51 }
 0x481   :  { %v2641_v41 = vadd.f32 %v2612_v34, %v9746_v56  ;;  %3096 = vst.msk [vmem:[#allocation3 + $0xf8] sm:$0x3] %vm3065_vm4, %v9759_v51 }
 0x482   :  { %3097 = vst.msk [vmem:[#allocation3 + $0x100] sm:$0xff] %vm3063_vm14, %v9759_v51 }
 0x483   :  { %v2653_v10 = vpack.c.bf16 %v2641_v41, %v2640_v63  ;;  %3098 = vst.msk [vmem:[#allocation3 + $0x108] sm:$0x3] %vm3065_vm4, %v9759_v51 }
 0x484   :  { %3099 = vst.msk [vmem:[#allocation3 + $0x110] sm:$0xff] %vm3063_vm14, %v9759_v51 }
 0x485   :  { %4923 = vmatmul.msk.bf16.gmra.mxu1 %vm9747_vm8, %v2653_v10  ;;  %3100 = vst.msk [vmem:[#allocation3 + $0x118] sm:$0x3] %vm3065_vm4, %v9759_v51 }
 0x486   :  { %v2614_v21 = vpop.f32.mrf.mxu3  ;;  %3101 = vst.msk [vmem:[#allocation3 + $0x120] sm:$0xff] %vm3063_vm14, %v9759_v51 }
 0x487   :  { %v2615_v7 = vadd.f32 %v5057_v46, %v2614_v21  ;;  %3102 = vst.msk [vmem:[#allocation3 + $0x128] sm:$0x3] %vm3065_vm4, %v9759_v51 }
 0x488   :  { %3103 = vst.msk [vmem:[#allocation3 + $0x130] sm:$0xff] %vm3063_vm14, %v9759_v51 }
 0x489   :  { %v2642_v6 = vadd.f32 %v2615_v7, %v9748_v47  ;;  %3104 = vst.msk [vmem:[#allocation3 + $0x138] sm:$0x3] %vm3065_vm4, %v9759_v51 }
 0x48e   :  { %v2616_v32 = vpop.f32.mrf.mxu3 }
 0x48f   :  { %v2617_v55 = vadd.f32 %v5057_v46, %v2616_v32 }
 0x491   :  { %v2643_v12 = vadd.f32 %v2617_v55, %v9749_v4 }
 0x493   :  { %v2654_v62 = vpack.c.bf16 %v2643_v12, %v2642_v6 }
 0x495   :  { %4924 = vmatmul.msk.bf16.gmra.mxu1 %vm9750_vm1, %v2654_v62 }
 0x496   :  { %v2619_v25 = vpop.f32.mrf.mxu3 }
 0x497   :  { %v2620_v38 = vadd.f32 %v5057_v46, %v2619_v25 }
 0x499   :  { %v2644_v36 = vadd.f32 %v2620_v38, %v9751_v26 }
 0x49e   :  { %v2621_v27 = vpop.f32.mrf.mxu3 }
 0x49f   :  { %v2622_v23 = vadd.f32 %v5057_v46, %v2621_v27 }
 0x4a1   :  { %v2645_v9 = vadd.f32 %v2622_v23, %v9752_v61 }
 0x4a3   :  { %v2655_v44 = vpack.c.bf16 %v2645_v9, %v2644_v36 }
 0x4a5   :  { %4925 = vmatmul.msk.bf16.gmra.mxu1 %vm9753_vm7, %v2655_v44 }
 0x4a6   :  { %v2624_v48 = vpop.f32.mrf.mxu3 }
 0x4a7   :  { %v2625_v30 = vadd.f32 %v5057_v46, %v2624_v48 }
 0x4a9   :  { %v2646_v20 = vadd.f32 %v2625_v30, %v9754_v33 }
 0x4ae   :  { %v2626_v17 = vpop.f32.mrf.mxu3 }
 0x4af   :  { %v2627_v52 = vadd.f32 %v5057_v46, %v2626_v17 }
 0x4b1   :  { %v2647_v49 = vadd.f32 %v2627_v52, %v9755_v11 }
 0x4b3   :  { %v2656_v37 = vpack.c.bf16 %v2647_v49, %v2646_v20 }
 0x4b5   :  { %4926 = vmatmul.msk.bf16.gmra.mxu1 %vm9722_vm0, %v2656_v37 }
 0x4b6   :  { %v2629_v59 = vpop.f32.mrf.mxu3 }
 0x4b7   :  { %v2630_v60 = vadd.f32 %v5057_v46, %v2629_v59 }
 0x4b9   :  { %v2648_v0 = vadd.f32 %v2630_v60, %v9756_v5 }
 0x4be   :  { %v2631_v42 = vpop.f32.mrf.mxu3 }
 0x4bf   :  { %v2632_v14 = vadd.f32 %v5057_v46, %v2631_v42 }
 0x4c1   :  { %v2649_v31 = vadd.f32 %v2632_v14, %v9757_v54 }
 0x4c3   :  { %v2657_v1 = vpack.c.bf16 %v2649_v31, %v2648_v0 }
 0x4c5   :  { %4927 = vmatmul.msk.bf16.gmra.mxu1 %vm9758_vm10, %v2657_v1 }
 0x4d2   :  { %v2703_v8 = vpop.f32.mrf.mxu1 }
 0x4d3   :  { %v2704_v46 = vadd.f32 %v7958_v35, %v2703_v8 }
 0x4d5   :  { %v4928_v40 = vmul.f32 -1.442695, %v2704_v46 }
 0x4d7   :  { %5203 = vpow2.f32 %v4928_v40 }
 0x4da   :  { %v2705_v57 = vpop.f32.mrf.mxu1 }
 0x4db   :  { %v7996_v13 = vadd.f32 %v7958_v35, %v2705_v57 }
 0x4dd   :  { %v5204_v29 = vpop.eup %5203  ;;  %v4929_v24 = vmul.f32 -1.442695, %v7996_v13 }
 0x4de   :  { %v2791_v19 = vadd.f32 1.0, %v5204_v29 }
 0x4e0   :  { %5205 = vrcp.f32 %v2791_v19  ;;  %v2818_v2 = vand.u32 2147483648, %v2791_v19  ;;  %v2816_v58 = vand.u32 2147483647, %v2791_v19  ;;  %vm2812_vm11 = vweird.f32 %v2791_v19 }
 0x4e1   :  { %5207 = vpow2.f32 %v4929_v24 }
 0x4e2   :  { %v2819_v39 = vor.u32 1.1754944e-38, %v2818_v2  ;;  %vm2817_vm5 = vcmp.eq.f32.partialorder %v2816_v58, 8.507059e+37  ;;  %v2708_v28 = vpop.f32.mrf.mxu1 }
 0x4e3   :  { %v2709_v56 = vadd.f32 %v7958_v35, %v2708_v28 }
 0x4e5   :  { %v4930_v41 = vmul.f32 -1.442695, %v2709_v56 }
 0x4e6   :  { %v5206_v45 = vpop.eup %5205 }
 0x4e7   :  { %v2808_v22 = vmul.f32 %v5206_v45, %v2791_v19  ;;  %vm2813_vm15 = vweird.f32 %v5206_v45  ;;  %v5208_v16 = vpop.eup %5207 }
 0x4e8   :  { %v2792_v43 = vadd.f32 1.0, %v5208_v16  ;;  %vm2814_vm2 = vmor %vm2812_vm11, %vm2813_vm15 }
 0x4e9   :  { %v2809_v18 = vsub.f32 1.0, %v2808_v22 }
 0x4ea   :  { %5209 = vrcp.f32 %v2792_v43  ;;  %v2833_v32 = vand.u32 2147483648, %v2792_v43  ;;  %v2831_v47 = vand.u32 2147483647, %v2792_v43  ;;  %vm2827_vm13 = vweird.f32 %v2792_v43  ;;  %v2710_v38 = vpop.f32.mrf.mxu1 }
 0x4eb   :  { %v2810_v53 = vmul.f32 %v5206_v45, %v2809_v18  ;;  %5211 = vpow2.f32 %v4930_v41  ;;  %v2711_v26 = vadd.f32 %v7958_v35, %v2710_v38 }
 0x4ec   :  { %v2834_v62 = vor.u32 1.1754944e-38, %v2833_v32  ;;  %vm2832_vm1 = vcmp.eq.f32.partialorder %v2831_v47, 8.507059e+37 }
 0x4ed   :  { %v2811_v15 = vadd.f32 %v5206_v45, %v2810_v53  ;;  %v4931_v36 = vmul.f32 -1.442695, %v2711_v26 }
 0x4ef   :  { %v2815_v50 = vsel %vm2814_vm2, %v5206_v45, %v2811_v15 }
 0x4f0   :  { %v2820_v34 = vsel %vm2817_vm5, %v2819_v39, %v2815_v50  ;;  %v5210_v10 = vpop.eup %5209 }
 0x4f1   :  { %v3047_v63 = vmul.f32 %v2820_v34, %v2704_v46  ;;  %v2823_v21 = vmul.f32 %v5210_v10, %v2792_v43  ;;  %vm2828_vm12 = vweird.f32 %v5210_v10  ;;  %v5212_v6 = vpop.eup %5211 }
 0x4f2   :  { %v2793_v12 = vadd.f32 1.0, %v5212_v6  ;;  %vm2829_vm8 = vmor %vm2827_vm13, %vm2828_vm12  ;;  %v2713_v37 = vpop.f32.mrf.mxu1 }
 0x4f3   :  { %3106 = vst.msk [vmem:[#allocation3 + $0x11] sm:$0xff] %vm3063_vm14, %v3047_v63  ;;  %v2824_v7 = vsub.f32 1.0, %v2823_v21  ;;  %v2714_v42 = vadd.f32 %v7958_v35, %v2713_v37 }
 0x4f4   :  { %5213 = vrcp.f32 %v2793_v12  ;;  %v2848_v30 = vand.u32 2147483648, %v2793_v12  ;;  %v2846_v52 = vand.u32 2147483647, %v2793_v12  ;;  %vm2842_vm0 = vweird.f32 %v2793_v12 }
 0x4f5   :  { %v2825_v55 = vmul.f32 %v5210_v10, %v2824_v7  ;;  %5215 = vpow2.f32 %v4931_v36  ;;  %v4932_v14 = vmul.f32 -1.442695, %v2714_v42 }
 0x4f6   :  { %v2849_v11 = vor.u32 1.1754944e-38, %v2848_v30  ;;  %vm2847_vm4 = vcmp.eq.f32.partialorder %v2846_v52, 8.507059e+37 }
 0x4f7   :  { %v2826_v4 = vadd.f32 %v5210_v10, %v2825_v55  ;;  %v3125_v55 = vld [vmem:[#allocation3] sm:$0xff] }
 0x4f9   :  { %v2830_v25 = vsel %vm2829_vm8, %v5210_v10, %v2826_v4  ;;  %v3174_v4 = vld [vmem:[#allocation3 + $0x1] sm:$0xff] }
 0x4fa   :  { %v2835_v27 = vsel %vm2832_vm1, %v2834_v62, %v2830_v25  ;;  %v5214_v61 = vpop.eup %5213  ;;  %v2715_v46 = vpop.f32.mrf.mxu1  ;;  %v3126_v37 = vld [vmem:[#allocation3 + $0x10] sm:$0xff] }
 0x4fb   :  { %v3048_v23 = vmul.f32 %v2835_v27, %v7996_v13  ;;  %v2838_v9 = vmul.f32 %v5214_v61, %v2793_v12  ;;  %v5216_v17 = vpop.eup %5215  ;;  %vm2843_vm7 = vweird.f32 %v5214_v61  ;;  %v8053_v57 = vadd.f32 %v7958_v35, %v2715_v46 }
 0x4fc   :  { %v2794_v20 = vadd.f32 1.0, %v5216_v17  ;;  %vm2844_vm10 = vmor %vm2842_vm0, %vm2843_vm7 }
 0x4fd   :  { %3107 = vst.msk [vmem:[#allocation3 + $0x21] sm:$0xff] %vm3063_vm14, %v3048_v23  ;;  %v2839_v44 = vsub.f32 1.0, %v2838_v9  ;;  %v4933_v22 = vmul.f32 -1.442695, %v8053_v57 }
 0x4fe   :  { %5217 = vrcp.f32 %v2794_v20  ;;  %v2863_v1 = vand.u32 2147483648, %v2794_v20  ;;  %v2861_v51 = vand.u32 2147483647, %v2794_v20  ;;  %vm2857_vm11 = vweird.f32 %v2794_v20 }
 0x4ff   :  { %v2840_v48 = vmul.f32 %v5214_v61, %v2839_v44  ;;  %5219 = vpow2.f32 %v4932_v14  ;;  %v3123_v44 = vld [vmem:[%s9520_s16 + $0x4] sm:$0x7] }
 0x500   :  { %v2864_v19 = vor.u32 1.1754944e-38, %v2863_v1  ;;  %vm2862_vm5 = vcmp.eq.f32.partialorder %v2861_v51, 8.507059e+37 }
 0x501   :  { %v2841_v33 = vadd.f32 %v5214_v61, %v2840_v48 }
 0x502   :  { %v2718_v43 = vpop.f32.mrf.mxu1 }
 0x503   :  { %v2845_v49 = vsel %vm2844_vm10, %v5214_v61, %v2841_v33  ;;  %v8058_v34 = vadd.f32 %v7958_v35, %v2718_v43  ;;  %v3223_v61 = vld [vmem:[#allocation3 + $0x2] sm:$0xff] }
 0x504   :  { %v2850_v59 = vsel %vm2847_vm4, %v2849_v11, %v2845_v49  ;;  %v5218_v5 = vpop.eup %5217  ;;  %v8084_v11 = vperm.slane %v3123_v44, 0 }
 0x505   :  { %v3049_v60 = vmul.f32 %v2850_v59, %v2709_v56  ;;  %v2853_v0 = vmul.f32 %v5218_v5, %v2794_v20  ;;  %v5220_v8 = vpop.eup %5219  ;;  %vm2858_vm15 = vweird.f32 %v5218_v5  ;;  %v3122_v56 = vld [vmem:[%s9520_s16] sm:$0x7]  ;;  %v4934_v10 = vmul.f32 -1.442695, %v8058_v34  ;;  %v3175_v59 = vld [vmem:[#allocation3 + $0x11] sm:$0xff] }
 0x506   :  { %v2795_v29 = vadd.f32 1.0, %v5220_v8  ;;  %vm2859_vm2 = vmor %vm2857_vm11, %vm2858_vm15  ;;  %v8064_v32 = vperm.slane %v3122_v56, 0  ;;  %v8066_v47 = vperm.slane %v3122_v56, 1  ;;  %v8071_v23 = vperm.slane %v3122_v56, 2  ;;  %v3176_v56 = vld [vmem:[#allocation3 + $0x21] sm:$0xff] }
 0x507   :  { %3108 = vst.msk [vmem:[#allocation3 + $0x31] sm:$0xff] %vm3063_vm14, %v3049_v60  ;;  %v2854_v54 = vsub.f32 1.0, %v2853_v0  ;;  %v3289_v51 = vmul.f32 %v8084_v11, %v3126_v37 }
 0x508   :  { %5221 = vrcp.f32 %v2795_v29  ;;  %v2876_v16 = vand.u32 2147483647, %v2795_v29  ;;  %v2878_v15 = vand.u32 2147483648, %v2795_v29  ;;  %vm2872_vm13 = vweird.f32 %v2795_v29 }
 0x509   :  { %v2855_v31 = vmul.f32 %v5218_v5, %v2854_v54  ;;  %5223 = vpow2.f32 %v4933_v22  ;;  %v3142_v62 = vmul.f32 %v8064_v32, %v3125_v55  ;;  %v3191_v27 = vmul.f32 %v8066_v47, %v3174_v4 }
 0x50a   :  { %v2879_v63 = vor.u32 1.1754944e-38, %v2878_v15  ;;  %vm2877_vm1 = vcmp.eq.f32.partialorder %v2876_v16, 8.507059e+37  ;;  %v2720_v25 = vpop.f32.mrf.mxu1  ;;  %v3240_v20 = vmul.f32 %v8071_v23, %v3223_v61  ;;  %v3143_v1 = vmul.f32 %v8064_v32, %v3126_v37 }
 0x50b   :  { %v2856_v40 = vadd.f32 %v5218_v5, %v2855_v31  ;;  %v8074_v36 = vadd.f32 %v7958_v35, %v2720_v25  ;;  %v3207_v33 = vadd.f32 %v3191_v27, %v3142_v62  ;;  %v3192_v8 = vmul.f32 %v8066_v47, %v3175_v59  ;;  %v3225_v25 = vld [vmem:[#allocation3 + $0x22] sm:$0xff] }
 0x50c   :  { %v8101_v22 = vperm.slane %v3123_v44, 2  ;;  %v3193_v62 = vmul.f32 %v8066_v47, %v3176_v56 }
 0x50d   :  { %v2860_v13 = vsel %vm2859_vm2, %v5218_v5, %v2856_v40  ;;  %v4935_v17 = vmul.f32 -1.442695, %v8074_v36  ;;  %v3256_v5 = vadd.f32 %v3240_v20, %v3207_v33  ;;  %v3124_v40 = vld [vmem:[%s9520_s16 + $0x8] sm:$0x7] }
 0x50e   :  { %v2865_v24 = vsel %vm2862_vm5, %v2864_v19, %v2860_v13  ;;  %v5222_v18 = vpop.eup %5221  ;;  %v3224_v13 = vld [vmem:[#allocation3 + $0x12] sm:$0xff] }
 0x50f   :  { %v3050_v45 = vmul.f32 %v2865_v24, %v2711_v26  ;;  %v2868_v2 = vmul.f32 %v5222_v18, %v2795_v29  ;;  %v5224_v58 = vpop.eup %5223  ;;  %vm2873_vm12 = vweird.f32 %v5222_v18  ;;  %v8098_v24 = vperm.slane %v3123_v44, 1  ;;  %v3128_v33 = vld [vmem:[#allocation3 + $0x30] sm:$0xff] }
 0x510   :  { %v2796_v50 = vadd.f32 1.0, %v5224_v58  ;;  %vm2874_vm8 = vmor %vm2872_vm13, %vm2873_vm12  ;;  %v8103_v58 = vperm.slane %v3124_v40, 0  ;;  %v3241_v15 = vmul.f32 %v8071_v23, %v3224_v13  ;;  %v3387_v55 = vmul.f32 %v8101_v22, %v3224_v13 }
 0x511   :  { %3109 = vst.msk [vmem:[#allocation3 + $0x41] sm:$0xff] %vm3063_vm14, %v3050_v45  ;;  %v2869_v53 = vsub.f32 1.0, %v2868_v2 }
 0x512   :  { %5225 = vrcp.f32 %v2796_v50  ;;  %v2893_v30 = vand.u32 2147483648, %v2796_v50  ;;  %v2891_v52 = vand.u32 2147483647, %v2796_v50  ;;  %vm2887_vm0 = vweird.f32 %v2796_v50  ;;  %v2723_v14 = vpop.f32.mrf.mxu1 }
 0x513   :  { %v2870_v39 = vmul.f32 %v5222_v18, %v2869_v53  ;;  %5227 = vpow2.f32 %v4934_v10  ;;  %v8087_v54 = vadd.f32 %v7958_v35, %v2723_v14  ;;  %v3305_v53 = vadd.f32 %v3289_v51, %v3256_v5 }
 0x514   :  { %v2894_v60 = vor.u32 1.1754944e-38, %v2893_v30  ;;  %vm2892_vm4 = vcmp.eq.f32.partialorder %v2891_v52, 8.507059e+37  ;;  %v3339_v30 = vmul.f32 %v8098_v24, %v3176_v56  ;;  %v3242_v52 = vmul.f32 %v8071_v23, %v3225_v25 }
 0x515   :  { %v2871_v28 = vadd.f32 %v5222_v18, %v2870_v39  ;;  %v4936_v19 = vmul.f32 -1.442695, %v8087_v54 }
 0x517   :  { %v2875_v41 = vsel %vm2874_vm8, %v5222_v18, %v2871_v28  ;;  %v3127_v18 = vld [vmem:[#allocation3 + $0x20] sm:$0xff] }
 0x518   :  { %v2880_v21 = vsel %vm2877_vm1, %v2879_v63, %v2875_v41  ;;  %v5226_v6 = vpop.eup %5225  ;;  %v3290_v28 = vmul.f32 %v8084_v11, %v3127_v18  ;;  %v3437_v27 = vmul.f32 %v8103_v58, %v3127_v18 }
 0x519   :  { %v3051_v7 = vmul.f32 %v2880_v21, %v2714_v42  ;;  %v2883_v12 = vmul.f32 %v5226_v6, %v2796_v50  ;;  %v5228_v38 = vpop.eup %5227  ;;  %vm2888_vm7 = vweird.f32 %v5226_v6  ;;  %v3338_v50 = vmul.f32 %v8098_v24, %v3175_v59 }
 0x51a   :  { %v8076_v9 = vadd.f32 1.0, %v5228_v38  ;;  %vm2889_vm10 = vmor %vm2887_vm0, %vm2888_vm7  ;;  %v3388_v59 = vmul.f32 %v8101_v22, %v3225_v25 }
 0x51b   :  { %3110 = vst.msk [vmem:[#allocation3 + $0x51] sm:$0xff] %vm3063_vm14, %v3051_v7  ;;  %v2884_v26 = vsub.f32 1.0, %v2883_v12  ;;  %v3354_v21 = vadd.f32 %v3338_v50, %v3305_v53  ;;  %v3226_v50 = vld [vmem:[#allocation3 + $0x32] sm:$0xff] }
 0x51c   :  { %5229 = vrcp.f32 %v8076_v9  ;;  %v2908_v39 = vand.u32 2147483648, %v8076_v9  ;;  %v2906_v63 = vand.u32 2147483647, %v8076_v9  ;;  %vm2902_vm11 = vweird.f32 %v8076_v9 }
 0x51d   :  { %v2885_v48 = vmul.f32 %v5226_v6, %v2884_v26  ;;  %5231 = vpow2.f32 %v4935_v17  ;;  %v8118_v26 = vperm.slane %v3124_v40, 1 }
 0x51e   :  { %5233 = vpow2.f32 %v4936_v19  ;;  %v2909_v12 = vor.u32 1.1754944e-38, %v2908_v39  ;;  %vm2907_vm5 = vcmp.eq.f32.partialorder %v2906_v63, 8.507059e+37 }
 0x51f   :  { %v2886_v49 = vadd.f32 %v5226_v6, %v2885_v48  ;;  %v3403_v48 = vadd.f32 %v3387_v55, %v3354_v21  ;;  %v3486_v14 = vmul.f32 %v8118_v26, %v3176_v56  ;;  %v3129_v21 = vld [vmem:[#allocation3 + $0x40] sm:$0xff] }
 0x521   :  { %v2890_v42 = vsel %vm2889_vm10, %v5226_v6, %v2886_v49  ;;  %v3144_v6 = vmul.f32 %v8064_v32, %v3127_v18 }
 0x522   :  { %v2895_v0 = vsel %vm2892_vm4, %v2894_v60, %v2890_v42  ;;  %v5230_v31 = vpop.eup %5229  ;;  %v2725_v60 = vpop.f32.mrf.mxu1  ;;  %v3453_v42 = vadd.f32 %v3437_v27, %v3403_v48 }
 0x523   :  { %v3052_v46 = vmul.f32 %v2895_v0, %v8053_v57  ;;  %v2898_v29 = vmul.f32 %v5230_v31, %v8076_v9  ;;  %v5232_v45 = vpop.eup %5231  ;;  %v3208_v57 = vadd.f32 %v3192_v8, %v3143_v1  ;;  %vm2903_vm15 = vweird.f32 %v5230_v31 }
 0x524   :  { %v8105_v16 = vadd.f32 1.0, %v5232_v45  ;;  %vm2904_vm2 = vmor %vm2902_vm11, %vm2903_vm15  ;;  %v5234_v7 = vpop.eup %5233  ;;  %v3209_v49 = vadd.f32 %v3193_v62, %v3144_v6  ;;  %v8133_v0 = vperm.slane %v3124_v40, 2  ;;  %v3438_v1 = vmul.f32 %v8103_v58, %v3128_v33 }
 0x525   :  { %3111 = vst.msk [vmem:[#allocation3 + $0x61] sm:$0xff] %vm3063_vm14, %v3052_v46  ;;  %v2899_v2 = vsub.f32 1.0, %v2898_v29  ;;  %v3257_v10 = vadd.f32 %v3241_v15, %v3208_v57  ;;  %v8120_v9 = vadd.f32 1.0, %v5234_v7  ;;  %v3177_v46 = vld [vmem:[#allocation3 + $0x31] sm:$0xff]  ;;  %v3502_v13 = vadd.f32 %v3486_v14, %v3453_v42  ;;  %v3227_v42 = vld [vmem:[#allocation3 + $0x42] sm:$0xff] }
 0x526   :  { %5235 = vrcp.f32 %v8105_v16  ;;  %v2921_v8 = vand.u32 2147483647, %v8105_v16  ;;  %v2923_v51 = vand.u32 2147483648, %v8105_v16  ;;  %v3258_v45 = vadd.f32 %v3242_v52, %v3209_v49 }
 0x527   :  { %v2900_v43 = vmul.f32 %v5230_v31, %v2899_v2  ;;  %v3306_v38 = vadd.f32 %v3290_v28, %v3257_v10  ;;  %5237 = vrcp.f32 %v8120_v9  ;;  %vm2917_vm13 = vweird.f32 %v8105_v16 }
 0x528   :  { %v3535_v40 = vmul.f32 %v8133_v0, %v3225_v25  ;;  %v3487_v15 = vmul.f32 %v8118_v26, %v3177_v46  ;;  %vm2922_vm1 = vcmp.eq.f32.partialorder %v2921_v8, 8.507059e+37  ;;  %v3194_v10 = vmul.f32 %v8066_v47, %v3177_v46  ;;  %v3182_v8 = vld [vmem:[#allocation3 + $0xa1] sm:$0xff] }
 0x529   :  { %v2901_v41 = vadd.f32 %v5230_v31, %v2900_v43  ;;  %v3355_v37 = vadd.f32 %v3339_v30, %v3306_v38  ;;  %v2924_v43 = vor.u32 1.1754944e-38, %v2923_v51  ;;  %v3340_v6 = vmul.f32 %v8098_v24, %v3177_v46 }
 0x52a   :  { %v3551_v56 = vadd.f32 %v3535_v40, %v3502_v13  ;;  %v2938_v62 = vand.u32 2147483648, %v8120_v9  ;;  %v3389_v38 = vmul.f32 %v8101_v22, %v3226_v50  ;;  %v3146_v30 = vmul.f32 %v8064_v32, %v3129_v21  ;;  %v2728_v51 = vpop.f32.mrf.mxu1  ;;  %v3130_v13 = vld [vmem:[#allocation3 + $0x50] sm:$0xff] }
 0x52b   :  { %v2905_v4 = vsel %vm2904_vm2, %v5230_v31, %v2901_v41  ;;  %v3291_v31 = vmul.f32 %v8084_v11, %v3128_v33  ;;  %v3404_v18 = vadd.f32 %v3388_v59, %v3355_v37  ;;  %v8147_v41 = vld [vmem:[%s9521_s17] ss:$0 sm:$0xff]  ;;  %vm2932_vm0 = vweird.f32 %v8120_v9 }
 0x52c   :  { %v2910_v61 = vsel %vm2907_vm5, %v2909_v12, %v2905_v4  ;;  %v5236_v44 = vpop.eup %5235  ;;  %v3178_v4 = vld [vmem:[#allocation3 + $0x41] sm:$0xff]  ;;  %v8160_v52 = vadd.f32 %v8147_v41, %v3551_v56  ;;  %v3439_v37 = vmul.f32 %v8103_v58, %v3129_v21  ;;  %v2939_v59 = vor.u32 1.1754944e-38, %v2938_v62 }
 0x52d   :  { %v3053_v17 = vmul.f32 %v2910_v61, %v8058_v34  ;;  %v2913_v20 = vmul.f32 %v5236_v44, %v8105_v16  ;;  %v8131_v34 = vadd.f32 %v7958_v35, %v2725_v60  ;;  %vm2918_vm12 = vweird.f32 %v5236_v44  ;;  %v5238_v2 = vpop.eup %5237  ;;  %v3520_v62 = vld [vmem:[#allocation3 + $0x42] sm:$0xff] }
 0x52e   :  { %v3307_v53 = vadd.f32 %v3291_v31, %v3258_v45  ;;  %vm2919_vm8 = vmor %vm2917_vm13, %vm2918_vm12  ;;  %v2928_v39 = vmul.f32 %v5238_v2, %v8120_v9  ;;  %v3454_v63 = vadd.f32 %v3438_v1, %v3404_v18  ;;  %v3145_v16 = vmul.f32 %v8064_v32, %v3128_v33  ;;  %v3133_v1 = vld [vmem:[#allocation3 + $0xa0] sm:$0xff]  ;;  %v8171_v45 = vld [vmem:[#allocation3 + $0x51] sm:$0xff] }
 0x52f   :  { %3112 = vst.msk [vmem:[#allocation3 + $0x71] sm:$0xff] %vm3063_vm14, %v3053_v17  ;;  %v2914_v5 = vsub.f32 1.0, %v2913_v20  ;;  %v4937_v19 = vmul.f32 -1.442695, %v8131_v34  ;;  %vm2933_vm7 = vweird.f32 %v5238_v2  ;;  %v2936_v61 = vand.u32 2147483647, %v8120_v9 }
 0x530   :  { %v2929_v55 = vsub.f32 1.0, %v2928_v39  ;;  %v3503_v25 = vadd.f32 %v3487_v15, %v3454_v63  ;;  %v3356_v48 = vadd.f32 %v3340_v6, %v3307_v53  ;;  %v3536_v17 = vmul.f32 %v8133_v0, %v3226_v50  ;;  %vm2934_vm10 = vmor %vm2932_vm0, %vm2933_vm7  ;;  %v8182_v39 = vld [vmem:[#allocation3 + $0x52] sm:$0xff] }
 0x531   :  { %v2915_v29 = vmul.f32 %v5236_v44, %v2914_v5  ;;  %5239 = vpow2.f32 %v4937_v19  ;;  %v3210_v49 = vadd.f32 %v3194_v10, %v3145_v16  ;;  %vm2937_vm4 = vcmp.eq.f32.partialorder %v2936_v61, 8.507059e+37  ;;  %v3231_v16 = vld [vmem:[#allocation3 + $0xa2] sm:$0xff] }
 0x532   :  { %v2930_v27 = vmul.f32 %v5238_v2, %v2929_v55  ;;  %v3552_v60 = vadd.f32 %v3536_v17, %v3503_v25  ;;  %v3243_v5 = vmul.f32 %v8071_v23, %v3226_v50  ;;  %v3405_v9 = vadd.f32 %v3389_v38, %v3356_v48  ;;  %v8197_v38 = vld [vmem:[#allocation3 + $0x61] sm:$0xff] }
 0x533   :  { %v2916_v57 = vadd.f32 %v5236_v44, %v2915_v29  ;;  %v4944_v46 = vmul.f32 -1.442695, %v8160_v52  ;;  %v3292_v19 = vmul.f32 %v8084_v11, %v3129_v21  ;;  %v3244_v40 = vmul.f32 %v8071_v23, %v3227_v42 }
 0x534   :  { %v2931_v33 = vadd.f32 %v5238_v2, %v2930_v27  ;;  %v3455_v53 = vadd.f32 %v3439_v37, %v3405_v9  ;;  %v8179_v15 = vadd.f32 %v8147_v41, %v3552_v60  ;;  %v3150_v50 = vmul.f32 %v8064_v32, %v3133_v1 }
 0x535   :  { %v2920_v28 = vsel %vm2919_vm8, %v5236_v44, %v2916_v57  ;;  %v3259_v57 = vadd.f32 %v3243_v5, %v3210_v49  ;;  %v3147_v63 = vmul.f32 %v8064_v32, %v3130_v13  ;;  %v3196_v56 = vmul.f32 %v8066_v47, %v8171_v45  ;;  %v8209_v49 = vld [vmem:[#allocation3 + $0x62] sm:$0xff] }
 0x536   :  { %v2925_v7 = vsel %vm2922_vm1, %v2924_v43, %v2920_v28  ;;  %v2935_v14 = vsel %vm2934_vm10, %v5238_v2, %v2931_v33  ;;  %v8175_v2 = vadd.f32 %v7958_v35, %v2728_v51  ;;  %v3341_v43 = vmul.f32 %v8098_v24, %v3178_v4 }
 0x537   :  { %v3054_v12 = vmul.f32 %v2925_v7, %v8074_v36  ;;  %v5240_v44 = vpop.eup %5239  ;;  %v3195_v36 = vmul.f32 %v8066_v47, %v3178_v4  ;;  %v2940_v31 = vsel %vm2937_vm4, %v2939_v59, %v2935_v14  ;;  %v3488_v10 = vmul.f32 %v8118_v26, %v3178_v4 }
 0x538   :  { %v8164_v20 = vadd.f32 1.0, %v5240_v44  ;;  %v3055_v18 = vmul.f32 %v2940_v31, %v8087_v54  ;;  %v3199_v54 = vmul.f32 %v8066_v47, %v3182_v8  ;;  %v4938_v28 = vmul.f32 -1.442695, %v8175_v2 }
 0x539   :  { %3113 = vst.msk [vmem:[#allocation3 + $0x81] sm:$0xff] %vm3063_vm14, %v3054_v12  ;;  %v3211_v29 = vadd.f32 %v3195_v36, %v3146_v30  ;;  %v3308_v55 = vadd.f32 %v3292_v19, %v3259_v57  ;;  %v3390_v6 = vmul.f32 %v8101_v22, %v3227_v42  ;;  %v8193_v12 = vld [vmem:[#allocation3 + $0x60] sm:$0xff]  ;;  %v3245_v25 = vmul.f32 %v8071_v23, %v8182_v39  ;;  %v8216_v42 = vld [vmem:[#allocation3 + $0x70] sm:$0xff] }
 0x53a   :  { %5241 = vrcp.f32 %v8164_v20  ;;  %3114 = vst.msk [vmem:[#allocation3 + $0xb1] sm:$0xff] %vm3063_vm14, %v3055_v18  ;;  %v3504_v61 = vadd.f32 %v3488_v10, %v3455_v53  ;;  %v4945_v4 = vmul.f32 -1.442695, %v8179_v15  ;;  %v3293_v44 = vmul.f32 %v8084_v11, %v3130_v13  ;;  %v8231_v53 = vld [vmem:[#allocation3 + $0x71] sm:$0xff] }
 0x53b   :  { %5243 = vpow2.f32 %v4944_v46  ;;  %v3260_v7 = vadd.f32 %v3244_v40, %v3211_v29  ;;  %v3342_v48 = vmul.f32 %v8098_v24, %v8171_v45  ;;  %v3215_v30 = vadd.f32 %v3199_v54, %v3150_v50  ;;  %v3521_v10 = vld [vmem:[#allocation3 + $0x52] sm:$0xff] }
 0x53c   :  { %5245 = vpow2.f32 %v4938_v28  ;;  %v3248_v17 = vmul.f32 %v8071_v23, %v3231_v16  ;;  %v3212_v36 = vadd.f32 %v3196_v56, %v3147_v63  ;;  %v8207_v33 = vmul.f32 %v8064_v32, %v8193_v12  ;;  %v2730_v16 = vpop.f32.mrf.mxu1 }
 0x53d   :  { %v3537_v59 = vmul.f32 %v8133_v0, %v3520_v62  ;;  %v8214_v60 = vmul.f32 %v8066_v47, %v8197_v38  ;;  %v2951_v14 = vand.u32 2147483647, %v8164_v20  ;;  %v2953_v5 = vand.u32 2147483648, %v8164_v20 }
 0x53e   :  { %v3357_v31 = vadd.f32 %v3341_v43, %v3308_v55  ;;  %5247 = vpow2.f32 %v4945_v4  ;;  %v8222_v29 = vmul.f32 %v8071_v23, %v8209_v49  ;;  %v3294_v19 = vmul.f32 %v8084_v11, %v8193_v12 }
 0x53f   :  { %v3553_v9 = vadd.f32 %v3537_v59, %v3504_v61  ;;  %v3264_v18 = vadd.f32 %v3248_v17, %v3215_v30  ;;  %v3440_v57 = vmul.f32 %v8103_v58, %v3130_v13  ;;  %v8229_v40 = vmul.f32 %v8064_v32, %v8216_v42 }
 0x540   :  { %v5242_v21 = vpop.eup %5241  ;;  %vm2947_vm11 = vweird.f32 %v8164_v20  ;;  %vm2952_vm5 = vcmp.eq.f32.partialorder %v2951_v14, 8.507059e+37  ;;  %v2954_v63 = vor.u32 1.1754944e-38, %v2953_v5  ;;  %v3406_v56 = vadd.f32 %v3390_v6, %v3357_v31 }
 0x541   :  { %v2943_v27 = vmul.f32 %v5242_v21, %v8164_v20  ;;  %v5244_v1 = vpop.eup %5243  ;;  %v3134_v8 = vld [vmem:[#allocation3 + $0xb0] sm:$0xff]  ;;  %vm2948_vm15 = vweird.f32 %v5242_v21  ;;  %v8240_v55 = vadd.f32 %v8147_v41, %v3553_v9  ;;  %v3198_v20 = vmul.f32 %v8066_v47, %v8231_v53 }
 0x542   :  { %v5246_v46 = vpop.eup %5245  ;;  %v3183_v54 = vld [vmem:[#allocation3 + $0xb1] sm:$0xff]  ;;  %v3297_v28 = vmul.f32 %v8084_v11, %v3134_v8  ;;  %vm2949_vm2 = vmor %vm2947_vm11, %vm2948_vm15  ;;  %v8242_v62 = vadd.f32 1.0, %v5244_v1  ;;  %v3309_v61 = vadd.f32 %v3293_v44, %v3260_v7  ;;  %v3456_v4 = vadd.f32 %v3440_v57, %v3406_v56 }
 0x543   :  { %v2944_v37 = vsub.f32 1.0, %v2943_v27  ;;  %v8234_v50 = vadd.f32 1.0, %v5246_v46  ;;  %v3151_v17 = vmul.f32 %v8064_v32, %v3134_v8  ;;  %v3391_v14 = vmul.f32 %v8101_v22, %v8182_v39 }
 0x544   :  { %v5248_v30 = vpop.eup %5247  ;;  %v3313_v59 = vadd.f32 %v3297_v28, %v3264_v18  ;;  %v3489_v5 = vmul.f32 %v8118_v26, %v8171_v45  ;;  %v3538_v7 = vmul.f32 %v8133_v0, %v3521_v10  ;;  %v3261_v31 = vadd.f32 %v3245_v25, %v3212_v36 }
 0x545   :  { %v2945_v51 = vmul.f32 %v5242_v21, %v2944_v37  ;;  %5249 = vrcp.f32 %v8234_v50  ;;  %v8250_v37 = vadd.f32 %v7958_v35, %v2730_v16  ;;  %v4946_v1 = vmul.f32 -1.442695, %v8240_v55 }
 0x546   :  { %5251 = vrcp.f32 %v8242_v62  ;;  %v3346_v8 = vmul.f32 %v8098_v24, %v3183_v54  ;;  %v8262_v9 = vadd.f32 1.0, %v5248_v30  ;;  %v3660_v39 = vand.u32 2147483647, %v8242_v62 }
 0x547   :  { %v2946_v43 = vadd.f32 %v5242_v21, %v2945_v51  ;;  %v4939_v44 = vmul.f32 -1.442695, %v8250_v37  ;;  %v3358_v51 = vadd.f32 %v3342_v48, %v3309_v61  ;;  %v3310_v18 = vadd.f32 %v3294_v19, %v3261_v31 }
 0x548   :  { %v3505_v57 = vadd.f32 %v3489_v5, %v3456_v4  ;;  %v2966_v36 = vand.u32 2147483647, %v8234_v50  ;;  %v3662_v28 = vand.u32 2147483648, %v8242_v62  ;;  %v3343_v56 = vmul.f32 %v8098_v24, %v8197_v38  ;;  %v3230_v5 = vld [vmem:[#allocation3 + $0x72] sm:$0xff] }
 0x549   :  { %v2950_v13 = vsel %vm2949_vm2, %v5242_v21, %v2946_v43  ;;  %v3200_v21 = vmul.f32 %v8066_v47, %v3183_v54  ;;  %5253 = vpow2.f32 %v4939_v44  ;;  %v3362_v43 = vadd.f32 %v3346_v8, %v3313_v59 }
 0x54a   :  { %v2955_v27 = vsel %vm2952_vm5, %v2954_v63, %v2950_v13  ;;  %v2968_v54 = vand.u32 2147483648, %v8234_v50  ;;  %v3213_v19 = vadd.f32 %v8214_v60, %v8207_v33  ;;  %v3407_v16 = vadd.f32 %v3391_v14, %v3358_v51 }
 0x54b   :  { %v3056_v6 = vmul.f32 %v2955_v27, %v8131_v34  ;;  %v3232_v34 = vld [vmem:[#allocation3 + $0xb2] sm:$0xff]  ;;  %v5250_v45 = vpop.eup %5249  ;;  %v3216_v46 = vadd.f32 %v3200_v21, %v3151_v17  ;;  %v3441_v10 = vmul.f32 %v8103_v58, %v8193_v12  ;;  %vm2962_vm12 = vweird.f32 %v8234_v50 }
 0x54c   :  { %v2958_v25 = vmul.f32 %v5250_v45, %v8234_v50  ;;  %v3249_v63 = vmul.f32 %v8071_v23, %v3232_v34  ;;  %v3395_v48 = vmul.f32 %v8101_v22, %v3232_v34  ;;  %v8277_v27 = vpop.eup %5251  ;;  %v3359_v4 = vadd.f32 %v3343_v56, %v3310_v18 }
 0x54d   :  { %3115 = vst.msk [vmem:[#allocation3 + $0xc1] sm:$0xff] %vm3063_vm14, %v3056_v6  ;;  %v3554_v30 = vadd.f32 %v3538_v7, %v3505_v57  ;;  %vm8284_vm13 = vcmp.eq.f32.partialorder %v2966_v36, 8.507059e+37  ;;  %v3295_v33 = vmul.f32 %v8084_v11, %v8216_v42  ;;  %vm2963_vm8 = vweird.f32 %v5250_v45  ;;  %v3279_v57 = vld [vmem:[#allocation3 + $0x80] sm:$0xff] }
 0x54e   :  { %v2959_v13 = vsub.f32 1.0, %v2958_v25  ;;  %v8279_v61 = vadd.f32 %v3249_v63, %v3216_v46  ;;  %v8282_v17 = vadd.f32 %v3395_v48, %v3362_v43  ;;  %v2969_v12 = vor.u32 1.1754944e-38, %v2968_v54  ;;  %vm2964_vm1 = vmor %vm2962_vm12, %vm2963_vm8 }
 0x54f   :  { %v5254_v60 = vpop.eup %5253  ;;  %v3392_v59 = vmul.f32 %v8101_v22, %v8209_v49  ;;  %v3442_v14 = vmul.f32 %v8103_v58, %v8216_v42  ;;  %v3262_v7 = vadd.f32 %v8222_v29, %v3213_v19  ;;  %v3457_v44 = vadd.f32 %v3441_v10, %v3407_v16  ;;  %v2733_v42 = vpop.f32.mrf.mxu1 }
 0x550   :  { %v2960_v21 = vmul.f32 %v5250_v45, %v2959_v13  ;;  %v3490_v31 = vmul.f32 %v8118_v26, %v8197_v38  ;;  %v3539_v34 = vmul.f32 %v8133_v0, %v8209_v49  ;;  %v8299_v51 = vadd.f32 1.0, %v5254_v60  ;;  %v3328_v13 = vld [vmem:[#allocation3 + $0x81] sm:$0xff] }
 0x551   :  { %v3214_v46 = vadd.f32 %v3198_v20, %v8229_v40  ;;  %v3408_v18 = vadd.f32 %v3392_v59, %v3359_v4  ;;  %v3311_v43 = vadd.f32 %v3295_v33, %v3262_v7  ;;  %v8305_v29 = vadd.f32 %v8147_v41, %v3554_v30 }
 0x552   :  { %v2961_v8 = vadd.f32 %v5250_v45, %v2960_v21  ;;  %5255 = vpow2.f32 %v4946_v1  ;;  %v8309_v38 = vmul.f32 %v8277_v27, %v8242_v62  ;;  %v3247_v40 = vmul.f32 %v8071_v23, %v3230_v5 }
 0x553   :  { %5257 = vrcp.f32 %v8299_v51  ;;  %v3458_v20 = vadd.f32 %v3442_v14, %v3408_v18  ;;  %v3344_v36 = vmul.f32 %v8098_v24, %v8231_v53  ;;  %v3491_v1 = vmul.f32 %v8118_v26, %v8231_v53 }
 0x554   :  { %v2965_v49 = vsel %vm2964_vm1, %v5250_v45, %v2961_v8  ;;  %v3135_v25 = vld [vmem:[#allocation3 + $0xc0] sm:$0xff]  ;;  %v3506_v63 = vadd.f32 %v3490_v31, %v3457_v44  ;;  %v8321_v45 = vadd.f32 %v7958_v35, %v2733_v42  ;;  %v3263_v54 = vadd.f32 %v3247_v40, %v3214_v46 }
 0x555   :  { %v2970_v50 = vsel %vm8284_vm13, %v2969_v12, %v2965_v49  ;;  %v3296_v56 = vmul.f32 %v8084_v11, %v3279_v57  ;;  %v3184_v19 = vld [vmem:[#allocation3 + $0xc1] sm:$0xff]  ;;  %v3360_v10 = vadd.f32 %v3344_v36, %v3311_v43  ;;  %v3393_v4 = vmul.f32 %v8101_v22, %v3230_v5  ;;  %v8349_v40 = vld [vmem:[%s9519_s15] ss:$0 sm:$0xff]  ;;  %s5437_s15 = smov [#allocation4]  }
 0x556   :  { %v3057_v48 = vmul.f32 %v2970_v50, %v8175_v2  ;;  %v8324_v16 = vld [vmem:[#allocation3 + $0xc2] sm:$0xff]  ;;  %v3540_v30 = vmul.f32 %v8133_v0, %v3230_v5  ;;  %v4947_v53 = vmul.f32 -1.442695, %v8305_v29  ;;  %v3298_v21 = vmul.f32 %v8084_v11, %v3135_v25  ;;  %v3427_v50 = vld [vmem:[#allocation3 + $0x90] sm:$0xff] }
 0x557   :  { %v4940_v35 = vmul.f32 -1.442695, %v8321_v45  ;;  %v3312_v2 = vadd.f32 %v3296_v56, %v3263_v54  ;;  %v3507_v6 = vadd.f32 %v3491_v1, %v3458_v20  ;;  %v3345_v60 = vmul.f32 %v8098_v24, %v3328_v13  ;;  %v3377_v8 = vld [vmem:[#allocation3 + $0x82] sm:$0xff]  ;;  %v2735_v42 = vpop.f32.mrf.mxu1 }
 0x558   :  { %3116 = vst.msk [vmem:[#allocation3 + $0xd1] sm:$0xff] %vm3063_vm14, %v3057_v48  ;;  %v8332_v33 = vpop.eup %5255  ;;  %v3443_v12 = vmul.f32 %v8103_v58, %v3279_v57  ;;  %v3555_v59 = vadd.f32 %v3539_v34, %v3506_v63  ;;  %v3653_v14 = vsub.f32 1.0, %v8309_v38  ;;  %v3152_v7 = vmul.f32 %v8064_v32, %v3135_v25 }
 0x559   :  { %v5258_v5 = vpop.eup %5257  ;;  %v3201_v44 = vmul.f32 %v8066_v47, %v3184_v19  ;;  %v3250_v31 = vmul.f32 %v8071_v23, %v8324_v16  ;;  %5259 = vpow2.f32 %v4940_v35  ;;  %v3347_v46 = vmul.f32 %v8098_v24, %v3184_v19 }
 0x55a   :  { %v2973_v18 = vmul.f32 %v5258_v5, %v8299_v51  ;;  %v3361_v43 = vadd.f32 %v3345_v60, %v3312_v2  ;;  %v3409_v57 = vadd.f32 %v3393_v4, %v3360_v10  ;;  %v3314_v34 = vadd.f32 %v3298_v21, %v8279_v61 }
 0x55b   :  { %v3396_v49 = vmul.f32 %v8101_v22, %v8324_v16  ;;  %v8352_v20 = vadd.f32 %v8349_v40, %v2735_v42  ;;  %v3556_v36 = vadd.f32 %v3540_v30, %v3507_v6  ;;  %v2983_v63 = vand.u32 2147483648, %v8299_v51 }
 0x55c   :  { %v2974_v1 = vsub.f32 1.0, %v2973_v18  ;;  %v3394_v48 = vmul.f32 %v8101_v22, %v3377_v8  ;;  %v3459_v54 = vadd.f32 %v3443_v12, %v3409_v57  ;;  %v8357_v61 = vmul.f32 %v8103_v58, %v3135_v25  ;;  %v3476_v12 = vld [vmem:[#allocation3 + $0x91] sm:$0xff] }
 0x55d   :  { %v8360_v56 = vmul.f32 %v8118_v26, %v3184_v19  ;;  %v3492_v10 = vmul.f32 %v8118_v26, %v3328_v13  ;;  %v8364_v4 = vadd.f32 %v8147_v41, %v3555_v59  ;;  %v4941_v30 = vmul.f32 -1.442695, %v8352_v20 }
 0x55e   :  { %v2975_v21 = vmul.f32 %v5258_v5, %v2974_v1  ;;  %v3410_v35 = vadd.f32 %v3394_v48, %v3361_v43  ;;  %v3444_v2 = vmul.f32 %v8103_v58, %v3427_v50  ;;  %v3217_v60 = vadd.f32 %v3201_v44, %v3152_v7 }
 0x55f   :  { %v5260_v6 = vpop.eup %5259  ;;  %vm2978_vm7 = vweird.f32 %v5258_v5  ;;  %v2981_v25 = vand.u32 2147483647, %v8299_v51  ;;  %v8370_v19 = vadd.f32 %v8147_v41, %v3556_v36  ;;  %v3363_v18 = vadd.f32 %v3347_v46, %v3314_v34  ;;  %v3136_v42 = vld [vmem:[#allocation3 + $0xd0] sm:$0xff]  ;;  %v2738_v7 = vpop.f32.mrf.mxu1 }
 0x560   :  { %vm2977_vm0 = vweird.f32 %v8299_v51  ;;  %v2984_v13 = vor.u32 1.1754944e-38, %v2983_v63  ;;  %v3508_v59 = vadd.f32 %v3492_v10, %v3459_v54  ;;  %v3185_v57 = vld [vmem:[#allocation3 + $0xd1] sm:$0xff]  ;;  %v2976_v1 = vadd.f32 %v5258_v5, %v2975_v21 }
 0x561   :  { %v8373_v43 = vadd.f32 1.0, %v5260_v6  ;;  %v3541_v50 = vmul.f32 %v8133_v0, %v3377_v8  ;;  %5261 = vpow2.f32 %v4947_v53  ;;  %vm2979_vm10 = vmor %vm2977_vm0, %vm2978_vm7  ;;  %v3460_v44 = vadd.f32 %v3444_v2, %v3410_v35  ;;  %v3525_v51 = vld [vmem:[#allocation3 + $0x92] sm:$0xff] }
 0x562   :  { %5263 = vpow2.f32 %v4941_v30  ;;  %v3493_v36 = vmul.f32 %v8118_v26, %v3476_v12  ;;  %v4948_v46 = vmul.f32 -1.442695, %v8364_v4  ;;  %v2980_v34 = vsel %vm2979_vm10, %v5258_v5, %v2976_v1  ;;  %v8382_v21 = vld [vmem:[#allocation3 + $0xd2] sm:$0xff] }
 0x563   :  { %vm2982_vm4 = vcmp.eq.f32.partialorder %v2981_v25, 8.507059e+37  ;;  %5265 = vrcp.f32 %v8373_v43  ;;  %v4949_v63 = vmul.f32 -1.442695, %v8370_v19  ;;  %v3153_v48 = vmul.f32 %v8064_v32, %v3136_v42 }
 0x564   :  { %v3202_v8 = vmul.f32 %v8066_v47, %v3185_v57  ;;  %v2985_v53 = vsel %vm2982_vm4, %v2984_v13, %v2980_v34  ;;  %v3557_v54 = vadd.f32 %v3541_v50, %v3508_v59  ;;  %v3266_v10 = vadd.f32 %v3250_v31, %v3217_v60 }
 0x565   :  { %v3299_v30 = vmul.f32 %v8084_v11, %v3136_v42  ;;  %v3058_v35 = vmul.f32 %v2985_v53, %v8250_v37  ;;  %v8387_v5 = vadd.f32 %v8349_v40, %v2738_v7  ;;  %v8389_v2 = vadd.f32 %v3396_v49, %v3363_v18 }
 0x566   :  { %v3509_v6 = vadd.f32 %v3493_v36, %v3460_v44  ;;  %v3542_v25 = vmul.f32 %v8133_v0, %v3525_v51  ;;  %5267 = vpow2.f32 %v4948_v46  ;;  %v8395_v60 = vadd.f32 1.0, %v8332_v33 }
 0x567   :  { %v5262_v12 = vpop.eup %5261  ;;  %3117 = vst.msk [vmem:[#allocation3 + $0xe1] sm:$0xff] %vm3063_vm14, %v3058_v35  ;;  %v4942_v31 = vmul.f32 -1.442695, %v8387_v5  ;;  %5269 = vpow2.f32 %v4949_v63  ;;  %v3654_v37 = vmul.f32 %v8277_v27, %v3653_v14  ;;  %vm3657_vm15 = vweird.f32 %v8277_v27  ;;  %v2740_v46 = vpop.f32.mrf.mxu1 }
 0x568   :  { %v5264_v49 = vpop.eup %5263  ;;  %v3218_v18 = vadd.f32 %v3202_v8, %v3153_v48  ;;  %v3251_v13 = vmul.f32 %v8071_v23, %v8382_v21  ;;  %v3348_v59 = vmul.f32 %v8098_v24, %v3185_v57  ;;  %v8405_v1 = vadd.f32 %v8147_v41, %v3557_v54 }
 0x569   :  { %v5266_v50 = vpop.eup %5265  ;;  %v3315_v7 = vadd.f32 %v3299_v30, %v3266_v10  ;;  %v8407_v33 = vadd.f32 1.0, %v5264_v49  ;;  %5271 = vpow2.f32 %v4942_v31  ;;  %v3461_v38 = vadd.f32 %v8357_v61, %v8282_v17 }
 0x56a   :  { %vm3656_vm11 = vweird.f32 %v8242_v62  ;;  %v8414_v14 = vmul.f32 %v8101_v22, %v8382_v21  ;;  %v8417_v44 = vmul.f32 %v8103_v58, %v3136_v42  ;;  %v2988_v36 = vmul.f32 %v5266_v50, %v8373_v43 }
 0x56b   :  { %v3558_v34 = vadd.f32 %v3542_v25, %v3509_v6  ;;  %v8421_v51 = vmul.f32 %v8118_v26, %v3185_v57  ;;  %v2996_v63 = vand.u32 2147483647, %v8373_v43  ;;  %v2998_v17 = vand.u32 2147483648, %v8373_v43  ;;  %vm8485_vm1 = vmor %vm3656_vm11, %vm3657_vm15 }
 0x56c   :  { %5273 = vrcp.f32 %v8407_v33  ;;  %v5268_v61 = vpop.eup %5267  ;;  %v2989_v48 = vsub.f32 1.0, %v2988_v36  ;;  %v8427_v8 = vadd.f32 %v8349_v40, %v2740_v46  ;;  %v4950_v42 = vmul.f32 -1.442695, %v8405_v1 }
 0x56d   :  { %v8430_v53 = vadd.f32 1.0, %v5262_v12  ;;  %v5270_v54 = vpop.eup %5269  ;;  %v8432_v10 = vadd.f32 %v3251_v13, %v3218_v18  ;;  %v8434_v57 = vadd.f32 %v3348_v59, %v3315_v7  ;;  %vm2992_vm2 = vweird.f32 %v8373_v43  ;;  %v3957_v18 = vld [vmem:[%s9522_s18 + $0x30] sm:$0xff] }
 0x56e   :  { %v3510_v30 = vadd.f32 %v8360_v56, %v3461_v38  ;;  %v2990_v35 = vmul.f32 %v5266_v50, %v2989_v48  ;;  %vm2993_vm5 = vweird.f32 %v5266_v50  ;;  %v4943_v6 = vmul.f32 -1.442695, %v8427_v8  ;;  %v3958_v56 = vld [vmem:[%s9522_s18 + $0x38] sm:$0xff]  ;;  %v3137_v46 = vld [vmem:[#allocation3 + $0xe0] sm:$0xff] }
 0x56f   :  { %v8440_v40 = vadd.f32 %v8147_v41, %v3558_v34  ;;  %vm8444_vm12 = vcmp.eq.f32.partialorder %v3660_v39, 8.507059e+37  ;;  %v5272_v12 = vpop.eup %5271  ;;  %vm8448_vm13 = vcmp.eq.f32.partialorder %v2996_v63, 8.507059e+37  ;;  %v2999_v49 = vor.u32 1.1754944e-38, %v2998_v17  ;;  %3976 = vmatpush.msra.mxu2 %v3958_v56  ;;  %vm2994_vm8 = vmor %vm2992_vm2, %vm2993_vm5  ;;  %v3186_v17 = vld [vmem:[#allocation3 + $0xe1] sm:$0xff]  ;;  %v3954_v56 = vld [vmem:[%s9522_s18 + $0x18] sm:$0xff] }
 0x570   :  { %v3543_v39 = vmul.f32 %v8133_v0, %v8324_v16  ;;  %v3655_v13 = vadd.f32 %v8277_v27, %v3654_v37  ;;  %v2991_v59 = vadd.f32 %v5266_v50, %v2990_v35  ;;  %5275 = vpow2.f32 %v4950_v42  ;;  %v3956_v16 = vld [vmem:[%s9522_s18 + $0x28] sm:$0xff] }
 0x571   :  { %v8461_v7 = vadd.f32 1.0, %v5268_v61  ;;  %v8463_v38 = vadd.f32 1.0, %v5270_v54  ;;  %v8470_v34 = vadd.f32 1.0, %v5272_v12  ;;  %5277 = vpow2.f32 %v4943_v6  ;;  %3977 = vmatpush.msra.mxu2 %v3957_v18 }
 0x572   :  { %v8465_v36 = vpop.eup %5273  ;;  %v3559_v37 = vadd.f32 %v3543_v39, %v3510_v30  ;;  %v3663_v63 = vor.u32 1.1754944e-38, %v3662_v28  ;;  %v2995_v61 = vsel %vm2994_vm8, %v5266_v50, %v2991_v59  ;;  %v3011_v42 = vand.u32 2147483647, %v8407_v33  ;;  %v3955_v30 = vld [vmem:[%s9522_s18 + $0x20] sm:$0xff] }
 0x573   :  { %v3003_v48 = vmul.f32 %v8465_v36, %v8407_v33  ;;  %v4951_v43 = vmul.f32 -1.442695, %v8440_v40  ;;  %v3000_v28 = vsel %vm8448_vm13, %v2999_v49, %v2995_v61  ;;  %v3013_v50 = vand.u32 2147483648, %v8407_v33  ;;  %3978 = vmatpush.msra.mxu2 %v3956_v16  ;;  %v3235_v39 = vld [vmem:[#allocation3 + $0xe2] sm:$0xff] }
 0x574   :  { %5279 = vrcp.f32 %v8470_v34  ;;  %v3659_v35 = vsel %vm8485_vm1, %v8277_v27, %v3655_v13  ;;  %v3300_v62 = vmul.f32 %v8084_v11, %v3137_v46  ;;  %v3059_v6 = vmul.f32 %v3000_v28, %v8321_v45 }
 0x575   :  { %v3004_v12 = vsub.f32 1.0, %v3003_v48  ;;  %vm3007_vm7 = vweird.f32 %v8407_v33  ;;  %v3154_v31 = vmul.f32 %v8064_v32, %v3137_v46  ;;  %v3203_v49 = vmul.f32 %v8066_v47, %v3186_v17  ;;  %3979 = vmatpush.msra.mxu2 %v3955_v30 }
 0x576   :  { %v8509_v18 = vmul.f32 %v8133_v0, %v8382_v21  ;;  %v8512_v27 = vadd.f32 %v8147_v41, %v3559_v37  ;;  %v8514_v45 = vpop.eup %5275  ;;  %v3447_v13 = vmul.f32 %v8103_v58, %v3137_v46  ;;  %3118 = vst.msk [vmem:[#allocation3 + $0xf1] sm:$0xff] %vm3063_vm14, %v3059_v6  ;;  %vm3008_vm0 = vweird.f32 %v8465_v36  ;;  %v3953_v37 = vld [vmem:[%s9522_s18 + $0x10] sm:$0xff] }
 0x577   :  { %v3005_v59 = vmul.f32 %v8465_v36, %v3004_v12  ;;  %vm8520_vm10 = vcmp.eq.f32.partialorder %v3011_v42, 8.507059e+37  ;;  %v5278_v21 = vpop.eup %5277  ;;  %v3014_v61 = vor.u32 1.1754944e-38, %v3013_v50  ;;  %v3462_v46 = vadd.f32 %v8417_v44, %v8389_v2  ;;  %3980 = vmatpush.msra.mxu2 %v3954_v56  ;;  %vm3009_vm4 = vmor %vm3007_vm7, %vm3008_vm0  ;;  %v3952_v44 = vld [vmem:[%s9522_s18 + $0x8] sm:$0xff] }
 0x578   :  { %5281 = vpow2.f32 %v4951_v43  ;;  %v8531_v48 = vsel %vm8444_vm12, %v3663_v63, %v3659_v35  ;;  %v3316_v42 = vadd.f32 %v3300_v62, %v8432_v10  ;;  %v8535_v28 = vadd.f32 1.0, %v5278_v21 }
 0x579   :  { %v3006_v54 = vadd.f32 %v8465_v36, %v3005_v59  ;;  %v3413_v50 = vadd.f32 %v8414_v14, %v8434_v57  ;;  %v3219_v6 = vadd.f32 %v3203_v49, %v3154_v31  ;;  %v3252_v12 = vmul.f32 %v8071_v23, %v3235_v39  ;;  %3981 = vmatpush.msra.mxu2 %v3953_v37 }
 0x57a   :  { %v5280_v30 = vpop.eup %5279  ;;  %v3349_v2 = vmul.f32 %v8098_v24, %v3186_v17  ;;  %5283 = vrcp.f32 %v8262_v9  ;;  %v3398_v25 = vmul.f32 %v8101_v22, %v3235_v39  ;;  %v3026_v63 = vand.u32 2147483647, %v8470_v34 }
 0x57b   :  { %v3010_v10 = vsel %vm3009_vm4, %v8465_v36, %v3006_v54  ;;  %v3018_v14 = vmul.f32 %v5280_v30, %v8470_v34  ;;  %5285 = vrcp.f32 %v8535_v28  ;;  %v3463_v57 = vadd.f32 %v3447_v13, %v3413_v50  ;;  %3982 = vmatpush.msra.mxu2 %v3952_v44  ;;  %v3951_v36 = vld [vmem:[%s9522_s18] sm:$0xff] }
 0x57c   :  { %v3015_v33 = vsel %vm8520_vm10, %v3014_v61, %v3010_v10  ;;  %v3028_v43 = vand.u32 2147483648, %v8470_v34  ;;  %v3365_v31 = vadd.f32 %v3349_v2, %v3316_v42  ;;  %v3496_v49 = vmul.f32 %v8118_v26, %v3186_v17 }
 0x57d   :  { %v3060_v35 = vmul.f32 %v3015_v33, %v8352_v20  ;;  %v3019_v62 = vsub.f32 1.0, %v3018_v14  ;;  %v3268_v13 = vadd.f32 %v3252_v12, %v3219_v6  ;;  %v3138_v59 = vld [vmem:[#allocation3 + $0xf0] sm:$0xff]  ;;  %vm3022_vm15 = vweird.f32 %v8470_v34  ;;  %3983 = vmatpush.msra.mxu2 %v3951_v36 }
 0x57e   :  { %v8562_v56 = vpop.eup %5281  ;;  %v3187_v16 = vld [vmem:[#allocation3 + $0xf1] sm:$0xff]  ;;  %v3511_v21 = vadd.f32 %v8421_v51, %v3462_v46  ;;  %v3545_v20 = vmul.f32 %v8133_v0, %v3235_v39  ;;  %v3155_v61 = vmul.f32 %v8064_v32, %v3138_v59  ;;  %v3301_v54 = vmul.f32 %v8084_v11, %v3138_v59 }
 0x57f   :  { %v3204_v37 = vmul.f32 %v8066_v47, %v3187_v16  ;;  %3119 = vst.msk [vmem:[#allocation3 + $0x101] sm:$0xff] %vm3063_vm14, %v3060_v35  ;;  %v3512_v17 = vadd.f32 %v3496_v49, %v3463_v57  ;;  %v3020_v50 = vmul.f32 %v5280_v30, %v3019_v62  ;;  %vm3023_vm11 = vweird.f32 %v5280_v30  ;;  %v3236_v10 = vld [vmem:[#allocation3 + $0xf2] sm:$0xff] }
 0x580   :  { %v8571_v42 = vpop.eup %5283  ;;  %vm8573_vm2 = vcmp.eq.f32.partialorder %v3026_v63, 8.507059e+37  ;;  %v3448_v51 = vmul.f32 %v8103_v58, %v3138_v59  ;;  %v3350_v46 = vmul.f32 %v8098_v24, %v3187_v16  ;;  %v3029_v12 = vor.u32 1.1754944e-38, %v3028_v43  ;;  %vm3024_vm5 = vmor %vm3022_vm15, %vm3023_vm11 }
 0x581   :  { %v5286_v39 = vpop.eup %5285  ;;  %v3317_v2 = vadd.f32 %v3301_v54, %v3268_v13  ;;  %v3414_v44 = vadd.f32 %v3398_v25, %v3365_v31  ;;  %v3021_v14 = vadd.f32 %v5280_v30, %v3020_v50  ;;  %v3560_v33 = vadd.f32 %v8509_v18, %v3511_v21 }
 0x582   :  { %v3033_v57 = vmul.f32 %v5286_v39, %v8535_v28  ;;  %v4952_v63 = vmul.f32 -1.442695, %v8512_v27  ;;  %v3220_v35 = vadd.f32 %v3204_v37, %v3155_v61  ;;  %v3561_v49 = vadd.f32 %v3545_v20, %v3512_v17 }
 0x583   :  { %v3366_v62 = vadd.f32 %v3350_v46, %v3317_v2  ;;  %v3464_v36 = vadd.f32 %v3448_v51, %v3414_v44  ;;  %v3025_v59 = vsel %vm3024_vm5, %v5280_v30, %v3021_v14  ;;  %vm3037_vm12 = vweird.f32 %v8535_v28 }
 0x584   :  { %v3034_v43 = vsub.f32 1.0, %v3033_v57  ;;  %v3043_v25 = vand.u32 2147483648, %v8535_v28  ;;  %v3253_v31 = vmul.f32 %v8071_v23, %v3236_v10  ;;  %v3030_v18 = vsel %vm8573_vm2, %v3029_v12, %v3025_v59 }
 0x585   :  { %v3399_v13 = vmul.f32 %v8101_v22, %v3236_v10  ;;  %v3497_v21 = vmul.f32 %v8118_v26, %v3187_v16  ;;  %v3061_v37 = vmul.f32 %v3030_v18, %v8387_v5  ;;  %vm3038_vm13 = vweird.f32 %v5286_v39 }
 0x586   :  { %v3139_v34 = vld [vmem:[#allocation3 + $0x100] sm:$0xff]  ;;  %v3035_v20 = vmul.f32 %v5286_v39, %v3034_v43  ;;  %v3041_v30 = vand.u32 2147483647, %v8535_v28  ;;  %v3269_v17 = vadd.f32 %v3253_v31, %v3220_v35  ;;  %vm3039_vm8 = vmor %vm3037_vm12, %vm3038_vm13  ;;  %v3044_v5 = vor.u32 1.1754944e-38, %v3043_v25  ;;  %v3435_v35 = vld [vmem:[#allocation3 + $0x130] sm:$0xff] }
 0x587   :  { %v3188_v61 = vld [vmem:[#allocation3 + $0x101] sm:$0xff]  ;;  %v3302_v54 = vmul.f32 %v8084_v11, %v3139_v34  ;;  %v3415_v50 = vadd.f32 %v3399_v13, %v3366_v62  ;;  %v3513_v51 = vadd.f32 %v3497_v21, %v3464_v36  ;;  %v3156_v6 = vmul.f32 %v8064_v32, %v3139_v34  ;;  %3120 = vst.msk [vmem:[#allocation3 + $0x111] sm:$0xff] %vm3063_vm14, %v3061_v37 }
 0x588   :  { %v3205_v46 = vmul.f32 %v8066_v47, %v3188_v61  ;;  %v3036_v16 = vadd.f32 %v5286_v39, %v3035_v20  ;;  %v3449_v12 = vmul.f32 %v8103_v58, %v3139_v34  ;;  %v3546_v44 = vmul.f32 %v8133_v0, %v3236_v10  ;;  %v3237_v59 = vld [vmem:[#allocation3 + $0x102] sm:$0xff] }
 0x589   :  { %v3318_v2 = vadd.f32 %v3302_v54, %v3269_v17  ;;  %v8603_v14 = vadd.f32 %v8147_v41, %v3560_v33  ;;  %vm3042_vm1 = vcmp.eq.f32.partialorder %v3041_v30, 8.507059e+37  ;;  %v3667_v36 = vmul.f32 %v8571_v42, %v8262_v9 }
 0x58a   :  { %v3040_v57 = vsel %vm3039_vm8, %v5286_v39, %v3036_v16  ;;  %v3465_v62 = vadd.f32 %v3449_v12, %v3415_v50  ;;  %v3351_v31 = vmul.f32 %v8098_v24, %v3188_v61  ;;  %v3562_v28 = vadd.f32 %v3546_v44, %v3513_v51 }
 0x58b   :  { %v3045_v43 = vsel %vm3042_vm1, %v3044_v5, %v3040_v57  ;;  %v8609_v25 = vadd.f32 1.0, %v8514_v45  ;;  %v3221_v18 = vadd.f32 %v3205_v46, %v3156_v6  ;;  %v3498_v33 = vmul.f32 %v8118_v26, %v3188_v61  ;;  %v3484_v45 = vld [vmem:[#allocation3 + $0x131] sm:$0xff] }
 0x58c   :  { %v3062_v10 = vmul.f32 %v3045_v43, %v8427_v8  ;;  %5287 = vpow2.f32 %v4952_v63  ;;  %v3367_v39 = vadd.f32 %v3351_v31, %v3318_v2  ;;  %v8614_v13 = vmul.f32 %v8103_v58, %v3435_v35 }
 0x58d   :  { %v8617_v21 = vadd.f32 %v8147_v41, %v3561_v49  ;;  %v8620_v34 = vadd.f32 1.0, %v8562_v56  ;;  %v3254_v37 = vmul.f32 %v8071_v23, %v3237_v59  ;;  %v3514_v8 = vadd.f32 %v3498_v33, %v3465_v62  ;;  %v3533_v62 = vld [vmem:[#allocation3 + $0x132] sm:$0xff] }
 0x58e   :  { %3121 = vst.msk [vmem:[#allocation3 + $0x121] sm:$0xff] %vm3063_vm14, %v3062_v10  ;;  %v4953_v20 = vmul.f32 -1.442695, %v8603_v14  ;;  %v3668_v61 = vsub.f32 1.0, %v3667_v36  ;;  %v3140_v63 = vld [vmem:[#allocation3 + $0x110] sm:$0xff]  ;;  %v3400_v54 = vmul.f32 %v8101_v22, %v3237_v59  ;;  %v3547_v17 = vmul.f32 %v8133_v0, %v3237_v59 }
 0x58f   :  { %v3189_v30 = vld [vmem:[#allocation3 + $0x111] sm:$0xff]  ;;  %v8628_v49 = vadd.f32 %v8147_v41, %v3562_v28  ;;  %5289 = vrcp.f32 %v8395_v60  ;;  %v3157_v56 = vmul.f32 %v8064_v32, %v3140_v63  ;;  %v3270_v51 = vadd.f32 %v3254_v37, %v3221_v18 }
 0x590   :  { %v3206_v50 = vmul.f32 %v8066_v47, %v3189_v30  ;;  %v3303_v6 = vmul.f32 %v8084_v11, %v3140_v63  ;;  %v3238_v46 = vld [vmem:[#allocation3 + $0x112] sm:$0xff]  ;;  %v3416_v16 = vadd.f32 %v3400_v54, %v3367_v39  ;;  %v3450_v12 = vmul.f32 %v8103_v58, %v3140_v63 }
 0x591   :  { %v8636_v5 = vmul.f32 %v8118_v26, %v3484_v45  ;;  %vm3672_vm7 = vweird.f32 %v8571_v42  ;;  %v3352_v57 = vmul.f32 %v8098_v24, %v3189_v30  ;;  %v3563_v32 = vadd.f32 %v3547_v17, %v3514_v8 }
 0x592   :  { %v5288_v41 = vpop.eup %5287  ;;  %v3222_v2 = vadd.f32 %v3206_v50, %v3157_v56  ;;  %v3319_v44 = vadd.f32 %v3303_v6, %v3270_v51  ;;  %v3466_v35 = vadd.f32 %v3450_v12, %v3416_v16  ;;  %v3499_v47 = vmul.f32 %v8118_v26, %v3189_v30 }
 0x593   :  { %5291 = vpow2.f32 %v4953_v20  ;;  %v4954_v36 = vmul.f32 -1.442695, %v8617_v21  ;;  %vm3671_vm0 = vweird.f32 %v8262_v9  ;;  %v3255_v59 = vmul.f32 %v8071_v23, %v3238_v46 }
 0x594   :  { %v3368_v43 = vadd.f32 %v3352_v57, %v3319_v44  ;;  %v4955_v31 = vmul.f32 -1.442695, %v8628_v49  ;;  %v3669_v28 = vmul.f32 %v8571_v42, %v3668_v61  ;;  %v3401_v39 = vmul.f32 %v8101_v22, %v3238_v46  ;;  %v8656_v61 = vld [vmem:[%s9521_s17] ss:$0 sm:$0xff]  ;;  %vm8684_vm10 = vmor %vm3671_vm0, %vm3672_vm7 }
 0x595   :  { %v8646_v10 = vpop.eup %5289  ;;  %v3287_v18 = vld [vmem:[#allocation3 + $0x120] sm:$0xff]  ;;  %v3515_v37 = vadd.f32 %v3499_v47, %v3466_v35  ;;  %v3548_v45 = vmul.f32 %v8133_v0, %v3238_v46  ;;  %5293 = vrcp.f32 %v8430_v53  ;;  %v3271_v8 = vadd.f32 %v3255_v59, %v3222_v2 }
 0x596   :  { %v3336_v33 = vld [vmem:[#allocation3 + $0x121] sm:$0xff]  ;;  %v3304_v20 = vmul.f32 %v8084_v11, %v3287_v18  ;;  %v3550_v23 = vmul.f32 %v8133_v0, %v3533_v62  ;;  %v8659_v63 = vadd.f32 %v8656_v61, %v3563_v32  ;;  %v3417_v54 = vadd.f32 %v3401_v39, %v3368_v43 }
 0x597   :  { %v3385_v30 = vld [vmem:[#allocation3 + $0x122] sm:$0xff]  ;;  %v3451_v17 = vmul.f32 %v8103_v58, %v3287_v18  ;;  %v3564_v56 = vadd.f32 %v3548_v45, %v3515_v37  ;;  %5295 = vpow2.f32 %v4954_v36  ;;  %v3353_v51 = vmul.f32 %v8098_v24, %v3336_v33 }
 0x598   :  { %v3320_v50 = vadd.f32 %v3304_v20, %v3271_v8  ;;  %v3675_v11 = vand.u32 2147483647, %v8262_v9  ;;  %v3682_v6 = vmul.f32 %v8646_v10, %v8395_v60  ;;  %v3500_v12 = vmul.f32 %v8118_v26, %v3336_v33 }
 0x599   :  { %v5292_v46 = vpop.eup %5291  ;;  %v3467_v16 = vadd.f32 %v3451_v17, %v3417_v54  ;;  %5297 = vpow2.f32 %v4955_v31  ;;  %v3670_v2 = vadd.f32 %v8571_v42, %v3669_v28  ;;  %v3402_v58 = vmul.f32 %v8101_v22, %v3385_v30 }
 0x59a   :  { %v3369_v44 = vadd.f32 %v3353_v51, %v3320_v50  ;;  %v4956_v57 = vmul.f32 -1.442695, %v8659_v63  ;;  %5299 = vrcp.f32 %v8461_v7  ;;  %v3549_v35 = vmul.f32 %v8133_v0, %v3385_v30 }
 0x59b   :  { %v8671_v24 = vpop.eup %5293  ;;  %v3516_v32 = vadd.f32 %v3500_v12, %v3467_v16  ;;  %v8675_v47 = vadd.f32 %v8656_v61, %v3564_v56  ;;  %v3677_v26 = vand.u32 2147483648, %v8262_v9  ;;  %v8678_v36 = vadd.f32 1.0, %v5288_v41 }
 0x59c   :  { %v3418_v62 = vadd.f32 %v3402_v58, %v3369_v44  ;;  %v3683_v59 = vsub.f32 1.0, %v3682_v6  ;;  %v3697_v0 = vmul.f32 %v8671_v24, %v8430_v53  ;;  %v8690_v28 = vadd.f32 1.0, %v5292_v46 }
 0x59d   :  { %v5296_v43 = vpop.eup %5295  ;;  %v3565_v31 = vadd.f32 %v3549_v35, %v3516_v32  ;;  %v3674_v41 = vsel %vm8684_vm10, %v8571_v42, %v3670_v2  ;;  %vm8695_vm4 = vcmp.eq.f32.partialorder %v3675_v11, 8.507059e+37  ;;  %5301 = vpow2.f32 %v4956_v57 }
 0x59e   :  { %v3468_v9 = vadd.f32 %v8614_v13, %v3418_v62  ;;  %v3690_v33 = vand.u32 2147483647, %v8395_v60  ;;  %v3698_v39 = vsub.f32 1.0, %v3697_v0  ;;  %v4957_v8 = vmul.f32 -1.442695, %v8675_v47 }
 0x59f   :  { %v5298_v37 = vpop.eup %5297  ;;  %v8702_v45 = vadd.f32 %v8656_v61, %v3565_v31  ;;  %v3678_v20 = vor.u32 1.1754944e-38, %v3677_v26  ;;  %5303 = vrcp.f32 %v8463_v38  ;;  %v3684_v54 = vmul.f32 %v8646_v10, %v3683_v59 }
 0x5a0   :  { %v8706_v42 = vpop.eup %5299  ;;  %v3517_v30 = vadd.f32 %v8636_v5, %v3468_v9  ;;  %vm3686_vm15 = vweird.f32 %v8395_v60  ;;  %v3692_v13 = vand.u32 2147483648, %v8395_v60  ;;  %v8712_v17 = vadd.f32 1.0, %v5296_v43 }
 0x5a1   :  { %v8716_v56 = vsel %vm8695_vm4, %v3678_v20, %v3674_v41  ;;  %v3699_v50 = vmul.f32 %v8671_v24, %v3698_v39  ;;  %v3712_v51 = vmul.f32 %v8706_v42, %v8461_v7  ;;  %v4958_v5 = vmul.f32 -1.442695, %v8702_v45 }
 0x5a2   :  { %v3566_v11 = vadd.f32 %v3550_v23, %v3517_v30  ;;  %v8722_v6 = vadd.f32 1.0, %v5298_v37  ;;  %vm8724_vm11 = vcmp.eq.f32.partialorder %v3690_v33, 8.507059e+37  ;;  %vm3701_vm2 = vweird.f32 %v8430_v53 }
 0x5a3   :  { %5305 = vpow2.f32 %v4957_v8  ;;  %v3705_v16 = vand.u32 2147483647, %v8430_v53  ;;  %v3707_v12 = vand.u32 2147483648, %v8430_v53  ;;  %v3713_v2 = vsub.f32 1.0, %v3712_v51  ;;  %v5302_v44 = vpop.eup %5301 }
 0x5a4   :  { %v3685_v58 = vadd.f32 %v8646_v10, %v3684_v54  ;;  %vm3687_vm5 = vweird.f32 %v8646_v10  ;;  %v3693_v23 = vor.u32 1.1754944e-38, %v3692_v13  ;;  %vm3702_vm12 = vweird.f32 %v8671_v24 }
 0x5a5   :  { %v8734_v57 = vpop.eup %5303  ;;  %v8737_v32 = vadd.f32 %v8656_v61, %v3566_v11  ;;  %v3700_v35 = vadd.f32 %v8671_v24, %v3699_v50  ;;  %v3720_v26 = vand.u32 2147483647, %v8461_v7  ;;  %5307 = vrcp.f32 %v8609_v25  ;;  %vm8748_vm13 = vmor %vm3686_vm15, %vm3687_vm5 }
 0x5a6   :  { %5309 = vpow2.f32 %v4958_v5  ;;  %v3714_v62 = vmul.f32 %v8706_v42, %v3713_v2  ;;  %v3722_v22 = vand.u32 2147483648, %v8461_v7  ;;  %v3727_v59 = vmul.f32 %v8734_v57, %v8463_v38  ;;  %vm8767_vm7 = vmor %vm3701_vm2, %vm3702_vm12 }
 0x5a7   :  { %vm8752_vm8 = vcmp.eq.f32.partialorder %v3705_v16, 8.507059e+37  ;;  %v3708_v43 = vor.u32 1.1754944e-38, %v3707_v12  ;;  %vm3716_vm1 = vweird.f32 %v8461_v7  ;;  %5311 = vrcp.f32 %v8620_v34 }
 0x5a8   :  { %v8758_v31 = vadd.f32 1.0, %v5302_v44  ;;  %v3689_v41 = vsel %vm8748_vm13, %v8646_v10, %v3685_v58  ;;  %v3728_v18 = vsub.f32 1.0, %v3727_v59  ;;  %v3735_v9 = vand.u32 2147483647, %v8463_v38 }
 0x5a9   :  { %v5306_v33 = vpop.eup %5305  ;;  %v4959_v39 = vmul.f32 -1.442695, %v8737_v32  ;;  %v3704_v37 = vsel %vm8767_vm7, %v8671_v24, %v3700_v35  ;;  %v3737_v10 = vand.u32 2147483648, %v8463_v38  ;;  %5313 = vrcp.f32 %v8678_v36 }
 0x5aa   :  { %v3715_v53 = vadd.f32 %v8706_v42, %v3714_v62  ;;  %vm3717_vm0 = vweird.f32 %v8706_v42  ;;  %vm8780_vm10 = vcmp.eq.f32.partialorder %v3720_v26, 8.507059e+37  ;;  %v3723_v20 = vor.u32 1.1754944e-38, %v3722_v22 }
 0x5ab   :  { %v8784_v30 = vpop.eup %5307  ;;  %v8788_v54 = vsel %vm8724_vm11, %v3693_v23, %v3689_v41  ;;  %v3729_v24 = vmul.f32 %v8734_v57, %v3728_v18  ;;  %vm3731_vm4 = vweird.f32 %v8463_v38  ;;  %v3752_v13 = vand.u32 2147483648, %v8609_v25  ;;  %vm8808_vm15 = vmor %vm3716_vm1, %vm3717_vm0 }
 0x5ac   :  { %v5310_v50 = vpop.eup %5309  ;;  %v8793_v51 = vadd.f32 1.0, %v5306_v33  ;;  %v8797_v11 = vsel %vm8752_vm8, %v3708_v43, %v3704_v37  ;;  %v3742_v5 = vmul.f32 %v8784_v30, %v8609_v25  ;;  %5315 = vrcp.f32 %v8690_v28 }
 0x5ad   :  { %v8802_v46 = vpop.eup %5311  ;;  %5317 = vpow2.f32 %v4959_v39  ;;  %vm8812_vm11 = vcmp.eq.f32.partialorder %v3735_v9, 8.507059e+37  ;;  %v3738_v2 = vor.u32 1.1754944e-38, %v3737_v10  ;;  %vm3746_vm2 = vweird.f32 %v8609_v25 }
 0x5ae   :  { %v3750_v44 = vand.u32 2147483647, %v8609_v25  ;;  %v3767_v58 = vand.u32 2147483648, %v8620_v34  ;;  %v3719_v23 = vsel %vm8808_vm15, %v8706_v42, %v3715_v53  ;;  %v3743_v7 = vsub.f32 1.0, %v3742_v5 }
 0x5af   :  { %v3757_v35 = vmul.f32 %v8802_v46, %v8620_v34  ;;  %v3765_v26 = vand.u32 2147483647, %v8620_v34  ;;  %v8825_v62 = vpop.eup %5313  ;;  %v3730_v22 = vadd.f32 %v8734_v57, %v3729_v24  ;;  %vm3732_vm5 = vweird.f32 %v8734_v57 }
 0x5b0   :  { %v3753_v59 = vor.u32 1.1754944e-38, %v3752_v13  ;;  %vm3761_vm12 = vweird.f32 %v8620_v34  ;;  %v8830_v0 = vadd.f32 1.0, %v5310_v50  ;;  %v3744_v61 = vmul.f32 %v8784_v30, %v3743_v7  ;;  %vm8845_vm13 = vmor %vm3731_vm4, %vm3732_vm5 }
 0x5b1   :  { %v3758_v42 = vsub.f32 1.0, %v3757_v35  ;;  %v3772_v43 = vmul.f32 %v8825_v62, %v8678_v36  ;;  %v8837_v41 = vsel %vm8780_vm10, %v3723_v20, %v3719_v23  ;;  %v3768_v60 = vor.u32 1.1754944e-38, %v3767_v58 }
 0x5b2   :  { %v3782_v18 = vand.u32 2147483648, %v8678_v36  ;;  %5319 = vrcp.f32 %v8712_v17  ;;  %v8841_v9 = vpop.eup %5315  ;;  %vm3747_vm8 = vweird.f32 %v8784_v30  ;;  %vm8850_vm1 = vcmp.eq.f32.partialorder %v3750_v44, 8.507059e+37 }
 0x5b3   :  { %v3759_v37 = vmul.f32 %v8802_v46, %v3758_v42  ;;  %vm8855_vm7 = vcmp.eq.f32.partialorder %v3765_v26, 8.507059e+37  ;;  %v3773_v53 = vsub.f32 1.0, %v3772_v43  ;;  %vm3776_vm0 = vweird.f32 %v8678_v36  ;;  %v5318_v8 = vpop.eup %5317  ;;  %vm8884_vm15 = vmor %vm3746_vm2, %vm3747_vm8 }
 0x5b4   :  { %v3780_v38 = vand.u32 2147483647, %v8678_v36  ;;  %v3734_v20 = vsel %vm8845_vm13, %v8734_v57, %v3730_v22  ;;  %v3787_v24 = vmul.f32 %v8841_v9, %v8690_v28  ;;  %v3797_v13 = vand.u32 2147483648, %v8690_v28 }
 0x5b5   :  { %5321 = vrcp.f32 %v8722_v6  ;;  %v3745_v50 = vadd.f32 %v8784_v30, %v3744_v61  ;;  %v3760_v5 = vadd.f32 %v8802_v46, %v3759_v37  ;;  %vm3762_vm10 = vweird.f32 %v8802_v46 }
 0x5b6   :  { %v3774_v16 = vmul.f32 %v8825_v62, %v3773_v53  ;;  %v3783_v44 = vor.u32 1.1754944e-38, %v3782_v18  ;;  %v3788_v58 = vsub.f32 1.0, %v3787_v24  ;;  %vm3791_vm4 = vweird.f32 %v8690_v28 }
 0x5b7   :  { %v3812_v57 = vand.u32 2147483648, %v8712_v17  ;;  %v8874_v23 = vadd.f32 1.0, %v5318_v8  ;;  %v8878_v7 = vsel %vm8812_vm11, %v3738_v2, %v3734_v20  ;;  %vm8888_vm5 = vcmp.eq.f32.partialorder %v3780_v38, 8.507059e+37  ;;  %vm8898_vm11 = vmor %vm3761_vm12, %vm3762_vm10 }
 0x5b8   :  { %v3795_v22 = vand.u32 2147483647, %v8690_v28  ;;  %5323 = vrcp.f32 %v8758_v31  ;;  %v8894_v61 = vpop.eup %5319  ;;  %vm3777_vm2 = vweird.f32 %v8825_v62  ;;  %v3789_v25 = vmul.f32 %v8841_v9, %v3788_v58 }
 0x5b9   :  { %v3798_v2 = vor.u32 1.1754944e-38, %v3797_v13  ;;  %v3810_v42 = vand.u32 2147483647, %v8712_v17  ;;  %v3749_v43 = vsel %vm8884_vm15, %v8784_v30, %v3745_v50  ;;  %v3764_v18 = vsel %vm8898_vm11, %v8802_v46, %v3760_v5  ;;  %vm8939_vm10 = vmor %vm3776_vm0, %vm3777_vm2 }
 0x5ba   :  { %v3775_v34 = vadd.f32 %v8825_v62, %v3774_v16  ;;  %v3802_v33 = vmul.f32 %v8894_v61, %v8712_v17  ;;  %vm3792_vm12 = vweird.f32 %v8841_v9  ;;  %vm3806_vm13 = vweird.f32 %v8712_v17 }
 0x5bb   :  { %v8914_v37 = vpop.eup %5321  ;;  %v3813_v53 = vor.u32 1.1754944e-38, %v3812_v57  ;;  %v3825_v38 = vand.u32 2147483647, %v8722_v6  ;;  %vm8919_vm8 = vcmp.eq.f32.partialorder %v3795_v22, 8.507059e+37  ;;  %v3827_v20 = vand.u32 2147483648, %v8722_v6  ;;  %vm8965_vm0 = vmor %vm3791_vm4, %vm3792_vm12 }
 0x5bc   :  { %v3803_v8 = vsub.f32 1.0, %v3802_v33  ;;  %v3817_v46 = vmul.f32 %v8914_v37, %v8722_v6  ;;  %5325 = vrcp.f32 %v8793_v51  ;;  %v8929_v24 = vsel %vm8850_vm1, %v3753_v59, %v3749_v43 }
 0x5bd   :  { %v8933_v13 = vsel %vm8855_vm7, %v3768_v60, %v3764_v18  ;;  %v3790_v5 = vadd.f32 %v8841_v9, %v3789_v25  ;;  %vm3821_vm15 = vweird.f32 %v8722_v6  ;;  %v3779_v59 = vsel %vm8939_vm10, %v8825_v62, %v3775_v34 }
 0x5be   :  { %v8945_v16 = vpop.eup %5323  ;;  %v3804_v60 = vmul.f32 %v8894_v61, %v3803_v8  ;;  %vm8951_vm1 = vcmp.eq.f32.partialorder %v3810_v42, 8.507059e+37  ;;  %v3818_v36 = vsub.f32 1.0, %v3817_v46  ;;  %v3840_v10 = vand.u32 2147483647, %v8758_v31 }
 0x5bf   :  { %v3832_v58 = vmul.f32 %v8945_v16, %v8758_v31  ;;  %vm3836_vm7 = vweird.f32 %v8758_v31  ;;  %v3842_v57 = vand.u32 2147483648, %v8758_v31  ;;  %5327 = vrcp.f32 %v8830_v0 }
 0x5c0   :  { %v3805_v35 = vadd.f32 %v8894_v61, %v3804_v60  ;;  %vm3807_vm11 = vweird.f32 %v8894_v61  ;;  %v3819_v22 = vmul.f32 %v8914_v37, %v3818_v36  ;;  %vm8972_vm2 = vcmp.eq.f32.partialorder %v3825_v38, 8.507059e+37 }
 0x5c1   :  { %v3828_v25 = vor.u32 1.1754944e-38, %v3827_v20  ;;  %v3784_v42 = vsel %vm8888_vm5, %v3783_v44, %v3779_v59  ;;  %v3794_v28 = vsel %vm8965_vm0, %v8841_v9, %v3790_v5  ;;  %vm3822_vm4 = vweird.f32 %v8914_v37  ;;  %vm8993_vm5 = vmor %vm3806_vm13, %vm3807_vm11 }
 0x5c2   :  { %v3833_v43 = vsub.f32 1.0, %v3832_v58  ;;  %v8982_v18 = vpop.eup %5325  ;;  %v3820_v34 = vadd.f32 %v8914_v37, %v3819_v22  ;;  %vm8985_vm12 = vcmp.eq.f32.partialorder %v3840_v10, 8.507059e+37  ;;  %v3857_v38 = vand.u32 2147483648, %v8793_v51  ;;  %vm9015_vm13 = vmor %vm3821_vm15, %vm3822_vm4 }
 0x5c3   :  { %5329 = vrcp.f32 %v8874_v23  ;;  %v3843_v26 = vor.u32 1.1754944e-38, %v3842_v57  ;;  %v3847_v8 = vmul.f32 %v8982_v18, %v8793_v51  ;;  %v3855_v46 = vand.u32 2147483647, %v8793_v51 }
 0x5c4   :  { %v3834_v9 = vmul.f32 %v8945_v16, %v3833_v43  ;;  %v3809_v20 = vsel %vm8993_vm5, %v8894_v61, %v3805_v35  ;;  %vm3837_vm10 = vweird.f32 %v8945_v16  ;;  %vm3851_vm0 = vweird.f32 %v8793_v51 }
 0x5c5   :  { %v3872_v17 = vand.u32 2147483648, %v8830_v0  ;;  %v9007_v50 = vpop.eup %5327  ;;  %v3799_v5 = vsel %vm8919_vm8, %v3798_v2, %v3794_v28  ;;  %v3848_v60 = vsub.f32 1.0, %v3847_v8  ;;  %v3870_v36 = vand.u32 2147483647, %v8830_v0  ;;  %vm9031_vm15 = vmor %vm3836_vm7, %vm3837_vm10 }
 0x5c6   :  { %v3835_v61 = vadd.f32 %v8945_v16, %v3834_v9  ;;  %v3824_v10 = vsel %vm9015_vm13, %v8914_v37, %v3820_v34  ;;  %v3858_v58 = vor.u32 1.1754944e-38, %v3857_v38  ;;  %v3862_v2 = vmul.f32 %v9007_v50, %v8830_v0 }
 0x5c7   :  { %vm3866_vm8 = vweird.f32 %v8830_v0  ;;  %v3814_v6 = vsel %vm8951_vm1, %v3813_v53, %v3809_v20  ;;  %v3849_v57 = vmul.f32 %v8982_v18, %v3848_v60  ;;  %vm3852_vm11 = vweird.f32 %v8982_v18 }
 0x5c8   :  { %vm9037_vm4 = vcmp.eq.f32.partialorder %v3855_v46, 8.507059e+37  ;;  %vm3881_vm5 = vweird.f32 %v8874_v23  ;;  %v3887_v62 = vand.u32 2147483648, %v8874_v23  ;;  %v3839_v31 = vsel %vm9031_vm15, %v8945_v16, %v3835_v61 }
 0x5c9   :  { %v5330_v39 = vpop.eup %5329  ;;  %v3863_v53 = vsub.f32 1.0, %v3862_v2  ;;  %v3873_v35 = vor.u32 1.1754944e-38, %v3872_v17  ;;  %v3885_v22 = vand.u32 2147483647, %v8874_v23  ;;  %v3829_v28 = vsel %vm8972_vm2, %v3828_v25, %v3824_v10  ;;  %vm9079_vm2 = vmor %vm3851_vm0, %vm3852_vm11 }
 0x5ca   :  { %v3850_v43 = vadd.f32 %v8982_v18, %v3849_v57  ;;  %vm3867_vm1 = vweird.f32 %v9007_v50  ;;  %vm9051_vm7 = vcmp.eq.f32.partialorder %v3870_v36, 8.507059e+37  ;;  %v3877_v38 = vmul.f32 %v5330_v39, %v8874_v23 }
 0x5cb   :  { %v3864_v44 = vmul.f32 %v9007_v50, %v3863_v53  ;;  %v9059_v16 = vmul.f32 %v8531_v48, %v8160_v52  ;;  %v9063_v12 = vmul.f32 %v8716_v56, %v8179_v15  ;;  %v9067_v25 = vmul.f32 %v8788_v54, %v8240_v55 }
 0x5cc   :  { %v3844_v9 = vsel %vm8985_vm12, %v3843_v26, %v3839_v31  ;;  %v3878_v8 = vsub.f32 1.0, %v3877_v38  ;;  %v3888_v46 = vor.u32 1.1754944e-38, %v3887_v62  ;;  %v9073_v20 = vmul.f32 %v8797_v11, %v8305_v29  ;;  %vm9105_vm12 = vmor %vm3866_vm8, %vm3867_vm1 }
 0x5cd   :  { %v3865_v15 = vadd.f32 %v9007_v50, %v3864_v44  ;;  %vm3882_vm10 = vweird.f32 %v5330_v39  ;;  %v9086_v55 = vmul.f32 %v8837_v41, %v8364_v4  ;;  %v9090_v48 = vmul.f32 %v8878_v7, %v8370_v19 }
 0x5ce   :  { %v3854_v29 = vsel %vm9079_vm2, %v8982_v18, %v3850_v43  ;;  %v3879_v56 = vmul.f32 %v5330_v39, %v3878_v8  ;;  %v9096_v54 = vmul.f32 %v3784_v42, %v8512_v27  ;;  %v9099_v51 = vmul.f32 %v3799_v5, %v8603_v14  ;;  %vm9129_vm0 = vmor %vm3881_vm5, %vm3882_vm10 }
 0x5cf   :  { %v9110_v19 = vmul.f32 %v3814_v6, %v8617_v21  ;;  %v3907_v11 = vsel %vm3063_vm14, %v9059_v16, 0.0  ;;  %v3908_v27 = vsel %vm3063_vm14, %v9063_v12, 0.0  ;;  %v3910_v14 = vsel %vm3063_vm14, %v9067_v25, 0.0 }
 0x5d0   :  { %v3869_v0 = vsel %vm9105_vm12, %v9007_v50, %v3865_v15  ;;  %v3880_v41 = vadd.f32 %v5330_v39, %v3879_v56  ;;  %v9122_v7 = vmul.f32 %v3829_v28, %v8628_v49  ;;  %v3909_v42 = vadd.f32 %v3908_v27, %v3907_v11 }
 0x5d1   :  { %v3859_v21 = vsel %vm9037_vm4, %v3858_v58, %v3854_v29  ;;  %v9135_v33 = vmul.f32 %v8929_v24, %v8405_v1  ;;  %v9138_v26 = vmul.f32 %v3844_v9, %v8659_v63  ;;  %v3912_v49 = vsel %vm3063_vm14, %v9073_v20, 0.0 }
 0x5d2   :  { %v3884_v17 = vsel %vm9129_vm0, %v5330_v39, %v3880_v41  ;;  %v3911_v50 = vadd.f32 %v3910_v14, %v3909_v42  ;;  %v3928_v23 = vsel %vm3063_vm14, %v9096_v54, 0.0  ;;  %v3929_v5 = vsel %vm3063_vm14, %v9099_v51, 0.0  ;;  %v5060_v42 = vld [vmem:[%s9523_s19] ss:$0 sm:$0xff]  ;;  %s4728_s19 = sshll.u32 %s5437_s15, 4  ;;  %s4729_s19 = int_to_ptr.vmem [resolvable:$true] %s4728_s19 }
 0x5d3   :  { %v3874_v1 = vsel %vm9051_vm7, %v3873_v35, %v3869_v0  ;;  %v3914_v63 = vsel %vm3063_vm14, %v9086_v55, 0.0  ;;  %v3930_v24 = vadd.f32 %v3929_v5, %v3928_v23  ;;  %v3931_v59 = vsel %vm3063_vm14, %v9110_v19, 0.0 }
 0x5d4   :  { %vm3886_vm13 = vcmp.eq.f32.partialorder %v3885_v22, 8.507059e+37  ;;  %v9155_v61 = vmul.f32 %v3859_v21, %v8675_v47  ;;  %v3913_v60 = vadd.f32 %v3912_v49, %v3911_v50  ;;  %v3933_v36 = vsel %vm3063_vm14, %v9122_v7, 0.0  ;;  %v4008_v21 = vld [vmem:[%s9524_s20] sm:$0xf] }
 0x5d5   :  { %v3889_v10 = vsel %vm3886_vm13, %v3888_v46, %v3884_v17  ;;  %v9161_v58 = vmul.f32 %v8933_v13, %v8440_v40  ;;  %v3916_v2 = vsel %vm3063_vm14, %v9090_v48, 0.0  ;;  %v3932_v6 = vadd.f32 %v3931_v59, %v3930_v24  ;;  %4962 = vmatpush.msk.msrb.mxu2 %vm2476_vm6, %v4008_v21 }
 0x5d6   :  { %v9166_v30 = vmul.f32 %v3874_v1, %v8702_v45  ;;  %v3915_v57 = vadd.f32 %v3914_v63, %v3913_v60  ;;  %v3935_v47 = vsel %vm3063_vm14, %v9138_v26, 0.0  ;;  %v3918_v37 = vsel %vm3063_vm14, %v9135_v33, 0.0 }
 0x5d7   :  { %v3934_v62 = vadd.f32 %v3933_v36, %v3932_v6  ;;  %v9173_v39 = vmul.f32 %v3889_v10, %v8737_v32  ;;  %v3937_v13 = vsel %vm3063_vm14, %v9155_v61, 0.0  ;;  %v3920_v31 = vsel %vm3063_vm14, %v9161_v58, 0.0 }
 0x5d8   :  { %v3917_v40 = vadd.f32 %v3916_v2, %v3915_v57  ;;  %v3939_v35 = vsel %vm3063_vm14, %v9166_v30, 0.0 }
 0x5d9   :  { %v3936_v45 = vadd.f32 %v3935_v47, %v3934_v62  ;;  %v3941_v43 = vsel %vm3063_vm14, %v9173_v39, 0.0  ;;  %v5061_v47 = vld [vmem:[%s9525_s21] ss:$0 sm:$0xff] }
 0x5da   :  { %v3919_v53 = vadd.f32 %v3918_v37, %v3917_v40  ;;  %v5041_v40 = vld [vmem:[%s9526_s22 + $0x18] sm:$0xff] }
 0x5db   :  { %v3938_v22 = vadd.f32 %v3937_v13, %v3936_v45  ;;  %v5039_v45 = vld [vmem:[%s9526_s22 + $0x8] sm:$0xff] }
 0x5dc   :  { %v3921_v28 = vadd.f32 %v3920_v31, %v3919_v53  ;;  %v5040_v31 = vld [vmem:[%s9526_s22 + $0x10] sm:$0xff] }
 0x5dd   :  { %v3940_v34 = vadd.f32 %v3939_v35, %v3938_v22  ;;  %v5038_v35 = vld [vmem:[%s9526_s22] sm:$0xff] }
 0x5de   :  { %v3922_v32 = vrot.slane %v3921_v28, 4 }
 0x5df   :  { %v3942_v38 = vadd.f32 %v3941_v43, %v3940_v34  ;;  %v4207_v34 = vld [vmem:[%s9528_s24 + $0x8] sm:$0xf] }
 0x5e0   :  { %v3923_v44 = vadd.f32 %v3922_v32, %v3921_v28  ;;  %v4217_v32 = vunpack.c.l.b16 %v4207_v34 }
 0x5e1   :  { %v3943_v9 = vrot.slane %v3942_v38, 4 }
 0x5e2   :  { %v3924_v8 = vrot.slane %v3923_v44, 2 }
 0x5e3   :  { %v3944_v46 = vadd.f32 %v3943_v9, %v3942_v38  ;;  %v4219_v9 = vpack.c.b16 %v4217_v32, %v4217_v32 }
 0x5e4   :  { %v3925_v52 = vadd.f32 %v3924_v8, %v3923_v44 }
 0x5e5   :  { %v3945_v15 = vrot.slane %v3944_v46, 2 }
 0x5e6   :  { %v3926_v29 = vrot.slane %v3925_v52, 1 }
 0x5e7   :  { %v3946_v56 = vadd.f32 %v3945_v15, %v3944_v46 }
 0x5e8   :  { %v3927_v4 = vadd.f32 %v3926_v29, %v3925_v52  ;;  %v4247_v52 = vsel %vm2476_vm6, %v4219_v9, 0  ;;  %vm4221_vm6 = vcmask 195584  }
 0x5e9   :  { %v3947_v11 = vrot.slane %v3946_v56, 1  ;;  %4255 = vmatpush.bf16.msrb.mxu0 %v4247_v52 }
 0x5ea   :  { %v3949_v14 = vmul.f32 %v3927_v4, %v7881_v3 }
 0x5eb   :  { %v3948_v27 = vadd.f32 %v3947_v11, %v3946_v56 }
 0x5ed   :  { %v3950_v0 = vmul.f32 %v3948_v27, %v7881_v3 }
 0x5ef   :  { %v3965_v41 = vsel %vm2423_vm9, %v3950_v0, %v3949_v14 }
 0x5f0   :  { %4960 = vmatmul.msk.f32.vlgmr.msra.gmra.mxu2 %vm3063_vm14, %v3965_v41 }
 0x5f1   :  { %4152 = vmatpush.bf16.msra.mxu2 %v5041_v40 }
 0x5f5   :  { %4153 = vmatpush.bf16.msra.mxu2 %v5040_v31 }
 0x5f9   :  { %4154 = vmatpush.bf16.msra.mxu2 %v5039_v45 }
 0x5fd   :  { %4155 = vmatpush.bf16.msra.mxu2 %v5038_v35 }
 0x673   :  { %v3985_v18 = vpop.f32.mrf.mxu2 }
 0x674   :  { %v3986_v49 = vadd.f32 %v5060_v42, %v3985_v18 }
 0x676   :  { %v4961_v17 = vmul.f32 -1.442695, %v3986_v49 }
 0x678   :  { %5331 = vpow2.f32 %v4961_v17 }
 0x67e   :  { %v5332_v50 = vpop.eup %5331 }
 0x67f   :  { %v3991_v23 = vadd.f32 1.0, %v5332_v50 }
 0x681   :  { %5333 = vrcp.f32 %v3991_v23  ;;  %v4003_v24 = vand.u32 2147483648, %v3991_v23  ;;  %v4001_v60 = vand.u32 2147483647, %v3991_v23  ;;  %vm3997_vm15 = vweird.f32 %v3991_v23 }
 0x683   :  { %v4004_v10 = vor.u32 1.1754944e-38, %v4003_v24  ;;  %vm4002_vm4 = vcmp.eq.f32.partialorder %v4001_v60, 8.507059e+37 }
 0x687   :  { %v5334_v5 = vpop.eup %5333 }
 0x688   :  { %v3993_v1 = vmul.f32 %v5334_v5, %v3991_v23  ;;  %vm3998_vm8 = vweird.f32 %v5334_v5 }
 0x689   :  { %vm3999_vm11 = vmor %vm3997_vm15, %vm3998_vm8 }
 0x68a   :  { %v3994_v63 = vsub.f32 1.0, %v3993_v1 }
 0x68c   :  { %v3995_v59 = vmul.f32 %v5334_v5, %v3994_v63 }
 0x68e   :  { %v3996_v36 = vadd.f32 %v5334_v5, %v3995_v59 }
 0x690   :  { %v4000_v2 = vsel %vm3999_vm11, %v5334_v5, %v3996_v36 }
 0x691   :  { %v4005_v6 = vsel %vm4002_vm4, %v4004_v10, %v4000_v2 }
 0x692   :  { %v4007_v57 = vmul.f32 %v4005_v6, %v3986_v49 }
 0x694   :  { %4963 = vmatmul.msk.f32.vlgmr.msrb.gmra.mxu2 %vm2472_vm3, %v4007_v57 }
 0x717   :  { %v4036_v37 = vpop.f32.mrf.mxu2 }
 0x718   :  { %v4037_v62 = vadd.f32 %v5061_v47, %v4036_v37 }
 0x71a   :  { %v4964_v13 = vmul.f32 -1.442695, %v4037_v62 }
 0x71c   :  { %5335 = vpow2.f32 %v4964_v13 }
 0x722   :  { %v5336_v53 = vpop.eup %5335 }
 0x723   :  { %v4042_v22 = vadd.f32 1.0, %v5336_v53 }
 0x725   :  { %5337 = vrcp.f32 %v4042_v22  ;;  %v4054_v44 = vand.u32 2147483648, %v4042_v22  ;;  %v4052_v46 = vand.u32 2147483647, %v4042_v22  ;;  %vm4048_vm5 = vweird.f32 %v4042_v22 }
 0x727   :  { %v4055_v29 = vor.u32 1.1754944e-38, %v4054_v44  ;;  %vm4053_vm7 = vcmp.eq.f32.partialorder %v4052_v46, 8.507059e+37 }
 0x72b   :  { %v5338_v28 = vpop.eup %5337 }
 0x72c   :  { %v4044_v43 = vmul.f32 %v5338_v28, %v4042_v22  ;;  %vm4049_vm3 = vweird.f32 %v5338_v28 }
 0x72d   :  { %vm4050_vm1 = vmor %vm4048_vm5, %vm4049_vm3 }
 0x72e   :  { %v4045_v38 = vsub.f32 1.0, %v4044_v43 }
 0x730   :  { %v4046_v8 = vmul.f32 %v5338_v28, %v4045_v38 }
 0x732   :  { %v4047_v15 = vadd.f32 %v5338_v28, %v4046_v8 }
 0x734   :  { %v4051_v56 = vsel %vm4050_vm1, %v5338_v28, %v4047_v15 }
 0x735   :  { %v4056_v4 = vsel %vm4053_vm7, %v4055_v29, %v4051_v56 }
 0x736   :  { %v4060_v11 = vperm.slane %v4056_v4, 0 }
 0x738   :  { %v4064_v27 = vmul.f32 %v4060_v11, %v9059_v16  ;;  %v4065_v14 = vmul.f32 %v4060_v11, %v9063_v12  ;;  %v4066_v41 = vmul.f32 %v4060_v11, %v9067_v25  ;;  %v4067_v42 = vmul.f32 %v4060_v11, %v9073_v20  ;;  %v5042_v25 = vld [vmem:[%s9528_s24] sm:$0xff] }
 0x739   :  { %v4068_v18 = vmul.f32 %v4060_v11, %v9086_v55  ;;  %v4069_v49 = vmul.f32 %v4060_v11, %v9090_v48  ;;  %v4070_v16 = vmul.f32 %v4060_v11, %v9135_v33  ;;  %v4071_v12 = vmul.f32 %v4060_v11, %v9161_v58  ;;  %4256 = vmatpush.bf16.msrb.mxu0 %v5042_v25 }
 0x73a   :  { %v4080_v0 = vpack.c.bf16 %v4065_v14, %v4064_v27  ;;  %v4081_v21 = vpack.c.bf16 %v4067_v42, %v4066_v41  ;;  %v4059_v20 = vrot.slane %v4056_v4, 1 }
 0x73b   :  { %v4082_v17 = vpack.c.bf16 %v4069_v49, %v4068_v18  ;;  %v4083_v50 = vpack.c.bf16 %v4071_v12, %v4070_v16 }
 0x73c   :  { %4981 = vmatmul.msk.bf16.vlgmr.msra.gmra.mxu2 %vm3063_vm14, %v4080_v0  ;;  %v4061_v23 = vperm.slane %v4059_v20, 0 }
 0x73e   :  { %v4072_v55 = vmul.f32 %v4061_v23, %v9096_v54  ;;  %v4073_v48 = vmul.f32 %v4061_v23, %v9099_v51  ;;  %v4074_v33 = vmul.f32 %v4061_v23, %v9110_v19  ;;  %v4075_v58 = vmul.f32 %v4061_v23, %v9122_v7  ;;  %v5062_v7 = vld [vmem:[%s9527_s23] ss:$0 sm:$0xff] }
 0x73f   :  { %v4076_v63 = vmul.f32 %v4061_v23, %v9138_v26  ;;  %v4077_v24 = vmul.f32 %v4061_v23, %v9155_v61  ;;  %v4078_v54 = vmul.f32 %v4061_v23, %v9166_v30  ;;  %v4079_v51 = vmul.f32 %v4061_v23, %v9173_v39 }
 0x740   :  { %v4084_v5 = vpack.c.bf16 %v4073_v48, %v4072_v55  ;;  %v4085_v1 = vpack.c.bf16 %v4075_v58, %v4074_v33 }
 0x741   :  { %v4086_v59 = vpack.c.bf16 %v4077_v24, %v4076_v63  ;;  %v4087_v60 = vpack.c.bf16 %v4079_v51, %v4078_v54 }
 0x74c   :  { %4982 = vmatmul.msk.bf16.gmra.mxu2 %vm3063_vm14, %v4081_v21  ;;  %v9255_v21 = vld [vmem:[%s9529_s25] ss:$0 sm:$0xff] }
 0x75c   :  { %4983 = vmatmul.msk.bf16.gmra.mxu2 %vm3063_vm14, %v4082_v17 }
 0x76c   :  { %4984 = vmatmul.msk.bf16.gmra.mxu2 %vm3063_vm14, %v4083_v50 }
 0x77c   :  { %4985 = vmatmul.msk.bf16.gmra.mxu2 %vm3063_vm14, %v4084_v5 }
 0x78c   :  { %4986 = vmatmul.msk.bf16.gmra.mxu2 %vm3063_vm14, %v4085_v1 }
 0x79c   :  { %4987 = vmatmul.msk.bf16.gmra.mxu2 %vm3063_vm14, %v4086_v59 }
 0x7ac   :  { %4988 = vmatmul.msk.bf16.gmra.mxu2 %vm3063_vm14, %v4087_v60 }
 0x7bf   :  { %v4157_v19 = vpop.f32.mrf.mxu2 }
 0x7c0   :  { %v4158_v10 = vadd.f32 %v5062_v7, %v4157_v19 }
 0x7c7   :  { %v4159_v36 = vpop.f32.mrf.mxu2 }
 0x7c8   :  { %v4160_v26 = vadd.f32 %v5062_v7, %v4159_v36 }
 0x7ca   :  { %v4197_v61 = vpack.c.bf16 %v4160_v26, %v4158_v10 }
 0x7cc   :  { %4993 = vmatmul.msk.bf16.vlgmr.msrb.gmra.mxu0 %vm4221_vm6, %v4197_v61 }
 0x7cf   :  { %v4162_v2 = vpop.f32.mrf.mxu2 }
 0x7d0   :  { %v4163_v30 = vadd.f32 %v5062_v7, %v4162_v2 }
 0x7d7   :  { %v4164_v6 = vpop.f32.mrf.mxu2 }
 0x7d8   :  { %v4165_v57 = vadd.f32 %v5062_v7, %v4164_v6 }
 0x7da   :  { %v4198_v39 = vpack.c.bf16 %v4165_v57, %v4163_v30 }
 0x7dc   :  { %4994 = vmatmul.msk.bf16.gmra.mxu0 %vm4221_vm6, %v4198_v39 }
 0x7df   :  { %v4167_v47 = vpop.f32.mrf.mxu2 }
 0x7e0   :  { %v4168_v62 = vadd.f32 %v5062_v7, %v4167_v47 }
 0x7e7   :  { %v4169_v37 = vpop.f32.mrf.mxu2 }
 0x7e8   :  { %v4170_v40 = vadd.f32 %v5062_v7, %v4169_v37 }
 0x7ea   :  { %v4199_v13 = vpack.c.bf16 %v4170_v40, %v4168_v62 }
 0x7ec   :  { %4995 = vmatmul.msk.bf16.gmra.mxu0 %vm4221_vm6, %v4199_v13 }
 0x7ef   :  { %v4172_v31 = vpop.f32.mrf.mxu2 }
 0x7f0   :  { %v4173_v53 = vadd.f32 %v5062_v7, %v4172_v31 }
 0x7f7   :  { %v4174_v45 = vpop.f32.mrf.mxu2 }
 0x7f8   :  { %v4175_v35 = vadd.f32 %v5062_v7, %v4174_v45 }
 0x7fa   :  { %v4200_v22 = vpack.c.bf16 %v4175_v35, %v4173_v53 }
 0x7fc   :  { %4996 = vmatmul.msk.bf16.gmra.mxu0 %vm4221_vm6, %v4200_v22 }
 0x7ff   :  { %v4177_v28 = vpop.f32.mrf.mxu2 }
 0x800   :  { %v4178_v34 = vadd.f32 %v5062_v7, %v4177_v28 }
 0x807   :  { %v4179_v43 = vpop.f32.mrf.mxu2 }
 0x808   :  { %v4180_v32 = vadd.f32 %v5062_v7, %v4179_v43 }
 0x80a   :  { %v4201_v38 = vpack.c.bf16 %v4180_v32, %v4178_v34 }
 0x80c   :  { %4997 = vmatmul.msk.bf16.gmra.mxu0 %vm4221_vm6, %v4201_v38 }
 0x80f   :  { %v4182_v44 = vpop.f32.mrf.mxu2 }
 0x810   :  { %v4183_v8 = vadd.f32 %v5062_v7, %v4182_v44 }
 0x817   :  { %v4184_v9 = vpop.f32.mrf.mxu2 }
 0x818   :  { %v4185_v46 = vadd.f32 %v5062_v7, %v4184_v9 }
 0x81a   :  { %v4202_v52 = vpack.c.bf16 %v4185_v46, %v4183_v8 }
 0x81c   :  { %4998 = vmatmul.msk.bf16.gmra.mxu0 %vm4221_vm6, %v4202_v52 }
 0x81f   :  { %v4187_v15 = vpop.f32.mrf.mxu2 }
 0x820   :  { %v4188_v56 = vadd.f32 %v5062_v7, %v4187_v15 }
 0x827   :  { %v4189_v29 = vpop.f32.mrf.mxu2 }
 0x828   :  { %v4190_v4 = vadd.f32 %v5062_v7, %v4189_v29 }
 0x82a   :  { %v4203_v11 = vpack.c.bf16 %v4190_v4, %v4188_v56 }
 0x82c   :  { %4999 = vmatmul.msk.bf16.gmra.mxu0 %vm4221_vm6, %v4203_v11 }
 0x82f   :  { %v4192_v27 = vpop.f32.mrf.mxu2 }
 0x830   :  { %v4193_v0 = vadd.f32 %v5062_v7, %v4192_v27 }
 0x837   :  { %v4194_v14 = vpop.f32.mrf.mxu2 }
 0x838   :  { %v4195_v41 = vadd.f32 %v5062_v7, %v4194_v14 }
 0x83a   :  { %v4204_v42 = vpack.c.bf16 %v4195_v41, %v4193_v0 }
 0x83c   :  { %5000 = vmatmul.msk.bf16.gmra.mxu0 %vm4221_vm6, %v4204_v42 }
 0x849   :  { %v4258_v18 = vpop.f32.mrf.mxu0 }
 0x84a   :  { %v4259_v49 = vadd.f32 %v9255_v21, %v4258_v18 }
 0x84c   :  { %v5001_v17 = vmul.f32 -1.442695, %v4259_v49 }
 0x84e   :  { %5339 = vpow2.f32 %v5001_v17 }
 0x851   :  { %v4260_v16 = vpop.f32.mrf.mxu0 }
 0x852   :  { %v4261_v12 = vadd.f32 %v9255_v21, %v4260_v16 }
 0x854   :  { %v5340_v50 = vpop.eup %5339  ;;  %v5002_v25 = vmul.f32 -1.442695, %v4261_v12 }
 0x855   :  { %v4346_v20 = vadd.f32 1.0, %v5340_v50 }
 0x856   :  { %5341 = vpow2.f32 %v5002_v25 }
 0x857   :  { %5343 = vrcp.f32 %v4346_v20  ;;  %v4373_v19 = vand.u32 2147483648, %v4346_v20  ;;  %vm4367_vm10 = vweird.f32 %v4346_v20  ;;  %v4371_v10 = vand.u32 2147483647, %v4346_v20 }
 0x859   :  { %v4263_v23 = vpop.f32.mrf.mxu0  ;;  %v4374_v6 = vor.u32 1.1754944e-38, %v4373_v19  ;;  %vm4372_vm0 = vcmp.eq.f32.partialorder %v4371_v10, 8.507059e+37 }
 0x85a   :  { %v9260_v55 = vadd.f32 %v9255_v21, %v4263_v23 }
 0x85c   :  { %v5342_v48 = vpop.eup %5341  ;;  %v5003_v5 = vmul.f32 -1.442695, %v9260_v55 }
 0x85d   :  { %v5344_v33 = vpop.eup %5343  ;;  %v4347_v58 = vadd.f32 1.0, %v5342_v48 }
 0x85e   :  { %v4363_v1 = vmul.f32 %v5344_v33, %v4346_v20  ;;  %5345 = vpow2.f32 %v5003_v5  ;;  %vm4368_vm2 = vweird.f32 %v5344_v33 }
 0x85f   :  { %5347 = vrcp.f32 %v4347_v58  ;;  %vm4369_vm12 = vmor %vm4367_vm10, %vm4368_vm2  ;;  %v4386_v57 = vand.u32 2147483647, %v4347_v58  ;;  %v4388_v39 = vand.u32 2147483648, %v4347_v58  ;;  %vm4382_vm8 = vweird.f32 %v4347_v58 }
 0x860   :  { %v4364_v63 = vsub.f32 1.0, %v4363_v1 }
 0x861   :  { %v4265_v24 = vpop.f32.mrf.mxu0  ;;  %v4389_v22 = vor.u32 1.1754944e-38, %v4388_v39  ;;  %vm4387_vm11 = vcmp.eq.f32.partialorder %v4386_v57, 8.507059e+37 }
 0x862   :  { %v4365_v59 = vmul.f32 %v5344_v33, %v4364_v63  ;;  %v9264_v54 = vadd.f32 %v9255_v21, %v4265_v24 }
 0x864   :  { %v5346_v51 = vpop.eup %5345  ;;  %v4366_v60 = vadd.f32 %v5344_v33, %v4365_v59  ;;  %v5004_v7 = vmul.f32 -1.442695, %v9264_v54 }
 0x865   :  { %v5348_v36 = vpop.eup %5347  ;;  %v4348_v26 = vadd.f32 1.0, %v5346_v51 }
 0x866   :  { %v4378_v61 = vmul.f32 %v5348_v36, %v4347_v58  ;;  %5349 = vpow2.f32 %v5004_v7  ;;  %v4370_v2 = vsel %vm4369_vm12, %v5344_v33, %v4366_v60  ;;  %vm4383_vm13 = vweird.f32 %v5348_v36  ;;  %v5046_v58 = vld [vmem:[%s9530_s26 + $0x18] sm:$0xff] }
 0x867   :  { %5351 = vrcp.f32 %v4348_v26  ;;  %v4375_v37 = vsel %vm4372_vm0, %v4374_v6, %v4370_v2  ;;  %vm4384_vm15 = vmor %vm4382_vm8, %vm4383_vm13  ;;  %v4401_v8 = vand.u32 2147483647, %v4348_v26  ;;  %v4403_v46 = vand.u32 2147483648, %v4348_v26  ;;  %4713 = vmatpush.bf16.msra.mxu3 %v5046_v58 }
 0x868   :  { %v4379_v30 = vsub.f32 1.0, %v4378_v61  ;;  %v4602_v35 = vmul.f32 %v4375_v37, %v4259_v49  ;;  %vm4397_vm3 = vweird.f32 %v4348_v26 }
 0x869   :  { %v4268_v47 = vpop.f32.mrf.mxu0  ;;  %v4404_v41 = vor.u32 1.1754944e-38, %v4403_v46  ;;  %vm4402_vm1 = vcmp.eq.f32.partialorder %v4401_v8, 8.507059e+37 }
 0x86a   :  { %v4380_v62 = vmul.f32 %v5348_v36, %v4379_v30  ;;  %v9268_v40 = vadd.f32 %v9255_v21, %v4268_v47  ;;  %v4618_v9 = vsel %vm3063_vm14, %v4602_v35, 0.0 }
 0x86c   :  { %v5350_v13 = vpop.eup %5349  ;;  %v4381_v31 = vadd.f32 %v5348_v36, %v4380_v62  ;;  %v5005_v45 = vmul.f32 -1.442695, %v9268_v40 }
 0x86d   :  { %v5352_v53 = vpop.eup %5351  ;;  %v4349_v28 = vadd.f32 1.0, %v5350_v13 }
 0x86e   :  { %v4385_v43 = vsel %vm4384_vm15, %v5348_v36, %v4381_v31  ;;  %v4393_v34 = vmul.f32 %v5352_v53, %v4348_v26  ;;  %5353 = vpow2.f32 %v5005_v45  ;;  %vm4398_vm4 = vweird.f32 %v5352_v53 }
 0x86f   :  { %v4390_v32 = vsel %vm4387_vm11, %v4389_v22, %v4385_v43  ;;  %5355 = vrcp.f32 %v4349_v28  ;;  %vm4399_vm5 = vmor %vm4397_vm3, %vm4398_vm4  ;;  %v4416_v50 = vand.u32 2147483647, %v4349_v28  ;;  %v4418_v25 = vand.u32 2147483648, %v4349_v28 }
 0x870   :  { %v4603_v38 = vmul.f32 %v4390_v32, %v4261_v12  ;;  %v4394_v44 = vsub.f32 1.0, %v4393_v34  ;;  %vm4412_vm6 = vweird.f32 %v4349_v28 }
 0x871   :  { %v4270_v52 = vpop.f32.mrf.mxu0  ;;  %v4419_v59 = vor.u32 1.1754944e-38, %v4418_v25  ;;  %vm4417_vm10 = vcmp.eq.f32.partialorder %v4416_v50, 8.507059e+37 }
 0x872   :  { %v4619_v15 = vsel %vm3063_vm14, %v4603_v38, 0.0  ;;  %v4395_v29 = vmul.f32 %v5352_v53, %v4394_v44  ;;  %v9274_v56 = vadd.f32 %v9255_v21, %v4270_v52 }
 0x873   :  { %v4620_v4 = vadd.f32 %v4619_v15, %v4618_v9 }
 0x874   :  { %v5354_v11 = vpop.eup %5353  ;;  %v4396_v27 = vadd.f32 %v5352_v53, %v4395_v29  ;;  %v5006_v14 = vmul.f32 -1.442695, %v9274_v56 }
 0x875   :  { %v5356_v0 = vpop.eup %5355  ;;  %v4350_v42 = vadd.f32 1.0, %v5354_v11 }
 0x876   :  { %v4400_v18 = vsel %vm4399_vm5, %v5352_v53, %v4396_v27  ;;  %v4408_v49 = vmul.f32 %v5356_v0, %v4349_v28  ;;  %5357 = vpow2.f32 %v5006_v14  ;;  %vm4413_vm7 = vweird.f32 %v5356_v0 }
 0x877   :  { %v4405_v17 = vsel %vm4402_vm1, %v4404_v41, %v4400_v18  ;;  %5359 = vrcp.f32 %v4350_v42  ;;  %vm4414_vm2 = vmor %vm4412_vm6, %vm4413_vm7  ;;  %v4431_v26 = vand.u32 2147483647, %v4350_v42  ;;  %v4433_v61 = vand.u32 2147483648, %v4350_v42 }
 0x878   :  { %v4604_v16 = vmul.f32 %v4405_v17, %v9260_v55  ;;  %v4409_v12 = vsub.f32 1.0, %v4408_v49  ;;  %vm4427_vm0 = vweird.f32 %v4350_v42 }
 0x879   :  { %v4273_v20 = vpop.f32.mrf.mxu0  ;;  %vm4432_vm8 = vcmp.eq.f32.partialorder %v4431_v26, 8.507059e+37 }
 0x87a   :  { %v4621_v23 = vsel %vm3063_vm14, %v4604_v16, 0.0  ;;  %v4410_v48 = vmul.f32 %v5356_v0, %v4409_v12  ;;  %v9280_v5 = vadd.f32 %v9255_v21, %v4273_v20 }
 0x87b   :  { %v4622_v33 = vadd.f32 %v4621_v23, %v4620_v4 }
 0x87c   :  { %v5358_v1 = vpop.eup %5357  ;;  %v4411_v63 = vadd.f32 %v5356_v0, %v4410_v48  ;;  %v5007_v55 = vmul.f32 -1.442695, %v9280_v5 }
 0x87d   :  { %v5360_v24 = vpop.eup %5359  ;;  %v4351_v51 = vadd.f32 1.0, %v5358_v1 }
 0x87e   :  { %v4415_v60 = vsel %vm4414_vm2, %v5356_v0, %v4411_v63  ;;  %v4423_v19 = vmul.f32 %v5360_v24, %v4350_v42  ;;  %5361 = vpow2.f32 %v5007_v55  ;;  %vm4428_vm12 = vweird.f32 %v5360_v24 }
 0x87f   :  { %v4420_v7 = vsel %vm4417_vm10, %v4419_v59, %v4415_v60  ;;  %5363 = vrcp.f32 %v4351_v51  ;;  %vm4429_vm13 = vmor %vm4427_vm0, %vm4428_vm12  ;;  %v4448_v43 = vand.u32 2147483648, %v4351_v51  ;;  %v4446_v38 = vand.u32 2147483647, %v4351_v51 }
 0x880   :  { %v4605_v36 = vmul.f32 %v4420_v7, %v9264_v54  ;;  %v4424_v10 = vsub.f32 1.0, %v4423_v19  ;;  %v4434_v54 = vor.u32 1.1754944e-38, %v4433_v61  ;;  %vm4442_vm11 = vweird.f32 %v4351_v51 }
 0x881   :  { %v4275_v2 = vpop.f32.mrf.mxu0  ;;  %v4449_v52 = vor.u32 1.1754944e-38, %v4448_v43  ;;  %vm4447_vm3 = vcmp.eq.f32.partialorder %v4446_v38, 8.507059e+37 }
 0x882   :  { %v4623_v6 = vsel %vm3063_vm14, %v4605_v36, 0.0  ;;  %v4425_v30 = vmul.f32 %v5360_v24, %v4424_v10  ;;  %v9289_v57 = vadd.f32 %v9255_v21, %v4275_v2 }
 0x883   :  { %v4624_v39 = vadd.f32 %v4623_v6, %v4622_v33  ;;  %v5045_v6 = vld [vmem:[%s9530_s26 + $0x10] sm:$0xff] }
 0x884   :  { %v5362_v47 = vpop.eup %5361  ;;  %v4426_v37 = vadd.f32 %v5360_v24, %v4425_v30  ;;  %v5008_v62 = vmul.f32 -1.442695, %v9289_v57  ;;  %4714 = vmatpush.bf16.msra.mxu3 %v5045_v6 }
 0x885   :  { %v5364_v13 = vpop.eup %5363  ;;  %v4352_v31 = vadd.f32 1.0, %v5362_v47 }
 0x886   :  { %v4430_v45 = vsel %vm4429_vm13, %v5360_v24, %v4426_v37  ;;  %v4438_v53 = vmul.f32 %v5364_v13, %v4351_v51  ;;  %5365 = vpow2.f32 %v5008_v62  ;;  %vm4443_vm15 = vweird.f32 %v5364_v13 }
 0x887   :  { %v4435_v35 = vsel %vm4432_vm8, %v4434_v54, %v4430_v45  ;;  %5367 = vrcp.f32 %v4352_v31  ;;  %vm4444_vm4 = vmor %vm4442_vm11, %vm4443_vm15  ;;  %v4463_v14 = vand.u32 2147483648, %v4352_v31  ;;  %v4461_v42 = vand.u32 2147483647, %v4352_v31 }
 0x888   :  { %v4606_v22 = vmul.f32 %v4435_v35, %v9268_v40  ;;  %v4439_v28 = vsub.f32 1.0, %v4438_v53  ;;  %vm4457_vm1 = vweird.f32 %v4352_v31 }
 0x889   :  { %v4464_v16 = vor.u32 1.1754944e-38, %v4463_v14  ;;  %v4278_v12 = vpop.f32.mrf.mxu0  ;;  %vm4462_vm6 = vcmp.eq.f32.partialorder %v4461_v42, 8.507059e+37 }
 0x88a   :  { %v4625_v34 = vsel %vm3063_vm14, %v4606_v22, 0.0  ;;  %v4440_v32 = vmul.f32 %v5364_v13, %v4439_v28  ;;  %v9299_v60 = vadd.f32 %v9255_v21, %v4278_v12 }
 0x88b   :  { %v4626_v44 = vadd.f32 %v4625_v34, %v4624_v39 }
 0x88c   :  { %v5366_v9 = vpop.eup %5365  ;;  %v4441_v8 = vadd.f32 %v5364_v13, %v4440_v32  ;;  %v5009_v36 = vmul.f32 -1.442695, %v9299_v60 }
 0x88d   :  { %v5368_v46 = vpop.eup %5367  ;;  %v4353_v15 = vadd.f32 1.0, %v5366_v9 }
 0x88e   :  { %v4445_v29 = vsel %vm4444_vm4, %v5364_v13, %v4441_v8  ;;  %v4453_v4 = vmul.f32 %v5368_v46, %v4352_v31  ;;  %vm4458_vm5 = vweird.f32 %v5368_v46 }
 0x88f   :  { %v4450_v11 = vsel %vm4447_vm3, %v4449_v52, %v4445_v29  ;;  %5369 = vrcp.f32 %v4353_v15  ;;  %vm4459_vm7 = vmor %vm4457_vm1, %vm4458_vm5  ;;  %v4478_v48 = vand.u32 2147483648, %v4353_v15  ;;  %v4476_v1 = vand.u32 2147483647, %v4353_v15 }
 0x890   :  { %v4607_v40 = vmul.f32 %v4450_v11, %v9274_v56  ;;  %v4454_v27 = vsub.f32 1.0, %v4453_v4  ;;  %vm4472_vm10 = vweird.f32 %v4353_v15  ;;  %5371 = vpow2.f32 %v5009_v36 }
 0x891   :  { %v4479_v24 = vor.u32 1.1754944e-38, %v4478_v48  ;;  %v4280_v59 = vpop.f32.mrf.mxu0  ;;  %vm4477_vm0 = vcmp.eq.f32.partialorder %v4476_v1, 8.507059e+37 }
 0x892   :  { %v4627_v0 = vsel %vm3063_vm14, %v4607_v40, 0.0  ;;  %v4455_v41 = vmul.f32 %v5368_v46, %v4454_v27  ;;  %v9307_v26 = vadd.f32 %v9255_v21, %v4280_v59 }
 0x893   :  { %v4628_v18 = vadd.f32 %v4627_v0, %v4626_v44 }
 0x894   :  { %v4456_v49 = vadd.f32 %v5368_v46, %v4455_v41  ;;  %v5010_v30 = vmul.f32 -1.442695, %v9307_v26 }
 0x895   :  { %v5370_v17 = vpop.eup %5369 }
 0x896   :  { %v4460_v50 = vsel %vm4459_vm7, %v5368_v46, %v4456_v49  ;;  %v4468_v25 = vmul.f32 %v5370_v17, %v4353_v15  ;;  %vm4473_vm2 = vweird.f32 %v5370_v17  ;;  %v5372_v39 = vpop.eup %5371  ;;  %5373 = vpow2.f32 %v5010_v30 }
 0x897   :  { %v4465_v20 = vsel %vm4462_vm6, %v4464_v16, %v4460_v50  ;;  %vm4474_vm12 = vmor %vm4472_vm10, %vm4473_vm2  ;;  %v9320_v62 = vadd.f32 1.0, %v5372_v39 }
 0x898   :  { %v4608_v56 = vmul.f32 %v4465_v20, %v9280_v5  ;;  %v4469_v23 = vsub.f32 1.0, %v4468_v25 }
 0x899   :  { %v4283_v61 = vpop.f32.mrf.mxu0  ;;  %vm4487_vm8 = vweird.f32 %v9320_v62  ;;  %v4491_v48 = vand.u32 2147483647, %v9320_v62 }
 0x89a   :  { %v4629_v33 = vsel %vm3063_vm14, %v4608_v56, 0.0  ;;  %v4470_v58 = vmul.f32 %v5370_v17, %v4469_v23  ;;  %v9310_v2 = vadd.f32 %v9255_v21, %v4283_v61 }
 0x89b   :  { %v4630_v63 = vadd.f32 %v4629_v33, %v4628_v18  ;;  %v5044_v18 = vld [vmem:[%s9530_s26 + $0x8] sm:$0xff]  ;;  %vm4492_vm4 = vcmp.eq.f32.partialorder %v4491_v48, 8.507059e+37 }
 0x89c   :  { %v4471_v55 = vadd.f32 %v5370_v17, %v4470_v58  ;;  %v5374_v54 = vpop.eup %5373  ;;  %4715 = vmatpush.bf16.msra.mxu3 %v5044_v18 }
 0x89d   :  { %v9324_v45 = vadd.f32 1.0, %v5374_v54 }
 0x89e   :  { %v4475_v51 = vsel %vm4474_vm12, %v5370_v17, %v4471_v55  ;;  %v4493_v17 = vand.u32 2147483648, %v9320_v62 }
 0x89f   :  { %v4480_v19 = vsel %vm4477_vm0, %v4479_v24, %v4475_v51  ;;  %v4508_v58 = vand.u32 2147483648, %v9324_v45  ;;  %vm4502_vm3 = vweird.f32 %v9324_v45  ;;  %v4506_v6 = vand.u32 2147483647, %v9324_v45 }
 0x8a0   :  { %v4609_v5 = vmul.f32 %v4480_v19, %v9289_v57  ;;  %v5011_v57 = vmul.f32 -1.442695, %v9310_v2  ;;  %v4494_v55 = vor.u32 1.1754944e-38, %v4493_v17 }
 0x8a1   :  { %v4285_v47 = vpop.f32.mrf.mxu0  ;;  %v4509_v30 = vor.u32 1.1754944e-38, %v4508_v58  ;;  %vm4507_vm6 = vcmp.eq.f32.partialorder %v4506_v6, 8.507059e+37 }
 0x8a2   :  { %v4631_v7 = vsel %vm3063_vm14, %v4609_v5, 0.0  ;;  %5375 = vpow2.f32 %v5011_v57  ;;  %v9318_v37 = vadd.f32 %v9255_v21, %v4285_v47  ;;  %v5043_v47 = vld [vmem:[%s9530_s26] sm:$0xff] }
 0x8a3   :  { %v9304_v10 = vadd.f32 %v4631_v7, %v4630_v63  ;;  %5377 = vrcp.f32 %v9320_v62  ;;  %4716 = vmatpush.bf16.msra.mxu3 %v5043_v47 }
 0x8a4   :  { %v5012_v13 = vmul.f32 -1.442695, %v9318_v37 }
 0x8a6   :  { %5379 = vpow2.f32 %v5012_v13 }
 0x8a7   :  { %5381 = vrcp.f32 %v9324_v45 }
 0x8a8   :  { %v5376_v31 = vpop.eup %5375 }
 0x8a9   :  { %v4288_v53 = vpop.f32.mrf.mxu0  ;;  %v9326_v35 = vadd.f32 1.0, %v5376_v31  ;;  %v5378_v28 = vpop.eup %5377 }
 0x8aa   :  { %v9329_v22 = vadd.f32 %v9255_v21, %v4288_v53  ;;  %v4483_v32 = vmul.f32 %v5378_v28, %v9320_v62  ;;  %vm4488_vm13 = vweird.f32 %v5378_v28 }
 0x8ab   :  { %5383 = vrcp.f32 %v9326_v35  ;;  %vm9373_vm15 = vmor %vm4487_vm8, %vm4488_vm13  ;;  %v4523_v62 = vand.u32 2147483648, %v9326_v35  ;;  %vm4517_vm7 = vweird.f32 %v9326_v35  ;;  %v4521_v53 = vand.u32 2147483647, %v9326_v35 }
 0x8ac   :  { %v5013_v43 = vmul.f32 -1.442695, %v9329_v22  ;;  %v5380_v34 = vpop.eup %5379  ;;  %v4484_v15 = vsub.f32 1.0, %v4483_v32 }
 0x8ad   :  { %v9335_v38 = vadd.f32 1.0, %v5380_v34  ;;  %v9340_v8 = vpop.eup %5381  ;;  %vm4522_vm12 = vcmp.eq.f32.partialorder %v4521_v53, 8.507059e+37 }
 0x8ae   :  { %5385 = vpow2.f32 %v5013_v43  ;;  %v4498_v4 = vmul.f32 %v9340_v8, %v9324_v45  ;;  %v4485_v40 = vmul.f32 %v5378_v28, %v4484_v15  ;;  %vm4503_vm11 = vweird.f32 %v9340_v8 }
 0x8af   :  { %5387 = vrcp.f32 %v9335_v38  ;;  %vm9393_vm5 = vmor %vm4502_vm3, %vm4503_vm11  ;;  %v4536_v34 = vand.u32 2147483647, %v9335_v38  ;;  %v4524_v15 = vor.u32 1.1754944e-38, %v4523_v62  ;;  %vm4532_vm0 = vweird.f32 %v9335_v38 }
 0x8b0   :  { %v4499_v0 = vsub.f32 1.0, %v4498_v4  ;;  %v4486_v12 = vadd.f32 %v5378_v28, %v4485_v40 }
 0x8b1   :  { %v4290_v44 = vpop.f32.mrf.mxu0  ;;  %v9343_v52 = vpop.eup %5383  ;;  %vm9429_vm8 = vcmp.eq.f32.partialorder %v4536_v34, 8.507059e+37 }
 0x8b2   :  { %v9338_v9 = vadd.f32 %v9255_v21, %v4290_v44  ;;  %v4513_v27 = vmul.f32 %v9343_v52, %v9326_v35  ;;  %v4500_v20 = vmul.f32 %v9340_v8, %v4499_v0  ;;  %v4490_v63 = vsel %vm9373_vm15, %v5378_v28, %v4486_v12 }
 0x8b3   :  { %v4495_v61 = vsel %vm4492_vm4, %v4494_v55, %v4490_v63  ;;  %vm4518_vm1 = vweird.f32 %v9343_v52  ;;  %v4538_v35 = vand.u32 2147483648, %v9335_v38 }
 0x8b4   :  { %v5014_v46 = vmul.f32 -1.442695, %v9338_v9  ;;  %v5386_v29 = vpop.eup %5385  ;;  %v4514_v50 = vsub.f32 1.0, %v4513_v27  ;;  %v4501_v51 = vadd.f32 %v9340_v8, %v4500_v20  ;;  %vm9412_vm2 = vmor %vm4517_vm7, %vm4518_vm1  ;;  %v4610_v44 = vmul.f32 %v4495_v61, %v9299_v60 }
 0x8b5   :  { %v9348_v11 = vadd.f32 1.0, %v5386_v29  ;;  %v9356_v42 = vpop.eup %5387 }
 0x8b6   :  { %5389 = vpow2.f32 %v5014_v46  ;;  %v4528_v56 = vmul.f32 %v9356_v42, %v9335_v38  ;;  %v4515_v24 = vmul.f32 %v9343_v52, %v4514_v50  ;;  %v4505_v54 = vsel %vm9393_vm5, %v9340_v8, %v4501_v51 }
 0x8b7   :  { %5391 = vrcp.f32 %v9348_v11  ;;  %v4510_v8 = vsel %vm4507_vm6, %v4509_v30, %v4505_v54  ;;  %vm4533_vm10 = vweird.f32 %v9356_v42  ;;  %v4553_v0 = vand.u32 2147483648, %v9348_v11 }
 0x8b8   :  { %v4529_v19 = vsub.f32 1.0, %v4528_v56  ;;  %v4611_v27 = vmul.f32 %v4510_v8, %v9307_v26  ;;  %vm9434_vm15 = vmor %vm4532_vm0, %vm4533_vm10  ;;  %v4539_v38 = vor.u32 1.1754944e-38, %v4538_v35  ;;  %vm4547_vm11 = vweird.f32 %v9348_v11 }
 0x8b9   :  { %v4293_v14 = vpop.f32.mrf.mxu0  ;;  %v4551_v17 = vand.u32 2147483647, %v9348_v11  ;;  %v4639_v6 = vsel %vm3063_vm14, %v4610_v44, 0.0 }
 0x8ba   :  { %v9354_v41 = vadd.f32 %v9255_v21, %v4293_v14  ;;  %v4530_v31 = vmul.f32 %v9356_v42, %v4529_v19  ;;  %v4640_v51 = vsel %vm3063_vm14, %v4611_v27, 0.0 }
 0x8bb   :  { %vm4552_vm1 = vcmp.eq.f32.partialorder %v4551_v17, 8.507059e+37  ;;  %v4641_v54 = vadd.f32 %v4640_v51, %v4639_v6 }
 0x8bc   :  { %v5390_v49 = vpop.eup %5389  ;;  %v5015_v16 = vmul.f32 -1.442695, %v9354_v41  ;;  %v4531_v29 = vadd.f32 %v9356_v42, %v4530_v31 }
 0x8bd   :  { %v9363_v25 = vadd.f32 1.0, %v5390_v49  ;;  %v9368_v23 = vpop.eup %5391 }
 0x8be   :  { %5393 = vpow2.f32 %v5015_v16  ;;  %v4543_v1 = vmul.f32 %v9368_v23, %v9348_v11  ;;  %vm4548_vm13 = vweird.f32 %v9368_v23  ;;  %v4535_v26 = vsel %vm9434_vm15, %v9356_v42, %v4531_v29 }
 0x8bf   :  { %5395 = vrcp.f32 %v9363_v25  ;;  %vm9445_vm4 = vmor %vm4547_vm11, %vm4548_vm13  ;;  %v4568_v48 = vand.u32 2147483648, %v9363_v25  ;;  %v4554_v42 = vor.u32 1.1754944e-38, %v4553_v0  ;;  %vm4562_vm5 = vweird.f32 %v9363_v25 }
 0x8c0   :  { %v4544_v7 = vsub.f32 1.0, %v4543_v1  ;;  %v4566_v33 = vand.u32 2147483647, %v9363_v25  ;;  %v4540_v1 = vsel %vm9429_vm8, %v4539_v38, %v4535_v26 }
 0x8c1   :  { %v4295_v59 = vpop.f32.mrf.mxu0  ;;  %v4569_v19 = vor.u32 1.1754944e-38, %v4568_v48 }
 0x8c2   :  { %v9386_v5 = vadd.f32 %v9255_v21, %v4295_v59  ;;  %v4516_v21 = vadd.f32 %v9343_v52, %v4515_v24  ;;  %v4545_v28 = vmul.f32 %v9368_v23, %v4544_v7  ;;  %v4613_v7 = vmul.f32 %v4540_v1, %v9318_v37 }
 0x8c4   :  { %v5394_v36 = vpop.eup %5393  ;;  %v5016_v57 = vmul.f32 -1.442695, %v9386_v5  ;;  %v4520_v46 = vsel %vm9412_vm2, %v9343_v52, %v4516_v21  ;;  %v4546_v40 = vadd.f32 %v9368_v23, %v4545_v28  ;;  %vm4567_vm2 = vcmp.eq.f32.partialorder %v4566_v33, 8.507059e+37 }
 0x8c5   :  { %v9391_v39 = vpop.eup %5395  ;;  %v9400_v13 = vadd.f32 1.0, %v5394_v36  ;;  %v4525_v52 = vsel %vm4522_vm12, %v4524_v15, %v4520_v46  ;;  %v4644_v31 = vsel %vm3063_vm14, %v4613_v7, 0.0 }
 0x8c6   :  { %v4558_v45 = vmul.f32 %v9391_v39, %v9363_v25  ;;  %5397 = vpow2.f32 %v5016_v57  ;;  %vm4563_vm3 = vweird.f32 %v9391_v39  ;;  %v4612_v56 = vmul.f32 %v4525_v52, %v9310_v2  ;;  %v5064_v2 = vld [vmem:[%s9531_s27] ss:$0 sm:$0xff] }
 0x8c7   :  { %5399 = vrcp.f32 %v9400_v13  ;;  %v4550_v11 = vsel %vm9445_vm4, %v9368_v23, %v4546_v40  ;;  %vm9462_vm7 = vmor %vm4562_vm5, %vm4563_vm3  ;;  %v4581_v23 = vand.u32 2147483647, %v9400_v13  ;;  %v4583_v63 = vand.u32 2147483648, %v9400_v13 }
 0x8c8   :  { %v4559_v32 = vsub.f32 1.0, %v4558_v45  ;;  %v4555_v55 = vsel %vm4552_vm1, %v4554_v42, %v4550_v11  ;;  %v4633_v25 = vrot.slane %v9304_v10, 4  ;;  %vm4577_vm10 = vweird.f32 %v9400_v13 }
 0x8c9   :  { %v4614_v30 = vmul.f32 %v4555_v55, %v9329_v22  ;;  %v4642_v21 = vsel %vm3063_vm14, %v4612_v56, 0.0  ;;  %vm4582_vm0 = vcmp.eq.f32.partialorder %v4581_v23, 8.507059e+37 }
 0x8ca   :  { %v4560_v4 = vmul.f32 %v9391_v39, %v4559_v32  ;;  %v4634_v53 = vadd.f32 %v4633_v25, %v9304_v10  ;;  %v4643_v28 = vadd.f32 %v4642_v21, %v4641_v54 }
 0x8cb   :  { %v4646_v43 = vsel %vm3063_vm14, %v4614_v30, 0.0 }
 0x8cc   :  { %v5398_v60 = vpop.eup %5397  ;;  %v4561_v50 = vadd.f32 %v9391_v39, %v4560_v4  ;;  %v4645_v46 = vadd.f32 %v4644_v31, %v4643_v28 }
 0x8cd   :  { %v5400_v18 = vpop.eup %5399  ;;  %v9440_v16 = vadd.f32 1.0, %v5398_v60 }
 0x8ce   :  { %v4573_v20 = vmul.f32 %v5400_v18, %v9400_v13  ;;  %v4565_v24 = vsel %vm9462_vm7, %v9391_v39, %v4561_v50  ;;  %vm4578_vm6 = vweird.f32 %v5400_v18  ;;  %v4584_v39 = vor.u32 1.1754944e-38, %v4583_v63 }
 0x8cf   :  { %5401 = vrcp.f32 %v9440_v16  ;;  %v4570_v57 = vsel %vm4567_vm2, %v4569_v19, %v4565_v24  ;;  %vm4579_vm12 = vmor %vm4577_vm10, %vm4578_vm6  ;;  %v4598_v34 = vand.u32 2147483648, %v9440_v16  ;;  %v4596_v8 = vand.u32 2147483647, %v9440_v16 }
 0x8d0   :  { %v4574_v58 = vsub.f32 1.0, %v4573_v20  ;;  %v4615_v22 = vmul.f32 %v4570_v57, %v9338_v9  ;;  %vm4592_vm8 = vweird.f32 %v9440_v16  ;;  %v4635_v9 = vrot.slane %v4634_v53, 2 }
 0x8d1   :  { %v4647_v29 = vadd.f32 %v4646_v43, %v4645_v46  ;;  %v4599_v10 = vor.u32 1.1754944e-38, %v4598_v34  ;;  %vm4597_vm11 = vcmp.eq.f32.partialorder %v4596_v8, 8.507059e+37 }
 0x8d2   :  { %v4575_v59 = vmul.f32 %v5400_v18, %v4574_v58  ;;  %v4648_v35 = vsel %vm3063_vm14, %v4615_v22, 0.0  ;;  %v4636_v52 = vadd.f32 %v4635_v9, %v4634_v53 }
 0x8d3   :  { %v4649_v60 = vadd.f32 %v4648_v35, %v4647_v29 }
 0x8d4   :  { %v4576_v36 = vadd.f32 %v5400_v18, %v4575_v59  ;;  %v4637_v49 = vrot.slane %v4636_v52, 1 }
 0x8d5   :  { %v5402_v61 = vpop.eup %5401 }
 0x8d6   :  { %v4580_v62 = vsel %vm4579_vm12, %v5400_v18, %v4576_v36  ;;  %v4588_v37 = vmul.f32 %v5402_v61, %v9440_v16  ;;  %vm4593_vm13 = vweird.f32 %v5402_v61  ;;  %v4638_v16 = vadd.f32 %v4637_v49, %v4636_v52 }
 0x8d7   :  { %v4585_v13 = vsel %vm4582_vm0, %v4584_v39, %v4580_v62  ;;  %vm4594_vm15 = vmor %vm4592_vm8, %vm4593_vm13 }
 0x8d8   :  { %v4589_v45 = vsub.f32 1.0, %v4588_v37  ;;  %v4616_v32 = vmul.f32 %v4585_v13, %v9354_v41  ;;  %v4660_v50 = vmul.f32 %v4638_v16, %v7881_v3 }
 0x8da   :  { %v4590_v44 = vmul.f32 %v5402_v61, %v4589_v45  ;;  %v4650_v4 = vsel %vm3063_vm14, %v4616_v32, 0.0  ;;  %v4662_v11 = vpack.c.bf16 %v4660_v50, %v4660_v50 }
 0x8db   :  { %v4651_v14 = vadd.f32 %v4650_v4, %v4649_v60 }
 0x8dc   :  { %v4591_v15 = vadd.f32 %v5402_v61, %v4590_v44 }
 0x8de   :  { %v4595_v40 = vsel %vm4594_vm15, %v5402_v61, %v4591_v15 }
 0x8df   :  { %v4600_v41 = vsel %vm4597_vm11, %v4599_v10, %v4595_v40 }
 0x8e0   :  { %v4617_v27 = vmul.f32 %v4600_v41, %v9386_v5  ;;  %v4678_v5 = vunpack.c.l.b16 %v4662_v11 }
 0x8e2   :  { %v4652_v0 = vsel %vm3063_vm14, %v4617_v27, 0.0 }
 0x8e3   :  { %v4653_v18 = vadd.f32 %v4652_v0, %v4651_v14 }
 0x8e5   :  { %v4654_v38 = vrot.slane %v4653_v18, 4 }
 0x8e7   :  { %v4655_v17 = vadd.f32 %v4654_v38, %v4653_v18 }
 0x8e9   :  { %v4656_v26 = vrot.slane %v4655_v17, 2 }
 0x8eb   :  { %v4657_v12 = vadd.f32 %v4656_v26, %v4655_v17 }
 0x8ed   :  { %v4658_v20 = vrot.slane %v4657_v12, 1 }
 0x8ef   :  { %v4659_v56 = vadd.f32 %v4658_v20, %v4657_v12 }
 0x8f1   :  { %v4661_v48 = vmul.f32 %v4659_v56, %v7881_v3 }
 0x8f3   :  { %v4663_v42 = vpack.c.bf16 %v4661_v48, %v4661_v48 }
 0x8f5   :  { %v4679_v33 = vunpack.c.l.b16 %v4663_v42 }
 0x8f7   :  { %v4680_v58 = vsel %vm2423_vm9, %v4679_v33, %v4678_v5 }
 0x8f8   :  { %v4681_v1 = vpack.c.b16 %v4680_v58, %v4680_v58 }
 0x8fa   :  { %5033 = vmatmul.msk.bf16.vlgmr.msra.gmra.mxu3 %vm3063_vm14, %v4681_v1 }
 0x97d   :  { %v4718_v23 = vpop.f32.mrf.mxu3 }
 0x97e   :  { %v4719_v3 = vadd.f32 %v5064_v2, %v4718_v23 }
 0x980   :  { %4722 = vst [vmem:[#allocation4] sm:$0x3] %v4719_v3 }
 0x981   :  { %4733 = dma.vmem_to_hbm [thread:$0]  %s4729_s19, 32, %s4731_s11, [#allocation5]  }
 0x985   :  { %v4720_v63 = vpop.f32.mrf.mxu3 }
 0x986   :  { %5432 = dma.done.wait [#allocation5], 32  }
 0x987   :  { %5433 = vsyncadd [#allocation5], 4294967264 }
 0x988   :  { %4738 = vsyncpa [#allocation5], 1 }

</bundles_post_ra>
